<compile_context>
chip_gen: v6e
topology: v6e:2x2x1
jax: 0.10.0
libtpu: 0.0.40
codegen_flags: <defaults>
</compile_context>

<pallas_src>
import math
import jax
import jax.numpy as jnp
from jax.experimental import pallas as pl
from jax.experimental.pallas import tpu as pltpu

_TM = 512                        # row tile for pointwise kernels
_TR = 512                        # row tile for kNN aggregation
_VMEM_LIMIT = 32 * 1024 * 1024   # explicit scoped-VMEM limit (safe on v5e/v6e/v7x)


def _round_up(x, m):
    return ((x + m - 1) // m) * m


def _compiler_params(n_parallel=1):
    return pltpu.CompilerParams(
        dimension_semantics=("parallel",) * n_parallel,
        vmem_limit_bytes=_VMEM_LIMIT)


# ----------------------------------------------------------------------------
# Kernel 1: fused pointwise MLP chain (L layers of matmul + bias + activation)
# ----------------------------------------------------------------------------
def _apply_act(y, act):
    if act == "relu":
        return jnp.maximum(y, 0.0)
    if act == "gelu":
        # TODO(synk): jax.nn.gelu defaults to the tanh approximation; PyTorch
        # nn.GELU default is exact erf (small numeric mismatch).
        return jax.nn.gelu(y)
    if act == "leaky":
        return jnp.where(y > 0, y, 0.2 * y)
    return y


def _make_mlp_kernel(acts, pre_act):
    n_layers = len(acts)

    def kernel(*refs):
        x_ref, o_ref = refs[0], refs[-1]
        h = _apply_act(x_ref[...].astype(jnp.float32), pre_act)
        for i in range(n_layers):
            w = refs[1 + 2 * i][...].astype(jnp.bfloat16)
            b = refs[2 + 2 * i][...].astype(jnp.float32)
            y = jnp.dot(h.astype(jnp.bfloat16), w,
                        preferred_element_type=jnp.float32) + b
            h = _apply_act(y, acts[i])
        o_ref[...] = h.astype(o_ref.dtype)

    return kernel


def fused_mlp(x, layers, acts, pre_act=None):
    """x: [..., Cin]; layers: list of {"w": [ci, co], "b": [co]} applied as a
    chain inside ONE Pallas kernel, tiled over the flattened row dimension."""
    lead = x.shape[:-1]
    ws = [l["w"] for l in layers]
    bs = [l["b"] for l in layers]
    x2 = x.reshape(-1, x.shape[-1])

    # Pad tiny contraction dims (e.g. xyz, Cin=3) up to 8; zero rows in W keep
    # the result unchanged while avoiding an almost-empty MXU pass.
    if x2.shape[-1] < 8:
        pad_c = 8 - x2.shape[-1]
        x2 = jnp.pad(x2, ((0, 0), (0, pad_c)))
        ws = [jnp.pad(ws[0], ((0, pad_c), (0, 0)))] + ws[1:]

    m, cin = x2.shape
    cout = ws[-1].shape[1]
    tm = min(_TM, _round_up(m, 8))
    mp = _round_up(m, tm)
    if mp != m:
        x2 = jnp.pad(x2, ((0, mp - m), (0, 0)))

    operands = [x2]
    in_specs = [pl.BlockSpec((tm, cin), lambda i: (i, 0))]
    for w, b in zip(ws, bs):
        operands += [w, b.reshape(1, -1)]
        in_specs += [pl.BlockSpec(w.shape, lambda i: (0, 0)),
                     pl.BlockSpec((1, w.shape[1]), lambda i: (0, 0))]

    out = pl.pallas_call(
        _make_mlp_kernel(tuple(acts), pre_act),
        out_shape=jax.ShapeDtypeStruct((mp, cout), x.dtype),
        grid=(mp // tm,),
        in_specs=in_specs,
        out_specs=pl.BlockSpec((tm, cout), lambda i: (i, 0)),
        compiler_params=_compiler_params(1),
    )(*operands)
    return out[:m].reshape(lead + (cout,))


def fused_linear(x, p, act="none"):
    return fused_mlp(x, [p], [act])


def apply_mlp(params_list, x, final_act=False, pre_act=None):
    n = len(params_list)
    acts = ["relu" if (i < n - 1 or final_act) else "none" for i in range(n)]
    return fused_mlp(x, params_list, acts, pre_act=pre_act)


# ----------------------------------------------------------------------------
# Kernel 2: MLP_Res (conv1 -> relu -> conv2, plus shortcut conv) in one kernel
# ----------------------------------------------------------------------------
def _mlp_res_kernel(x_ref, w1_ref, b1_ref, w2_ref, b2_ref, ws_ref, bs_ref, o_ref):
    x = x_ref[...].astype(jnp.bfloat16)
    h = jnp.dot(x, w1_ref[...].astype(jnp.bfloat16),
                preferred_element_type=jnp.float32) + b1_ref[...]
    h = jnp.maximum(h, 0.0).astype(jnp.bfloat16)
    y = jnp.dot(h, w2_ref[...].astype(jnp.bfloat16),
                preferred_element_type=jnp.float32) + b2_ref[...]
    sc = jnp.dot(x, ws_ref[...].astype(jnp.bfloat16),
                 preferred_element_type=jnp.float32) + bs_ref[...]
    o_ref[...] = (y + sc).astype(o_ref.dtype)


def fused_mlp_res(p, x):
    lead = x.shape[:-1]
    x2 = x.reshape(-1, x.shape[-1])
    m, cin = x2.shape
    cout = p["c2"]["w"].shape[1]
    tm = min(_TM, _round_up(m, 8))
    mp = _round_up(m, tm)
    if mp != m:
        x2 = jnp.pad(x2, ((0, mp - m), (0, 0)))

    def full(a):
        return pl.BlockSpec(a.shape, lambda i: (0, 0))

    w1, b1 = p["c1"]["w"], p["c1"]["b"].reshape(1, -1)
    w2, b2 = p["c2"]["w"], p["c2"]["b"].reshape(1, -1)
    ws, bs = p["sc"]["w"], p["sc"]["b"].reshape(1, -1)
    out = pl.pallas_call(
        _mlp_res_kernel,
        out_shape=jax.ShapeDtypeStruct((mp, cout), x.dtype),
        grid=(mp // tm,),
        in_specs=[pl.BlockSpec((tm, cin), lambda i: (i, 0)),
                  full(w1), full(b1), full(w2), full(b2), full(ws), full(bs)],
        out_specs=pl.BlockSpec((tm, cout), lambda i: (i, 0)),
        compiler_params=_compiler_params(1),
    )(x2, w1, b1, w2, b2, ws, bs)
    return out[:m].reshape(lead + (cout,))


# ----------------------------------------------------------------------------
# Kernel 3: multi-head self-attention — one grid step per batch, all heads
# processed in-kernel, lane-dense [N, C] output block.
# ----------------------------------------------------------------------------
def _make_mhsa_kernel(num_heads, dh):
    scale = 1.0 / math.sqrt(dh)

    def kernel(q_ref, k_ref, v_ref, o_ref):
        q = q_ref[0]
        k = k_ref[0]
        v = v_ref[0]
        outs = []
        for h in range(num_heads):                       # static unroll
            sl = slice(h * dh, (h + 1) * dh)
            qh = q[:, sl].astype(jnp.bfloat16)
            kh = k[:, sl].astype(jnp.bfloat16)
            vh = v[:, sl].astype(jnp.bfloat16)
            # contract last dims directly — no XLU transpose of K
            s = jax.lax.dot_general(qh, kh, (((1,), (1,)), ((), ())),
                                    preferred_element_type=jnp.float32) * scale
            s = s - jnp.max(s, axis=-1, keepdims=True)
            p = jnp.exp(s)
            p = p * pl.reciprocal(jnp.sum(p, axis=-1, keepdims=True), approx=True)
            outs.append(jnp.dot(p.astype(jnp.bfloat16), vh,
                                preferred_element_type=jnp.float32))
        o_ref[...] = jnp.concatenate(outs, axis=-1).astype(o_ref.dtype)[None]

    return kernel


def mhsa(q, k, v, num_heads):
    """q, k, v: [B, N, C] -> [B, N, C] (softmax over all N keys)."""
    # TODO(synk): for very large N, tile flash-style over KV (online softmax)
    # instead of the full NxN score matrix; fine at SeedFormer point counts.
    b, n, c = q.shape
    dh = c // num_heads
    spec = pl.BlockSpec((1, n, c), lambda i: (i, 0, 0))
    return pl.pallas_call(
        _make_mhsa_kernel(num_heads, dh),
        out_shape=jax.ShapeDtypeStruct((b, n, c), q.dtype),
        grid=(b,),
        in_specs=[spec, spec, spec],
        out_specs=spec,
        compiler_params=_compiler_params(1),
    )(q, k, v)


# ----------------------------------------------------------------------------
# Kernel 4: kNN attention — per-group softmax over neighbors + weighted sum.
# `groups` = up_factor replicas packed along the channel axis of `logits`;
# values are broadcast over the groups inside the kernel (no jnp.repeat).
# ----------------------------------------------------------------------------
def _make_knn_agg_kernel(groups):
    def kernel(l_ref, v_ref, o_ref):
        s = l_ref[...].astype(jnp.float32)               # [tr, k, groups*d]
        s = s - jnp.max(s, axis=1, keepdims=True)
        p = jnp.exp(s)
        p = p * pl.reciprocal(jnp.sum(p, axis=1, keepdims=True), approx=True)
        v = v_ref[...].astype(jnp.float32)               # [tr, k, d]
        if groups > 1:
            v = jnp.concatenate([v] * groups, axis=-1)   # lane broadcast
        o_ref[...] = jnp.sum(p * v, axis=1).astype(o_ref.dtype)
    return kernel


def knn_aggregate(logits, values, groups=1):
    """logits: [B, M, K, groups*D]; values: [B, M, K, D] -> [B, M, groups*D]."""
    b, m, k, gd = logits.shape
    d = values.shape[-1]
    r = b * m
    l2 = logits.reshape(r, k, gd)
    v2 = values.reshape(r, k, d)
    tr = min(_TR, _round_up(r, 8))
    rp = _round_up(r, tr)
    if rp != r:
        l2 = jnp.pad(l2, ((0, rp - r), (0, 0), (0, 0)))
        v2 = jnp.pad(v2, ((0, rp - r), (0, 0), (0, 0)))
    out = pl.pallas_call(
        _make_knn_agg_kernel(groups),
        out_shape=jax.ShapeDtypeStruct((rp, gd), logits.dtype),
        grid=(rp // tr,),
        in_specs=[pl.BlockSpec((tr, k, gd), lambda i: (i, 0, 0)),
                  pl.BlockSpec((tr, k, d), lambda i: (i, 0, 0))],
        out_specs=pl.BlockSpec((tr, gd), lambda i: (i, 0)),
        compiler_params=_compiler_params(1),
    )(l2, v2)
    return out[:r].reshape(b, m, gd)


# ----------------------------------------------------------------------------
# Parameter init (deterministic, synthetic)
# ----------------------------------------------------------------------------
def init_linear(key, cin, cout):
    k1, k2 = jax.random.split(key)
    w = jax.random.normal(k1, (cin, cout), jnp.float32) / jnp.sqrt(float(cin))
    b = jax.random.normal(k2, (cout,), jnp.float32) * 0.01
    return {"w": w, "b": b}


def init_mlp(key, in_dim, hidden_dims, out_dim):
    dims = [in_dim] + list(hidden_dims) + [out_dim]
    keys = jax.random.split(key, len(dims) - 1)
    return [init_linear(k, dims[i], dims[i + 1]) for i, k in enumerate(keys)]


def init_mlp_res(key, in_dim, hidden_dim, out_dim):
    k1, k2, k3 = jax.random.split(key, 3)
    return {"c1": init_linear(k1, in_dim, hidden_dim),
            "c2": init_linear(k2, hidden_dim, out_dim),
            "sc": init_linear(k3, in_dim, out_dim)}


def init_block(key, c):
    keys = jax.random.split(key, 4)
    return {"ln1_g": jnp.ones((c,), jnp.float32), "ln1_b": jnp.zeros((c,), jnp.float32),
            "qkv": init_linear(keys[0], c, 3 * c),
            "proj": init_linear(keys[1], c, c),
            "ln2_g": jnp.ones((c,), jnp.float32), "ln2_b": jnp.zeros((c,), jnp.float32),
            "fc1": init_linear(keys[2], c, 4 * c),
            "fc2": init_linear(keys[3], 4 * c, c)}


def init_up_transformer(key, in_ch, out_ch, dim, up_factor):
    keys = jax.random.split(key, 9)
    p = {"mlp_v": init_mlp_res(keys[0], 2 * in_ch, in_ch, in_ch),
         "conv_q": init_linear(keys[1], in_ch, dim),
         "conv_k": init_linear(keys[2], in_ch, dim),
         "conv_v": init_linear(keys[3], in_ch, dim),
         "conv_up": init_linear(keys[4], in_ch, dim),
         "pos_mlp": init_mlp(keys[5], 3, [64], dim),
         "attn_h": init_linear(keys[6], dim, 4 * dim),
         "conv_end": init_linear(keys[8], dim, out_ch)}
    if up_factor is None:
        p["attn_o"] = init_linear(keys[7], 4 * dim, dim)
    else:
        # ConvTranspose2d((up,1),(up,1)) == up independent linears interleaved;
        # stored pre-concatenated so ONE fused matmul emits all up replicas.
        p["attn_o"] = init_linear(keys[7], 4 * dim, up_factor * dim)
    return p


def init_params(key, cfg):
    in_dim, out_dim = cfg["in_dim"], cfg["out_dim"]
    attn_dim, up = cfg["attn_dim"], cfg["up_factor"]
    keys = jax.random.split(key, 10)
    return {
        # TODO(synk): BottleneckInterpPointConv internals are not given; modeled
        # as 3-NN inverse-distance interpolation + bottleneck pointwise MLP.
        "seed_interp": {"c1": init_linear(keys[0], in_dim, max(in_dim // 2, 1)),
                        "c2": init_linear(keys[1], max(in_dim // 2, 1), out_dim)},
        "mlp1": init_mlp(keys[2], 3, [out_dim // 2], out_dim),
        "mlp2": init_mlp(keys[3], 3 * out_dim, [2 * out_dim], out_dim),
        "pos_embed": init_mlp(keys[4], 3, [in_dim // 2], out_dim),
        "blocks": [init_block(k, out_dim) for k in jax.random.split(keys[5], 3)],
        "attn": init_up_transformer(keys[6], out_dim, out_dim, attn_dim, None),
        "upsample_attn": init_up_transformer(keys[7], out_dim, out_dim, attn_dim, up),
        "feature_mlp": init_mlp_res(keys[8], 2 * out_dim, out_dim, out_dim),
        "offset_mlp": init_mlp(keys[9], out_dim, [out_dim // 2], 3),
    }


# ----------------------------------------------------------------------------
# Sub-module forward functions (Pallas kernels inside, glue in JAX)
# ----------------------------------------------------------------------------
def layernorm(x, g, b, eps=1e-5):
    mu = jnp.mean(x, axis=-1, keepdims=True)
    var = jnp.mean((x - mu) ** 2, axis=-1, keepdims=True)
    return (x - mu) * jax.lax.rsqrt(var + eps) * g + b


def apply_transformer_block(p, x, num_heads):
    h = layernorm(x, p["ln1_g"], p["ln1_b"])
    qkv = fused_linear(h, p["qkv"])
    q, k, v = jnp.split(qkv, 3, axis=-1)
    o = mhsa(q, k, v, num_heads)
    x = x + fused_linear(o, p["proj"])
    h = layernorm(x, p["ln2_g"], p["ln2_b"])
    h = fused_mlp(h, [p["fc1"], p["fc2"]], ["gelu", "none"])   # fc1+fc2 fused
    return x + h


def knn_idx(pos, k):
    # TODO(synk): top-k neighbor selection has no clean Pallas equivalent; JAX.
    d = jnp.sum((pos[:, :, None, :] - pos[:, None, :, :]) ** 2, axis=-1)
    _, idx = jax.lax.top_k(-d, k)
    return idx  # [B, N, k] (includes self)


def group(feat, idx):
    # feat: [B, N, C], idx: [B, M, k] -> [B, M, k, C]
    return jax.vmap(lambda f, i: f[i])(feat, idx)


def apply_seed_interp(p, seed_xyz, seed_feat, xyz, num_neighbors=3):
    d = jnp.sum((xyz[:, :, None, :] - seed_xyz[:, None, :, :]) ** 2, axis=-1)
    neg_d, idx = jax.lax.top_k(-d, num_neighbors)
    w = 1.0 / (jnp.maximum(-neg_d, 0.0) + 1e-8)
    w = w / jnp.sum(w, axis=-1, keepdims=True)
    interp = jnp.sum(group(seed_feat, idx) * w[..., None], axis=2)  # [B, N, Cin]
    return fused_mlp(interp, [p["c1"], p["c2"]], ["relu", "none"])


def apply_up_transformer(p, pos, key_f, query_f, upfeat, n_knn, up_factor):
    b, n, _ = query_f.shape
    dim = p["conv_q"]["w"].shape[1]

    value = fused_mlp_res(p["mlp_v"], jnp.concatenate([key_f, query_f], axis=-1))
    identity = value
    keyp = fused_linear(key_f, p["conv_k"])
    queryp = fused_linear(query_f, p["conv_q"])
    valuep = fused_linear(value, p["conv_v"])

    idx = knn_idx(pos, n_knn)                            # [B, N, k]
    key_g = group(keyp, idx)                             # [B, N, k, dim]
    qk_rel = queryp[:, :, None, :] - key_g

    pos_rel = pos[:, :, None, :] - group(pos, idx)       # [B, N, k, 3]
    pos_emb = apply_mlp(p["pos_mlp"], pos_rel)           # [B, N, k, dim]

    upf = fused_linear(upfeat, p["conv_up"])
    upf_rel = upf[:, :, None, :] - group(upf, idx)

    attn_in = qk_rel + pos_emb + upf_rel                 # [B, N, k, dim]
    value_g = group(valuep, idx) + pos_emb + upf_rel     # [B, N, k, dim]

    # attn_h (+relu) and attn_o fused into ONE kernel; in the up_factor branch
    # attn_o already emits all `up` replicas packed along the channel axis.
    logits = fused_mlp(attn_in, [p["attn_h"], p["attn_o"]], ["relu", "none"])

    if up_factor is None:
        agg = knn_aggregate(logits, value_g, groups=1)               # [B, N, dim]
        y = fused_linear(agg, p["conv_end"])
        return y + identity

    up = up_factor
    agg = knn_aggregate(logits, value_g, groups=up)                  # [B, N, up*dim]
    y = fused_linear(agg.reshape(b, n * up, dim), p["conv_end"])     # [B, N*up, C]
    # identity broadcast over the replicas (replaces jnp.repeat materialization)
    y = y.reshape(b, n, up, -1) + identity[:, :, None, :]
    return y.reshape(b, n * up, -1)


# ----------------------------------------------------------------------------
# RobustUpsampler forward
# ----------------------------------------------------------------------------
def robust_upsampler_forward(params, xyz, prev_features, seed_xyz, seed_features, cfg):
    up = cfg["up_factor"]
    b, n, _ = xyz.shape

    interp = apply_seed_interp(params["seed_interp"], seed_xyz, seed_features, xyz)

    feats = apply_mlp(params["mlp1"], xyz)                                   # [B,N,C]
    gmax = jnp.broadcast_to(jnp.max(feats, axis=1, keepdims=True), feats.shape)
    feat_embed = apply_mlp(params["mlp2"],
                           jnp.concatenate([feats, gmax, interp], axis=-1))
    pos_embed = apply_mlp(params["pos_embed"], xyz)
    embed = pos_embed + feat_embed
    for blk in params["blocks"]:
        embed = apply_transformer_block(blk, embed, cfg["num_heads"])
    features = embed

    key1 = prev_features if prev_features is not None else features
    features = apply_up_transformer(params["attn"], xyz, key1, features, interp,
                                    cfg["k"], None)
    key2 = prev_features if prev_features is not None else features
    upsampled_features = apply_up_transformer(params["upsample_attn"], xyz, key2,
                                              features, interp, cfg["k"], up)

    c = features.shape[-1]
    up_features = jnp.broadcast_to(features[:, :, None, :],
                                   (b, n, up, c)).reshape(b, n * up, c)
    up_xyz = jnp.broadcast_to(xyz[:, :, None, :],
                              (b, n, up, 3)).reshape(b, n * up, 3)

    upsampled_features = fused_mlp_res(
        params["feature_mlp"],
        jnp.concatenate([upsampled_features, up_features], axis=-1))
    # leaky_relu fused as the pre-activation of the offset-MLP kernel
    offsets = apply_mlp(params["offset_mlp"], upsampled_features, pre_act="leaky")
    upsampled_xyz = up_xyz + offsets
    return upsampled_xyz, upsampled_features


# ----------------------------------------------------------------------------
if __name__ == "__main__":
    CFG = dict(in_dim=32, out_dim=32, attn_dim=32, up_factor=2, k=8, num_heads=4)
    B, N, N1 = 2, 16, 8

    key = jax.random.PRNGKey(0)
    kp, kx, ks, kf, kprev = jax.random.split(key, 5)
    xyz = jax.random.normal(kx, (B, N, 3), jnp.float32)
    seed_xyz = jax.random.normal(ks, (B, N1, 3), jnp.float32)
    seed_features = jax.random.normal(kf, (B, N1, CFG["in_dim"]), jnp.float32)
    prev_features = jax.random.normal(kprev, (B, N, CFG["out_dim"]), jnp.float32)

    params = init_params(kp, CFG)

    fwd = jax.jit(lambda p, a, pr, sx, sf: robust_upsampler_forward(p, a, pr, sx, sf, CFG))
    up_xyz, up_feat = fwd(params, xyz, prev_features, seed_xyz, seed_features)
    jax.block_until_ready((up_xyz, up_feat))

    assert up_xyz.shape == (B, N * CFG["up_factor"], 3)
    assert up_feat.shape == (B, N * CFG["up_factor"], CFG["out_dim"])
    assert bool(jnp.all(jnp.isfinite(up_xyz))) and bool(jnp.all(jnp.isfinite(up_feat)))
    print("KERNEL_OK")
</pallas_src>

<mosaic_0001>
module attributes {stable_mosaic.version = 11 : i64} {
  func.func @kernel(%arg0: i32, %arg1: memref<32x32xf32, #tpu.memory_space<vmem>>, %arg2: memref<32x16xf32, #tpu.memory_space<vmem>>, %arg3: memref<1x16xf32, #tpu.memory_space<vmem>>, %arg4: memref<16x32xf32, #tpu.memory_space<vmem>>, %arg5: memref<1x32xf32, #tpu.memory_space<vmem>>, %arg6: memref<32x32xf32, #tpu.memory_space<vmem>>) attributes {dimension_semantics = [#tpu.dimension_semantics<parallel>], iteration_bounds = array<i64: 1>, scalar_prefetch = 0 : i64, scratch_operands = 0 : i64, tpu.core_type = #tpu.core_type<tc>, window_params = [{transform_indices = @transform_0, window_bounds = array<i64: 32, 32>}, {pipeline_mode = #tpu.pipeline_mode<synchronous>, transform_indices = @transform_1, window_bounds = array<i64: 32, 16>}, {pipeline_mode = #tpu.pipeline_mode<synchronous>, transform_indices = @transform_2, window_bounds = array<i64: 1, 16>}, {pipeline_mode = #tpu.pipeline_mode<synchronous>, transform_indices = @transform_3, window_bounds = array<i64: 16, 32>}, {pipeline_mode = #tpu.pipeline_mode<synchronous>, transform_indices = @transform_4, window_bounds = array<i64: 1, 32>}, {transform_indices = @transform_5, window_bounds = array<i64: 32, 32>}]} {
    %c0 = arith.constant 0 : index
    %c0_0 = arith.constant 0 : index
    %0 = vector.load %arg1[%c0, %c0_0] : memref<32x32xf32, #tpu.memory_space<vmem>>, vector<32x32xf32>
    %c0_1 = arith.constant 0 : index
    %c0_2 = arith.constant 0 : index
    %1 = vector.load %arg2[%c0_1, %c0_2] : memref<32x16xf32, #tpu.memory_space<vmem>>, vector<32x16xf32>
    %2 = arith.truncf %1 : vector<32x16xf32> to vector<32x16xbf16>
    %c0_3 = arith.constant 0 : index
    %c0_4 = arith.constant 0 : index
    %3 = vector.load %arg3[%c0_3, %c0_4] : memref<1x16xf32, #tpu.memory_space<vmem>>, vector<1x16xf32>
    %4 = arith.truncf %0 : vector<32x32xf32> to vector<32x32xbf16>
    %cst = arith.constant dense<0.000000e+00> : vector<32x16xf32>
    %5 = tpu.matmul %4, %2, %cst {dimension_numbers = #tpu.dot_dimension_numbers<[1], [0], [0], [1], [0, 0, 1, 1], [], []>} : vector<32x32xbf16>, vector<32x16xbf16>, vector<32x16xf32> -> vector<32x16xf32>
    %6 = vector.broadcast %3 : vector<1x16xf32> to vector<32x16xf32>
    %7 = arith.addf %5, %6 : vector<32x16xf32>
    %cst_5 = arith.constant 0.000000e+00 : f32
    %8 = vector.broadcast %cst_5 : f32 to vector<32x16xf32>
    %9 = arith.maximumf %7, %8 : vector<32x16xf32>
    %c0_6 = arith.constant 0 : index
    %c0_7 = arith.constant 0 : index
    %10 = vector.load %arg4[%c0_6, %c0_7] : memref<16x32xf32, #tpu.memory_space<vmem>>, vector<16x32xf32>
    %11 = arith.truncf %10 : vector<16x32xf32> to vector<16x32xbf16>
    %c0_8 = arith.constant 0 : index
    %c0_9 = arith.constant 0 : index
    %12 = vector.load %arg5[%c0_8, %c0_9] : memref<1x32xf32, #tpu.memory_space<vmem>>, vector<1x32xf32>
    %13 = arith.truncf %9 : vector<32x16xf32> to vector<32x16xbf16>
    %cst_10 = arith.constant dense<0.000000e+00> : vector<32x32xf32>
    %14 = tpu.matmul %13, %11, %cst_10 {dimension_numbers = #tpu.dot_dimension_numbers<[1], [0], [0], [1], [0, 0, 1, 1], [], []>} : vector<32x16xbf16>, vector<16x32xbf16>, vector<32x32xf32> -> vector<32x32xf32>
    %15 = vector.broadcast %12 : vector<1x32xf32> to vector<32x32xf32>
    %16 = arith.addf %14, %15 : vector<32x32xf32>
    %c0_11 = arith.constant 0 : index
    %c0_12 = arith.constant 0 : index
    %17 = vector.load %arg6[%c0_11, %c0_12] : memref<32x32xf32, #tpu.memory_space<vmem>>, vector<32x32xf32>
    tpu.vector_store %arg6[%c0_11, %c0_12], %16 {strides = array<i32>} : memref<32x32xf32, #tpu.memory_space<vmem>>, vector<32x32xf32>,
    return
  }
  func.func @transform_0(%arg0: i32) -> (i32, i32) {
    %c0_i32 = arith.constant 0 : i32
    %c0_i32_0 = arith.constant 0 : i32
    return %arg0, %c0_i32 : i32, i32
  }
  func.func @transform_1(%arg0: i32) -> (i32, i32) {
    %c0_i32 = arith.constant 0 : i32
    %c0_i32_0 = arith.constant 0 : i32
    %c0_i32_1 = arith.constant 0 : i32
    return %c0_i32, %c0_i32_0 : i32, i32
  }
  func.func @transform_2(%arg0: i32) -> (i32, i32) {
    %c0_i32 = arith.constant 0 : i32
    %c0_i32_0 = arith.constant 0 : i32
    %c0_i32_1 = arith.constant 0 : i32
    return %c0_i32, %c0_i32_0 : i32, i32
  }
  func.func @transform_3(%arg0: i32) -> (i32, i32) {
    %c0_i32 = arith.constant 0 : i32
    %c0_i32_0 = arith.constant 0 : i32
    %c0_i32_1 = arith.constant 0 : i32
    return %c0_i32, %c0_i32_0 : i32, i32
  }
  func.func @transform_4(%arg0: i32) -> (i32, i32) {
    %c0_i32 = arith.constant 0 : i32
    %c0_i32_0 = arith.constant 0 : i32
    %c0_i32_1 = arith.constant 0 : i32
    return %c0_i32, %c0_i32_0 : i32, i32
  }
  func.func @transform_5(%arg0: i32) -> (i32, i32) {
    %c0_i32 = arith.constant 0 : i32
    %c0_i32_0 = arith.constant 0 : i32
    return %arg0, %c0_i32 : i32, i32
  }
}

module attributes {stable_mosaic.version = 11 : i64} {
  func.func @kernel(%arg0: i32, %arg1: memref<32x32xf32, #tpu.memory_space<vmem>>, %arg2: memref<32x32xf32, #tpu.memory_space<vmem>>, %arg3: memref<1x32xf32, #tpu.memory_space<vmem>>, %arg4: memref<32x32xf32, #tpu.memory_space<vmem>>) attributes {dimension_semantics = [#tpu.dimension_semantics<parallel>], iteration_bounds = array<i64: 1>, scalar_prefetch = 0 : i64, scratch_operands = 0 : i64, tpu.core_type = #tpu.core_type<tc>, window_params = [{transform_indices = @transform_0, window_bounds = array<i64: 32, 32>}, {pipeline_mode = #tpu.pipeline_mode<synchronous>, transform_indices = @transform_1, window_bounds = array<i64: 32, 32>}, {pipeline_mode = #tpu.pipeline_mode<synchronous>, transform_indices = @transform_2, window_bounds = array<i64: 1, 32>}, {transform_indices = @transform_3, window_bounds = array<i64: 32, 32>}]} {
    %c0 = arith.constant 0 : index
    %c0_0 = arith.constant 0 : index
    %0 = vector.load %arg1[%c0, %c0_0] : memref<32x32xf32, #tpu.memory_space<vmem>>, vector<32x32xf32>
    %c0_1 = arith.constant 0 : index
    %c0_2 = arith.constant 0 : index
    %1 = vector.load %arg2[%c0_1, %c0_2] : memref<32x32xf32, #tpu.memory_space<vmem>>, vector<32x32xf32>
    %2 = arith.truncf %1 : vector<32x32xf32> to vector<32x32xbf16>
    %c0_3 = arith.constant 0 : index
    %c0_4 = arith.constant 0 : index
    %3 = vector.load %arg3[%c0_3, %c0_4] : memref<1x32xf32, #tpu.memory_space<vmem>>, vector<1x32xf32>
    %4 = arith.truncf %0 : vector<32x32xf32> to vector<32x32xbf16>
    %cst = arith.constant dense<0.000000e+00> : vector<32x32xf32>
    %5 = tpu.matmul %4, %2, %cst {dimension_numbers = #tpu.dot_dimension_numbers<[1], [0], [0], [1], [0, 0, 1, 1], [], []>} : vector<32x32xbf16>, vector<32x32xbf16>, vector<32x32xf32> -> vector<32x32xf32>
    %6 = vector.broadcast %3 : vector<1x32xf32> to vector<32x32xf32>
    %7 = arith.addf %5, %6 : vector<32x32xf32>
    %c0_5 = arith.constant 0 : index
    %c0_6 = arith.constant 0 : index
    %8 = vector.load %arg4[%c0_5, %c0_6] : memref<32x32xf32, #tpu.memory_space<vmem>>, vector<32x32xf32>
    tpu.vector_store %arg4[%c0_5, %c0_6], %7 {strides = array<i32>} : memref<32x32xf32, #tpu.memory_space<vmem>>, vector<32x32xf32>,
    return
  }
  func.func @transform_0(%arg0: i32) -> (i32, i32) {
    %c0_i32 = arith.constant 0 : i32
    %c0_i32_0 = arith.constant 0 : i32
    return %arg0, %c0_i32 : i32, i32
  }
  func.func @transform_1(%arg0: i32) -> (i32, i32) {
    %c0_i32 = arith.constant 0 : i32
    %c0_i32_0 = arith.constant 0 : i32
    %c0_i32_1 = arith.constant 0 : i32
    return %c0_i32, %c0_i32_0 : i32, i32
  }
  func.func @transform_2(%arg0: i32) -> (i32, i32) {
    %c0_i32 = arith.constant 0 : i32
    %c0_i32_0 = arith.constant 0 : i32
    %c0_i32_1 = arith.constant 0 : i32
    return %c0_i32, %c0_i32_0 : i32, i32
  }
  func.func @transform_3(%arg0: i32) -> (i32, i32) {
    %c0_i32 = arith.constant 0 : i32
    %c0_i32_0 = arith.constant 0 : i32
    return %arg0, %c0_i32 : i32, i32
  }
}

module attributes {stable_mosaic.version = 11 : i64} {
  func.func @kernel(%arg0: i32, %arg1: memref<32x8xf32, #tpu.memory_space<vmem>>, %arg2: memref<8x16xf32, #tpu.memory_space<vmem>>, %arg3: memref<1x16xf32, #tpu.memory_space<vmem>>, %arg4: memref<16x32xf32, #tpu.memory_space<vmem>>, %arg5: memref<1x32xf32, #tpu.memory_space<vmem>>, %arg6: memref<32x32xf32, #tpu.memory_space<vmem>>) attributes {dimension_semantics = [#tpu.dimension_semantics<parallel>], iteration_bounds = array<i64: 1>, scalar_prefetch = 0 : i64, scratch_operands = 0 : i64, tpu.core_type = #tpu.core_type<tc>, window_params = [{transform_indices = @transform_0, window_bounds = array<i64: 32, 8>}, {pipeline_mode = #tpu.pipeline_mode<synchronous>, transform_indices = @transform_1, window_bounds = array<i64: 8, 16>}, {pipeline_mode = #tpu.pipeline_mode<synchronous>, transform_indices = @transform_2, window_bounds = array<i64: 1, 16>}, {pipeline_mode = #tpu.pipeline_mode<synchronous>, transform_indices = @transform_3, window_bounds = array<i64: 16, 32>}, {pipeline_mode = #tpu.pipeline_mode<synchronous>, transform_indices = @transform_4, window_bounds = array<i64: 1, 32>}, {transform_indices = @transform_5, window_bounds = array<i64: 32, 32>}]} {
    %c0 = arith.constant 0 : index
    %c0_0 = arith.constant 0 : index
    %0 = vector.load %arg1[%c0, %c0_0] : memref<32x8xf32, #tpu.memory_space<vmem>>, vector<32x8xf32>
    %c0_1 = arith.constant 0 : index
    %c0_2 = arith.constant 0 : index
    %1 = vector.load %arg2[%c0_1, %c0_2] : memref<8x16xf32, #tpu.memory_space<vmem>>, vector<8x16xf32>
    %2 = arith.truncf %1 : vector<8x16xf32> to vector<8x16xbf16>
    %c0_3 = arith.constant 0 : index
    %c0_4 = arith.constant 0 : index
    %3 = vector.load %arg3[%c0_3, %c0_4] : memref<1x16xf32, #tpu.memory_space<vmem>>, vector<1x16xf32>
    %4 = arith.truncf %0 : vector<32x8xf32> to vector<32x8xbf16>
    %cst = arith.constant dense<0.000000e+00> : vector<32x16xf32>
    %5 = tpu.matmul %4, %2, %cst {dimension_numbers = #tpu.dot_dimension_numbers<[1], [0], [0], [1], [0, 0, 1, 1], [], []>} : vector<32x8xbf16>, vector<8x16xbf16>, vector<32x16xf32> -> vector<32x16xf32>
    %6 = vector.broadcast %3 : vector<1x16xf32> to vector<32x16xf32>
    %7 = arith.addf %5, %6 : vector<32x16xf32>
    %cst_5 = arith.constant 0.000000e+00 : f32
    %8 = vector.broadcast %cst_5 : f32 to vector<32x16xf32>
    %9 = arith.maximumf %7, %8 : vector<32x16xf32>
    %c0_6 = arith.constant 0 : index
    %c0_7 = arith.constant 0 : index
    %10 = vector.load %arg4[%c0_6, %c0_7] : memref<16x32xf32, #tpu.memory_space<vmem>>, vector<16x32xf32>
    %11 = arith.truncf %10 : vector<16x32xf32> to vector<16x32xbf16>
    %c0_8 = arith.constant 0 : index
    %c0_9 = arith.constant 0 : index
    %12 = vector.load %arg5[%c0_8, %c0_9] : memref<1x32xf32, #tpu.memory_space<vmem>>, vector<1x32xf32>
    %13 = arith.truncf %9 : vector<32x16xf32> to vector<32x16xbf16>
    %cst_10 = arith.constant dense<0.000000e+00> : vector<32x32xf32>
    %14 = tpu.matmul %13, %11, %cst_10 {dimension_numbers = #tpu.dot_dimension_numbers<[1], [0], [0], [1], [0, 0, 1, 1], [], []>} : vector<32x16xbf16>, vector<16x32xbf16>, vector<32x32xf32> -> vector<32x32xf32>
    %15 = vector.broadcast %12 : vector<1x32xf32> to vector<32x32xf32>
    %16 = arith.addf %14, %15 : vector<32x32xf32>
    %c0_11 = arith.constant 0 : index
    %c0_12 = arith.constant 0 : index
    %17 = vector.load %arg6[%c0_11, %c0_12] : memref<32x32xf32, #tpu.memory_space<vmem>>, vector<32x32xf32>
    tpu.vector_store %arg6[%c0_11, %c0_12], %16 {strides = array<i32>} : memref<32x32xf32, #tpu.memory_space<vmem>>, vector<32x32xf32>,
    return
  }
  func.func @transform_0(%arg0: i32) -> (i32, i32) {
    %c0_i32 = arith.constant 0 : i32
    %c0_i32_0 = arith.constant 0 : i32
    return %arg0, %c0_i32 : i32, i32
  }
  func.func @transform_1(%arg0: i32) -> (i32, i32) {
    %c0_i32 = arith.constant 0 : i32
    %c0_i32_0 = arith.constant 0 : i32
    %c0_i32_1 = arith.constant 0 : i32
    return %c0_i32, %c0_i32_0 : i32, i32
  }
  func.func @transform_2(%arg0: i32) -> (i32, i32) {
    %c0_i32 = arith.constant 0 : i32
    %c0_i32_0 = arith.constant 0 : i32
    %c0_i32_1 = arith.constant 0 : i32
    return %c0_i32, %c0_i32_0 : i32, i32
  }
  func.func @transform_3(%arg0: i32) -> (i32, i32) {
    %c0_i32 = arith.constant 0 : i32
    %c0_i32_0 = arith.constant 0 : i32
    %c0_i32_1 = arith.constant 0 : i32
    return %c0_i32, %c0_i32_0 : i32, i32
  }
  func.func @transform_4(%arg0: i32) -> (i32, i32) {
    %c0_i32 = arith.constant 0 : i32
    %c0_i32_0 = arith.constant 0 : i32
    %c0_i32_1 = arith.constant 0 : i32
    return %c0_i32, %c0_i32_0 : i32, i32
  }
  func.func @transform_5(%arg0: i32) -> (i32, i32) {
    %c0_i32 = arith.constant 0 : i32
    %c0_i32_0 = arith.constant 0 : i32
    return %arg0, %c0_i32 : i32, i32
  }
}

module attributes {stable_mosaic.version = 11 : i64} {
  func.func @kernel(%arg0: i32, %arg1: memref<32x32xf32, #tpu.memory_space<vmem>>, %arg2: memref<32x96xf32, #tpu.memory_space<vmem>>, %arg3: memref<1x96xf32, #tpu.memory_space<vmem>>, %arg4: memref<32x96xf32, #tpu.memory_space<vmem>>) attributes {dimension_semantics = [#tpu.dimension_semantics<parallel>], iteration_bounds = array<i64: 1>, scalar_prefetch = 0 : i64, scratch_operands = 0 : i64, tpu.core_type = #tpu.core_type<tc>, window_params = [{transform_indices = @transform_0, window_bounds = array<i64: 32, 32>}, {pipeline_mode = #tpu.pipeline_mode<synchronous>, transform_indices = @transform_1, window_bounds = array<i64: 32, 96>}, {pipeline_mode = #tpu.pipeline_mode<synchronous>, transform_indices = @transform_2, window_bounds = array<i64: 1, 96>}, {transform_indices = @transform_3, window_bounds = array<i64: 32, 96>}]} {
    %c0 = arith.constant 0 : index
    %c0_0 = arith.constant 0 : index
    %0 = vector.load %arg1[%c0, %c0_0] : memref<32x32xf32, #tpu.memory_space<vmem>>, vector<32x32xf32>
    %c0_1 = arith.constant 0 : index
    %c0_2 = arith.constant 0 : index
    %1 = vector.load %arg2[%c0_1, %c0_2] : memref<32x96xf32, #tpu.memory_space<vmem>>, vector<32x96xf32>
    %2 = arith.truncf %1 : vector<32x96xf32> to vector<32x96xbf16>
    %c0_3 = arith.constant 0 : index
    %c0_4 = arith.constant 0 : index
    %3 = vector.load %arg3[%c0_3, %c0_4] : memref<1x96xf32, #tpu.memory_space<vmem>>, vector<1x96xf32>
    %4 = arith.truncf %0 : vector<32x32xf32> to vector<32x32xbf16>
    %cst = arith.constant dense<0.000000e+00> : vector<32x96xf32>
    %5 = tpu.matmul %4, %2, %cst {dimension_numbers = #tpu.dot_dimension_numbers<[1], [0], [0], [1], [0, 0, 1, 1], [], []>} : vector<32x32xbf16>, vector<32x96xbf16>, vector<32x96xf32> -> vector<32x96xf32>
    %6 = vector.broadcast %3 : vector<1x96xf32> to vector<32x96xf32>
    %7 = arith.addf %5, %6 : vector<32x96xf32>
    %c0_5 = arith.constant 0 : index
    %c0_6 = arith.constant 0 : index
    %8 = vector.load %arg4[%c0_5, %c0_6] : memref<32x96xf32, #tpu.memory_space<vmem>>, vector<32x96xf32>
    tpu.vector_store %arg4[%c0_5, %c0_6], %7 {strides = array<i32>} : memref<32x96xf32, #tpu.memory_space<vmem>>, vector<32x96xf32>,
    return
  }
  func.func @transform_0(%arg0: i32) -> (i32, i32) {
    %c0_i32 = arith.constant 0 : i32
    %c0_i32_0 = arith.constant 0 : i32
    return %arg0, %c0_i32 : i32, i32
  }
  func.func @transform_1(%arg0: i32) -> (i32, i32) {
    %c0_i32 = arith.constant 0 : i32
    %c0_i32_0 = arith.constant 0 : i32
    %c0_i32_1 = arith.constant 0 : i32
    return %c0_i32, %c0_i32_0 : i32, i32
  }
  func.func @transform_2(%arg0: i32) -> (i32, i32) {
    %c0_i32 = arith.constant 0 : i32
    %c0_i32_0 = arith.constant 0 : i32
    %c0_i32_1 = arith.constant 0 : i32
    return %c0_i32, %c0_i32_0 : i32, i32
  }
  func.func @transform_3(%arg0: i32) -> (i32, i32) {
    %c0_i32 = arith.constant 0 : i32
    %c0_i32_0 = arith.constant 0 : i32
    return %arg0, %c0_i32 : i32, i32
  }
}

module attributes {stable_mosaic.version = 11 : i64} {
  func.func @kernel(%arg0: i32, %arg1: memref<32x96xf32, #tpu.memory_space<vmem>>, %arg2: memref<96x64xf32, #tpu.memory_space<vmem>>, %arg3: memref<1x64xf32, #tpu.memory_space<vmem>>, %arg4: memref<64x32xf32, #tpu.memory_space<vmem>>, %arg5: memref<1x32xf32, #tpu.memory_space<vmem>>, %arg6: memref<32x32xf32, #tpu.memory_space<vmem>>) attributes {dimension_semantics = [#tpu.dimension_semantics<parallel>], iteration_bounds = array<i64: 1>, scalar_prefetch = 0 : i64, scratch_operands = 0 : i64, tpu.core_type = #tpu.core_type<tc>, window_params = [{transform_indices = @transform_0, window_bounds = array<i64: 32, 96>}, {pipeline_mode = #tpu.pipeline_mode<synchronous>, transform_indices = @transform_1, window_bounds = array<i64: 96, 64>}, {pipeline_mode = #tpu.pipeline_mode<synchronous>, transform_indices = @transform_2, window_bounds = array<i64: 1, 64>}, {pipeline_mode = #tpu.pipeline_mode<synchronous>, transform_indices = @transform_3, window_bounds = array<i64: 64, 32>}, {pipeline_mode = #tpu.pipeline_mode<synchronous>, transform_indices = @transform_4, window_bounds = array<i64: 1, 32>}, {transform_indices = @transform_5, window_bounds = array<i64: 32, 32>}]} {
    %c0 = arith.constant 0 : index
    %c0_0 = arith.constant 0 : index
    %0 = vector.load %arg1[%c0, %c0_0] : memref<32x96xf32, #tpu.memory_space<vmem>>, vector<32x96xf32>
    %c0_1 = arith.constant 0 : index
    %c0_2 = arith.constant 0 : index
    %1 = vector.load %arg2[%c0_1, %c0_2] : memref<96x64xf32, #tpu.memory_space<vmem>>, vector<96x64xf32>
    %2 = arith.truncf %1 : vector<96x64xf32> to vector<96x64xbf16>
    %c0_3 = arith.constant 0 : index
    %c0_4 = arith.constant 0 : index
    %3 = vector.load %arg3[%c0_3, %c0_4] : memref<1x64xf32, #tpu.memory_space<vmem>>, vector<1x64xf32>
    %4 = arith.truncf %0 : vector<32x96xf32> to vector<32x96xbf16>
    %cst = arith.constant dense<0.000000e+00> : vector<32x64xf32>
    %5 = tpu.matmul %4, %2, %cst {dimension_numbers = #tpu.dot_dimension_numbers<[1], [0], [0], [1], [0, 0, 1, 1], [], []>} : vector<32x96xbf16>, vector<96x64xbf16>, vector<32x64xf32> -> vector<32x64xf32>
    %6 = vector.broadcast %3 : vector<1x64xf32> to vector<32x64xf32>
    %7 = arith.addf %5, %6 : vector<32x64xf32>
    %cst_5 = arith.constant 0.000000e+00 : f32
    %8 = vector.broadcast %cst_5 : f32 to vector<32x64xf32>
    %9 = arith.maximumf %7, %8 : vector<32x64xf32>
    %c0_6 = arith.constant 0 : index
    %c0_7 = arith.constant 0 : index
    %10 = vector.load %arg4[%c0_6, %c0_7] : memref<64x32xf32, #tpu.memory_space<vmem>>, vector<64x32xf32>
    %11 = arith.truncf %10 : vector<64x32xf32> to vector<64x32xbf16>
    %c0_8 = arith.constant 0 : index
    %c0_9 = arith.constant 0 : index
    %12 = vector.load %arg5[%c0_8, %c0_9] : memref<1x32xf32, #tpu.memory_space<vmem>>, vector<1x32xf32>
    %13 = arith.truncf %9 : vector<32x64xf32> to vector<32x64xbf16>
    %cst_10 = arith.constant dense<0.000000e+00> : vector<32x32xf32>
    %14 = tpu.matmul %13, %11, %cst_10 {dimension_numbers = #tpu.dot_dimension_numbers<[1], [0], [0], [1], [0, 0, 1, 1], [], []>} : vector<32x64xbf16>, vector<64x32xbf16>, vector<32x32xf32> -> vector<32x32xf32>
    %15 = vector.broadcast %12 : vector<1x32xf32> to vector<32x32xf32>
    %16 = arith.addf %14, %15 : vector<32x32xf32>
    %c0_11 = arith.constant 0 : index
    %c0_12 = arith.constant 0 : index
    %17 = vector.load %arg6[%c0_11, %c0_12] : memref<32x32xf32, #tpu.memory_space<vmem>>, vector<32x32xf32>
    tpu.vector_store %arg6[%c0_11, %c0_12], %16 {strides = array<i32>} : memref<32x32xf32, #tpu.memory_space<vmem>>, vector<32x32xf32>,
    return
  }
  func.func @transform_0(%arg0: i32) -> (i32, i32) {
    %c0_i32 = arith.constant 0 : i32
    %c0_i32_0 = arith.constant 0 : i32
    return %arg0, %c0_i32 : i32, i32
  }
  func.func @transform_1(%arg0: i32) -> (i32, i32) {
    %c0_i32 = arith.constant 0 : i32
    %c0_i32_0 = arith.constant 0 : i32
    %c0_i32_1 = arith.constant 0 : i32
    return %c0_i32, %c0_i32_0 : i32, i32
  }
  func.func @transform_2(%arg0: i32) -> (i32, i32) {
    %c0_i32 = arith.constant 0 : i32
    %c0_i32_0 = arith.constant 0 : i32
    %c0_i32_1 = arith.constant 0 : i32
    return %c0_i32, %c0_i32_0 : i32, i32
  }
  func.func @transform_3(%arg0: i32) -> (i32, i32) {
    %c0_i32 = arith.constant 0 : i32
    %c0_i32_0 = arith.constant 0 : i32
    %c0_i32_1 = arith.constant 0 : i32
    return %c0_i32, %c0_i32_0 : i32, i32
  }
  func.func @transform_4(%arg0: i32) -> (i32, i32) {
    %c0_i32 = arith.constant 0 : i32
    %c0_i32_0 = arith.constant 0 : i32
    %c0_i32_1 = arith.constant 0 : i32
    return %c0_i32, %c0_i32_0 : i32, i32
  }
  func.func @transform_5(%arg0: i32) -> (i32, i32) {
    %c0_i32 = arith.constant 0 : i32
    %c0_i32_0 = arith.constant 0 : i32
    return %arg0, %c0_i32 : i32, i32
  }
}

module attributes {stable_mosaic.version = 11 : i64} {
  func.func @kernel(%arg0: i32, %arg1: memref<1x16x32xf32, #tpu.memory_space<vmem>>, %arg2: memref<1x16x32xf32, #tpu.memory_space<vmem>>, %arg3: memref<1x16x32xf32, #tpu.memory_space<vmem>>, %arg4: memref<1x16x32xf32, #tpu.memory_space<vmem>>) attributes {dimension_semantics = [#tpu.dimension_semantics<parallel>], iteration_bounds = array<i64: 2>, scalar_prefetch = 0 : i64, scratch_operands = 0 : i64, tpu.core_type = #tpu.core_type<tc>, window_params = [{transform_indices = @transform_0, window_bounds = array<i64: 1, 16, 32>}, {transform_indices = @transform_1, window_bounds = array<i64: 1, 16, 32>}, {transform_indices = @transform_2, window_bounds = array<i64: 1, 16, 32>}, {transform_indices = @transform_3, window_bounds = array<i64: 1, 16, 32>}]} {
    %c0 = arith.constant 0 : index
    %c0_0 = arith.constant 0 : index
    %c0_1 = arith.constant 0 : index
    %0 = vector.load %arg1[%c0, %c0_0, %c0_1] : memref<1x16x32xf32, #tpu.memory_space<vmem>>, vector<1x16x32xf32>
    %1 = vector.shape_cast %0 : vector<1x16x32xf32> to vector<16x32xf32>
    %c0_2 = arith.constant 0 : index
    %c0_3 = arith.constant 0 : index
    %c0_4 = arith.constant 0 : index
    %2 = vector.load %arg2[%c0_2, %c0_3, %c0_4] : memref<1x16x32xf32, #tpu.memory_space<vmem>>, vector<1x16x32xf32>
    %3 = vector.shape_cast %2 : vector<1x16x32xf32> to vector<16x32xf32>
    %c0_5 = arith.constant 0 : index
    %c0_6 = arith.constant 0 : index
    %c0_7 = arith.constant 0 : index
    %4 = vector.load %arg3[%c0_5, %c0_6, %c0_7] : memref<1x16x32xf32, #tpu.memory_space<vmem>>, vector<1x16x32xf32>
    %5 = vector.shape_cast %4 : vector<1x16x32xf32> to vector<16x32xf32>
    %6 = vector.extract_strided_slice %1 {offsets = [0, 0], sizes = [16, 8], strides = [1, 1]} : vector<16x32xf32> to vector<16x8xf32>
    %7 = arith.truncf %6 : vector<16x8xf32> to vector<16x8xbf16>
    %8 = vector.extract_strided_slice %3 {offsets = [0, 0], sizes = [16, 8], strides = [1, 1]} : vector<16x32xf32> to vector<16x8xf32>
    %9 = arith.truncf %8 : vector<16x8xf32> to vector<16x8xbf16>
    %10 = vector.extract_strided_slice %5 {offsets = [0, 0], sizes = [16, 8], strides = [1, 1]} : vector<16x32xf32> to vector<16x8xf32>
    %11 = arith.truncf %10 : vector<16x8xf32> to vector<16x8xbf16>
    %cst = arith.constant dense<0.000000e+00> : vector<16x16xf32>
    %12 = tpu.matmul %7, %9, %cst {dimension_numbers = #tpu.dot_dimension_numbers<[1], [1], [0], [0], [0, 0, 1, 0], [], []>} : vector<16x8xbf16>, vector<16x8xbf16>, vector<16x16xf32> -> vector<16x16xf32>
    %cst_8 = arith.constant 0.353553385 : f32
    %13 = vector.broadcast %cst_8 : f32 to vector<16x16xf32>
    %14 = arith.mulf %12, %13 : vector<16x16xf32>
    %cst_9 = arith.constant dense<0xFF800000> : vector<16xf32>
    %15 = vector.multi_reduction <maximumf>, %14, %cst_9 [1] : vector<16x16xf32> to vector<16xf32>
    %16 = vector.shape_cast %15 : vector<16xf32> to vector<16x1xf32>
    %17 = vector.broadcast %16 : vector<16x1xf32> to vector<16x16xf32>
    %18 = arith.subf %14, %17 : vector<16x16xf32>
    %19 = math.exp %18 : vector<16x16xf32>
    %cst_10 = arith.constant dense<0.000000e+00> : vector<16xf32>
    %20 = vector.multi_reduction <add>, %19, %cst_10 [1] : vector<16x16xf32> to vector<16xf32>
    %21 = vector.shape_cast %20 : vector<16xf32> to vector<16x1xf32>
    %22 = tpu.reciprocal %21 {approx = true} : vector<16x1xf32> -> vector<16x1xf32>
    %23 = vector.broadcast %22 : vector<16x1xf32> to vector<16x16xf32>
    %24 = arith.mulf %19, %23 : vector<16x16xf32>
    %25 = arith.truncf %24 : vector<16x16xf32> to vector<16x16xbf16>
    %cst_11 = arith.constant dense<0.000000e+00> : vector<16x8xf32>
    %26 = tpu.matmul %25, %11, %cst_11 {dimension_numbers = #tpu.dot_dimension_numbers<[1], [0], [0], [1], [0, 0, 1, 1], [], []>} : vector<16x16xbf16>, vector<16x8xbf16>, vector<16x8xf32> -> vector<16x8xf32>
    %27 = vector.extract_strided_slice %1 {offsets = [0, 8], sizes = [16, 8], strides = [1, 1]} : vector<16x32xf32> to vector<16x8xf32>
    %28 = arith.truncf %27 : vector<16x8xf32> to vector<16x8xbf16>
    %29 = vector.extract_strided_slice %3 {offsets = [0, 8], sizes = [16, 8], strides = [1, 1]} : vector<16x32xf32> to vector<16x8xf32>
    %30 = arith.truncf %29 : vector<16x8xf32> to vector<16x8xbf16>
    %31 = vector.extract_strided_slice %5 {offsets = [0, 8], sizes = [16, 8], strides = [1, 1]} : vector<16x32xf32> to vector<16x8xf32>
    %32 = arith.truncf %31 : vector<16x8xf32> to vector<16x8xbf16>
    %cst_12 = arith.constant dense<0.000000e+00> : vector<16x16xf32>
    %33 = tpu.matmul %28, %30, %cst_12 {dimension_numbers = #tpu.dot_dimension_numbers<[1], [1], [0], [0], [0, 0, 1, 0], [], []>} : vector<16x8xbf16>, vector<16x8xbf16>, vector<16x16xf32> -> vector<16x16xf32>
    %cst_13 = arith.constant 0.353553385 : f32
    %34 = vector.broadcast %cst_13 : f32 to vector<16x16xf32>
    %35 = arith.mulf %33, %34 : vector<16x16xf32>
    %cst_14 = arith.constant dense<0xFF800000> : vector<16xf32>
    %36 = vector.multi_reduction <maximumf>, %35, %cst_14 [1] : vector<16x16xf32> to vector<16xf32>
    %37 = vector.shape_cast %36 : vector<16xf32> to vector<16x1xf32>
    %38 = vector.broadcast %37 : vector<16x1xf32> to vector<16x16xf32>
    %39 = arith.subf %35, %38 : vector<16x16xf32>
    %40 = math.exp %39 : vector<16x16xf32>
    %cst_15 = arith.constant dense<0.000000e+00> : vector<16xf32>
    %41 = vector.multi_reduction <add>, %40, %cst_15 [1] : vector<16x16xf32> to vector<16xf32>
    %42 = vector.shape_cast %41 : vector<16xf32> to vector<16x1xf32>
    %43 = tpu.reciprocal %42 {approx = true} : vector<16x1xf32> -> vector<16x1xf32>
    %44 = vector.broadcast %43 : vector<16x1xf32> to vector<16x16xf32>
    %45 = arith.mulf %40, %44 : vector<16x16xf32>
    %46 = arith.truncf %45 : vector<16x16xf32> to vector<16x16xbf16>
    %cst_16 = arith.constant dense<0.000000e+00> : vector<16x8xf32>
    %47 = tpu.matmul %46, %32, %cst_16 {dimension_numbers = #tpu.dot_dimension_numbers<[1], [0], [0], [1], [0, 0, 1, 1], [], []>} : vector<16x16xbf16>, vector<16x8xbf16>, vector<16x8xf32> -> vector<16x8xf32>
    %48 = vector.extract_strided_slice %1 {offsets = [0, 16], sizes = [16, 8], strides = [1, 1]} : vector<16x32xf32> to vector<16x8xf32>
    %49 = arith.truncf %48 : vector<16x8xf32> to vector<16x8xbf16>
    %50 = vector.extract_strided_slice %3 {offsets = [0, 16], sizes = [16, 8], strides = [1, 1]} : vector<16x32xf32> to vector<16x8xf32>
    %51 = arith.truncf %50 : vector<16x8xf32> to vector<16x8xbf16>
    %52 = vector.extract_strided_slice %5 {offsets = [0, 16], sizes = [16, 8], strides = [1, 1]} : vector<16x32xf32> to vector<16x8xf32>
    %53 = arith.truncf %52 : vector<16x8xf32> to vector<16x8xbf16>
    %cst_17 = arith.constant dense<0.000000e+00> : vector<16x16xf32>
    %54 = tpu.matmul %49, %51, %cst_17 {dimension_numbers = #tpu.dot_dimension_numbers<[1], [1], [0], [0], [0, 0, 1, 0], [], []>} : vector<16x8xbf16>, vector<16x8xbf16>, vector<16x16xf32> -> vector<16x16xf32>
    %cst_18 = arith.constant 0.353553385 : f32
    %55 = vector.broadcast %cst_18 : f32 to vector<16x16xf32>
    %56 = arith.mulf %54, %55 : vector<16x16xf32>
    %cst_19 = arith.constant dense<0xFF800000> : vector<16xf32>
    %57 = vector.multi_reduction <maximumf>, %56, %cst_19 [1] : vector<16x16xf32> to vector<16xf32>
    %58 = vector.shape_cast %57 : vector<16xf32> to vector<16x1xf32>
    %59 = vector.broadcast %58 : vector<16x1xf32> to vector<16x16xf32>
    %60 = arith.subf %56, %59 : vector<16x16xf32>
    %61 = math.exp %60 : vector<16x16xf32>
    %cst_20 = arith.constant dense<0.000000e+00> : vector<16xf32>
    %62 = vector.multi_reduction <add>, %61, %cst_20 [1] : vector<16x16xf32> to vector<16xf32>
    %63 = vector.shape_cast %62 : vector<16xf32> to vector<16x1xf32>
    %64 = tpu.reciprocal %63 {approx = true} : vector<16x1xf32> -> vector<16x1xf32>
    %65 = vector.broadcast %64 : vector<16x1xf32> to vector<16x16xf32>
    %66 = arith.mulf %61, %65 : vector<16x16xf32>
    %67 = arith.truncf %66 : vector<16x16xf32> to vector<16x16xbf16>
    %cst_21 = arith.constant dense<0.000000e+00> : vector<16x8xf32>
    %68 = tpu.matmul %67, %53, %cst_21 {dimension_numbers = #tpu.dot_dimension_numbers<[1], [0], [0], [1], [0, 0, 1, 1], [], []>} : vector<16x16xbf16>, vector<16x8xbf16>, vector<16x8xf32> -> vector<16x8xf32>
    %69 = vector.extract_strided_slice %1 {offsets = [0, 24], sizes = [16, 8], strides = [1, 1]} : vector<16x32xf32> to vector<16x8xf32>
    %70 = arith.truncf %69 : vector<16x8xf32> to vector<16x8xbf16>
    %71 = vector.extract_strided_slice %3 {offsets = [0, 24], sizes = [16, 8], strides = [1, 1]} : vector<16x32xf32> to vector<16x8xf32>
    %72 = arith.truncf %71 : vector<16x8xf32> to vector<16x8xbf16>
    %73 = vector.extract_strided_slice %5 {offsets = [0, 24], sizes = [16, 8], strides = [1, 1]} : vector<16x32xf32> to vector<16x8xf32>
    %74 = arith.truncf %73 : vector<16x8xf32> to vector<16x8xbf16>
    %cst_22 = arith.constant dense<0.000000e+00> : vector<16x16xf32>
    %75 = tpu.matmul %70, %72, %cst_22 {dimension_numbers = #tpu.dot_dimension_numbers<[1], [1], [0], [0], [0, 0, 1, 0], [], []>} : vector<16x8xbf16>, vector<16x8xbf16>, vector<16x16xf32> -> vector<16x16xf32>
    %cst_23 = arith.constant 0.353553385 : f32
    %76 = vector.broadcast %cst_23 : f32 to vector<16x16xf32>
    %77 = arith.mulf %75, %76 : vector<16x16xf32>
    %cst_24 = arith.constant dense<0xFF800000> : vector<16xf32>
    %78 = vector.multi_reduction <maximumf>, %77, %cst_24 [1] : vector<16x16xf32> to vector<16xf32>
    %79 = vector.shape_cast %78 : vector<16xf32> to vector<16x1xf32>
    %80 = vector.broadcast %79 : vector<16x1xf32> to vector<16x16xf32>
    %81 = arith.subf %77, %80 : vector<16x16xf32>
    %82 = math.exp %81 : vector<16x16xf32>
    %cst_25 = arith.constant dense<0.000000e+00> : vector<16xf32>
    %83 = vector.multi_reduction <add>, %82, %cst_25 [1] : vector<16x16xf32> to vector<16xf32>
    %84 = vector.shape_cast %83 : vector<16xf32> to vector<16x1xf32>
    %85 = tpu.reciprocal %84 {approx = true} : vector<16x1xf32> -> vector<16x1xf32>
    %86 = vector.broadcast %85 : vector<16x1xf32> to vector<16x16xf32>
    %87 = arith.mulf %82, %86 : vector<16x16xf32>
    %88 = arith.truncf %87 : vector<16x16xf32> to vector<16x16xbf16>
    %cst_26 = arith.constant dense<0.000000e+00> : vector<16x8xf32>
    %89 = tpu.matmul %88, %74, %cst_26 {dimension_numbers = #tpu.dot_dimension_numbers<[1], [0], [0], [1], [0, 0, 1, 1], [], []>} : vector<16x16xbf16>, vector<16x8xbf16>, vector<16x8xf32> -> vector<16x8xf32>
    %90 = tpu.concatenate %26, %47, %68, %89 in 1 : vector<16x8xf32>, vector<16x8xf32>, vector<16x8xf32>, vector<16x8xf32> -> vector<16x32xf32>
    %91 = vector.shape_cast %90 : vector<16x32xf32> to vector<1x16x32xf32>
    %c0_27 = arith.constant 0 : index
    %c0_28 = arith.constant 0 : index
    %c0_29 = arith.constant 0 : index
    %92 = vector.load %arg4[%c0_27, %c0_28, %c0_29] : memref<1x16x32xf32, #tpu.memory_space<vmem>>, vector<1x16x32xf32>
    tpu.vector_store %arg4[%c0_27, %c0_28, %c0_29], %91 {strides = array<i32>} : memref<1x16x32xf32, #tpu.memory_space<vmem>>, vector<1x16x32xf32>,
    return
  }
  func.func @transform_0(%arg0: i32) -> (i32, i32, i32) {
    %c0_i32 = arith.constant 0 : i32
    %c0_i32_0 = arith.constant 0 : i32
    %c0_i32_1 = arith.constant 0 : i32
    return %arg0, %c0_i32, %c0_i32_0 : i32, i32, i32
  }
  func.func @transform_1(%arg0: i32) -> (i32, i32, i32) {
    %c0_i32 = arith.constant 0 : i32
    %c0_i32_0 = arith.constant 0 : i32
    %c0_i32_1 = arith.constant 0 : i32
    return %arg0, %c0_i32, %c0_i32_0 : i32, i32, i32
  }
  func.func @transform_2(%arg0: i32) -> (i32, i32, i32) {
    %c0_i32 = arith.constant 0 : i32
    %c0_i32_0 = arith.constant 0 : i32
    %c0_i32_1 = arith.constant 0 : i32
    return %arg0, %c0_i32, %c0_i32_0 : i32, i32, i32
  }
  func.func @transform_3(%arg0: i32) -> (i32, i32, i32) {
    %c0_i32 = arith.constant 0 : i32
    %c0_i32_0 = arith.constant 0 : i32
    %c0_i32_1 = arith.constant 0 : i32
    return %arg0, %c0_i32, %c0_i32_0 : i32, i32, i32
  }
}

module attributes {stable_mosaic.version = 11 : i64} {
  func.func @kernel(%arg0: i32, %arg1: memref<32x32xf32, #tpu.memory_space<vmem>>, %arg2: memref<32x128xf32, #tpu.memory_space<vmem>>, %arg3: memref<1x128xf32, #tpu.memory_space<vmem>>, %arg4: memref<128x32xf32, #tpu.memory_space<vmem>>, %arg5: memref<1x32xf32, #tpu.memory_space<vmem>>, %arg6: memref<32x32xf32, #tpu.memory_space<vmem>>) attributes {dimension_semantics = [#tpu.dimension_semantics<parallel>], iteration_bounds = array<i64: 1>, scalar_prefetch = 0 : i64, scratch_operands = 0 : i64, tpu.core_type = #tpu.core_type<tc>, window_params = [{transform_indices = @transform_0, window_bounds = array<i64: 32, 32>}, {pipeline_mode = #tpu.pipeline_mode<synchronous>, transform_indices = @transform_1, window_bounds = array<i64: 32, 128>}, {pipeline_mode = #tpu.pipeline_mode<synchronous>, transform_indices = @transform_2, window_bounds = array<i64: 1, 128>}, {pipeline_mode = #tpu.pipeline_mode<synchronous>, transform_indices = @transform_3, window_bounds = array<i64: 128, 32>}, {pipeline_mode = #tpu.pipeline_mode<synchronous>, transform_indices = @transform_4, window_bounds = array<i64: 1, 32>}, {transform_indices = @transform_5, window_bounds = array<i64: 32, 32>}]} {
    %c0 = arith.constant 0 : index
    %c0_0 = arith.constant 0 : index
    %0 = vector.load %arg1[%c0, %c0_0] : memref<32x32xf32, #tpu.memory_space<vmem>>, vector<32x32xf32>
    %c0_1 = arith.constant 0 : index
    %c0_2 = arith.constant 0 : index
    %1 = vector.load %arg2[%c0_1, %c0_2] : memref<32x128xf32, #tpu.memory_space<vmem>>, vector<32x128xf32>
    %2 = arith.truncf %1 : vector<32x128xf32> to vector<32x128xbf16>
    %c0_3 = arith.constant 0 : index
    %c0_4 = arith.constant 0 : index
    %3 = vector.load %arg3[%c0_3, %c0_4] : memref<1x128xf32, #tpu.memory_space<vmem>>, vector<1x128xf32>
    %4 = arith.truncf %0 : vector<32x32xf32> to vector<32x32xbf16>
    %cst = arith.constant dense<0.000000e+00> : vector<32x128xf32>
    %5 = tpu.matmul %4, %2, %cst {dimension_numbers = #tpu.dot_dimension_numbers<[1], [0], [0], [1], [0, 0, 1, 1], [], []>} : vector<32x32xbf16>, vector<32x128xbf16>, vector<32x128xf32> -> vector<32x128xf32>
    %6 = vector.broadcast %3 : vector<1x128xf32> to vector<32x128xf32>
    %7 = arith.addf %5, %6 : vector<32x128xf32>
    %8 = arith.mulf %7, %7 : vector<32x128xf32>
    %9 = arith.mulf %7, %8 : vector<32x128xf32>
    %cst_5 = arith.constant 4.471500e-02 : f32
    %10 = vector.broadcast %cst_5 : f32 to vector<32x128xf32>
    %11 = arith.mulf %10, %9 : vector<32x128xf32>
    %12 = arith.addf %7, %11 : vector<32x128xf32>
    %cst_6 = arith.constant 0.797884583 : f32
    %13 = vector.broadcast %cst_6 : f32 to vector<32x128xf32>
    %14 = arith.mulf %13, %12 : vector<32x128xf32>
    %15 = math.tanh %14 : vector<32x128xf32>
    %cst_7 = arith.constant 1.000000e+00 : f32
    %16 = vector.broadcast %cst_7 : f32 to vector<32x128xf32>
    %17 = arith.addf %16, %15 : vector<32x128xf32>
    %cst_8 = arith.constant 5.000000e-01 : f32
    %18 = vector.broadcast %cst_8 : f32 to vector<32x128xf32>
    %19 = arith.mulf %18, %17 : vector<32x128xf32>
    %20 = arith.mulf %7, %19 : vector<32x128xf32>
    %c0_9 = arith.constant 0 : index
    %c0_10 = arith.constant 0 : index
    %21 = vector.load %arg4[%c0_9, %c0_10] : memref<128x32xf32, #tpu.memory_space<vmem>>, vector<128x32xf32>
    %22 = arith.truncf %21 : vector<128x32xf32> to vector<128x32xbf16>
    %c0_11 = arith.constant 0 : index
    %c0_12 = arith.constant 0 : index
    %23 = vector.load %arg5[%c0_11, %c0_12] : memref<1x32xf32, #tpu.memory_space<vmem>>, vector<1x32xf32>
    %24 = arith.truncf %20 : vector<32x128xf32> to vector<32x128xbf16>
    %cst_13 = arith.constant dense<0.000000e+00> : vector<32x32xf32>
    %25 = tpu.matmul %24, %22, %cst_13 {dimension_numbers = #tpu.dot_dimension_numbers<[1], [0], [0], [1], [0, 0, 1, 1], [], []>} : vector<32x128xbf16>, vector<128x32xbf16>, vector<32x32xf32> -> vector<32x32xf32>
    %26 = vector.broadcast %23 : vector<1x32xf32> to vector<32x32xf32>
    %27 = arith.addf %25, %26 : vector<32x32xf32>
    %c0_14 = arith.constant 0 : index
    %c0_15 = arith.constant 0 : index
    %28 = vector.load %arg6[%c0_14, %c0_15] : memref<32x32xf32, #tpu.memory_space<vmem>>, vector<32x32xf32>
    tpu.vector_store %arg6[%c0_14, %c0_15], %27 {strides = array<i32>} : memref<32x32xf32, #tpu.memory_space<vmem>>, vector<32x32xf32>,
    return
  }
  func.func @transform_0(%arg0: i32) -> (i32, i32) {
    %c0_i32 = arith.constant 0 : i32
    %c0_i32_0 = arith.constant 0 : i32
    return %arg0, %c0_i32 : i32, i32
  }
  func.func @transform_1(%arg0: i32) -> (i32, i32) {
    %c0_i32 = arith.constant 0 : i32
    %c0_i32_0 = arith.constant 0 : i32
    %c0_i32_1 = arith.constant 0 : i32
    return %c0_i32, %c0_i32_0 : i32, i32
  }
  func.func @transform_2(%arg0: i32) -> (i32, i32) {
    %c0_i32 = arith.constant 0 : i32
    %c0_i32_0 = arith.constant 0 : i32
    %c0_i32_1 = arith.constant 0 : i32
    return %c0_i32, %c0_i32_0 : i32, i32
  }
  func.func @transform_3(%arg0: i32) -> (i32, i32) {
    %c0_i32 = arith.constant 0 : i32
    %c0_i32_0 = arith.constant 0 : i32
    %c0_i32_1 = arith.constant 0 : i32
    return %c0_i32, %c0_i32_0 : i32, i32
  }
  func.func @transform_4(%arg0: i32) -> (i32, i32) {
    %c0_i32 = arith.constant 0 : i32
    %c0_i32_0 = arith.constant 0 : i32
    %c0_i32_1 = arith.constant 0 : i32
    return %c0_i32, %c0_i32_0 : i32, i32
  }
  func.func @transform_5(%arg0: i32) -> (i32, i32) {
    %c0_i32 = arith.constant 0 : i32
    %c0_i32_0 = arith.constant 0 : i32
    return %arg0, %c0_i32 : i32, i32
  }
}

module attributes {stable_mosaic.version = 11 : i64} {
  func.func @kernel(%arg0: i32, %arg1: memref<256x8xf32, #tpu.memory_space<vmem>>, %arg2: memref<8x64xf32, #tpu.memory_space<vmem>>, %arg3: memref<1x64xf32, #tpu.memory_space<vmem>>, %arg4: memref<64x32xf32, #tpu.memory_space<vmem>>, %arg5: memref<1x32xf32, #tpu.memory_space<vmem>>, %arg6: memref<256x32xf32, #tpu.memory_space<vmem>>) attributes {dimension_semantics = [#tpu.dimension_semantics<parallel>], iteration_bounds = array<i64: 1>, scalar_prefetch = 0 : i64, scratch_operands = 0 : i64, tpu.core_type = #tpu.core_type<tc>, window_params = [{transform_indices = @transform_0, window_bounds = array<i64: 256, 8>}, {pipeline_mode = #tpu.pipeline_mode<synchronous>, transform_indices = @transform_1, window_bounds = array<i64: 8, 64>}, {pipeline_mode = #tpu.pipeline_mode<synchronous>, transform_indices = @transform_2, window_bounds = array<i64: 1, 64>}, {pipeline_mode = #tpu.pipeline_mode<synchronous>, transform_indices = @transform_3, window_bounds = array<i64: 64, 32>}, {pipeline_mode = #tpu.pipeline_mode<synchronous>, transform_indices = @transform_4, window_bounds = array<i64: 1, 32>}, {transform_indices = @transform_5, window_bounds = array<i64: 256, 32>}]} {
    %c0 = arith.constant 0 : index
    %c0_0 = arith.constant 0 : index
    %0 = vector.load %arg1[%c0, %c0_0] : memref<256x8xf32, #tpu.memory_space<vmem>>, vector<256x8xf32>
    %c0_1 = arith.constant 0 : index
    %c0_2 = arith.constant 0 : index
    %1 = vector.load %arg2[%c0_1, %c0_2] : memref<8x64xf32, #tpu.memory_space<vmem>>, vector<8x64xf32>
    %2 = arith.truncf %1 : vector<8x64xf32> to vector<8x64xbf16>
    %c0_3 = arith.constant 0 : index
    %c0_4 = arith.constant 0 : index
    %3 = vector.load %arg3[%c0_3, %c0_4] : memref<1x64xf32, #tpu.memory_space<vmem>>, vector<1x64xf32>
    %4 = arith.truncf %0 : vector<256x8xf32> to vector<256x8xbf16>
    %cst = arith.constant dense<0.000000e+00> : vector<256x64xf32>
    %5 = tpu.matmul %4, %2, %cst {dimension_numbers = #tpu.dot_dimension_numbers<[1], [0], [0], [1], [0, 0, 1, 1], [], []>} : vector<256x8xbf16>, vector<8x64xbf16>, vector<256x64xf32> -> vector<256x64xf32>
    %6 = vector.broadcast %3 : vector<1x64xf32> to vector<256x64xf32>
    %7 = arith.addf %5, %6 : vector<256x64xf32>
    %cst_5 = arith.constant 0.000000e+00 : f32
    %8 = vector.broadcast %cst_5 : f32 to vector<256x64xf32>
    %9 = arith.maximumf %7, %8 : vector<256x64xf32>
    %c0_6 = arith.constant 0 : index
    %c0_7 = arith.constant 0 : index
    %10 = vector.load %arg4[%c0_6, %c0_7] : memref<64x32xf32, #tpu.memory_space<vmem>>, vector<64x32xf32>
    %11 = arith.truncf %10 : vector<64x32xf32> to vector<64x32xbf16>
    %c0_8 = arith.constant 0 : index
    %c0_9 = arith.constant 0 : index
    %12 = vector.load %arg5[%c0_8, %c0_9] : memref<1x32xf32, #tpu.memory_space<vmem>>, vector<1x32xf32>
    %13 = arith.truncf %9 : vector<256x64xf32> to vector<256x64xbf16>
    %cst_10 = arith.constant dense<0.000000e+00> : vector<256x32xf32>
    %14 = tpu.matmul %13, %11, %cst_10 {dimension_numbers = #tpu.dot_dimension_numbers<[1], [0], [0], [1], [0, 0, 1, 1], [], []>} : vector<256x64xbf16>, vector<64x32xbf16>, vector<256x32xf32> -> vector<256x32xf32>
    %15 = vector.broadcast %12 : vector<1x32xf32> to vector<256x32xf32>
    %16 = arith.addf %14, %15 : vector<256x32xf32>
    %c0_11 = arith.constant 0 : index
    %c0_12 = arith.constant 0 : index
    %17 = vector.load %arg6[%c0_11, %c0_12] : memref<256x32xf32, #tpu.memory_space<vmem>>, vector<256x32xf32>
    tpu.vector_store %arg6[%c0_11, %c0_12], %16 {strides = array<i32>} : memref<256x32xf32, #tpu.memory_space<vmem>>, vector<256x32xf32>,
    return
  }
  func.func @transform_0(%arg0: i32) -> (i32, i32) {
    %c0_i32 = arith.constant 0 : i32
    %c0_i32_0 = arith.constant 0 : i32
    return %arg0, %c0_i32 : i32, i32
  }
  func.func @transform_1(%arg0: i32) -> (i32, i32) {
    %c0_i32 = arith.constant 0 : i32
    %c0_i32_0 = arith.constant 0 : i32
    %c0_i32_1 = arith.constant 0 : i32
    return %c0_i32, %c0_i32_0 : i32, i32
  }
  func.func @transform_2(%arg0: i32) -> (i32, i32) {
    %c0_i32 = arith.constant 0 : i32
    %c0_i32_0 = arith.constant 0 : i32
    %c0_i32_1 = arith.constant 0 : i32
    return %c0_i32, %c0_i32_0 : i32, i32
  }
  func.func @transform_3(%arg0: i32) -> (i32, i32) {
    %c0_i32 = arith.constant 0 : i32
    %c0_i32_0 = arith.constant 0 : i32
    %c0_i32_1 = arith.constant 0 : i32
    return %c0_i32, %c0_i32_0 : i32, i32
  }
  func.func @transform_4(%arg0: i32) -> (i32, i32) {
    %c0_i32 = arith.constant 0 : i32
    %c0_i32_0 = arith.constant 0 : i32
    %c0_i32_1 = arith.constant 0 : i32
    return %c0_i32, %c0_i32_0 : i32, i32
  }
  func.func @transform_5(%arg0: i32) -> (i32, i32) {
    %c0_i32 = arith.constant 0 : i32
    %c0_i32_0 = arith.constant 0 : i32
    return %arg0, %c0_i32 : i32, i32
  }
}

module attributes {stable_mosaic.version = 11 : i64} {
  func.func @kernel(%arg0: i32, %arg1: memref<256x32xf32, #tpu.memory_space<vmem>>, %arg2: memref<32x128xf32, #tpu.memory_space<vmem>>, %arg3: memref<1x128xf32, #tpu.memory_space<vmem>>, %arg4: memref<128x32xf32, #tpu.memory_space<vmem>>, %arg5: memref<1x32xf32, #tpu.memory_space<vmem>>, %arg6: memref<256x32xf32, #tpu.memory_space<vmem>>) attributes {dimension_semantics = [#tpu.dimension_semantics<parallel>], iteration_bounds = array<i64: 1>, scalar_prefetch = 0 : i64, scratch_operands = 0 : i64, tpu.core_type = #tpu.core_type<tc>, window_params = [{transform_indices = @transform_0, window_bounds = array<i64: 256, 32>}, {pipeline_mode = #tpu.pipeline_mode<synchronous>, transform_indices = @transform_1, window_bounds = array<i64: 32, 128>}, {pipeline_mode = #tpu.pipeline_mode<synchronous>, transform_indices = @transform_2, window_bounds = array<i64: 1, 128>}, {pipeline_mode = #tpu.pipeline_mode<synchronous>, transform_indices = @transform_3, window_bounds = array<i64: 128, 32>}, {pipeline_mode = #tpu.pipeline_mode<synchronous>, transform_indices = @transform_4, window_bounds = array<i64: 1, 32>}, {transform_indices = @transform_5, window_bounds = array<i64: 256, 32>}]} {
    %c0 = arith.constant 0 : index
    %c0_0 = arith.constant 0 : index
    %0 = vector.load %arg1[%c0, %c0_0] : memref<256x32xf32, #tpu.memory_space<vmem>>, vector<256x32xf32>
    %c0_1 = arith.constant 0 : index
    %c0_2 = arith.constant 0 : index
    %1 = vector.load %arg2[%c0_1, %c0_2] : memref<32x128xf32, #tpu.memory_space<vmem>>, vector<32x128xf32>
    %2 = arith.truncf %1 : vector<32x128xf32> to vector<32x128xbf16>
    %c0_3 = arith.constant 0 : index
    %c0_4 = arith.constant 0 : index
    %3 = vector.load %arg3[%c0_3, %c0_4] : memref<1x128xf32, #tpu.memory_space<vmem>>, vector<1x128xf32>
    %4 = arith.truncf %0 : vector<256x32xf32> to vector<256x32xbf16>
    %cst = arith.constant dense<0.000000e+00> : vector<256x128xf32>
    %5 = tpu.matmul %4, %2, %cst {dimension_numbers = #tpu.dot_dimension_numbers<[1], [0], [0], [1], [0, 0, 1, 1], [], []>} : vector<256x32xbf16>, vector<32x128xbf16>, vector<256x128xf32> -> vector<256x128xf32>
    %6 = vector.broadcast %3 : vector<1x128xf32> to vector<256x128xf32>
    %7 = arith.addf %5, %6 : vector<256x128xf32>
    %cst_5 = arith.constant 0.000000e+00 : f32
    %8 = vector.broadcast %cst_5 : f32 to vector<256x128xf32>
    %9 = arith.maximumf %7, %8 : vector<256x128xf32>
    %c0_6 = arith.constant 0 : index
    %c0_7 = arith.constant 0 : index
    %10 = vector.load %arg4[%c0_6, %c0_7] : memref<128x32xf32, #tpu.memory_space<vmem>>, vector<128x32xf32>
    %11 = arith.truncf %10 : vector<128x32xf32> to vector<128x32xbf16>
    %c0_8 = arith.constant 0 : index
    %c0_9 = arith.constant 0 : index
    %12 = vector.load %arg5[%c0_8, %c0_9] : memref<1x32xf32, #tpu.memory_space<vmem>>, vector<1x32xf32>
    %13 = arith.truncf %9 : vector<256x128xf32> to vector<256x128xbf16>
    %cst_10 = arith.constant dense<0.000000e+00> : vector<256x32xf32>
    %14 = tpu.matmul %13, %11, %cst_10 {dimension_numbers = #tpu.dot_dimension_numbers<[1], [0], [0], [1], [0, 0, 1, 1], [], []>} : vector<256x128xbf16>, vector<128x32xbf16>, vector<256x32xf32> -> vector<256x32xf32>
    %15 = vector.broadcast %12 : vector<1x32xf32> to vector<256x32xf32>
    %16 = arith.addf %14, %15 : vector<256x32xf32>
    %c0_11 = arith.constant 0 : index
    %c0_12 = arith.constant 0 : index
    %17 = vector.load %arg6[%c0_11, %c0_12] : memref<256x32xf32, #tpu.memory_space<vmem>>, vector<256x32xf32>
    tpu.vector_store %arg6[%c0_11, %c0_12], %16 {strides = array<i32>} : memref<256x32xf32, #tpu.memory_space<vmem>>, vector<256x32xf32>,
    return
  }
  func.func @transform_0(%arg0: i32) -> (i32, i32) {
    %c0_i32 = arith.constant 0 : i32
    %c0_i32_0 = arith.constant 0 : i32
    return %arg0, %c0_i32 : i32, i32
  }
  func.func @transform_1(%arg0: i32) -> (i32, i32) {
    %c0_i32 = arith.constant 0 : i32
    %c0_i32_0 = arith.constant 0 : i32
    %c0_i32_1 = arith.constant 0 : i32
    return %c0_i32, %c0_i32_0 : i32, i32
  }
  func.func @transform_2(%arg0: i32) -> (i32, i32) {
    %c0_i32 = arith.constant 0 : i32
    %c0_i32_0 = arith.constant 0 : i32
    %c0_i32_1 = arith.constant 0 : i32
    return %c0_i32, %c0_i32_0 : i32, i32
  }
  func.func @transform_3(%arg0: i32) -> (i32, i32) {
    %c0_i32 = arith.constant 0 : i32
    %c0_i32_0 = arith.constant 0 : i32
    %c0_i32_1 = arith.constant 0 : i32
    return %c0_i32, %c0_i32_0 : i32, i32
  }
  func.func @transform_4(%arg0: i32) -> (i32, i32) {
    %c0_i32 = arith.constant 0 : i32
    %c0_i32_0 = arith.constant 0 : i32
    %c0_i32_1 = arith.constant 0 : i32
    return %c0_i32, %c0_i32_0 : i32, i32
  }
  func.func @transform_5(%arg0: i32) -> (i32, i32) {
    %c0_i32 = arith.constant 0 : i32
    %c0_i32_0 = arith.constant 0 : i32
    return %arg0, %c0_i32 : i32, i32
  }
}

module attributes {stable_mosaic.version = 11 : i64} {
  func.func @_mlp_res_kernel(%arg0: i32, %arg1: memref<32x64xf32, #tpu.memory_space<vmem>>, %arg2: memref<64x32xf32, #tpu.memory_space<vmem>>, %arg3: memref<1x32xf32, #tpu.memory_space<vmem>>, %arg4: memref<32x32xf32, #tpu.memory_space<vmem>>, %arg5: memref<1x32xf32, #tpu.memory_space<vmem>>, %arg6: memref<64x32xf32, #tpu.memory_space<vmem>>, %arg7: memref<1x32xf32, #tpu.memory_space<vmem>>, %arg8: memref<32x32xf32, #tpu.memory_space<vmem>>) attributes {dimension_semantics = [#tpu.dimension_semantics<parallel>], iteration_bounds = array<i64: 1>, scalar_prefetch = 0 : i64, scratch_operands = 0 : i64, tpu.core_type = #tpu.core_type<tc>, window_params = [{transform_indices = @transform_0, window_bounds = array<i64: 32, 64>}, {pipeline_mode = #tpu.pipeline_mode<synchronous>, transform_indices = @transform_1, window_bounds = array<i64: 64, 32>}, {pipeline_mode = #tpu.pipeline_mode<synchronous>, transform_indices = @transform_2, window_bounds = array<i64: 1, 32>}, {pipeline_mode = #tpu.pipeline_mode<synchronous>, transform_indices = @transform_3, window_bounds = array<i64: 32, 32>}, {pipeline_mode = #tpu.pipeline_mode<synchronous>, transform_indices = @transform_4, window_bounds = array<i64: 1, 32>}, {pipeline_mode = #tpu.pipeline_mode<synchronous>, transform_indices = @transform_5, window_bounds = array<i64: 64, 32>}, {pipeline_mode = #tpu.pipeline_mode<synchronous>, transform_indices = @transform_6, window_bounds = array<i64: 1, 32>}, {transform_indices = @transform_7, window_bounds = array<i64: 32, 32>}]} {
    %c0 = arith.constant 0 : index
    %c0_0 = arith.constant 0 : index
    %0 = vector.load %arg1[%c0, %c0_0] : memref<32x64xf32, #tpu.memory_space<vmem>>, vector<32x64xf32>
    %1 = arith.truncf %0 : vector<32x64xf32> to vector<32x64xbf16>
    %c0_1 = arith.constant 0 : index
    %c0_2 = arith.constant 0 : index
    %2 = vector.load %arg2[%c0_1, %c0_2] : memref<64x32xf32, #tpu.memory_space<vmem>>, vector<64x32xf32>
    %3 = arith.truncf %2 : vector<64x32xf32> to vector<64x32xbf16>
    %cst = arith.constant dense<0.000000e+00> : vector<32x32xf32>
    %4 = tpu.matmul %1, %3, %cst {dimension_numbers = #tpu.dot_dimension_numbers<[1], [0], [0], [1], [0, 0, 1, 1], [], []>} : vector<32x64xbf16>, vector<64x32xbf16>, vector<32x32xf32> -> vector<32x32xf32>
    %c0_3 = arith.constant 0 : index
    %c0_4 = arith.constant 0 : index
    %5 = vector.load %arg3[%c0_3, %c0_4] : memref<1x32xf32, #tpu.memory_space<vmem>>, vector<1x32xf32>
    %6 = vector.broadcast %5 : vector<1x32xf32> to vector<32x32xf32>
    %7 = arith.addf %4, %6 : vector<32x32xf32>
    %cst_5 = arith.constant 0.000000e+00 : f32
    %8 = vector.broadcast %cst_5 : f32 to vector<32x32xf32>
    %9 = arith.maximumf %7, %8 : vector<32x32xf32>
    %10 = arith.truncf %9 : vector<32x32xf32> to vector<32x32xbf16>
    %c0_6 = arith.constant 0 : index
    %c0_7 = arith.constant 0 : index
    %11 = vector.load %arg4[%c0_6, %c0_7] : memref<32x32xf32, #tpu.memory_space<vmem>>, vector<32x32xf32>
    %12 = arith.truncf %11 : vector<32x32xf32> to vector<32x32xbf16>
    %cst_8 = arith.constant dense<0.000000e+00> : vector<32x32xf32>
    %13 = tpu.matmul %10, %12, %cst_8 {dimension_numbers = #tpu.dot_dimension_numbers<[1], [0], [0], [1], [0, 0, 1, 1], [], []>} : vector<32x32xbf16>, vector<32x32xbf16>, vector<32x32xf32> -> vector<32x32xf32>
    %c0_9 = arith.constant 0 : index
    %c0_10 = arith.constant 0 : index
    %14 = vector.load %arg5[%c0_9, %c0_10] : memref<1x32xf32, #tpu.memory_space<vmem>>, vector<1x32xf32>
    %15 = vector.broadcast %14 : vector<1x32xf32> to vector<32x32xf32>
    %16 = arith.addf %13, %15 : vector<32x32xf32>
    %c0_11 = arith.constant 0 : index
    %c0_12 = arith.constant 0 : index
    %17 = vector.load %arg6[%c0_11, %c0_12] : memref<64x32xf32, #tpu.memory_space<vmem>>, vector<64x32xf32>
    %18 = arith.truncf %17 : vector<64x32xf32> to vector<64x32xbf16>
    %cst_13 = arith.constant dense<0.000000e+00> : vector<32x32xf32>
    %19 = tpu.matmul %1, %18, %cst_13 {dimension_numbers = #tpu.dot_dimension_numbers<[1], [0], [0], [1], [0, 0, 1, 1], [], []>} : vector<32x64xbf16>, vector<64x32xbf16>, vector<32x32xf32> -> vector<32x32xf32>
    %c0_14 = arith.constant 0 : index
    %c0_15 = arith.constant 0 : index
    %20 = vector.load %arg7[%c0_14, %c0_15] : memref<1x32xf32, #tpu.memory_space<vmem>>, vector<1x32xf32>
    %21 = vector.broadcast %20 : vector<1x32xf32> to vector<32x32xf32>
    %22 = arith.addf %19, %21 : vector<32x32xf32>
    %23 = arith.addf %16, %22 : vector<32x32xf32>
    %c0_16 = arith.constant 0 : index
    %c0_17 = arith.constant 0 : index
    %24 = vector.load %arg8[%c0_16, %c0_17] : memref<32x32xf32, #tpu.memory_space<vmem>>, vector<32x32xf32>
    tpu.vector_store %arg8[%c0_16, %c0_17], %23 {strides = array<i32>} : memref<32x32xf32, #tpu.memory_space<vmem>>, vector<32x32xf32>,
    return
  }
  func.func @transform_0(%arg0: i32) -> (i32, i32) {
    %c0_i32 = arith.constant 0 : i32
    %c0_i32_0 = arith.constant 0 : i32
    return %arg0, %c0_i32 : i32, i32
  }
  func.func @transform_1(%arg0: i32) -> (i32, i32) {
    %c0_i32 = arith.constant 0 : i32
    %c0_i32_0 = arith.constant 0 : i32
    %c0_i32_1 = arith.constant 0 : i32
    return %c0_i32, %c0_i32_0 : i32, i32
  }
  func.func @transform_2(%arg0: i32) -> (i32, i32) {
    %c0_i32 = arith.constant 0 : i32
    %c0_i32_0 = arith.constant 0 : i32
    %c0_i32_1 = arith.constant 0 : i32
    return %c0_i32, %c0_i32_0 : i32, i32
  }
  func.func @transform_3(%arg0: i32) -> (i32, i32) {
    %c0_i32 = arith.constant 0 : i32
    %c0_i32_0 = arith.constant 0 : i32
    %c0_i32_1 = arith.constant 0 : i32
    return %c0_i32, %c0_i32_0 : i32, i32
  }
  func.func @transform_4(%arg0: i32) -> (i32, i32) {
    %c0_i32 = arith.constant 0 : i32
    %c0_i32_0 = arith.constant 0 : i32
    %c0_i32_1 = arith.constant 0 : i32
    return %c0_i32, %c0_i32_0 : i32, i32
  }
  func.func @transform_5(%arg0: i32) -> (i32, i32) {
    %c0_i32 = arith.constant 0 : i32
    %c0_i32_0 = arith.constant 0 : i32
    %c0_i32_1 = arith.constant 0 : i32
    return %c0_i32, %c0_i32_0 : i32, i32
  }
  func.func @transform_6(%arg0: i32) -> (i32, i32) {
    %c0_i32 = arith.constant 0 : i32
    %c0_i32_0 = arith.constant 0 : i32
    %c0_i32_1 = arith.constant 0 : i32
    return %c0_i32, %c0_i32_0 : i32, i32
  }
  func.func @transform_7(%arg0: i32) -> (i32, i32) {
    %c0_i32 = arith.constant 0 : i32
    %c0_i32_0 = arith.constant 0 : i32
    return %arg0, %c0_i32 : i32, i32
  }
}

module attributes {stable_mosaic.version = 11 : i64} {
  func.func @kernel(%arg0: i32, %arg1: memref<32x8x32xf32, #tpu.memory_space<vmem>>, %arg2: memref<32x8x32xf32, #tpu.memory_space<vmem>>, %arg3: memref<32x32xf32, #tpu.memory_space<vmem>>) attributes {dimension_semantics = [#tpu.dimension_semantics<parallel>], iteration_bounds = array<i64: 1>, scalar_prefetch = 0 : i64, scratch_operands = 0 : i64, tpu.core_type = #tpu.core_type<tc>, window_params = [{transform_indices = @transform_0, window_bounds = array<i64: 32, 8, 32>}, {transform_indices = @transform_1, window_bounds = array<i64: 32, 8, 32>}, {transform_indices = @transform_2, window_bounds = array<i64: 32, 32>}]} {
    %c0 = arith.constant 0 : index
    %c0_0 = arith.constant 0 : index
    %c0_1 = arith.constant 0 : index
    %0 = vector.load %arg1[%c0, %c0_0, %c0_1] : memref<32x8x32xf32, #tpu.memory_space<vmem>>, vector<32x8x32xf32>
    %cst = arith.constant dense<0xFF800000> : vector<32x32xf32>
    %1 = vector.multi_reduction <maximumf>, %0, %cst [1] : vector<32x8x32xf32> to vector<32x32xf32>
    %2 = vector.shape_cast %1 : vector<32x32xf32> to vector<32x1x32xf32>
    %3 = vector.broadcast %2 : vector<32x1x32xf32> to vector<32x8x32xf32>
    %4 = arith.subf %0, %3 : vector<32x8x32xf32>
    %5 = math.exp %4 : vector<32x8x32xf32>
    %cst_2 = arith.constant dense<0.000000e+00> : vector<32x32xf32>
    %6 = vector.multi_reduction <add>, %5, %cst_2 [1] : vector<32x8x32xf32> to vector<32x32xf32>
    %7 = vector.shape_cast %6 : vector<32x32xf32> to vector<32x1x32xf32>
    %8 = tpu.reciprocal %7 {approx = true} : vector<32x1x32xf32> -> vector<32x1x32xf32>
    %9 = vector.broadcast %8 : vector<32x1x32xf32> to vector<32x8x32xf32>
    %10 = arith.mulf %5, %9 : vector<32x8x32xf32>
    %c0_3 = arith.constant 0 : index
    %c0_4 = arith.constant 0 : index
    %c0_5 = arith.constant 0 : index
    %11 = vector.load %arg2[%c0_3, %c0_4, %c0_5] : memref<32x8x32xf32, #tpu.memory_space<vmem>>, vector<32x8x32xf32>
    %12 = arith.mulf %10, %11 : vector<32x8x32xf32>
    %cst_6 = arith.constant dense<0.000000e+00> : vector<32x32xf32>
    %13 = vector.multi_reduction <add>, %12, %cst_6 [1] : vector<32x8x32xf32> to vector<32x32xf32>
    %c0_7 = arith.constant 0 : index
    %c0_8 = arith.constant 0 : index
    %14 = vector.load %arg3[%c0_7, %c0_8] : memref<32x32xf32, #tpu.memory_space<vmem>>, vector<32x32xf32>
    tpu.vector_store %arg3[%c0_7, %c0_8], %13 {strides = array<i32>} : memref<32x32xf32, #tpu.memory_space<vmem>>, vector<32x32xf32>,
    return
  }
  func.func @transform_0(%arg0: i32) -> (i32, i32, i32) {
    %c0_i32 = arith.constant 0 : i32
    %c0_i32_0 = arith.constant 0 : i32
    %c0_i32_1 = arith.constant 0 : i32
    return %arg0, %c0_i32, %c0_i32_0 : i32, i32, i32
  }
  func.func @transform_1(%arg0: i32) -> (i32, i32, i32) {
    %c0_i32 = arith.constant 0 : i32
    %c0_i32_0 = arith.constant 0 : i32
    %c0_i32_1 = arith.constant 0 : i32
    return %arg0, %c0_i32, %c0_i32_0 : i32, i32, i32
  }
  func.func @transform_2(%arg0: i32) -> (i32, i32) {
    %c0_i32 = arith.constant 0 : i32
    %c0_i32_0 = arith.constant 0 : i32
    return %arg0, %c0_i32 : i32, i32
  }
}

module attributes {stable_mosaic.version = 11 : i64} {
  func.func @kernel(%arg0: i32, %arg1: memref<256x32xf32, #tpu.memory_space<vmem>>, %arg2: memref<32x128xf32, #tpu.memory_space<vmem>>, %arg3: memref<1x128xf32, #tpu.memory_space<vmem>>, %arg4: memref<128x64xf32, #tpu.memory_space<vmem>>, %arg5: memref<1x64xf32, #tpu.memory_space<vmem>>, %arg6: memref<256x64xf32, #tpu.memory_space<vmem>>) attributes {dimension_semantics = [#tpu.dimension_semantics<parallel>], iteration_bounds = array<i64: 1>, scalar_prefetch = 0 : i64, scratch_operands = 0 : i64, tpu.core_type = #tpu.core_type<tc>, window_params = [{transform_indices = @transform_0, window_bounds = array<i64: 256, 32>}, {pipeline_mode = #tpu.pipeline_mode<synchronous>, transform_indices = @transform_1, window_bounds = array<i64: 32, 128>}, {pipeline_mode = #tpu.pipeline_mode<synchronous>, transform_indices = @transform_2, window_bounds = array<i64: 1, 128>}, {pipeline_mode = #tpu.pipeline_mode<synchronous>, transform_indices = @transform_3, window_bounds = array<i64: 128, 64>}, {pipeline_mode = #tpu.pipeline_mode<synchronous>, transform_indices = @transform_4, window_bounds = array<i64: 1, 64>}, {transform_indices = @transform_5, window_bounds = array<i64: 256, 64>}]} {
    %c0 = arith.constant 0 : index
    %c0_0 = arith.constant 0 : index
    %0 = vector.load %arg1[%c0, %c0_0] : memref<256x32xf32, #tpu.memory_space<vmem>>, vector<256x32xf32>
    %c0_1 = arith.constant 0 : index
    %c0_2 = arith.constant 0 : index
    %1 = vector.load %arg2[%c0_1, %c0_2] : memref<32x128xf32, #tpu.memory_space<vmem>>, vector<32x128xf32>
    %2 = arith.truncf %1 : vector<32x128xf32> to vector<32x128xbf16>
    %c0_3 = arith.constant 0 : index
    %c0_4 = arith.constant 0 : index
    %3 = vector.load %arg3[%c0_3, %c0_4] : memref<1x128xf32, #tpu.memory_space<vmem>>, vector<1x128xf32>
    %4 = arith.truncf %0 : vector<256x32xf32> to vector<256x32xbf16>
    %cst = arith.constant dense<0.000000e+00> : vector<256x128xf32>
    %5 = tpu.matmul %4, %2, %cst {dimension_numbers = #tpu.dot_dimension_numbers<[1], [0], [0], [1], [0, 0, 1, 1], [], []>} : vector<256x32xbf16>, vector<32x128xbf16>, vector<256x128xf32> -> vector<256x128xf32>
    %6 = vector.broadcast %3 : vector<1x128xf32> to vector<256x128xf32>
    %7 = arith.addf %5, %6 : vector<256x128xf32>
    %cst_5 = arith.constant 0.000000e+00 : f32
    %8 = vector.broadcast %cst_5 : f32 to vector<256x128xf32>
    %9 = arith.maximumf %7, %8 : vector<256x128xf32>
    %c0_6 = arith.constant 0 : index
    %c0_7 = arith.constant 0 : index
    %10 = vector.load %arg4[%c0_6, %c0_7] : memref<128x64xf32, #tpu.memory_space<vmem>>, vector<128x64xf32>
    %11 = arith.truncf %10 : vector<128x64xf32> to vector<128x64xbf16>
    %c0_8 = arith.constant 0 : index
    %c0_9 = arith.constant 0 : index
    %12 = vector.load %arg5[%c0_8, %c0_9] : memref<1x64xf32, #tpu.memory_space<vmem>>, vector<1x64xf32>
    %13 = arith.truncf %9 : vector<256x128xf32> to vector<256x128xbf16>
    %cst_10 = arith.constant dense<0.000000e+00> : vector<256x64xf32>
    %14 = tpu.matmul %13, %11, %cst_10 {dimension_numbers = #tpu.dot_dimension_numbers<[1], [0], [0], [1], [0, 0, 1, 1], [], []>} : vector<256x128xbf16>, vector<128x64xbf16>, vector<256x64xf32> -> vector<256x64xf32>
    %15 = vector.broadcast %12 : vector<1x64xf32> to vector<256x64xf32>
    %16 = arith.addf %14, %15 : vector<256x64xf32>
    %c0_11 = arith.constant 0 : index
    %c0_12 = arith.constant 0 : index
    %17 = vector.load %arg6[%c0_11, %c0_12] : memref<256x64xf32, #tpu.memory_space<vmem>>, vector<256x64xf32>
    tpu.vector_store %arg6[%c0_11, %c0_12], %16 {strides = array<i32>} : memref<256x64xf32, #tpu.memory_space<vmem>>, vector<256x64xf32>,
    return
  }
  func.func @transform_0(%arg0: i32) -> (i32, i32) {
    %c0_i32 = arith.constant 0 : i32
    %c0_i32_0 = arith.constant 0 : i32
    return %arg0, %c0_i32 : i32, i32
  }
  func.func @transform_1(%arg0: i32) -> (i32, i32) {
    %c0_i32 = arith.constant 0 : i32
    %c0_i32_0 = arith.constant 0 : i32
    %c0_i32_1 = arith.constant 0 : i32
    return %c0_i32, %c0_i32_0 : i32, i32
  }
  func.func @transform_2(%arg0: i32) -> (i32, i32) {
    %c0_i32 = arith.constant 0 : i32
    %c0_i32_0 = arith.constant 0 : i32
    %c0_i32_1 = arith.constant 0 : i32
    return %c0_i32, %c0_i32_0 : i32, i32
  }
  func.func @transform_3(%arg0: i32) -> (i32, i32) {
    %c0_i32 = arith.constant 0 : i32
    %c0_i32_0 = arith.constant 0 : i32
    %c0_i32_1 = arith.constant 0 : i32
    return %c0_i32, %c0_i32_0 : i32, i32
  }
  func.func @transform_4(%arg0: i32) -> (i32, i32) {
    %c0_i32 = arith.constant 0 : i32
    %c0_i32_0 = arith.constant 0 : i32
    %c0_i32_1 = arith.constant 0 : i32
    return %c0_i32, %c0_i32_0 : i32, i32
  }
  func.func @transform_5(%arg0: i32) -> (i32, i32) {
    %c0_i32 = arith.constant 0 : i32
    %c0_i32_0 = arith.constant 0 : i32
    return %arg0, %c0_i32 : i32, i32
  }
}

module attributes {stable_mosaic.version = 11 : i64} {
  func.func @kernel(%arg0: i32, %arg1: memref<32x8x64xf32, #tpu.memory_space<vmem>>, %arg2: memref<32x8x32xf32, #tpu.memory_space<vmem>>, %arg3: memref<32x64xf32, #tpu.memory_space<vmem>>) attributes {dimension_semantics = [#tpu.dimension_semantics<parallel>], iteration_bounds = array<i64: 1>, scalar_prefetch = 0 : i64, scratch_operands = 0 : i64, tpu.core_type = #tpu.core_type<tc>, window_params = [{transform_indices = @transform_0, window_bounds = array<i64: 32, 8, 64>}, {transform_indices = @transform_1, window_bounds = array<i64: 32, 8, 32>}, {transform_indices = @transform_2, window_bounds = array<i64: 32, 64>}]} {
    %c0 = arith.constant 0 : index
    %c0_0 = arith.constant 0 : index
    %c0_1 = arith.constant 0 : index
    %0 = vector.load %arg1[%c0, %c0_0, %c0_1] : memref<32x8x64xf32, #tpu.memory_space<vmem>>, vector<32x8x64xf32>
    %cst = arith.constant dense<0xFF800000> : vector<32x64xf32>
    %1 = vector.multi_reduction <maximumf>, %0, %cst [1] : vector<32x8x64xf32> to vector<32x64xf32>
    %2 = vector.shape_cast %1 : vector<32x64xf32> to vector<32x1x64xf32>
    %3 = vector.broadcast %2 : vector<32x1x64xf32> to vector<32x8x64xf32>
    %4 = arith.subf %0, %3 : vector<32x8x64xf32>
    %5 = math.exp %4 : vector<32x8x64xf32>
    %cst_2 = arith.constant dense<0.000000e+00> : vector<32x64xf32>
    %6 = vector.multi_reduction <add>, %5, %cst_2 [1] : vector<32x8x64xf32> to vector<32x64xf32>
    %7 = vector.shape_cast %6 : vector<32x64xf32> to vector<32x1x64xf32>
    %8 = tpu.reciprocal %7 {approx = true} : vector<32x1x64xf32> -> vector<32x1x64xf32>
    %9 = vector.broadcast %8 : vector<32x1x64xf32> to vector<32x8x64xf32>
    %10 = arith.mulf %5, %9 : vector<32x8x64xf32>
    %c0_3 = arith.constant 0 : index
    %c0_4 = arith.constant 0 : index
    %c0_5 = arith.constant 0 : index
    %11 = vector.load %arg2[%c0_3, %c0_4, %c0_5] : memref<32x8x32xf32, #tpu.memory_space<vmem>>, vector<32x8x32xf32>
    %12 = tpu.concatenate %11, %11 in 2 : vector<32x8x32xf32>, vector<32x8x32xf32> -> vector<32x8x64xf32>
    %13 = arith.mulf %10, %12 : vector<32x8x64xf32>
    %cst_6 = arith.constant dense<0.000000e+00> : vector<32x64xf32>
    %14 = vector.multi_reduction <add>, %13, %cst_6 [1] : vector<32x8x64xf32> to vector<32x64xf32>
    %c0_7 = arith.constant 0 : index
    %c0_8 = arith.constant 0 : index
    %15 = vector.load %arg3[%c0_7, %c0_8] : memref<32x64xf32, #tpu.memory_space<vmem>>, vector<32x64xf32>
    tpu.vector_store %arg3[%c0_7, %c0_8], %14 {strides = array<i32>} : memref<32x64xf32, #tpu.memory_space<vmem>>, vector<32x64xf32>,
    return
  }
  func.func @transform_0(%arg0: i32) -> (i32, i32, i32) {
    %c0_i32 = arith.constant 0 : i32
    %c0_i32_0 = arith.constant 0 : i32
    %c0_i32_1 = arith.constant 0 : i32
    return %arg0, %c0_i32, %c0_i32_0 : i32, i32, i32
  }
  func.func @transform_1(%arg0: i32) -> (i32, i32, i32) {
    %c0_i32 = arith.constant 0 : i32
    %c0_i32_0 = arith.constant 0 : i32
    %c0_i32_1 = arith.constant 0 : i32
    return %arg0, %c0_i32, %c0_i32_0 : i32, i32, i32
  }
  func.func @transform_2(%arg0: i32) -> (i32, i32) {
    %c0_i32 = arith.constant 0 : i32
    %c0_i32_0 = arith.constant 0 : i32
    return %arg0, %c0_i32 : i32, i32
  }
}

module attributes {stable_mosaic.version = 11 : i64} {
  func.func @kernel(%arg0: i32, %arg1: memref<64x32xf32, #tpu.memory_space<vmem>>, %arg2: memref<32x32xf32, #tpu.memory_space<vmem>>, %arg3: memref<1x32xf32, #tpu.memory_space<vmem>>, %arg4: memref<64x32xf32, #tpu.memory_space<vmem>>) attributes {dimension_semantics = [#tpu.dimension_semantics<parallel>], iteration_bounds = array<i64: 1>, scalar_prefetch = 0 : i64, scratch_operands = 0 : i64, tpu.core_type = #tpu.core_type<tc>, window_params = [{transform_indices = @transform_0, window_bounds = array<i64: 64, 32>}, {pipeline_mode = #tpu.pipeline_mode<synchronous>, transform_indices = @transform_1, window_bounds = array<i64: 32, 32>}, {pipeline_mode = #tpu.pipeline_mode<synchronous>, transform_indices = @transform_2, window_bounds = array<i64: 1, 32>}, {transform_indices = @transform_3, window_bounds = array<i64: 64, 32>}]} {
    %c0 = arith.constant 0 : index
    %c0_0 = arith.constant 0 : index
    %0 = vector.load %arg1[%c0, %c0_0] : memref<64x32xf32, #tpu.memory_space<vmem>>, vector<64x32xf32>
    %c0_1 = arith.constant 0 : index
    %c0_2 = arith.constant 0 : index
    %1 = vector.load %arg2[%c0_1, %c0_2] : memref<32x32xf32, #tpu.memory_space<vmem>>, vector<32x32xf32>
    %2 = arith.truncf %1 : vector<32x32xf32> to vector<32x32xbf16>
    %c0_3 = arith.constant 0 : index
    %c0_4 = arith.constant 0 : index
    %3 = vector.load %arg3[%c0_3, %c0_4] : memref<1x32xf32, #tpu.memory_space<vmem>>, vector<1x32xf32>
    %4 = arith.truncf %0 : vector<64x32xf32> to vector<64x32xbf16>
    %cst = arith.constant dense<0.000000e+00> : vector<64x32xf32>
    %5 = tpu.matmul %4, %2, %cst {dimension_numbers = #tpu.dot_dimension_numbers<[1], [0], [0], [1], [0, 0, 1, 1], [], []>} : vector<64x32xbf16>, vector<32x32xbf16>, vector<64x32xf32> -> vector<64x32xf32>
    %6 = vector.broadcast %3 : vector<1x32xf32> to vector<64x32xf32>
    %7 = arith.addf %5, %6 : vector<64x32xf32>
    %c0_5 = arith.constant 0 : index
    %c0_6 = arith.constant 0 : index
    %8 = vector.load %arg4[%c0_5, %c0_6] : memref<64x32xf32, #tpu.memory_space<vmem>>, vector<64x32xf32>
    tpu.vector_store %arg4[%c0_5, %c0_6], %7 {strides = array<i32>} : memref<64x32xf32, #tpu.memory_space<vmem>>, vector<64x32xf32>,
    return
  }
  func.func @transform_0(%arg0: i32) -> (i32, i32) {
    %c0_i32 = arith.constant 0 : i32
    %c0_i32_0 = arith.constant 0 : i32
    return %arg0, %c0_i32 : i32, i32
  }
  func.func @transform_1(%arg0: i32) -> (i32, i32) {
    %c0_i32 = arith.constant 0 : i32
    %c0_i32_0 = arith.constant 0 : i32
    %c0_i32_1 = arith.constant 0 : i32
    return %c0_i32, %c0_i32_0 : i32, i32
  }
  func.func @transform_2(%arg0: i32) -> (i32, i32) {
    %c0_i32 = arith.constant 0 : i32
    %c0_i32_0 = arith.constant 0 : i32
    %c0_i32_1 = arith.constant 0 : i32
    return %c0_i32, %c0_i32_0 : i32, i32
  }
  func.func @transform_3(%arg0: i32) -> (i32, i32) {
    %c0_i32 = arith.constant 0 : i32
    %c0_i32_0 = arith.constant 0 : i32
    return %arg0, %c0_i32 : i32, i32
  }
}

module attributes {stable_mosaic.version = 11 : i64} {
  func.func @_mlp_res_kernel(%arg0: i32, %arg1: memref<64x64xf32, #tpu.memory_space<vmem>>, %arg2: memref<64x32xf32, #tpu.memory_space<vmem>>, %arg3: memref<1x32xf32, #tpu.memory_space<vmem>>, %arg4: memref<32x32xf32, #tpu.memory_space<vmem>>, %arg5: memref<1x32xf32, #tpu.memory_space<vmem>>, %arg6: memref<64x32xf32, #tpu.memory_space<vmem>>, %arg7: memref<1x32xf32, #tpu.memory_space<vmem>>, %arg8: memref<64x32xf32, #tpu.memory_space<vmem>>) attributes {dimension_semantics = [#tpu.dimension_semantics<parallel>], iteration_bounds = array<i64: 1>, scalar_prefetch = 0 : i64, scratch_operands = 0 : i64, tpu.core_type = #tpu.core_type<tc>, window_params = [{transform_indices = @transform_0, window_bounds = array<i64: 64, 64>}, {pipeline_mode = #tpu.pipeline_mode<synchronous>, transform_indices = @transform_1, window_bounds = array<i64: 64, 32>}, {pipeline_mode = #tpu.pipeline_mode<synchronous>, transform_indices = @transform_2, window_bounds = array<i64: 1, 32>}, {pipeline_mode = #tpu.pipeline_mode<synchronous>, transform_indices = @transform_3, window_bounds = array<i64: 32, 32>}, {pipeline_mode = #tpu.pipeline_mode<synchronous>, transform_indices = @transform_4, window_bounds = array<i64: 1, 32>}, {pipeline_mode = #tpu.pipeline_mode<synchronous>, transform_indices = @transform_5, window_bounds = array<i64: 64, 32>}, {pipeline_mode = #tpu.pipeline_mode<synchronous>, transform_indices = @transform_6, window_bounds = array<i64: 1, 32>}, {transform_indices = @transform_7, window_bounds = array<i64: 64, 32>}]} {
    %c0 = arith.constant 0 : index
    %c0_0 = arith.constant 0 : index
    %0 = vector.load %arg1[%c0, %c0_0] : memref<64x64xf32, #tpu.memory_space<vmem>>, vector<64x64xf32>
    %1 = arith.truncf %0 : vector<64x64xf32> to vector<64x64xbf16>
    %c0_1 = arith.constant 0 : index
    %c0_2 = arith.constant 0 : index
    %2 = vector.load %arg2[%c0_1, %c0_2] : memref<64x32xf32, #tpu.memory_space<vmem>>, vector<64x32xf32>
    %3 = arith.truncf %2 : vector<64x32xf32> to vector<64x32xbf16>
    %cst = arith.constant dense<0.000000e+00> : vector<64x32xf32>
    %4 = tpu.matmul %1, %3, %cst {dimension_numbers = #tpu.dot_dimension_numbers<[1], [0], [0], [1], [0, 0, 1, 1], [], []>} : vector<64x64xbf16>, vector<64x32xbf16>, vector<64x32xf32> -> vector<64x32xf32>
    %c0_3 = arith.constant 0 : index
    %c0_4 = arith.constant 0 : index
    %5 = vector.load %arg3[%c0_3, %c0_4] : memref<1x32xf32, #tpu.memory_space<vmem>>, vector<1x32xf32>
    %6 = vector.broadcast %5 : vector<1x32xf32> to vector<64x32xf32>
    %7 = arith.addf %4, %6 : vector<64x32xf32>
    %cst_5 = arith.constant 0.000000e+00 : f32
    %8 = vector.broadcast %cst_5 : f32 to vector<64x32xf32>
    %9 = arith.maximumf %7, %8 : vector<64x32xf32>
    %10 = arith.truncf %9 : vector<64x32xf32> to vector<64x32xbf16>
    %c0_6 = arith.constant 0 : index
    %c0_7 = arith.constant 0 : index
    %11 = vector.load %arg4[%c0_6, %c0_7] : memref<32x32xf32, #tpu.memory_space<vmem>>, vector<32x32xf32>
    %12 = arith.truncf %11 : vector<32x32xf32> to vector<32x32xbf16>
    %cst_8 = arith.constant dense<0.000000e+00> : vector<64x32xf32>
    %13 = tpu.matmul %10, %12, %cst_8 {dimension_numbers = #tpu.dot_dimension_numbers<[1], [0], [0], [1], [0, 0, 1, 1], [], []>} : vector<64x32xbf16>, vector<32x32xbf16>, vector<64x32xf32> -> vector<64x32xf32>
    %c0_9 = arith.constant 0 : index
    %c0_10 = arith.constant 0 : index
    %14 = vector.load %arg5[%c0_9, %c0_10] : memref<1x32xf32, #tpu.memory_space<vmem>>, vector<1x32xf32>
    %15 = vector.broadcast %14 : vector<1x32xf32> to vector<64x32xf32>
    %16 = arith.addf %13, %15 : vector<64x32xf32>
    %c0_11 = arith.constant 0 : index
    %c0_12 = arith.constant 0 : index
    %17 = vector.load %arg6[%c0_11, %c0_12] : memref<64x32xf32, #tpu.memory_space<vmem>>, vector<64x32xf32>
    %18 = arith.truncf %17 : vector<64x32xf32> to vector<64x32xbf16>
    %cst_13 = arith.constant dense<0.000000e+00> : vector<64x32xf32>
    %19 = tpu.matmul %1, %18, %cst_13 {dimension_numbers = #tpu.dot_dimension_numbers<[1], [0], [0], [1], [0, 0, 1, 1], [], []>} : vector<64x64xbf16>, vector<64x32xbf16>, vector<64x32xf32> -> vector<64x32xf32>
    %c0_14 = arith.constant 0 : index
    %c0_15 = arith.constant 0 : index
    %20 = vector.load %arg7[%c0_14, %c0_15] : memref<1x32xf32, #tpu.memory_space<vmem>>, vector<1x32xf32>
    %21 = vector.broadcast %20 : vector<1x32xf32> to vector<64x32xf32>
    %22 = arith.addf %19, %21 : vector<64x32xf32>
    %23 = arith.addf %16, %22 : vector<64x32xf32>
    %c0_16 = arith.constant 0 : index
    %c0_17 = arith.constant 0 : index
    %24 = vector.load %arg8[%c0_16, %c0_17] : memref<64x32xf32, #tpu.memory_space<vmem>>, vector<64x32xf32>
    tpu.vector_store %arg8[%c0_16, %c0_17], %23 {strides = array<i32>} : memref<64x32xf32, #tpu.memory_space<vmem>>, vector<64x32xf32>,
    return
  }
  func.func @transform_0(%arg0: i32) -> (i32, i32) {
    %c0_i32 = arith.constant 0 : i32
    %c0_i32_0 = arith.constant 0 : i32
    return %arg0, %c0_i32 : i32, i32
  }
  func.func @transform_1(%arg0: i32) -> (i32, i32) {
    %c0_i32 = arith.constant 0 : i32
    %c0_i32_0 = arith.constant 0 : i32
    %c0_i32_1 = arith.constant 0 : i32
    return %c0_i32, %c0_i32_0 : i32, i32
  }
  func.func @transform_2(%arg0: i32) -> (i32, i32) {
    %c0_i32 = arith.constant 0 : i32
    %c0_i32_0 = arith.constant 0 : i32
    %c0_i32_1 = arith.constant 0 : i32
    return %c0_i32, %c0_i32_0 : i32, i32
  }
  func.func @transform_3(%arg0: i32) -> (i32, i32) {
    %c0_i32 = arith.constant 0 : i32
    %c0_i32_0 = arith.constant 0 : i32
    %c0_i32_1 = arith.constant 0 : i32
    return %c0_i32, %c0_i32_0 : i32, i32
  }
  func.func @transform_4(%arg0: i32) -> (i32, i32) {
    %c0_i32 = arith.constant 0 : i32
    %c0_i32_0 = arith.constant 0 : i32
    %c0_i32_1 = arith.constant 0 : i32
    return %c0_i32, %c0_i32_0 : i32, i32
  }
  func.func @transform_5(%arg0: i32) -> (i32, i32) {
    %c0_i32 = arith.constant 0 : i32
    %c0_i32_0 = arith.constant 0 : i32
    %c0_i32_1 = arith.constant 0 : i32
    return %c0_i32, %c0_i32_0 : i32, i32
  }
  func.func @transform_6(%arg0: i32) -> (i32, i32) {
    %c0_i32 = arith.constant 0 : i32
    %c0_i32_0 = arith.constant 0 : i32
    %c0_i32_1 = arith.constant 0 : i32
    return %c0_i32, %c0_i32_0 : i32, i32
  }
  func.func @transform_7(%arg0: i32) -> (i32, i32) {
    %c0_i32 = arith.constant 0 : i32
    %c0_i32_0 = arith.constant 0 : i32
    return %arg0, %c0_i32 : i32, i32
  }
}

module attributes {stable_mosaic.version = 11 : i64} {
  func.func @kernel(%arg0: i32, %arg1: memref<64x32xf32, #tpu.memory_space<vmem>>, %arg2: memref<32x16xf32, #tpu.memory_space<vmem>>, %arg3: memref<1x16xf32, #tpu.memory_space<vmem>>, %arg4: memref<16x3xf32, #tpu.memory_space<vmem>>, %arg5: memref<1x3xf32, #tpu.memory_space<vmem>>, %arg6: memref<64x3xf32, #tpu.memory_space<vmem>>) attributes {dimension_semantics = [#tpu.dimension_semantics<parallel>], iteration_bounds = array<i64: 1>, scalar_prefetch = 0 : i64, scratch_operands = 0 : i64, tpu.core_type = #tpu.core_type<tc>, window_params = [{transform_indices = @transform_0, window_bounds = array<i64: 64, 32>}, {pipeline_mode = #tpu.pipeline_mode<synchronous>, transform_indices = @transform_1, window_bounds = array<i64: 32, 16>}, {pipeline_mode = #tpu.pipeline_mode<synchronous>, transform_indices = @transform_2, window_bounds = array<i64: 1, 16>}, {pipeline_mode = #tpu.pipeline_mode<synchronous>, transform_indices = @transform_3, window_bounds = array<i64: 16, 3>}, {pipeline_mode = #tpu.pipeline_mode<synchronous>, transform_indices = @transform_4, window_bounds = array<i64: 1, 3>}, {transform_indices = @transform_5, window_bounds = array<i64: 64, 3>}]} {
    %c0 = arith.constant 0 : index
    %c0_0 = arith.constant 0 : index
    %0 = vector.load %arg1[%c0, %c0_0] : memref<64x32xf32, #tpu.memory_space<vmem>>, vector<64x32xf32>
    %cst = arith.constant 0.000000e+00 : f32
    %1 = vector.broadcast %cst : f32 to vector<64x32xf32>
    %2 = arith.cmpf ogt, %0, %1 : vector<64x32xf32>
    %cst_1 = arith.constant 2.000000e-01 : f32
    %3 = vector.broadcast %cst_1 : f32 to vector<64x32xf32>
    %4 = arith.mulf %3, %0 : vector<64x32xf32>
    %5 = arith.select %2, %0, %4 : vector<64x32xi1>, vector<64x32xf32>
    %c0_2 = arith.constant 0 : index
    %c0_3 = arith.constant 0 : index
    %6 = vector.load %arg2[%c0_2, %c0_3] : memref<32x16xf32, #tpu.memory_space<vmem>>, vector<32x16xf32>
    %7 = arith.truncf %6 : vector<32x16xf32> to vector<32x16xbf16>
    %c0_4 = arith.constant 0 : index
    %c0_5 = arith.constant 0 : index
    %8 = vector.load %arg3[%c0_4, %c0_5] : memref<1x16xf32, #tpu.memory_space<vmem>>, vector<1x16xf32>
    %9 = arith.truncf %5 : vector<64x32xf32> to vector<64x32xbf16>
    %cst_6 = arith.constant dense<0.000000e+00> : vector<64x16xf32>
    %10 = tpu.matmul %9, %7, %cst_6 {dimension_numbers = #tpu.dot_dimension_numbers<[1], [0], [0], [1], [0, 0, 1, 1], [], []>} : vector<64x32xbf16>, vector<32x16xbf16>, vector<64x16xf32> -> vector<64x16xf32>
    %11 = vector.broadcast %8 : vector<1x16xf32> to vector<64x16xf32>
    %12 = arith.addf %10, %11 : vector<64x16xf32>
    %cst_7 = arith.constant 0.000000e+00 : f32
    %13 = vector.broadcast %cst_7 : f32 to vector<64x16xf32>
    %14 = arith.maximumf %12, %13 : vector<64x16xf32>
    %c0_8 = arith.constant 0 : index
    %c0_9 = arith.constant 0 : index
    %15 = vector.load %arg4[%c0_8, %c0_9] : memref<16x3xf32, #tpu.memory_space<vmem>>, vector<16x3xf32>
    %16 = arith.truncf %15 : vector<16x3xf32> to vector<16x3xbf16>
    %c0_10 = arith.constant 0 : index
    %c0_11 = arith.constant 0 : index
    %17 = vector.load %arg5[%c0_10, %c0_11] : memref<1x3xf32, #tpu.memory_space<vmem>>, vector<1x3xf32>
    %18 = arith.truncf %14 : vector<64x16xf32> to vector<64x16xbf16>
    %cst_12 = arith.constant dense<0.000000e+00> : vector<64x3xf32>
    %19 = tpu.matmul %18, %16, %cst_12 {dimension_numbers = #tpu.dot_dimension_numbers<[1], [0], [0], [1], [0, 0, 1, 1], [], []>} : vector<64x16xbf16>, vector<16x3xbf16>, vector<64x3xf32> -> vector<64x3xf32>
    %20 = vector.broadcast %17 : vector<1x3xf32> to vector<64x3xf32>
    %21 = arith.addf %19, %20 : vector<64x3xf32>
    %c0_13 = arith.constant 0 : index
    %c0_14 = arith.constant 0 : index
    %22 = vector.load %arg6[%c0_13, %c0_14] : memref<64x3xf32, #tpu.memory_space<vmem>>, vector<64x3xf32>
    tpu.vector_store %arg6[%c0_13, %c0_14], %21 {strides = array<i32>} : memref<64x3xf32, #tpu.memory_space<vmem>>, vector<64x3xf32>,
    return
  }
  func.func @transform_0(%arg0: i32) -> (i32, i32) {
    %c0_i32 = arith.constant 0 : i32
    %c0_i32_0 = arith.constant 0 : i32
    return %arg0, %c0_i32 : i32, i32
  }
  func.func @transform_1(%arg0: i32) -> (i32, i32) {
    %c0_i32 = arith.constant 0 : i32
    %c0_i32_0 = arith.constant 0 : i32
    %c0_i32_1 = arith.constant 0 : i32
    return %c0_i32, %c0_i32_0 : i32, i32
  }
  func.func @transform_2(%arg0: i32) -> (i32, i32) {
    %c0_i32 = arith.constant 0 : i32
    %c0_i32_0 = arith.constant 0 : i32
    %c0_i32_1 = arith.constant 0 : i32
    return %c0_i32, %c0_i32_0 : i32, i32
  }
  func.func @transform_3(%arg0: i32) -> (i32, i32) {
    %c0_i32 = arith.constant 0 : i32
    %c0_i32_0 = arith.constant 0 : i32
    %c0_i32_1 = arith.constant 0 : i32
    return %c0_i32, %c0_i32_0 : i32, i32
  }
  func.func @transform_4(%arg0: i32) -> (i32, i32) {
    %c0_i32 = arith.constant 0 : i32
    %c0_i32_0 = arith.constant 0 : i32
    %c0_i32_1 = arith.constant 0 : i32
    return %c0_i32, %c0_i32_0 : i32, i32
  }
  func.func @transform_5(%arg0: i32) -> (i32, i32) {
    %c0_i32 = arith.constant 0 : i32
    %c0_i32_0 = arith.constant 0 : i32
    return %arg0, %c0_i32 : i32, i32
  }
}

</mosaic_0001>

<bundles_post_ra>
// kernel: neg.6
= control target key start
LH: loop header
LB: loop body
LE: loop exit
PB: predicated region body
PF: predicated region fallthrough
CT: control target
= control target key end

     0   :  { %s72_s0 = inlined_call_operand.vmem [shape: f32[2,16,16], index: 0, kind: input, shape index: {}]   ;;  %s73_s1 = inlined_call_operand.vmem [shape: f32[2,16,16], index: 1, kind: output, shape index: {}]  }
   0x1   :  { %v2_v0 = vld [vmem:[%s72_s0] sm:$0xff]  ;;  %v32_v1 = vld [vmem:[%s72_s0 + $0x10] sm:$0xff]  ;;  %v34_v2 = vld [vmem:[%s72_s0 + $0x8] sm:$0xff] }
   0x2   :  { %v5_v3 = vxor.u32 2147483648, %v2_v0  ;;  %v12_v4 = vxor.u32 2147483648, %v32_v1  ;;  %v20_v5 = vxor.u32 2147483648, %v34_v2  ;;  %v36_v6 = vld [vmem:[%s72_s0 + $0x18] sm:$0xff] }
   0x3   :  { %v28_v7 = vxor.u32 2147483648, %v36_v6 }
   0x4   :  { %7 = vst [vmem:[%s73_s1] sm:$0xff] %v5_v3  ;;  %33 = vst [vmem:[%s73_s1 + $0x10] sm:$0xff] %v12_v4 }
   0x5   :  { %35 = vst [vmem:[%s73_s1 + $0x8] sm:$0xff] %v20_v5  ;;  %37 = vst [vmem:[%s73_s1 + $0x18] sm:$0xff] %v28_v7 }

// kernel: neg.4
= control target key start
LH: loop header
LB: loop body
LE: loop exit
PB: predicated region body
PF: predicated region fallthrough
CT: control target
= control target key end

     0   :  { %s40_s0 = inlined_call_operand.vmem [shape: f32[2,16,8], index: 0, kind: input, shape index: {}]   ;;  %s41_s1 = inlined_call_operand.vmem [shape: f32[2,16,8], index: 1, kind: output, shape index: {}]  }
   0x1   :  { %v2_v0 = vld [vmem:[%s40_s0] sm:$0xff]  ;;  %v16_v1 = vld [vmem:[%s40_s0 + $0x8] sm:$0xff] }
   0x2   :  { %v5_v2 = vxor.u32 2147483648, %v2_v0  ;;  %v12_v3 = vxor.u32 2147483648, %v16_v1 }
   0x4   :  { %7 = vst [vmem:[%s41_s1] sm:$0xff] %v5_v2  ;;  %17 = vst [vmem:[%s41_s1 + $0x8] sm:$0xff] %v12_v3 }

// kernel: _lambda_.36
= control target key start
LH: loop header
LB: loop body
LE: loop exit
PB: predicated region body
PF: predicated region fallthrough
CT: control target
= control target key end

     0   :  { %vm40_vm0 = vcmask 261120   ;;  %vm112_vm1 = vcmask 130048   ;;  %s287_s1 = inlined_call_operand.vmem [shape: f32[32,16], index: 1, kind: input, shape index: {}]   ;;  %s288_s0 = inlined_call_operand.vmem [shape: f32[32,32], index: 0, kind: input, shape index: {}]   ;;  %s289_s3 = inlined_call_operand.vmem [shape: f32[16,32], index: 3, kind: input, shape index: {}]   ;;  %s290_s2 = inlined_call_operand.vmem [shape: f32[1,16], index: 2, kind: input, shape index: {}]   ;;  %s291_s4 = inlined_call_operand.vmem [shape: f32[1,32], index: 4, kind: input, shape index: {}]   ;;  %s292_s5 = inlined_call_operand.vmem [shape: f32[32,32], index: 5, kind: output, shape index: {}]  }
   0x1   :  { %v27_v0 = vld [vmem:[%s287_s1 + $0x10] sm:$0xff]  ;;  %v28_v1 = vld [vmem:[%s287_s1 + $0x18] sm:$0xff]  ;;  %v25_v2 = vld [vmem:[%s287_s1] sm:$0xff] }
   0x2   :  { %v30_v3 = vpack.c.bf16 %v28_v1, %v27_v0  ;;  %v26_v4 = vld [vmem:[%s287_s1 + $0x8] sm:$0xff]  ;;  %v21_v5 = vld [vmem:[%s288_s0] sm:$0xff]  ;;  %v23_v9 = vld [vmem:[%s288_s0 + $0x10] sm:$0xff] }
   0x3   :  { %v22_v6 = vld [vmem:[%s288_s0 + $0x8] sm:$0xff]  ;;  %v29_v7 = vpack.c.bf16 %v26_v4, %v25_v2  ;;  %v24_v10 = vld [vmem:[%s288_s0 + $0x18] sm:$0xff]  ;;  %v100_v12 = vld [vmem:[%s289_s3] sm:$0xff] }
   0x4   :  { %v32_v8 = vpack.c.bf16 %v22_v6, %v21_v5  ;;  %189 = vmatprep.subr.bf16.mxu0 %v30_v3  ;;  %v33_v11 = vpack.c.bf16 %v24_v10, %v23_v9  ;;  %v101_v13 = vld [vmem:[%s289_s3 + $0x8] sm:$0xff]  ;;  %v176_v17 = vld [vmem:[%s290_s2] ss:$0 sm:$0xff] }
   0x5   :  { %190 = vmatpush3.bf16.msra.mxu0 %v30_v3  ;;  %v102_v14 = vpack.c.bf16 %v101_v13, %v100_v12  ;;  %v179_v30 = vld [vmem:[%s291_s4] ss:$0 sm:$0xff] }
   0x6   :  { %193 = vmatprep.mubr.msk.bf16.mxu0 %vm40_vm0, %v32_v8  ;;  %191 = vmatprep.subr.bf16.mxu0 %v29_v7 }
   0x7   :  { %197 = vmatprep.subr.bf16.mxu1 %v102_v14 }
   0x8   :  { %198 = vmatpush3.bf16.msra.mxu1 %v102_v14 }
   0x9   :  { %192 = vmatpush3.bf16.msra.mxu0 %v29_v7 }
   0xc   :  { %194 = vmatmul.mubr.msk.bf16.vlgmr.msra.gmra.mxu0 %vm40_vm0, %v33_v11 }
  0xcc   :  { %v195_v15 = vpop.f32.mrf.mxu0 }
  0xcd   :  { %v90_v21 = vadd.f32 %v195_v15, %v176_v17 }
  0xce   :  { %v81_v16 = vpop.f32.mrf.mxu0 }
  0xcf   :  { %v82_v19 = vadd.f32 %v176_v17, %v81_v16  ;;  %v98_v27 = vmax.f32 %v90_v21, 0.0 }
  0xd0   :  { %v196_v18 = vpop.f32.mrf.mxu0 }
  0xd1   :  { %v93_v20 = vadd.f32 %v196_v18, %v176_v17  ;;  %v96_v25 = vmax.f32 %v82_v19, 0.0 }
  0xd2   :  { %v84_v22 = vpop.f32.mrf.mxu0 }
  0xd3   :  { %v85_v23 = vadd.f32 %v176_v17, %v84_v22  ;;  %v99_v24 = vmax.f32 %v93_v20, 0.0 }
  0xd5   :  { %v97_v26 = vmax.f32 %v85_v23, 0.0  ;;  %v105_v29 = vpack.c.bf16 %v99_v24, %v98_v27 }
  0xd7   :  { %v104_v28 = vpack.c.bf16 %v97_v26, %v96_v25 }
  0xd9   :  { %199 = vmatprep.mubr.msk.bf16.mxu1 %vm112_vm1, %v104_v28 }
  0xda   :  { %200 = vmatmul.mubr.msk.bf16.vlgmr.msra.gmra.mxu1 %vm112_vm1, %v105_v29 }
 0x19a   :  { %v201_v31 = vpop.f32.mrf.mxu1 }
 0x19b   :  { %v162_v32 = vadd.f32 %v201_v31, %v179_v30 }
 0x19c   :  { %v153_v33 = vpop.f32.mrf.mxu1 }
 0x19d   :  { %170 = vst.msk [vmem:[%s292_s5 + $0x10] sm:$0xff] %vm40_vm0, %v162_v32  ;;  %v154_v34 = vadd.f32 %v179_v30, %v153_v33 }
 0x19e   :  { %v202_v35 = vpop.f32.mrf.mxu1 }
 0x19f   :  { %168 = vst.msk [vmem:[%s292_s5] sm:$0xff] %vm40_vm0, %v154_v34  ;;  %v165_v36 = vadd.f32 %v202_v35, %v179_v30 }
 0x1a0   :  { %v156_v37 = vpop.f32.mrf.mxu1 }
 0x1a1   :  { %171 = vst.msk [vmem:[%s292_s5 + $0x18] sm:$0xff] %vm40_vm0, %v165_v36  ;;  %v157_v38 = vadd.f32 %v179_v30, %v156_v37 }
 0x1a3   :  { %169 = vst.msk [vmem:[%s292_s5 + $0x8] sm:$0xff] %vm40_vm0, %v157_v38 }

// kernel: _lambda_.57
= control target key start
LH: loop header
LB: loop body
LE: loop exit
PB: predicated region body
PF: predicated region fallthrough
CT: control target
= control target key end

     0   :  { %vm34_vm0 = vcmask 261120   ;;  %s178_s1 = inlined_call_operand.vmem [shape: f32[32,32], index: 1, kind: input, shape index: {}]   ;;  %s179_s0 = inlined_call_operand.vmem [shape: f32[32,32], index: 0, kind: input, shape index: {}]   ;;  %s180_s2 = inlined_call_operand.vmem [shape: f32[1,32], index: 2, kind: input, shape index: {}]   ;;  %s181_s3 = inlined_call_operand.vmem [shape: f32[32,32], index: 3, kind: output, shape index: {}]  }
   0x1   :  { %v21_v0 = vld [vmem:[%s178_s1 + $0x10] sm:$0xff]  ;;  %v22_v1 = vld [vmem:[%s178_s1 + $0x18] sm:$0xff]  ;;  %v19_v2 = vld [vmem:[%s178_s1] sm:$0xff] }
   0x2   :  { %v24_v3 = vpack.c.bf16 %v22_v1, %v21_v0  ;;  %v20_v4 = vld [vmem:[%s178_s1 + $0x8] sm:$0xff]  ;;  %v15_v5 = vld [vmem:[%s179_s0] sm:$0xff]  ;;  %v17_v9 = vld [vmem:[%s179_s0 + $0x10] sm:$0xff] }
   0x3   :  { %v16_v6 = vld [vmem:[%s179_s0 + $0x8] sm:$0xff]  ;;  %v23_v7 = vpack.c.bf16 %v20_v4, %v19_v2  ;;  %v18_v10 = vld [vmem:[%s179_s0 + $0x18] sm:$0xff]  ;;  %v98_v12 = vld [vmem:[%s180_s2] ss:$0 sm:$0xff] }
   0x4   :  { %v26_v8 = vpack.c.bf16 %v16_v6, %v15_v5  ;;  %105 = vmatprep.subr.bf16.mxu0 %v24_v3  ;;  %v27_v11 = vpack.c.bf16 %v18_v10, %v17_v9 }
   0x5   :  { %106 = vmatpush3.bf16.msra.mxu0 %v24_v3 }
   0x6   :  { %109 = vmatprep.mubr.msk.bf16.mxu0 %vm34_vm0, %v26_v8  ;;  %107 = vmatprep.subr.bf16.mxu0 %v23_v7 }
   0x9   :  { %108 = vmatpush3.bf16.msra.mxu0 %v23_v7 }
   0xc   :  { %110 = vmatmul.mubr.msk.bf16.vlgmr.msra.gmra.mxu0 %vm34_vm0, %v27_v11 }
  0xcc   :  { %v111_v13 = vpop.f32.mrf.mxu0 }
  0xcd   :  { %v84_v14 = vadd.f32 %v111_v13, %v98_v12 }
  0xce   :  { %v75_v15 = vpop.f32.mrf.mxu0 }
  0xcf   :  { %92 = vst.msk [vmem:[%s181_s3 + $0x10] sm:$0xff] %vm34_vm0, %v84_v14  ;;  %v76_v16 = vadd.f32 %v98_v12, %v75_v15 }
  0xd0   :  { %v112_v17 = vpop.f32.mrf.mxu0 }
  0xd1   :  { %90 = vst.msk [vmem:[%s181_s3] sm:$0xff] %vm34_vm0, %v76_v16  ;;  %v87_v18 = vadd.f32 %v112_v17, %v98_v12 }
  0xd2   :  { %v78_v19 = vpop.f32.mrf.mxu0 }
  0xd3   :  { %93 = vst.msk [vmem:[%s181_s3 + $0x18] sm:$0xff] %vm34_vm0, %v87_v18  ;;  %v79_v20 = vadd.f32 %v98_v12, %v78_v19 }
  0xd5   :  { %91 = vst.msk [vmem:[%s181_s3 + $0x8] sm:$0xff] %vm34_vm0, %v79_v20 }

// kernel: _lambda_.39
= control target key start
LH: loop header
LB: loop body
LE: loop exit
PB: predicated region body
PF: predicated region fallthrough
CT: control target
= control target key end

     0   :  { %vm43_vm0 = vcmask 1043456   ;;  %vm36_vm1 = vcmask 64512   ;;  %vm112_vm2 = vcmask 130048   ;;  %vm168_vm3 = vcmask 261120   ;;  %s271_s1 = inlined_call_operand.vmem [shape: f32[8,16], index: 1, kind: input, shape index: {}]   ;;  %s272_s0 = inlined_call_operand.vmem [shape: f32[32,8], index: 0, kind: input, shape index: {}]   ;;  %s273_s3 = inlined_call_operand.vmem [shape: f32[16,32], index: 3, kind: input, shape index: {}]   ;;  %s274_s2 = inlined_call_operand.vmem [shape: f32[1,16], index: 2, kind: input, shape index: {}]   ;;  %s275_s4 = inlined_call_operand.vmem [shape: f32[1,32], index: 4, kind: input, shape index: {}]   ;;  %s276_s5 = inlined_call_operand.vmem [shape: f32[32,32], index: 5, kind: output, shape index: {}]  }
   0x1   :  { %v25_v0 = vld [vmem:[%s271_s1] sm:$0xff]  ;;  %v22_v2 = vld [vmem:[%s272_s0 + $0x8] sm:$0xff]  ;;  %v23_v5 = vld [vmem:[%s272_s0 + $0x10] sm:$0xff] }
   0x2   :  { %v21_v1 = vld [vmem:[%s272_s0] sm:$0xff]  ;;  %v26_v3 = vpack.c.bf16 %v25_v0, %v25_v0  ;;  %v24_v6 = vld [vmem:[%s272_s0 + $0x18] sm:$0xff]  ;;  %v101_v10 = vld [vmem:[%s273_s3 + $0x8] sm:$0xff] }
   0x3   :  { %v28_v4 = vpack.c.bf16 %v22_v2, %v21_v1  ;;  %v29_v8 = vpack.c.bf16 %v24_v6, %v23_v5  ;;  %v100_v9 = vld [vmem:[%s273_s3] sm:$0xff] }
   0x4   :  { %201 = vmatprep.subr.msk.bf16.mxu0 %vm43_vm0, %v26_v3  ;;  %v45_v7 = vsel %vm43_vm0, %v26_v3, 0  ;;  %v102_v11 = vpack.c.bf16 %v101_v10, %v100_v9  ;;  %v177_v14 = vld [vmem:[%s274_s2] ss:$0 sm:$0xff] }
   0x5   :  { %191 = vmatprep.mubr.msk.bf16.mxu0 %vm36_vm1, %v28_v4  ;;  %190 = vmatpush3.bf16.msra.mxu0 %v45_v7  ;;  %v180_v27 = vld [vmem:[%s275_s4] ss:$0 sm:$0xff] }
   0x6   :  { %195 = vmatprep.subr.bf16.mxu1 %v102_v11 }
   0x7   :  { %196 = vmatpush3.bf16.msra.mxu1 %v102_v11 }
   0x8   :  { %192 = vmatmul.mubr.msk.bf16.vlgmr.msra.gmra.mxu0 %vm36_vm1, %v29_v8 }
  0xc8   :  { %v193_v12 = vpop.f32.mrf.mxu0 }
  0xc9   :  { %v90_v18 = vadd.f32 %v193_v12, %v177_v14 }
  0xca   :  { %v81_v13 = vpop.f32.mrf.mxu0 }
  0xcb   :  { %v82_v16 = vadd.f32 %v177_v14, %v81_v13  ;;  %v98_v24 = vmax.f32 %v90_v18, 0.0 }
  0xcc   :  { %v194_v15 = vpop.f32.mrf.mxu0 }
  0xcd   :  { %v93_v17 = vadd.f32 %v194_v15, %v177_v14  ;;  %v96_v22 = vmax.f32 %v82_v16, 0.0 }
  0xce   :  { %v84_v19 = vpop.f32.mrf.mxu0 }
  0xcf   :  { %v85_v20 = vadd.f32 %v177_v14, %v84_v19  ;;  %v99_v21 = vmax.f32 %v93_v17, 0.0 }
  0xd1   :  { %v97_v23 = vmax.f32 %v85_v20, 0.0  ;;  %v105_v26 = vpack.c.bf16 %v99_v21, %v98_v24 }
  0xd3   :  { %v104_v25 = vpack.c.bf16 %v97_v23, %v96_v22 }
  0xd5   :  { %197 = vmatprep.mubr.msk.bf16.mxu1 %vm112_vm2, %v104_v25 }
  0xd6   :  { %198 = vmatmul.mubr.msk.bf16.vlgmr.msra.gmra.mxu1 %vm112_vm2, %v105_v26 }
 0x196   :  { %v199_v28 = vpop.f32.mrf.mxu1 }
 0x197   :  { %v162_v29 = vadd.f32 %v199_v28, %v180_v27 }
 0x198   :  { %v153_v30 = vpop.f32.mrf.mxu1 }
 0x199   :  { %171 = vst.msk [vmem:[%s276_s5 + $0x10] sm:$0xff] %vm168_vm3, %v162_v29  ;;  %v154_v31 = vadd.f32 %v180_v27, %v153_v30 }
 0x19a   :  { %v200_v32 = vpop.f32.mrf.mxu1 }
 0x19b   :  { %169 = vst.msk [vmem:[%s276_s5] sm:$0xff] %vm168_vm3, %v154_v31  ;;  %v165_v33 = vadd.f32 %v200_v32, %v180_v27 }
 0x19c   :  { %v156_v34 = vpop.f32.mrf.mxu1 }
 0x19d   :  { %172 = vst.msk [vmem:[%s276_s5 + $0x18] sm:$0xff] %vm168_vm3, %v165_v33  ;;  %v157_v35 = vadd.f32 %v180_v27, %v156_v34 }
 0x19f   :  { %170 = vst.msk [vmem:[%s276_s5 + $0x8] sm:$0xff] %vm168_vm3, %v157_v35 }

// kernel: _lambda_.40
= control target key start
LH: loop header
LB: loop body
LE: loop exit
PB: predicated region body
PF: predicated region fallthrough
CT: control target
= control target key end

     0   :  { %vm34_vm0 = vcmask 261120   ;;  %vm90_vm1 = vcmask 785408   ;;  %s173_s1 = inlined_call_operand.vmem [shape: f32[32,96], index: 1, kind: input, shape index: {}]   ;;  %s174_s0 = inlined_call_operand.vmem [shape: f32[32,32], index: 0, kind: input, shape index: {}]   ;;  %s175_s2 = inlined_call_operand.vmem [shape: f32[1,96], index: 2, kind: input, shape index: {}]   ;;  %s176_s3 = inlined_call_operand.vmem [shape: f32[32,96], index: 3, kind: output, shape index: {}]  }
   0x1   :  { %v21_v0 = vld [vmem:[%s173_s1 + $0x10] sm:$0xff]  ;;  %v22_v1 = vld [vmem:[%s173_s1 + $0x18] sm:$0xff]  ;;  %v19_v2 = vld [vmem:[%s173_s1] sm:$0xff] }
   0x2   :  { %v24_v3 = vpack.c.bf16 %v22_v1, %v21_v0  ;;  %v20_v4 = vld [vmem:[%s173_s1 + $0x8] sm:$0xff]  ;;  %v15_v5 = vld [vmem:[%s174_s0] sm:$0xff]  ;;  %v17_v9 = vld [vmem:[%s174_s0 + $0x10] sm:$0xff] }
   0x3   :  { %v16_v6 = vld [vmem:[%s174_s0 + $0x8] sm:$0xff]  ;;  %v23_v7 = vpack.c.bf16 %v20_v4, %v19_v2  ;;  %v18_v10 = vld [vmem:[%s174_s0 + $0x18] sm:$0xff]  ;;  %v99_v12 = vld [vmem:[%s175_s2] ss:$0 sm:$0xff] }
   0x4   :  { %v26_v8 = vpack.c.bf16 %v16_v6, %v15_v5  ;;  %106 = vmatprep.subr.bf16.mxu0 %v24_v3  ;;  %v27_v11 = vpack.c.bf16 %v18_v10, %v17_v9 }
   0x5   :  { %107 = vmatpush3.bf16.msra.mxu0 %v24_v3 }
   0x6   :  { %110 = vmatprep.mubr.msk.bf16.mxu0 %vm34_vm0, %v26_v8  ;;  %108 = vmatprep.subr.bf16.mxu0 %v23_v7 }
   0x9   :  { %109 = vmatpush3.bf16.msra.mxu0 %v23_v7 }
   0xc   :  { %111 = vmatmul.mubr.msk.bf16.vlgmr.msra.gmra.mxu0 %vm34_vm0, %v27_v11 }
  0xcc   :  { %v112_v13 = vpop.f32.mrf.mxu0 }
  0xcd   :  { %v84_v14 = vadd.f32 %v112_v13, %v99_v12 }
  0xce   :  { %v75_v15 = vpop.f32.mrf.mxu0 }
  0xcf   :  { %93 = vst.msk [vmem:[%s176_s3 + $0x10] sm:$0xff] %vm90_vm1, %v84_v14  ;;  %v76_v16 = vadd.f32 %v99_v12, %v75_v15 }
  0xd0   :  { %v113_v17 = vpop.f32.mrf.mxu0 }
  0xd1   :  { %91 = vst.msk [vmem:[%s176_s3] sm:$0xff] %vm90_vm1, %v76_v16  ;;  %v87_v18 = vadd.f32 %v113_v17, %v99_v12 }
  0xd2   :  { %v78_v19 = vpop.f32.mrf.mxu0 }
  0xd3   :  { %94 = vst.msk [vmem:[%s176_s3 + $0x18] sm:$0xff] %vm90_vm1, %v87_v18  ;;  %v79_v20 = vadd.f32 %v99_v12, %v78_v19 }
  0xd5   :  { %92 = vst.msk [vmem:[%s176_s3 + $0x8] sm:$0xff] %vm90_vm1, %v79_v20 }

// kernel: _lambda_.38
= control target key start
LH: loop header
LB: loop body
LE: loop exit
PB: predicated region body
PF: predicated region fallthrough
CT: control target
= control target key end

     0   :  { %vm52_vm0 = vcmask 785408   ;;  %vm133_vm1 = vcmask 523264   ;;  %vm189_vm2 = vcmask 261120   ;;  %s368_s1 = inlined_call_operand.vmem [shape: f32[96,64], index: 1, kind: input, shape index: {}]   ;;  %s369_s0 = inlined_call_operand.vmem [shape: f32[32,96], index: 0, kind: input, shape index: {}]   ;;  %s370_s3 = inlined_call_operand.vmem [shape: f32[64,32], index: 3, kind: input, shape index: {}]   ;;  %s371_s2 = inlined_call_operand.vmem [shape: f32[1,64], index: 2, kind: input, shape index: {}]   ;;  %s372_s4 = inlined_call_operand.vmem [shape: f32[1,32], index: 4, kind: input, shape index: {}]   ;;  %s373_s5 = inlined_call_operand.vmem [shape: f32[32,32], index: 5, kind: output, shape index: {}]  }
   0x1   :  { %v35_v0 = vld [vmem:[%s368_s1 + $0x50] sm:$0xff]  ;;  %v36_v1 = vld [vmem:[%s368_s1 + $0x58] sm:$0xff]  ;;  %v33_v2 = vld [vmem:[%s368_s1 + $0x40] sm:$0xff] }
   0x2   :  { %v42_v3 = vpack.c.bf16 %v36_v1, %v35_v0  ;;  %v34_v4 = vld [vmem:[%s368_s1 + $0x48] sm:$0xff]  ;;  %v31_v6 = vld [vmem:[%s368_s1 + $0x30] sm:$0xff]  ;;  %v32_v7 = vld [vmem:[%s368_s1 + $0x38] sm:$0xff] }
   0x3   :  { %v41_v5 = vpack.c.bf16 %v34_v4, %v33_v2  ;;  %v21_v8 = vld [vmem:[%s369_s0] sm:$0xff]  ;;  %v22_v9 = vld [vmem:[%s369_s0 + $0x8] sm:$0xff]  ;;  %v40_v10 = vpack.c.bf16 %v32_v7, %v31_v6  ;;  %v118_v12 = vld [vmem:[%s370_s3 + $0x30] sm:$0xff] }
   0x4   :  { %218 = vmatprep.subr.bf16.mxu0 %v42_v3  ;;  %v44_v11 = vpack.c.bf16 %v22_v9, %v21_v8  ;;  %v119_v13 = vld [vmem:[%s370_s3 + $0x38] sm:$0xff]  ;;  %v29_v14 = vld [vmem:[%s368_s1 + $0x20] sm:$0xff]  ;;  %v30_v15 = vld [vmem:[%s368_s1 + $0x28] sm:$0xff] }
   0x5   :  { %219 = vmatpush3.bf16.msra.mxu0 %v42_v3  ;;  %v123_v16 = vpack.c.bf16 %v119_v13, %v118_v12  ;;  %v39_v17 = vpack.c.bf16 %v30_v15, %v29_v14  ;;  %v27_v18 = vld [vmem:[%s368_s1 + $0x10] sm:$0xff]  ;;  %v28_v19 = vld [vmem:[%s368_s1 + $0x18] sm:$0xff]  ;;  %v25_v21 = vld [vmem:[%s368_s1] sm:$0xff] }
   0x6   :  { %220 = vmatprep.subr.bf16.mxu0 %v41_v5  ;;  %230 = vmatprep.mubr.msk.bf16.mxu0 %vm52_vm0, %v44_v11  ;;  %v38_v20 = vpack.c.bf16 %v28_v19, %v27_v18  ;;  %v26_v22 = vld [vmem:[%s368_s1 + $0x8] sm:$0xff]  ;;  %v23_v24 = vld [vmem:[%s369_s0 + $0x10] sm:$0xff]  ;;  %v24_v25 = vld [vmem:[%s369_s0 + $0x18] sm:$0xff] }
   0x7   :  { %234 = vmatprep.subr.bf16.mxu1 %v123_v16  ;;  %v37_v23 = vpack.c.bf16 %v26_v22, %v25_v21  ;;  %v45_v26 = vpack.c.bf16 %v24_v25, %v23_v24  ;;  %v116_v27 = vld [vmem:[%s370_s3 + $0x20] sm:$0xff]  ;;  %v117_v28 = vld [vmem:[%s370_s3 + $0x28] sm:$0xff]  ;;  %v114_v30 = vld [vmem:[%s370_s3 + $0x10] sm:$0xff] }
   0x8   :  { %235 = vmatpush3.bf16.msra.mxu1 %v123_v16  ;;  %v122_v29 = vpack.c.bf16 %v117_v28, %v116_v27  ;;  %v115_v31 = vld [vmem:[%s370_s3 + $0x18] sm:$0xff]  ;;  %v112_v33 = vld [vmem:[%s370_s3] sm:$0xff]  ;;  %v113_v34 = vld [vmem:[%s370_s3 + $0x8] sm:$0xff] }
   0x9   :  { %221 = vmatpush3.bf16.msra.mxu0 %v41_v5  ;;  %v121_v32 = vpack.c.bf16 %v115_v31, %v114_v30  ;;  %v120_v35 = vpack.c.bf16 %v113_v34, %v112_v33  ;;  %v198_v38 = vld [vmem:[%s371_s2] ss:$0 sm:$0xff] }
   0xa   :  { %222 = vmatprep.subr.bf16.mxu0 %v40_v10  ;;  %236 = vmatprep.subr.bf16.mxu1 %v122_v29  ;;  %v201_v51 = vld [vmem:[%s372_s4] ss:$0 sm:$0xff] }
   0xc   :  { %237 = vmatpush3.bf16.msra.mxu1 %v122_v29 }
   0xd   :  { %223 = vmatpush3.bf16.msra.mxu0 %v40_v10  ;;  %238 = vmatprep.subr.bf16.mxu1 %v121_v32 }
   0xe   :  { %224 = vmatprep.subr.bf16.mxu0 %v39_v17 }
  0x10   :  { %239 = vmatpush3.bf16.msra.mxu1 %v121_v32 }
  0x11   :  { %225 = vmatpush3.bf16.msra.mxu0 %v39_v17  ;;  %240 = vmatprep.subr.bf16.mxu1 %v120_v35 }
  0x12   :  { %226 = vmatprep.subr.bf16.mxu0 %v38_v20 }
  0x14   :  { %241 = vmatpush3.bf16.msra.mxu1 %v120_v35 }
  0x15   :  { %227 = vmatpush3.bf16.msra.mxu0 %v38_v20 }
  0x16   :  { %228 = vmatprep.subr.bf16.mxu0 %v37_v23 }
  0x19   :  { %229 = vmatpush3.bf16.msra.mxu0 %v37_v23 }
  0x1c   :  { %231 = vmatmul.mubr.msk.bf16.vlgmr.msra.gmra.mxu0 %vm52_vm0, %v45_v26 }
  0xdc   :  { %v232_v36 = vpop.f32.mrf.mxu0 }
  0xdd   :  { %v102_v42 = vadd.f32 %v232_v36, %v198_v38 }
  0xde   :  { %v93_v37 = vpop.f32.mrf.mxu0 }
  0xdf   :  { %v94_v40 = vadd.f32 %v198_v38, %v93_v37  ;;  %v110_v48 = vmax.f32 %v102_v42, 0.0 }
  0xe0   :  { %v233_v39 = vpop.f32.mrf.mxu0 }
  0xe1   :  { %v105_v41 = vadd.f32 %v233_v39, %v198_v38  ;;  %v108_v46 = vmax.f32 %v94_v40, 0.0 }
  0xe2   :  { %v96_v43 = vpop.f32.mrf.mxu0 }
  0xe3   :  { %v97_v44 = vadd.f32 %v198_v38, %v96_v43  ;;  %v111_v45 = vmax.f32 %v105_v41, 0.0 }
  0xe5   :  { %v109_v47 = vmax.f32 %v97_v44, 0.0  ;;  %v126_v50 = vpack.c.bf16 %v111_v45, %v110_v48 }
  0xe7   :  { %v125_v49 = vpack.c.bf16 %v109_v47, %v108_v46 }
  0xe9   :  { %242 = vmatprep.mubr.msk.bf16.mxu1 %vm133_vm1, %v125_v49 }
  0xea   :  { %243 = vmatmul.mubr.msk.bf16.vlgmr.msra.gmra.mxu1 %vm133_vm1, %v126_v50 }
 0x1aa   :  { %v244_v52 = vpop.f32.mrf.mxu1 }
 0x1ab   :  { %v183_v53 = vadd.f32 %v244_v52, %v201_v51 }
 0x1ac   :  { %v174_v54 = vpop.f32.mrf.mxu1 }
 0x1ad   :  { %192 = vst.msk [vmem:[%s373_s5 + $0x10] sm:$0xff] %vm189_vm2, %v183_v53  ;;  %v175_v55 = vadd.f32 %v201_v51, %v174_v54 }
 0x1ae   :  { %v245_v56 = vpop.f32.mrf.mxu1 }
 0x1af   :  { %190 = vst.msk [vmem:[%s373_s5] sm:$0xff] %vm189_vm2, %v175_v55  ;;  %v186_v57 = vadd.f32 %v245_v56, %v201_v51 }
 0x1b0   :  { %v177_v58 = vpop.f32.mrf.mxu1 }
 0x1b1   :  { %193 = vst.msk [vmem:[%s373_s5 + $0x18] sm:$0xff] %vm189_vm2, %v186_v57  ;;  %v178_v59 = vadd.f32 %v201_v51, %v177_v58 }
 0x1b3   :  { %191 = vst.msk [vmem:[%s373_s5 + $0x8] sm:$0xff] %vm189_vm2, %v178_v59 }

// kernel: _lambda_.41
= control target key start
LH: loop header
LB: loop body
LE: loop exit
PB: predicated region body
PF: predicated region fallthrough
CT: control target
= control target key end

     0   :  { %s999_s12 = smov 0   ;;  %s1105_s0 = inlined_call_operand.vmem [shape: f32[2,16,32], index: 0, kind: input, shape index: {}]   ;;  %s1106_s1 = inlined_call_operand.vmem [shape: f32[2,16,32], index: 1, kind: input, shape index: {}]   ;;  %s1107_s2 = inlined_call_operand.vmem [shape: f32[2,16,32], index: 2, kind: input, shape index: {}]   ;;  %s1108_s3 = inlined_call_operand.vmem [shape: f32[2,16,32], index: 3, kind: output, shape index: {}]  }
   0x1 LB: > { %s824_s13 = sadd.s32 4294967295, %s969_s12   ;;  %p828_p0 = scmp.ge.s32.totalorder %s969_s12, 1  ;;  %s969_s12 = sphi %s999_s12, %s13_s12  }
   0x2   : > { %p157_p1 = scmp.lt.s32.totalorder %s969_s12, 3 }
   0x4   : > { %p158_p2 = pnand %p828_p0, %p157_p1 }
   0x5   : > { %p191_p3 = scmp.lt.s32.totalorder (!%p158_p2), %s824_s13, 1  ;;  %s973_s21 = smov (!%p158_p2), 120  }
   0x6   : > { %161 = sbr.rel (%p158_p2) target bundleno = 1434 (0x59a), region = 32  ;;  %s974_s22 = smov (!%p158_p2), 104  }
   0x7   : > { %s975_s26 = smov (!%p158_p2), 112   ;;  %s976_s27 = smov (!%p158_p2), 8  }
   0x8   : > { %s977_s28 = smov (!%p158_p2), 16   ;;  %s978_s29 = smov (!%p158_p2), 24  }
   0xb   : > { %v971_v0 = vmov 0.0   ;;  %vm972_vm0 = vmmov 0   ;;  %s1110_s13 = smov (!%p191_p3, %s824_s13), 1  ;;  %vm221_vm1 = vcmask 64512   ;;  %vm271_vm2 = vcmask 130048  }
   0xc   : > { %867 = vmatprep.subr.bf16.mxu0 %v971_v0  ;;  %869 = vmatprep.mubr.msk.bf16.mxu0 %vm972_vm0, %v971_v0  ;;  %s1013_s14 = sshll.u32 %s1110_s13, 4  ;;  %vm739_vm3 = vcmask 195584   ;;  %vm742_vm4 = vcmask 261120  }
   0xd   : > { %873 = vmatprep.subr.bf16.mxu1 %v971_v0  ;;  %875 = vmatprep.mubr.msk.bf16.mxu1 %vm972_vm0, %v971_v0  ;;  %s200_s17 = scalar_lea.vmem %s1106_s1, %s1013_s14  ;;  %s195_s20 = scalar_lea.vmem %s1105_s0, %s1013_s14 }
   0xe   : > { %v214_v1 = vld [vmem:[%s200_s17] sm:$0xff]  ;;  %v215_v2 = vld [vmem:[%s200_s17 + $0x8] sm:$0xff]  ;;  %s205_s25 = scalar_lea.vmem %s1107_s2, %s1013_s14  ;;  %s210_s5 = scalar_lea.vmem %s1108_s3, %s1013_s14 }
   0xf   : > { %v219_v3 = vpack.c.bf16 %v215_v2, %v214_v1  ;;  %v212_v5 = vld [vmem:[%s195_s20] sm:$0xff]  ;;  %v213_v6 = vld [vmem:[%s195_s20 + $0x8] sm:$0xff] }
  0x10   : > { %v218_v7 = vpack.c.bf16 %v213_v6, %v212_v5  ;;  %v216_v26 = vld [vmem:[%s205_s25] sm:$0xff]  ;;  %v217_v27 = vld [vmem:[%s205_s25 + $0x8] sm:$0xff] }
  0x11   : > { %v226_v4 = vsel %vm221_vm1, %v219_v3, 0  ;;  %v1038_v28 = vpack.c.bf16 %v217_v27, %v216_v26 }
  0x12   : > { %868 = vmatpush3.bf16.xpose.msra.mxu0 %v226_v4 }
  0x13   : > { %885 = vmatprep.subr.bf16.mxu0 %v971_v0  ;;  %874 = vmatpush3.bf16.msra.mxu1 %v1038_v28 }
  0x14   : > { %879 = vmatprep.subr.bf16.mxu1 %v971_v0 }
  0x19   : > { %870 = vmatmul.mubr.msk.bf16.vlgmr.msra.gmra.mxu0 %vm221_vm1, %v218_v7 }
  0x1a   : > { %887 = vmatprep.mubr.msk.bf16.mxu0 %vm972_vm0, %v971_v0 }
  0xd9   : > { %v262_v8 = vpop.f32.mrf.mxu0 }
  0xda   : > { %v269_v9 = vmul.f32 0.35355338, %v262_v8 }
  0xdb   : > { %v871_v10 = vpop.f32.mrf.mxu0 }
  0xdc   : > { %v272_v11 = vsel %vm271_vm2, %v269_v9, -inf }
  0xdd   : > { %273 = vmax.xlane.f32.xlu0 %v272_v11  ;;  %v265_v12 = vpop.f32.mrf.mxu0 }
  0xde   : > { %v270_v13 = vmul.f32 0.35355338, %v265_v12 }
  0xdf   : > { %v872_v14 = vpop.f32.mrf.mxu0 }
  0xe0   : > { %v275_v15 = vsel %vm271_vm2, %v270_v13, -inf }
  0xe1   : > { %276 = vmax.xlane.f32.xlu0 %v275_v15 }
  0xf7   : > { %343 = vrot.lane.b32.xlu0 %v219_v3, %s973_s21 }
  0xfb   : > { %590 = vrot.lane.b32.xlu0 %v219_v3, %s974_s22 }
 0x166   : > { %v274_v16 = vpop.xlane.xlu0 %273 }
 0x167   : > { %v278_v17 = vsub.f32 %v269_v9, %v274_v16 }
 0x169   : > { %v280_v18 = vmul.f32 1.442695, %v278_v17 }
 0x16a   : > { %v277_v19 = vpop.xlane.xlu0 %276 }
 0x16b   : > { %931 = vpow2.f32 %v280_v18  ;;  %v279_v20 = vsub.f32 %v270_v13, %v277_v19 }
 0x16d   : > { %v282_v21 = vmul.f32 1.442695, %v279_v20 }
 0x16e   : > { %v344_v33 = vpop.permute.xlu0 %343 }
 0x16f   : > { %933 = vpow2.f32 %v282_v21  ;;  %v349_v37 = vsel %vm221_vm1, %v344_v33, 0 }
 0x172   : > { %v591_v41 = vpop.permute.xlu0 %590 }
 0x173   : > { %v596_v43 = vsel %vm221_vm1, %v591_v41, 0 }
 0x178   : > { %v932_v22 = vpop.eup %931 }
 0x179   : > { %v284_v23 = vsel %vm271_vm2, %v932_v22, 0.0 }
 0x17a   : > { %285 = vadd.xlane.f32.xlu1 %v284_v23 }
 0x17c   : > { %v934_v24 = vpop.eup %933 }
 0x17d   : > { %v287_v25 = vsel %vm271_vm2, %v934_v24, 0.0 }
 0x17e   : > { %288 = vadd.xlane.f32.xlu1 %v287_v25 }
 0x18f   : > { %340 = vrot.lane.b32.xlu1 %v218_v7, %s973_s21 }
 0x193   : > { %467 = vrot.lane.b32.xlu1 %v219_v3, %s975_s26 }
 0x197   : > { %465 = vrot.lane.b32.xlu1 %v218_v7, %s975_s26 }
 0x19b   : > { %588 = vrot.lane.b32.xlu1 %v218_v7, %s974_s22 }
 0x203   : > { %v286_v29 = vpop.xlane.xlu1 %285 }
 0x204   : > { %935 = vrcp.f32 %v286_v29 }
 0x207   : > { %v289_v30 = vpop.xlane.xlu1 %288 }
 0x208   : > { %937 = vrcp.f32 %v289_v30 }
 0x20b   : > { %v341_v36 = vpop.permute.xlu1 %340 }
 0x20f   : > { %v468_v39 = vpop.permute.xlu1 %467 }
 0x210   : > { %v473_v40 = vsel %vm221_vm1, %v468_v39, 0 }
 0x211   : > { %v936_v31 = vpop.eup %935 }
 0x212   : > { %v292_v34 = vmul.f32 %v936_v31, %v932_v22 }
 0x213   : > { %v466_v42 = vpop.permute.xlu1 %465 }
 0x215   : > { %v938_v32 = vpop.eup %937 }
 0x216   : > { %v293_v35 = vmul.f32 %v938_v32, %v934_v24 }
 0x217   : > { %v589_v44 = vpop.permute.xlu1 %588 }
 0x218   : > { %v294_v38 = vpack.c.bf16 %v293_v35, %v292_v34 }
 0x21a   : > { %876 = vmatmul.mubr.msk.bf16.vlgmr.msra.gmra.mxu1 %vm271_vm2, %v294_v38 }
 0x21b   : > { %880 = vmatpush3.bf16.xpose.msra.mxu1 %v349_v37  ;;  %881 = vmatprep.mubr.msk.bf16.mxu1 %vm972_vm0, %v971_v0 }
 0x21c   : > { %891 = vmatprep.subr.bf16.mxu1 %v971_v0 }
 0x222   : > { %882 = vmatmul.mubr.msk.bf16.vlgmr.msra.gmra.mxu1 %vm221_vm1, %v341_v36 }
 0x223   : > { %892 = vmatpush3.bf16.xpose.msra.mxu1 %v473_v40  ;;  %893 = vmatprep.mubr.msk.bf16.mxu1 %vm972_vm0, %v971_v0 }
 0x224   : > { %903 = vmatprep.subr.bf16.mxu1 %v971_v0 }
 0x22a   : > { %894 = vmatmul.mubr.msk.bf16.vlgmr.msra.gmra.mxu1 %vm221_vm1, %v466_v42 }
 0x22b   : > { %904 = vmatpush3.bf16.xpose.msra.mxu1 %v596_v43  ;;  %905 = vmatprep.mubr.msk.bf16.mxu1 %vm972_vm0, %v971_v0 }
 0x232   : > { %906 = vmatmul.mubr.msk.bf16.vlgmr.msra.gmra.mxu1 %vm221_vm1, %v589_v44 }
 0x2da   : > { %v1061_v45 = vpop.f32.mrf.mxu1 }
 0x2dc   : > { %v877_v46 = vpop.f32.mrf.mxu1 }
 0x2de   : > { %v1063_v47 = vpop.f32.mrf.mxu1 }
 0x2e0   : > { %v878_v48 = vpop.f32.mrf.mxu1 }
 0x2e2   : > { %v385_v49 = vpop.f32.mrf.mxu1 }
 0x2e3   : > { %v392_v50 = vmul.f32 0.35355338, %v385_v49 }
 0x2e4   : > { %v883_v51 = vpop.f32.mrf.mxu1 }
 0x2e5   : > { %v394_v52 = vsel %vm271_vm2, %v392_v50, -inf }
 0x2e6   : > { %395 = vmax.xlane.f32.xlu0 %v394_v52  ;;  %v388_v53 = vpop.f32.mrf.mxu1 }
 0x2e7   : > { %v393_v54 = vmul.f32 0.35355338, %v388_v53 }
 0x2e8   : > { %v884_v55 = vpop.f32.mrf.mxu1 }
 0x2e9   : > { %v397_v56 = vsel %vm271_vm2, %v393_v54, -inf }
 0x2ea   : > { %398 = vmax.xlane.f32.xlu1 %v397_v56  ;;  %v509_v57 = vpop.f32.mrf.mxu1 }
 0x2eb   : > { %v516_v58 = vmul.f32 0.35355338, %v509_v57 }
 0x2ec   : > { %v895_v59 = vpop.f32.mrf.mxu1 }
 0x2ed   : > { %v518_v60 = vsel %vm271_vm2, %v516_v58, -inf }
 0x2ee   : > { %519 = vmax.xlane.f32.xlu0 %v518_v60  ;;  %v512_v61 = vpop.f32.mrf.mxu1 }
 0x2ef   : > { %v517_v62 = vmul.f32 0.35355338, %v512_v61 }
 0x2f0   : > { %v896_v63 = vpop.f32.mrf.mxu1 }
 0x2f1   : > { %v521_v1 = vsel %vm271_vm2, %v517_v62, -inf }
 0x2f2   : > { %522 = vmax.xlane.f32.xlu0 %v521_v1  ;;  %v632_v2 = vpop.f32.mrf.mxu1 }
 0x2f3   : > { %v639_v3 = vmul.f32 0.35355338, %v632_v2 }
 0x2f4   : > { %v907_v4 = vpop.f32.mrf.mxu1 }
 0x2f5   : > { %v641_v5 = vsel %vm271_vm2, %v639_v3, -inf }
 0x2f6   : > { %642 = vmax.xlane.f32.xlu0 %v641_v5  ;;  %v635_v6 = vpop.f32.mrf.mxu1 }
 0x2f7   : > { %v640_v7 = vmul.f32 0.35355338, %v635_v6 }
 0x2f8   : > { %v908_v8 = vpop.f32.mrf.mxu1 }
 0x2f9   : > { %v644_v9 = vsel %vm271_vm2, %v640_v7, -inf }
 0x2fa   : > { %645 = vmax.xlane.f32.xlu1 %v644_v9 }
 0x36f   : > { %v396_v10 = vpop.xlane.xlu0 %395 }
 0x370   : > { %v400_v11 = vsub.f32 %v392_v50, %v396_v10 }
 0x372   : > { %v402_v12 = vmul.f32 1.442695, %v400_v11 }
 0x373   : > { %v399_v13 = vpop.xlane.xlu1 %398 }
 0x374   : > { %939 = vpow2.f32 %v402_v12  ;;  %v401_v14 = vsub.f32 %v393_v54, %v399_v13 }
 0x376   : > { %v404_v15 = vmul.f32 1.442695, %v401_v14 }
 0x377   : > { %v520_v16 = vpop.xlane.xlu0 %519 }
 0x378   : > { %941 = vpow2.f32 %v404_v15  ;;  %v524_v17 = vsub.f32 %v516_v58, %v520_v16 }
 0x37a   : > { %v526_v18 = vmul.f32 1.442695, %v524_v17 }
 0x37b   : > { %v523_v19 = vpop.xlane.xlu0 %522 }
 0x37c   : > { %943 = vpow2.f32 %v526_v18  ;;  %v525_v20 = vsub.f32 %v517_v62, %v523_v19 }
 0x37e   : > { %v528_v21 = vmul.f32 1.442695, %v525_v20 }
 0x37f   : > { %v643_v22 = vpop.xlane.xlu0 %642 }
 0x380   : > { %945 = vpow2.f32 %v528_v21  ;;  %v647_v23 = vsub.f32 %v639_v3, %v643_v22 }
 0x381   : > { %v940_v24 = vpop.eup %939 }
 0x382   : > { %v649_v25 = vmul.f32 1.442695, %v647_v23  ;;  %v406_v26 = vsel %vm271_vm2, %v940_v24, 0.0 }
 0x383   : > { %407 = vadd.xlane.f32.xlu0 %v406_v26  ;;  %v646_v36 = vpop.xlane.xlu1 %645 }
 0x384   : > { %947 = vpow2.f32 %v649_v25  ;;  %v648_v37 = vsub.f32 %v640_v7, %v646_v36 }
 0x385   : > { %v942_v27 = vpop.eup %941 }
 0x386   : > { %v409_v29 = vsel %vm271_vm2, %v942_v27, 0.0  ;;  %v651_v38 = vmul.f32 1.442695, %v648_v37 }
 0x387   : > { %410 = vadd.xlane.f32.xlu1 %v409_v29 }
 0x388   : > { %949 = vpow2.f32 %v651_v38 }
 0x389   : > { %v944_v30 = vpop.eup %943 }
 0x38a   : > { %v530_v31 = vsel %vm271_vm2, %v944_v30, 0.0 }
 0x38b   : > { %531 = vadd.xlane.f32.xlu0 %v530_v31 }
 0x38d   : > { %v946_v32 = vpop.eup %945 }
 0x38e   : > { %v533_v33 = vsel %vm271_vm2, %v946_v32, 0.0 }
 0x38f   : > { %534 = vadd.xlane.f32.xlu1 %v533_v33 }
 0x391   : > { %v948_v34 = vpop.eup %947 }
 0x392   : > { %v653_v35 = vsel %vm271_vm2, %v948_v34, 0.0 }
 0x393   : > { %654 = vadd.xlane.f32.xlu0 %v653_v35 }
 0x395   : > { %v950_v39 = vpop.eup %949 }
 0x396   : > { %v656_v40 = vsel %vm271_vm2, %v950_v39, 0.0 }
 0x3a0   : > { %541 = vrot.lane.b32.xlu1 %v1038_v28, %s975_s26 }
 0x3a9   : > { %418 = vrot.lane.b32.xlu0 %v1038_v28, %s973_s21 }
 0x3c4   : > { %657 = vadd.xlane.f32.xlu1 %v656_v40 }
 0x3d5   : > { %664 = vrot.lane.b32.xlu1 %v1038_v28, %s974_s22 }
 0x40c   : > { %v408_v41 = vpop.xlane.xlu0 %407 }
 0x40d   : > { %951 = vrcp.f32 %v408_v41 }
 0x410   : > { %v411_v42 = vpop.xlane.xlu1 %410 }
 0x411   : > { %953 = vrcp.f32 %v411_v42 }
 0x414   : > { %v532_v43 = vpop.xlane.xlu0 %531 }
 0x415   : > { %955 = vrcp.f32 %v532_v43 }
 0x418   : > { %v535_v44 = vpop.xlane.xlu1 %534 }
 0x419   : > { %957 = vrcp.f32 %v535_v44 }
 0x41a   : > { %v952_v46 = vpop.eup %951 }
 0x41b   : > { %v414_v50 = vmul.f32 %v952_v46, %v940_v24 }
 0x41c   : > { %v655_v48 = vpop.xlane.xlu0 %654  ;;  %v542_v28 = vpop.permute.xlu1 %541 }
 0x41d   : > { %959 = vrcp.f32 %v655_v48 }
 0x41e   : > { %v954_v49 = vpop.eup %953 }
 0x41f   : > { %v415_v51 = vmul.f32 %v954_v49, %v942_v27 }
 0x420   : > { %v419_v52 = vpop.permute.xlu0 %418 }
 0x421   : > { %886 = vmatpush3.bf16.msra.mxu0 %v419_v52  ;;  %v416_v53 = vpack.c.bf16 %v415_v51, %v414_v50 }
 0x422   : > { %897 = vmatprep.subr.bf16.mxu0 %v971_v0  ;;  %v956_v54 = vpop.eup %955 }
 0x423   : > { %v538_v56 = vmul.f32 %v956_v54, %v944_v30 }
 0x424   : > { %888 = vmatmul.mubr.msk.bf16.vlgmr.msra.gmra.mxu0 %vm271_vm2, %v416_v53 }
 0x425   : > { %898 = vmatpush3.bf16.msra.mxu0 %v542_v28  ;;  %899 = vmatprep.mubr.msk.bf16.mxu0 %vm972_vm0, %v971_v0 }
 0x426   : > { %v958_v55 = vpop.eup %957  ;;  %909 = vmatprep.subr.bf16.mxu0 %v971_v0 }
 0x427   : > { %v539_v57 = vmul.f32 %v958_v55, %v946_v32 }
 0x429   : > { %v540_v58 = vpack.c.bf16 %v539_v57, %v538_v56 }
 0x42a   : > { %v960_v61 = vpop.eup %959 }
 0x42b   : > { %v661_v63 = vmul.f32 %v960_v61, %v948_v34 }
 0x42c   : > { %900 = vmatmul.mubr.msk.bf16.vlgmr.msra.gmra.mxu0 %vm271_vm2, %v540_v58 }
 0x42d   : > { %911 = vmatprep.mubr.msk.bf16.mxu0 %vm972_vm0, %v971_v0 }
 0x44d   : > { %v658_v59 = vpop.xlane.xlu1 %657 }
 0x44e   : > { %961 = vrcp.f32 %v658_v59 }
 0x451   : > { %v665_v60 = vpop.permute.xlu1 %664 }
 0x452   : > { %910 = vmatpush3.bf16.msra.mxu0 %v665_v60 }
 0x45b   : > { %v962_v62 = vpop.eup %961 }
 0x45c   : > { %v662_v1 = vmul.f32 %v962_v62, %v950_v39 }
 0x45e   : > { %v663_v2 = vpack.c.bf16 %v662_v1, %v661_v63 }
 0x460   : > { %912 = vmatmul.mubr.msk.bf16.vlgmr.msra.gmra.mxu0 %vm271_vm2, %v663_v2 }
 0x4e4   : > { %v458_v3 = vpop.f32.mrf.mxu0 }
 0x4e5   : > { %713 = vrot.lane.b32.xlu1 %v458_v3, %s976_s27 }
 0x4e6   : > { %v889_v4 = vpop.f32.mrf.mxu0 }
 0x4e8   : > { %v461_v5 = vpop.f32.mrf.mxu0 }
 0x4e9   : > { %715 = vrot.lane.b32.xlu0 %v461_v5, %s976_s27 }
 0x4ea   : > { %v890_v6 = vpop.f32.mrf.mxu0 }
 0x4ec   : > { %v581_v0 = vpop.f32.mrf.mxu0 }
 0x4ed   : > { %721 = vrot.lane.b32.xlu1 %v581_v0, %s977_s28 }
 0x4ee   : > { %v901_v7 = vpop.f32.mrf.mxu0 }
 0x4f0   : > { %v584_v8 = vpop.f32.mrf.mxu0 }
 0x4f1   : > { %723 = vrot.lane.b32.xlu0 %v584_v8, %s977_s28 }
 0x4f2   : > { %v902_v9 = vpop.f32.mrf.mxu0 }
 0x520   : > { %v704_v10 = vpop.f32.mrf.mxu0 }
 0x521   : > { %729 = vrot.lane.b32.xlu1 %v704_v10, %s978_s29 }
 0x522   : > { %v913_v11 = vpop.f32.mrf.mxu0 }
 0x524   : > { %v707_v12 = vpop.f32.mrf.mxu0 }
 0x525   : > { %731 = vrot.lane.b32.xlu0 %v707_v12, %s978_s29 }
 0x526   : > { %v914_v13 = vpop.f32.mrf.mxu0 }
 0x557   : > { %v714_v14 = vpop.permute.xlu1 %713 }
 0x558   : > { %v735_v17 = vsel %vm221_vm1, %v1061_v45, %v714_v14 }
 0x55b   : > { %v716_v15 = vpop.permute.xlu0 %715 }
 0x55c   : > { %v736_v22 = vsel %vm221_vm1, %v1063_v47, %v716_v15 }
 0x55f   : > { %v722_v16 = vpop.permute.xlu1 %721 }
 0x560   : > { %v737_v18 = vsel %vm271_vm2, %v735_v17, %v722_v16 }
 0x563   : > { %v724_v19 = vpop.permute.xlu0 %723 }
 0x564   : > { %v738_v23 = vsel %vm271_vm2, %v736_v22, %v724_v19 }
 0x593   : > { %v730_v20 = vpop.permute.xlu1 %729 }
 0x594   : > { %v740_v21 = vsel %vm739_vm3, %v737_v18, %v730_v20 }
 0x595   : > { %743 = vst.msk [vmem:[%s210_s5] sm:$0xff] %vm742_vm4, %v740_v21 }
 0x597   : > { %v732_v24 = vpop.permute.xlu0 %731 }
 0x598   : > { %v741_v25 = vsel %vm739_vm3, %v738_v23, %v732_v24 }
 0x599   : > { %744 = vst.msk [vmem:[%s210_s5 + $0x8] sm:$0xff] %vm742_vm4, %v741_v25 }
 0x59a PF: > { %s13_s12 = sadd.s32 1, %s969_s12  }
 0x59b   : > { %p10_p4 = scmp.ge.s32.totalorder %s13_s12, 4  }
 0x59d   :  { %12 = sbr.rel (!%p10_p4) target bundleno = 1 (0x1), region = 68 }

// kernel: _lambda_.43
= control target key start
LH: loop header
LB: loop body
LE: loop exit
PB: predicated region body
PF: predicated region fallthrough
CT: control target
= control target key end

     0   :  { %vm40_vm0 = vcmask 261120   ;;  %s402_s1 = inlined_call_operand.vmem [shape: f32[32,128], index: 1, kind: input, shape index: {}]   ;;  %s403_s0 = inlined_call_operand.vmem [shape: f32[32,32], index: 0, kind: input, shape index: {}]   ;;  %s404_s3 = inlined_call_operand.vmem [shape: f32[128,32], index: 3, kind: input, shape index: {}]   ;;  %s405_s2 = inlined_call_operand.vmem [shape: f32[1,128], index: 2, kind: input, shape index: {}]   ;;  %s406_s4 = inlined_call_operand.vmem [shape: f32[1,32], index: 4, kind: input, shape index: {}]   ;;  %s407_s5 = inlined_call_operand.vmem [shape: f32[32,32], index: 5, kind: output, shape index: {}]  }
   0x1   :  { %v27_v0 = vld [vmem:[%s402_s1 + $0x10] sm:$0xff]  ;;  %v28_v1 = vld [vmem:[%s402_s1 + $0x18] sm:$0xff]  ;;  %v25_v2 = vld [vmem:[%s402_s1] sm:$0xff] }
   0x2   :  { %v30_v3 = vpack.c.bf16 %v28_v1, %v27_v0  ;;  %v26_v4 = vld [vmem:[%s402_s1 + $0x8] sm:$0xff]  ;;  %v21_v5 = vld [vmem:[%s403_s0] sm:$0xff]  ;;  %v23_v9 = vld [vmem:[%s403_s0 + $0x10] sm:$0xff] }
   0x3   :  { %v22_v6 = vld [vmem:[%s403_s0 + $0x8] sm:$0xff]  ;;  %v29_v7 = vpack.c.bf16 %v26_v4, %v25_v2  ;;  %v24_v10 = vld [vmem:[%s403_s0 + $0x18] sm:$0xff]  ;;  %v146_v12 = vld [vmem:[%s404_s3 + $0x70] sm:$0xff] }
   0x4   :  { %v32_v8 = vpack.c.bf16 %v22_v6, %v21_v5  ;;  %240 = vmatprep.subr.bf16.mxu0 %v30_v3  ;;  %v33_v11 = vpack.c.bf16 %v24_v10, %v23_v9  ;;  %v147_v13 = vld [vmem:[%s404_s3 + $0x78] sm:$0xff]  ;;  %v144_v15 = vld [vmem:[%s404_s3 + $0x60] sm:$0xff]  ;;  %v145_v16 = vld [vmem:[%s404_s3 + $0x68] sm:$0xff] }
   0x5   :  { %241 = vmatpush3.bf16.msra.mxu0 %v30_v3  ;;  %v155_v14 = vpack.c.bf16 %v147_v13, %v146_v12  ;;  %v154_v17 = vpack.c.bf16 %v145_v16, %v144_v15  ;;  %v142_v18 = vld [vmem:[%s404_s3 + $0x50] sm:$0xff]  ;;  %v143_v19 = vld [vmem:[%s404_s3 + $0x58] sm:$0xff]  ;;  %v140_v21 = vld [vmem:[%s404_s3 + $0x40] sm:$0xff] }
   0x6   :  { %244 = vmatprep.mubr.msk.bf16.mxu0 %vm40_vm0, %v32_v8  ;;  %242 = vmatprep.subr.bf16.mxu0 %v29_v7  ;;  %v153_v20 = vpack.c.bf16 %v143_v19, %v142_v18  ;;  %v141_v22 = vld [vmem:[%s404_s3 + $0x48] sm:$0xff]  ;;  %v138_v23 = vld [vmem:[%s404_s3 + $0x30] sm:$0xff]  ;;  %v139_v25 = vld [vmem:[%s404_s3 + $0x38] sm:$0xff] }
   0x7   :  { %248 = vmatprep.subr.bf16.mxu1 %v155_v14  ;;  %v152_v24 = vpack.c.bf16 %v141_v22, %v140_v21  ;;  %v151_v26 = vpack.c.bf16 %v139_v25, %v138_v23  ;;  %v136_v27 = vld [vmem:[%s404_s3 + $0x20] sm:$0xff]  ;;  %v137_v28 = vld [vmem:[%s404_s3 + $0x28] sm:$0xff]  ;;  %v134_v30 = vld [vmem:[%s404_s3 + $0x10] sm:$0xff] }
   0x8   :  { %249 = vmatpush3.bf16.msra.mxu1 %v155_v14  ;;  %v150_v29 = vpack.c.bf16 %v137_v28, %v136_v27  ;;  %v135_v31 = vld [vmem:[%s404_s3 + $0x18] sm:$0xff]  ;;  %v132_v33 = vld [vmem:[%s404_s3] sm:$0xff]  ;;  %v133_v34 = vld [vmem:[%s404_s3 + $0x8] sm:$0xff] }
   0x9   :  { %243 = vmatpush3.bf16.msra.mxu0 %v29_v7  ;;  %250 = vmatprep.subr.bf16.mxu1 %v154_v17  ;;  %v149_v32 = vpack.c.bf16 %v135_v31, %v134_v30  ;;  %v148_v35 = vpack.c.bf16 %v133_v34, %v132_v33  ;;  %v222_v36 = vld [vmem:[%s405_s2] ss:$0 sm:$0xff] }
   0xa   :  { %v225_v19 = vld [vmem:[%s406_s4] ss:$0 sm:$0xff] }
   0xc   :  { %245 = vmatmul.mubr.msk.bf16.vlgmr.msra.gmra.mxu0 %vm40_vm0, %v33_v11  ;;  %251 = vmatpush3.bf16.msra.mxu1 %v154_v17 }
   0xd   :  { %252 = vmatprep.subr.bf16.mxu1 %v153_v20 }
  0x10   :  { %253 = vmatpush3.bf16.msra.mxu1 %v153_v20 }
  0x11   :  { %254 = vmatprep.subr.bf16.mxu1 %v152_v24 }
  0x14   :  { %255 = vmatpush3.bf16.msra.mxu1 %v152_v24 }
  0x15   :  { %256 = vmatprep.subr.bf16.mxu1 %v151_v26 }
  0x18   :  { %257 = vmatpush3.bf16.msra.mxu1 %v151_v26 }
  0x19   :  { %258 = vmatprep.subr.bf16.mxu1 %v150_v29 }
  0x1c   :  { %259 = vmatpush3.bf16.msra.mxu1 %v150_v29 }
  0x1d   :  { %260 = vmatprep.subr.bf16.mxu1 %v149_v32 }
  0x20   :  { %261 = vmatpush3.bf16.msra.mxu1 %v149_v32 }
  0x21   :  { %262 = vmatprep.subr.bf16.mxu1 %v148_v35 }
  0x24   :  { %263 = vmatpush3.bf16.msra.mxu1 %v148_v35 }
  0xcc   :  { %v246_v37 = vpop.f32.mrf.mxu0 }
  0xcd   :  { %v90_v38 = vadd.f32 %v246_v37, %v222_v36 }
  0xce   :  { %v81_v39 = vpop.f32.mrf.mxu0 }
  0xcf   :  { %v98_v40 = vmul.f32 %v90_v38, %v90_v38  ;;  %v82_v41 = vadd.f32 %v222_v36, %v81_v39 }
  0xd0   :  { %v247_v42 = vpop.f32.mrf.mxu0 }
  0xd1   :  { %v102_v43 = vmul.f32 %v98_v40, %v90_v38  ;;  %v96_v44 = vmul.f32 %v82_v41, %v82_v41  ;;  %v93_v45 = vadd.f32 %v247_v42, %v222_v36 }
  0xd2   :  { %v84_v46 = vpop.f32.mrf.mxu0 }
  0xd3   :  { %v106_v47 = vmul.f32 0.044715, %v102_v43  ;;  %v100_v48 = vmul.f32 %v96_v44, %v82_v41  ;;  %v99_v49 = vmul.f32 %v93_v45, %v93_v45  ;;  %v85_v50 = vadd.f32 %v222_v36, %v84_v46 }
  0xd5   :  { %v110_v51 = vadd.f32 %v106_v47, %v90_v38  ;;  %v104_v52 = vmul.f32 0.044715, %v100_v48  ;;  %v103_v53 = vmul.f32 %v99_v49, %v93_v45  ;;  %v97_v54 = vmul.f32 %v85_v50, %v85_v50 }
  0xd7   :  { %v114_v55 = vmul.f32 0.7978846, %v110_v51  ;;  %v108_v56 = vadd.f32 %v104_v52, %v82_v41  ;;  %v107_v57 = vmul.f32 0.044715, %v103_v53  ;;  %v101_v58 = vmul.f32 %v97_v54, %v85_v50 }
  0xd9   :  { %v111_v59 = vadd.f32 %v107_v57, %v93_v45  ;;  %v105_v60 = vmul.f32 0.044715, %v101_v58  ;;  %v112_v61 = vmul.f32 0.7978846, %v108_v56  ;;  %268 = vtanh.f32 %v114_v55 }
  0xdb   :  { %v115_v62 = vmul.f32 0.7978846, %v111_v59  ;;  %v109_v63 = vadd.f32 %v105_v60, %v85_v50  ;;  %270 = vtanh.f32 %v112_v61 }
  0xdd   :  { %272 = vtanh.f32 %v115_v62  ;;  %v113_v0 = vmul.f32 0.7978846, %v109_v63 }
  0xdf   :  { %274 = vtanh.f32 %v113_v0 }
  0xe6   :  { %v269_v1 = vpop.eup %268 }
  0xe7   :  { %v122_v5 = vadd.f32 1.0, %v269_v1 }
  0xe8   :  { %v271_v2 = vpop.eup %270 }
  0xe9   :  { %v120_v3 = vadd.f32 1.0, %v271_v2  ;;  %v126_v11 = vmul.f32 0.5, %v122_v5 }
  0xea   :  { %v273_v4 = vpop.eup %272 }
  0xeb   :  { %v123_v6 = vadd.f32 1.0, %v273_v4  ;;  %v124_v9 = vmul.f32 0.5, %v120_v3  ;;  %v130_v16 = vmul.f32 %v126_v11, %v90_v38 }
  0xec   :  { %v275_v7 = vpop.eup %274 }
  0xed   :  { %v121_v8 = vadd.f32 1.0, %v275_v7  ;;  %v127_v10 = vmul.f32 0.5, %v123_v6  ;;  %v128_v14 = vmul.f32 %v124_v9, %v82_v41 }
  0xef   :  { %v125_v12 = vmul.f32 0.5, %v121_v8  ;;  %v131_v13 = vmul.f32 %v127_v10, %v93_v45 }
  0xf1   :  { %v129_v15 = vmul.f32 %v125_v12, %v85_v50  ;;  %v158_v18 = vpack.c.bf16 %v131_v13, %v130_v16 }
  0xf3   :  { %v157_v17 = vpack.c.bf16 %v129_v15, %v128_v14 }
  0xf5   :  { %264 = vmatprep.mubr.bf16.mxu1 %v157_v17 }
  0xf6   :  { %265 = vmatmul.mubr.bf16.vlgmr.msra.gmra.mxu1 %v158_v18 }
 0x1b6   :  { %v266_v20 = vpop.f32.mrf.mxu1 }
 0x1b7   :  { %v208_v21 = vadd.f32 %v266_v20, %v225_v19 }
 0x1b8   :  { %v199_v22 = vpop.f32.mrf.mxu1 }
 0x1b9   :  { %216 = vst.msk [vmem:[%s407_s5 + $0x10] sm:$0xff] %vm40_vm0, %v208_v21  ;;  %v200_v23 = vadd.f32 %v225_v19, %v199_v22 }
 0x1ba   :  { %v267_v24 = vpop.f32.mrf.mxu1 }
 0x1bb   :  { %214 = vst.msk [vmem:[%s407_s5] sm:$0xff] %vm40_vm0, %v200_v23  ;;  %v211_v25 = vadd.f32 %v267_v24, %v225_v19 }
 0x1bc   :  { %v202_v26 = vpop.f32.mrf.mxu1 }
 0x1bd   :  { %217 = vst.msk [vmem:[%s407_s5 + $0x18] sm:$0xff] %vm40_vm0, %v211_v25  ;;  %v203_v27 = vadd.f32 %v225_v19, %v202_v26 }
 0x1bf   :  { %215 = vst.msk [vmem:[%s407_s5 + $0x8] sm:$0xff] %vm40_vm0, %v203_v27 }

// kernel: _lambda_.56
= control target key start
LH: loop header
LB: loop body
LE: loop exit
PB: predicated region body
PF: predicated region fallthrough
CT: control target
= control target key end

     0   :  { %vm127_vm0 = vcmask 1043456   ;;  %vm78_vm1 = vcmask 64512   ;;  %vm359_vm2 = vcmask 523264   ;;  %vm569_vm3 = vcmask 261120   ;;  %s1139_s1 = inlined_call_operand.vmem [shape: f32[8,64], index: 1, kind: input, shape index: {}]   ;;  %s1140_s0 = inlined_call_operand.vmem [shape: f32[256,8], index: 0, kind: input, shape index: {}]   ;;  %s1141_s3 = inlined_call_operand.vmem [shape: f32[64,32], index: 3, kind: input, shape index: {}]   ;;  %s1142_s2 = inlined_call_operand.vmem [shape: f32[1,64], index: 2, kind: input, shape index: {}]   ;;  %s1143_s4 = inlined_call_operand.vmem [shape: f32[1,32], index: 4, kind: input, shape index: {}]   ;;  %s1144_s5 = inlined_call_operand.vmem [shape: f32[256,32], index: 5, kind: output, shape index: {}]  }
   0x1   :  { %v53_v0 = vld [vmem:[%s1139_s1] sm:$0xff]  ;;  %v22_v2 = vld [vmem:[%s1140_s0 + $0x8] sm:$0xff]  ;;  %v23_v5 = vld [vmem:[%s1140_s0 + $0x10] sm:$0xff] }
   0x2   :  { %v21_v1 = vld [vmem:[%s1140_s0] sm:$0xff]  ;;  %v54_v3 = vpack.c.bf16 %v53_v0, %v53_v0  ;;  %v24_v6 = vld [vmem:[%s1140_s0 + $0x18] sm:$0xff]  ;;  %v26_v8 = vld [vmem:[%s1140_s0 + $0x28] sm:$0xff] }
   0x3   :  { %v56_v4 = vpack.c.bf16 %v22_v2, %v21_v1  ;;  %v25_v7 = vld [vmem:[%s1140_s0 + $0x20] sm:$0xff]  ;;  %v57_v10 = vpack.c.bf16 %v24_v6, %v23_v5  ;;  %v27_v12 = vld [vmem:[%s1140_s0 + $0x30] sm:$0xff]  ;;  %v28_v13 = vld [vmem:[%s1140_s0 + $0x38] sm:$0xff] }
   0x4   :  { %751 = vmatprep.subr.msk.bf16.mxu0 %vm127_vm0, %v54_v3  ;;  %v129_v9 = vsel %vm127_vm0, %v54_v3, 0  ;;  %v58_v11 = vpack.c.bf16 %v26_v8, %v25_v7  ;;  %v29_v14 = vld [vmem:[%s1140_s0 + $0x40] sm:$0xff]  ;;  %v30_v15 = vld [vmem:[%s1140_s0 + $0x48] sm:$0xff]  ;;  %v59_v16 = vpack.c.bf16 %v28_v13, %v27_v12  ;;  %v330_v17 = vld [vmem:[%s1141_s3 + $0x30] sm:$0xff] }
   0x5   :  { %679 = vmatprep.mubr.msk.bf16.mxu0 %vm78_vm1, %v56_v4  ;;  %678 = vmatpush3.bf16.msra.mxu0 %v129_v9  ;;  %v331_v18 = vld [vmem:[%s1141_s3 + $0x38] sm:$0xff]  ;;  %v60_v19 = vpack.c.bf16 %v30_v15, %v29_v14  ;;  %v31_v21 = vld [vmem:[%s1140_s0 + $0x50] sm:$0xff]  ;;  %v33_v23 = vld [vmem:[%s1140_s0 + $0x60] sm:$0xff] }
   0x6   :  { %v335_v20 = vpack.c.bf16 %v331_v18, %v330_v17  ;;  %v32_v22 = vld [vmem:[%s1140_s0 + $0x58] sm:$0xff]  ;;  %v34_v24 = vld [vmem:[%s1140_s0 + $0x68] sm:$0xff]  ;;  %v35_v27 = vld [vmem:[%s1140_s0 + $0x70] sm:$0xff] }
   0x7   :  { %v61_v25 = vpack.c.bf16 %v32_v22, %v31_v21  ;;  %v62_v26 = vpack.c.bf16 %v34_v24, %v33_v23  ;;  %v36_v28 = vld [vmem:[%s1140_s0 + $0x78] sm:$0xff]  ;;  %v37_v29 = vld [vmem:[%s1140_s0 + $0x80] sm:$0xff]  ;;  %v38_v30 = vld [vmem:[%s1140_s0 + $0x88] sm:$0xff] }
   0x8   :  { %680 = vmatmul.mubr.msk.bf16.vlgmr.msra.gmra.mxu0 %vm78_vm1, %v57_v10  ;;  %711 = vmatprep.subr.bf16.mxu1 %v335_v20  ;;  %v63_v31 = vpack.c.bf16 %v36_v28, %v35_v27  ;;  %v64_v32 = vpack.c.bf16 %v38_v30, %v37_v29  ;;  %v39_v33 = vld [vmem:[%s1140_s0 + $0x90] sm:$0xff]  ;;  %v40_v34 = vld [vmem:[%s1140_s0 + $0x98] sm:$0xff]  ;;  %v41_v35 = vld [vmem:[%s1140_s0 + $0xa0] sm:$0xff] }
   0x9   :  { %683 = vmatprep.mubr.msk.bf16.mxu0 %vm78_vm1, %v58_v11  ;;  %712 = vmatpush3.bf16.msra.mxu1 %v335_v20  ;;  %v42_v36 = vld [vmem:[%s1140_s0 + $0xa8] sm:$0xff]  ;;  %v65_v37 = vpack.c.bf16 %v40_v34, %v39_v33  ;;  %v43_v39 = vld [vmem:[%s1140_s0 + $0xb0] sm:$0xff]  ;;  %v44_v40 = vld [vmem:[%s1140_s0 + $0xb8] sm:$0xff] }
   0xa   :  { %v66_v38 = vpack.c.bf16 %v42_v36, %v41_v35  ;;  %v45_v41 = vld [vmem:[%s1140_s0 + $0xc0] sm:$0xff]  ;;  %v46_v42 = vld [vmem:[%s1140_s0 + $0xc8] sm:$0xff]  ;;  %v67_v43 = vpack.c.bf16 %v44_v40, %v43_v39  ;;  %v47_v45 = vld [vmem:[%s1140_s0 + $0xd0] sm:$0xff] }
   0xb   :  { %v68_v44 = vpack.c.bf16 %v46_v42, %v45_v41  ;;  %v48_v46 = vld [vmem:[%s1140_s0 + $0xd8] sm:$0xff]  ;;  %v49_v47 = vld [vmem:[%s1140_s0 + $0xe0] sm:$0xff]  ;;  %v50_v48 = vld [vmem:[%s1140_s0 + $0xe8] sm:$0xff] }
   0xc   :  { %v69_v49 = vpack.c.bf16 %v48_v46, %v47_v45  ;;  %v70_v50 = vpack.c.bf16 %v50_v48, %v49_v47  ;;  %v51_v51 = vld [vmem:[%s1140_s0 + $0xf0] sm:$0xff]  ;;  %v52_v52 = vld [vmem:[%s1140_s0 + $0xf8] sm:$0xff]  ;;  %v328_v54 = vld [vmem:[%s1141_s3 + $0x20] sm:$0xff] }
   0xd   :  { %v71_v53 = vpack.c.bf16 %v52_v52, %v51_v51  ;;  %v329_v55 = vld [vmem:[%s1141_s3 + $0x28] sm:$0xff]  ;;  %v326_v57 = vld [vmem:[%s1141_s3 + $0x10] sm:$0xff]  ;;  %v327_v58 = vld [vmem:[%s1141_s3 + $0x18] sm:$0xff] }
   0xe   :  { %v334_v56 = vpack.c.bf16 %v329_v55, %v328_v54  ;;  %v333_v59 = vpack.c.bf16 %v327_v58, %v326_v57  ;;  %v324_v60 = vld [vmem:[%s1141_s3] sm:$0xff]  ;;  %v325_v61 = vld [vmem:[%s1141_s3 + $0x8] sm:$0xff] }
   0xf   :  { %v332_v62 = vpack.c.bf16 %v325_v61, %v324_v60  ;;  %v924_v1 = vld [vmem:[%s1142_s2] ss:$0 sm:$0xff] }
  0x10   :  { %684 = vmatmul.mubr.msk.bf16.gmra.mxu0 %vm78_vm1, %v59_v16  ;;  %713 = vmatprep.subr.bf16.mxu1 %v334_v56 }
  0x11   :  { %687 = vmatprep.mubr.msk.bf16.mxu0 %vm78_vm1, %v60_v19  ;;  %714 = vmatpush3.bf16.msra.mxu1 %v334_v56 }
  0x12   :  { %715 = vmatprep.subr.bf16.mxu1 %v333_v59 }
  0x15   :  { %716 = vmatpush3.bf16.msra.mxu1 %v333_v59 }
  0x16   :  { %717 = vmatprep.subr.bf16.mxu1 %v332_v62 }
  0x18   :  { %688 = vmatmul.mubr.msk.bf16.gmra.mxu0 %vm78_vm1, %v61_v25 }
  0x19   :  { %691 = vmatprep.mubr.msk.bf16.mxu0 %vm78_vm1, %v62_v26  ;;  %718 = vmatpush3.bf16.msra.mxu1 %v332_v62 }
  0x20   :  { %692 = vmatmul.mubr.msk.bf16.gmra.mxu0 %vm78_vm1, %v63_v31 }
  0x21   :  { %695 = vmatprep.mubr.msk.bf16.mxu0 %vm78_vm1, %v64_v32 }
  0x28   :  { %696 = vmatmul.mubr.msk.bf16.gmra.mxu0 %vm78_vm1, %v65_v37 }
  0x29   :  { %699 = vmatprep.mubr.msk.bf16.mxu0 %vm78_vm1, %v66_v38 }
  0x30   :  { %700 = vmatmul.mubr.msk.bf16.gmra.mxu0 %vm78_vm1, %v67_v43 }
  0x31   :  { %703 = vmatprep.mubr.msk.bf16.mxu0 %vm78_vm1, %v68_v44 }
  0x38   :  { %704 = vmatmul.mubr.msk.bf16.gmra.mxu0 %vm78_vm1, %v69_v49 }
  0x39   :  { %707 = vmatprep.mubr.msk.bf16.mxu0 %vm78_vm1, %v70_v50 }
  0x40   :  { %708 = vmatmul.mubr.msk.bf16.gmra.mxu0 %vm78_vm1, %v71_v53 }
  0xc8   :  { %v681_v63 = vpop.f32.mrf.mxu0 }
  0xc9   :  { %v174_v5 = vadd.f32 %v681_v63, %v924_v1 }
  0xca   :  { %v165_v0 = vpop.f32.mrf.mxu0 }
  0xcb   :  { %v166_v3 = vadd.f32 %v924_v1, %v165_v0  ;;  %v294_v12 = vmax.f32 %v174_v5, 0.0 }
  0xcc   :  { %v682_v2 = vpop.f32.mrf.mxu0 }
  0xcd   :  { %v177_v4 = vadd.f32 %v682_v2, %v924_v1  ;;  %v292_v10 = vmax.f32 %v166_v3, 0.0 }
  0xce   :  { %v168_v6 = vpop.f32.mrf.mxu0 }
  0xcf   :  { %v169_v7 = vadd.f32 %v924_v1, %v168_v6  ;;  %v295_v8 = vmax.f32 %v177_v4, 0.0 }
  0xd0   :  { %v685_v9 = vpop.f32.mrf.mxu0 }
  0xd1   :  { %v293_v11 = vmax.f32 %v169_v7, 0.0  ;;  %v338_v15 = vpack.c.bf16 %v295_v8, %v294_v12  ;;  %v190_v19 = vadd.f32 %v685_v9, %v924_v1 }
  0xd2   :  { %v181_v13 = vpop.f32.mrf.mxu0 }
  0xd3   :  { %v337_v14 = vpack.c.bf16 %v293_v11, %v292_v10  ;;  %v182_v17 = vadd.f32 %v924_v1, %v181_v13  ;;  %v298_v26 = vmax.f32 %v190_v19, 0.0 }
  0xd4   :  { %v686_v16 = vpop.f32.mrf.mxu0 }
  0xd5   :  { %v193_v18 = vadd.f32 %v686_v16, %v924_v1  ;;  %719 = vmatprep.mubr.msk.bf16.mxu1 %vm359_vm2, %v337_v14  ;;  %v296_v24 = vmax.f32 %v182_v17, 0.0 }
  0xd6   :  { %v184_v20 = vpop.f32.mrf.mxu0  ;;  %720 = vmatmul.mubr.msk.bf16.vlgmr.msra.gmra.mxu1 %vm359_vm2, %v338_v15 }
  0xd7   :  { %v185_v21 = vadd.f32 %v924_v1, %v184_v20  ;;  %v299_v22 = vmax.f32 %v193_v18, 0.0 }
  0xd8   :  { %v689_v23 = vpop.f32.mrf.mxu0 }
  0xd9   :  { %v297_v25 = vmax.f32 %v185_v21, 0.0  ;;  %v340_v29 = vpack.c.bf16 %v299_v22, %v298_v26  ;;  %v206_v33 = vadd.f32 %v689_v23, %v924_v1 }
  0xda   :  { %v197_v27 = vpop.f32.mrf.mxu0 }
  0xdb   :  { %v339_v28 = vpack.c.bf16 %v297_v25, %v296_v24  ;;  %v198_v31 = vadd.f32 %v924_v1, %v197_v27  ;;  %v302_v40 = vmax.f32 %v206_v33, 0.0 }
  0xdc   :  { %v690_v30 = vpop.f32.mrf.mxu0 }
  0xdd   :  { %v209_v32 = vadd.f32 %v690_v30, %v924_v1  ;;  %723 = vmatprep.mubr.msk.bf16.mxu1 %vm359_vm2, %v339_v28  ;;  %v300_v38 = vmax.f32 %v198_v31, 0.0 }
  0xde   :  { %v200_v34 = vpop.f32.mrf.mxu0  ;;  %724 = vmatmul.mubr.msk.bf16.gmra.mxu1 %vm359_vm2, %v340_v29 }
  0xdf   :  { %v201_v35 = vadd.f32 %v924_v1, %v200_v34  ;;  %v303_v36 = vmax.f32 %v209_v32, 0.0 }
  0xe0   :  { %v693_v37 = vpop.f32.mrf.mxu0 }
  0xe1   :  { %v301_v39 = vmax.f32 %v201_v35, 0.0  ;;  %v342_v43 = vpack.c.bf16 %v303_v36, %v302_v40  ;;  %v222_v47 = vadd.f32 %v693_v37, %v924_v1 }
  0xe2   :  { %v213_v41 = vpop.f32.mrf.mxu0 }
  0xe3   :  { %v341_v42 = vpack.c.bf16 %v301_v39, %v300_v38  ;;  %v214_v45 = vadd.f32 %v924_v1, %v213_v41  ;;  %v306_v54 = vmax.f32 %v222_v47, 0.0 }
  0xe4   :  { %v694_v44 = vpop.f32.mrf.mxu0 }
  0xe5   :  { %v225_v46 = vadd.f32 %v694_v44, %v924_v1  ;;  %727 = vmatprep.mubr.msk.bf16.mxu1 %vm359_vm2, %v341_v42  ;;  %v304_v52 = vmax.f32 %v214_v45, 0.0 }
  0xe6   :  { %v216_v48 = vpop.f32.mrf.mxu0  ;;  %728 = vmatmul.mubr.msk.bf16.gmra.mxu1 %vm359_vm2, %v342_v43 }
  0xe7   :  { %v217_v49 = vadd.f32 %v924_v1, %v216_v48  ;;  %v307_v50 = vmax.f32 %v225_v46, 0.0 }
  0xe8   :  { %v697_v51 = vpop.f32.mrf.mxu0 }
  0xe9   :  { %v305_v53 = vmax.f32 %v217_v49, 0.0  ;;  %v344_v57 = vpack.c.bf16 %v307_v50, %v306_v54  ;;  %v238_v61 = vadd.f32 %v697_v51, %v924_v1  ;;  %v977_v49 = vld [vmem:[%s1143_s4] ss:$0 sm:$0xff] }
  0xea   :  { %v229_v55 = vpop.f32.mrf.mxu0 }
  0xeb   :  { %v343_v56 = vpack.c.bf16 %v305_v53, %v304_v52  ;;  %v230_v59 = vadd.f32 %v924_v1, %v229_v55  ;;  %v310_v5 = vmax.f32 %v238_v61, 0.0 }
  0xec   :  { %v698_v58 = vpop.f32.mrf.mxu0 }
  0xed   :  { %v241_v60 = vadd.f32 %v698_v58, %v924_v1  ;;  %731 = vmatprep.mubr.msk.bf16.mxu1 %vm359_vm2, %v343_v56  ;;  %v308_v3 = vmax.f32 %v230_v59, 0.0 }
  0xee   :  { %v232_v62 = vpop.f32.mrf.mxu0  ;;  %732 = vmatmul.mubr.msk.bf16.gmra.mxu1 %vm359_vm2, %v344_v57 }
  0xef   :  { %v233_v63 = vadd.f32 %v924_v1, %v232_v62  ;;  %v311_v0 = vmax.f32 %v241_v60, 0.0 }
  0xf0   :  { %v701_v2 = vpop.f32.mrf.mxu0 }
  0xf1   :  { %v309_v4 = vmax.f32 %v233_v63, 0.0  ;;  %v346_v8 = vpack.c.bf16 %v311_v0, %v310_v5  ;;  %v254_v12 = vadd.f32 %v701_v2, %v924_v1 }
  0xf2   :  { %v245_v6 = vpop.f32.mrf.mxu0 }
  0xf3   :  { %v345_v7 = vpack.c.bf16 %v309_v4, %v308_v3  ;;  %v246_v10 = vadd.f32 %v924_v1, %v245_v6  ;;  %v314_v19 = vmax.f32 %v254_v12, 0.0 }
  0xf4   :  { %v702_v9 = vpop.f32.mrf.mxu0 }
  0xf5   :  { %v257_v11 = vadd.f32 %v702_v9, %v924_v1  ;;  %735 = vmatprep.mubr.msk.bf16.mxu1 %vm359_vm2, %v345_v7  ;;  %v312_v17 = vmax.f32 %v246_v10, 0.0 }
  0xf6   :  { %v248_v13 = vpop.f32.mrf.mxu0  ;;  %736 = vmatmul.mubr.msk.bf16.gmra.mxu1 %vm359_vm2, %v346_v8 }
  0xf7   :  { %v249_v14 = vadd.f32 %v924_v1, %v248_v13  ;;  %v315_v15 = vmax.f32 %v257_v11, 0.0 }
  0xf8   :  { %v705_v16 = vpop.f32.mrf.mxu0 }
  0xf9   :  { %v313_v18 = vmax.f32 %v249_v14, 0.0  ;;  %v348_v22 = vpack.c.bf16 %v315_v15, %v314_v19  ;;  %v270_v26 = vadd.f32 %v705_v16, %v924_v1 }
  0xfa   :  { %v261_v20 = vpop.f32.mrf.mxu0 }
  0xfb   :  { %v347_v21 = vpack.c.bf16 %v313_v18, %v312_v17  ;;  %v262_v24 = vadd.f32 %v924_v1, %v261_v20  ;;  %v318_v33 = vmax.f32 %v270_v26, 0.0 }
  0xfc   :  { %v706_v23 = vpop.f32.mrf.mxu0 }
  0xfd   :  { %v273_v25 = vadd.f32 %v706_v23, %v924_v1  ;;  %739 = vmatprep.mubr.msk.bf16.mxu1 %vm359_vm2, %v347_v21  ;;  %v316_v31 = vmax.f32 %v262_v24, 0.0 }
  0xfe   :  { %v264_v27 = vpop.f32.mrf.mxu0  ;;  %740 = vmatmul.mubr.msk.bf16.gmra.mxu1 %vm359_vm2, %v348_v22 }
  0xff   :  { %v265_v28 = vadd.f32 %v924_v1, %v264_v27  ;;  %v319_v29 = vmax.f32 %v273_v25, 0.0 }
 0x100   :  { %v709_v30 = vpop.f32.mrf.mxu0 }
 0x101   :  { %v317_v32 = vmax.f32 %v265_v28, 0.0  ;;  %v350_v36 = vpack.c.bf16 %v319_v29, %v318_v33  ;;  %v286_v40 = vadd.f32 %v709_v30, %v924_v1 }
 0x102   :  { %v277_v34 = vpop.f32.mrf.mxu0 }
 0x103   :  { %v349_v35 = vpack.c.bf16 %v317_v32, %v316_v31  ;;  %v278_v38 = vadd.f32 %v924_v1, %v277_v34  ;;  %v322_v46 = vmax.f32 %v286_v40, 0.0 }
 0x104   :  { %v710_v37 = vpop.f32.mrf.mxu0 }
 0x105   :  { %v289_v39 = vadd.f32 %v710_v37, %v924_v1  ;;  %743 = vmatprep.mubr.msk.bf16.mxu1 %vm359_vm2, %v349_v35  ;;  %v320_v44 = vmax.f32 %v278_v38, 0.0 }
 0x106   :  { %v280_v41 = vpop.f32.mrf.mxu0  ;;  %744 = vmatmul.mubr.msk.bf16.gmra.mxu1 %vm359_vm2, %v350_v36 }
 0x107   :  { %v281_v42 = vadd.f32 %v924_v1, %v280_v41  ;;  %v323_v43 = vmax.f32 %v289_v39, 0.0 }
 0x109   :  { %v321_v45 = vmax.f32 %v281_v42, 0.0  ;;  %v352_v48 = vpack.c.bf16 %v323_v43, %v322_v46 }
 0x10b   :  { %v351_v47 = vpack.c.bf16 %v321_v45, %v320_v44 }
 0x10d   :  { %747 = vmatprep.mubr.msk.bf16.mxu1 %vm359_vm2, %v351_v47 }
 0x10e   :  { %748 = vmatmul.mubr.msk.bf16.gmra.mxu1 %vm359_vm2, %v352_v48 }
 0x196   :  { %v721_v50 = vpop.f32.mrf.mxu1 }
 0x197   :  { %v451_v51 = vadd.f32 %v721_v50, %v977_v49 }
 0x198   :  { %v442_v1 = vpop.f32.mrf.mxu1 }
 0x199   :  { %572 = vst.msk [vmem:[%s1144_s5 + $0x10] sm:$0xff] %vm569_vm3, %v451_v51  ;;  %v443_v52 = vadd.f32 %v977_v49, %v442_v1 }
 0x19a   :  { %v722_v53 = vpop.f32.mrf.mxu1 }
 0x19b   :  { %570 = vst.msk [vmem:[%s1144_s5] sm:$0xff] %vm569_vm3, %v443_v52  ;;  %v454_v54 = vadd.f32 %v722_v53, %v977_v49 }
 0x19c   :  { %v445_v55 = vpop.f32.mrf.mxu1 }
 0x19d   :  { %573 = vst.msk [vmem:[%s1144_s5 + $0x18] sm:$0xff] %vm569_vm3, %v454_v54  ;;  %v446_v56 = vadd.f32 %v977_v49, %v445_v55 }
 0x19e   :  { %v725_v57 = vpop.f32.mrf.mxu1 }
 0x19f   :  { %571 = vst.msk [vmem:[%s1144_s5 + $0x8] sm:$0xff] %vm569_vm3, %v446_v56  ;;  %v467_v58 = vadd.f32 %v725_v57, %v977_v49 }
 0x1a0   :  { %v458_v59 = vpop.f32.mrf.mxu1 }
 0x1a1   :  { %576 = vst.msk [vmem:[%s1144_s5 + $0x30] sm:$0xff] %vm569_vm3, %v467_v58  ;;  %v459_v60 = vadd.f32 %v977_v49, %v458_v59 }
 0x1a2   :  { %v726_v61 = vpop.f32.mrf.mxu1 }
 0x1a3   :  { %574 = vst.msk [vmem:[%s1144_s5 + $0x20] sm:$0xff] %vm569_vm3, %v459_v60  ;;  %v470_v62 = vadd.f32 %v726_v61, %v977_v49 }
 0x1a4   :  { %v461_v63 = vpop.f32.mrf.mxu1 }
 0x1a5   :  { %577 = vst.msk [vmem:[%s1144_s5 + $0x38] sm:$0xff] %vm569_vm3, %v470_v62  ;;  %v462_v0 = vadd.f32 %v977_v49, %v461_v63 }
 0x1a6   :  { %v729_v2 = vpop.f32.mrf.mxu1 }
 0x1a7   :  { %575 = vst.msk [vmem:[%s1144_s5 + $0x28] sm:$0xff] %vm569_vm3, %v462_v0  ;;  %v483_v3 = vadd.f32 %v729_v2, %v977_v49 }
 0x1a8   :  { %v474_v4 = vpop.f32.mrf.mxu1 }
 0x1a9   :  { %580 = vst.msk [vmem:[%s1144_s5 + $0x50] sm:$0xff] %vm569_vm3, %v483_v3  ;;  %v475_v5 = vadd.f32 %v977_v49, %v474_v4 }
 0x1aa   :  { %v730_v6 = vpop.f32.mrf.mxu1 }
 0x1ab   :  { %578 = vst.msk [vmem:[%s1144_s5 + $0x40] sm:$0xff] %vm569_vm3, %v475_v5  ;;  %v486_v7 = vadd.f32 %v730_v6, %v977_v49 }
 0x1ac   :  { %v477_v8 = vpop.f32.mrf.mxu1 }
 0x1ad   :  { %581 = vst.msk [vmem:[%s1144_s5 + $0x58] sm:$0xff] %vm569_vm3, %v486_v7  ;;  %v478_v9 = vadd.f32 %v977_v49, %v477_v8 }
 0x1ae   :  { %v733_v10 = vpop.f32.mrf.mxu1 }
 0x1af   :  { %579 = vst.msk [vmem:[%s1144_s5 + $0x48] sm:$0xff] %vm569_vm3, %v478_v9  ;;  %v499_v11 = vadd.f32 %v733_v10, %v977_v49 }
 0x1b0   :  { %v490_v12 = vpop.f32.mrf.mxu1 }
 0x1b1   :  { %584 = vst.msk [vmem:[%s1144_s5 + $0x70] sm:$0xff] %vm569_vm3, %v499_v11  ;;  %v491_v13 = vadd.f32 %v977_v49, %v490_v12 }
 0x1b2   :  { %v734_v14 = vpop.f32.mrf.mxu1 }
 0x1b3   :  { %582 = vst.msk [vmem:[%s1144_s5 + $0x60] sm:$0xff] %vm569_vm3, %v491_v13  ;;  %v502_v15 = vadd.f32 %v734_v14, %v977_v49 }
 0x1b4   :  { %v493_v16 = vpop.f32.mrf.mxu1 }
 0x1b5   :  { %585 = vst.msk [vmem:[%s1144_s5 + $0x78] sm:$0xff] %vm569_vm3, %v502_v15  ;;  %v494_v17 = vadd.f32 %v977_v49, %v493_v16 }
 0x1b6   :  { %v737_v18 = vpop.f32.mrf.mxu1 }
 0x1b7   :  { %583 = vst.msk [vmem:[%s1144_s5 + $0x68] sm:$0xff] %vm569_vm3, %v494_v17  ;;  %v515_v19 = vadd.f32 %v737_v18, %v977_v49 }
 0x1b8   :  { %v506_v20 = vpop.f32.mrf.mxu1 }
 0x1b9   :  { %588 = vst.msk [vmem:[%s1144_s5 + $0x90] sm:$0xff] %vm569_vm3, %v515_v19  ;;  %v507_v21 = vadd.f32 %v977_v49, %v506_v20 }
 0x1ba   :  { %v738_v22 = vpop.f32.mrf.mxu1 }
 0x1bb   :  { %586 = vst.msk [vmem:[%s1144_s5 + $0x80] sm:$0xff] %vm569_vm3, %v507_v21  ;;  %v518_v23 = vadd.f32 %v738_v22, %v977_v49 }
 0x1bc   :  { %v509_v24 = vpop.f32.mrf.mxu1 }
 0x1bd   :  { %589 = vst.msk [vmem:[%s1144_s5 + $0x98] sm:$0xff] %vm569_vm3, %v518_v23  ;;  %v510_v25 = vadd.f32 %v977_v49, %v509_v24 }
 0x1be   :  { %v741_v26 = vpop.f32.mrf.mxu1 }
 0x1bf   :  { %587 = vst.msk [vmem:[%s1144_s5 + $0x88] sm:$0xff] %vm569_vm3, %v510_v25  ;;  %v531_v27 = vadd.f32 %v741_v26, %v977_v49 }
 0x1c0   :  { %v522_v28 = vpop.f32.mrf.mxu1 }
 0x1c1   :  { %592 = vst.msk [vmem:[%s1144_s5 + $0xb0] sm:$0xff] %vm569_vm3, %v531_v27  ;;  %v523_v29 = vadd.f32 %v977_v49, %v522_v28 }
 0x1c2   :  { %v742_v30 = vpop.f32.mrf.mxu1 }
 0x1c3   :  { %590 = vst.msk [vmem:[%s1144_s5 + $0xa0] sm:$0xff] %vm569_vm3, %v523_v29  ;;  %v534_v31 = vadd.f32 %v742_v30, %v977_v49 }
 0x1c4   :  { %v525_v32 = vpop.f32.mrf.mxu1 }
 0x1c5   :  { %593 = vst.msk [vmem:[%s1144_s5 + $0xb8] sm:$0xff] %vm569_vm3, %v534_v31  ;;  %v526_v33 = vadd.f32 %v977_v49, %v525_v32 }
 0x1c6   :  { %v745_v34 = vpop.f32.mrf.mxu1 }
 0x1c7   :  { %591 = vst.msk [vmem:[%s1144_s5 + $0xa8] sm:$0xff] %vm569_vm3, %v526_v33  ;;  %v547_v35 = vadd.f32 %v745_v34, %v977_v49 }
 0x1c8   :  { %v538_v36 = vpop.f32.mrf.mxu1 }
 0x1c9   :  { %596 = vst.msk [vmem:[%s1144_s5 + $0xd0] sm:$0xff] %vm569_vm3, %v547_v35  ;;  %v539_v37 = vadd.f32 %v977_v49, %v538_v36 }
 0x1ca   :  { %v746_v38 = vpop.f32.mrf.mxu1 }
 0x1cb   :  { %594 = vst.msk [vmem:[%s1144_s5 + $0xc0] sm:$0xff] %vm569_vm3, %v539_v37  ;;  %v550_v39 = vadd.f32 %v746_v38, %v977_v49 }
 0x1cc   :  { %v541_v40 = vpop.f32.mrf.mxu1 }
 0x1cd   :  { %597 = vst.msk [vmem:[%s1144_s5 + $0xd8] sm:$0xff] %vm569_vm3, %v550_v39  ;;  %v542_v41 = vadd.f32 %v977_v49, %v541_v40 }
 0x1ce   :  { %v749_v42 = vpop.f32.mrf.mxu1 }
 0x1cf   :  { %595 = vst.msk [vmem:[%s1144_s5 + $0xc8] sm:$0xff] %vm569_vm3, %v542_v41  ;;  %v563_v43 = vadd.f32 %v749_v42, %v977_v49 }
 0x1d0   :  { %v554_v44 = vpop.f32.mrf.mxu1 }
 0x1d1   :  { %600 = vst.msk [vmem:[%s1144_s5 + $0xf0] sm:$0xff] %vm569_vm3, %v563_v43  ;;  %v555_v45 = vadd.f32 %v977_v49, %v554_v44 }
 0x1d2   :  { %v750_v46 = vpop.f32.mrf.mxu1 }
 0x1d3   :  { %598 = vst.msk [vmem:[%s1144_s5 + $0xe0] sm:$0xff] %vm569_vm3, %v555_v45  ;;  %v566_v47 = vadd.f32 %v750_v46, %v977_v49 }
 0x1d4   :  { %v557_v48 = vpop.f32.mrf.mxu1 }
 0x1d5   :  { %601 = vst.msk [vmem:[%s1144_s5 + $0xf8] sm:$0xff] %vm569_vm3, %v566_v47  ;;  %v558_v50 = vadd.f32 %v977_v49, %v557_v48 }
 0x1d7   :  { %599 = vst.msk [vmem:[%s1144_s5 + $0xe8] sm:$0xff] %vm569_vm3, %v558_v50 }

// kernel: _lambda_.58
= control target key start
LH: loop header
LB: loop body
LE: loop exit
PB: predicated region body
PF: predicated region fallthrough
CT: control target
= control target key end

     0   :  { %vm82_vm0 = vcmask 261120   ;;  %s1132_s1 = inlined_call_operand.vmem [shape: f32[32,128], index: 1, kind: input, shape index: {}]   ;;  %s1133_s0 = inlined_call_operand.vmem [shape: f32[256,32], index: 0, kind: input, shape index: {}]   ;;  %s1134_s3 = inlined_call_operand.vmem [shape: f32[128,32], index: 3, kind: input, shape index: {}]   ;;  %s1135_s2 = inlined_call_operand.vmem [shape: f32[1,128], index: 2, kind: input, shape index: {}]   ;;  %s1136_s4 = inlined_call_operand.vmem [shape: f32[1,32], index: 4, kind: input, shape index: {}]   ;;  %s1137_s5 = inlined_call_operand.vmem [shape: f32[256,32], index: 5, kind: output, shape index: {}]  }
   0x1   :  { %v55_v0 = vld [vmem:[%s1132_s1 + $0x10] sm:$0xff]  ;;  %v56_v1 = vld [vmem:[%s1132_s1 + $0x18] sm:$0xff]  ;;  %v53_v2 = vld [vmem:[%s1132_s1] sm:$0xff] }
   0x2   :  { %v58_v3 = vpack.c.bf16 %v56_v1, %v55_v0  ;;  %v54_v4 = vld [vmem:[%s1132_s1 + $0x8] sm:$0xff]  ;;  %v21_v5 = vld [vmem:[%s1133_s0] sm:$0xff]  ;;  %v23_v9 = vld [vmem:[%s1133_s0 + $0x10] sm:$0xff] }
   0x3   :  { %v22_v6 = vld [vmem:[%s1133_s0 + $0x8] sm:$0xff]  ;;  %v57_v7 = vpack.c.bf16 %v54_v4, %v53_v2  ;;  %v24_v10 = vld [vmem:[%s1133_s0 + $0x18] sm:$0xff]  ;;  %v25_v11 = vld [vmem:[%s1133_s0 + $0x20] sm:$0xff] }
   0x4   :  { %v60_v8 = vpack.c.bf16 %v22_v6, %v21_v5  ;;  %628 = vmatprep.subr.bf16.mxu0 %v58_v3  ;;  %v26_v12 = vld [vmem:[%s1133_s0 + $0x28] sm:$0xff]  ;;  %v61_v13 = vpack.c.bf16 %v24_v10, %v23_v9  ;;  %v27_v15 = vld [vmem:[%s1133_s0 + $0x30] sm:$0xff]  ;;  %v28_v16 = vld [vmem:[%s1133_s0 + $0x38] sm:$0xff] }
   0x5   :  { %629 = vmatpush3.bf16.msra.mxu0 %v58_v3  ;;  %v62_v14 = vpack.c.bf16 %v26_v12, %v25_v11  ;;  %v338_v17 = vld [vmem:[%s1134_s3 + $0x70] sm:$0xff]  ;;  %v339_v18 = vld [vmem:[%s1134_s3 + $0x78] sm:$0xff]  ;;  %v336_v19 = vld [vmem:[%s1134_s3 + $0x60] sm:$0xff]  ;;  %v63_v27 = vpack.c.bf16 %v28_v16, %v27_v15 }
   0x6   :  { %632 = vmatprep.mubr.msk.bf16.mxu0 %vm82_vm0, %v60_v8  ;;  %630 = vmatprep.subr.bf16.mxu0 %v57_v7  ;;  %v29_v20 = vld [vmem:[%s1133_s0 + $0x40] sm:$0xff]  ;;  %v30_v21 = vld [vmem:[%s1133_s0 + $0x48] sm:$0xff]  ;;  %v347_v22 = vpack.c.bf16 %v339_v18, %v338_v17  ;;  %v334_v25 = vld [vmem:[%s1134_s3 + $0x50] sm:$0xff] }
   0x7   :  { %v337_v23 = vld [vmem:[%s1134_s3 + $0x68] sm:$0xff]  ;;  %v335_v26 = vld [vmem:[%s1134_s3 + $0x58] sm:$0xff]  ;;  %v64_v28 = vpack.c.bf16 %v30_v21, %v29_v20  ;;  %v332_v30 = vld [vmem:[%s1134_s3 + $0x40] sm:$0xff] }
   0x8   :  { %v346_v24 = vpack.c.bf16 %v337_v23, %v336_v19  ;;  %712 = vmatprep.subr.bf16.mxu1 %v347_v22  ;;  %v345_v29 = vpack.c.bf16 %v335_v26, %v334_v25  ;;  %v333_v31 = vld [vmem:[%s1134_s3 + $0x48] sm:$0xff]  ;;  %v31_v32 = vld [vmem:[%s1133_s0 + $0x50] sm:$0xff]  ;;  %v32_v33 = vld [vmem:[%s1133_s0 + $0x58] sm:$0xff] }
   0x9   :  { %631 = vmatpush3.bf16.msra.mxu0 %v57_v7  ;;  %720 = vmatpush3.bf16.msra.mxu1 %v347_v22  ;;  %v33_v34 = vld [vmem:[%s1133_s0 + $0x60] sm:$0xff]  ;;  %v34_v35 = vld [vmem:[%s1133_s0 + $0x68] sm:$0xff]  ;;  %v344_v36 = vpack.c.bf16 %v333_v31, %v332_v30  ;;  %v330_v37 = vld [vmem:[%s1134_s3 + $0x30] sm:$0xff]  ;;  %v65_v39 = vpack.c.bf16 %v32_v33, %v31_v32 }
   0xa   :  { %664 = vmatprep.subr.bf16.mxu0 %v347_v22  ;;  %713 = vmatprep.subr.bf16.mxu1 %v346_v24  ;;  %v331_v38 = vld [vmem:[%s1134_s3 + $0x38] sm:$0xff]  ;;  %v66_v40 = vpack.c.bf16 %v34_v35, %v33_v34  ;;  %v35_v42 = vld [vmem:[%s1133_s0 + $0x70] sm:$0xff]  ;;  %v37_v44 = vld [vmem:[%s1133_s0 + $0x80] sm:$0xff] }
   0xb   :  { %v343_v41 = vpack.c.bf16 %v331_v38, %v330_v37  ;;  %v36_v43 = vld [vmem:[%s1133_s0 + $0x78] sm:$0xff]  ;;  %v38_v45 = vld [vmem:[%s1133_s0 + $0x88] sm:$0xff]  ;;  %v39_v48 = vld [vmem:[%s1133_s0 + $0x90] sm:$0xff] }
   0xc   :  { %633 = vmatmul.mubr.msk.bf16.vlgmr.msra.gmra.mxu0 %vm82_vm0, %v61_v13  ;;  %v67_v46 = vpack.c.bf16 %v36_v43, %v35_v42  ;;  %v68_v47 = vpack.c.bf16 %v38_v45, %v37_v44  ;;  %v40_v49 = vld [vmem:[%s1133_s0 + $0x98] sm:$0xff]  ;;  %v41_v50 = vld [vmem:[%s1133_s0 + $0xa0] sm:$0xff]  ;;  %v42_v51 = vld [vmem:[%s1133_s0 + $0xa8] sm:$0xff] }
   0xd   :  { %636 = vmatprep.mubr.msk.bf16.mxu0 %vm82_vm0, %v62_v14  ;;  %665 = vmatpush3.bf16.msra.mxu0 %v347_v22  ;;  %v69_v52 = vpack.c.bf16 %v40_v49, %v39_v48  ;;  %v70_v53 = vpack.c.bf16 %v42_v51, %v41_v50  ;;  %v43_v54 = vld [vmem:[%s1133_s0 + $0xb0] sm:$0xff]  ;;  %v44_v55 = vld [vmem:[%s1133_s0 + $0xb8] sm:$0xff]  ;;  %v45_v56 = vld [vmem:[%s1133_s0 + $0xc0] sm:$0xff] }
   0xe   :  { %666 = vmatprep.subr.bf16.mxu0 %v346_v24  ;;  %721 = vmatpush3.bf16.msra.mxu1 %v346_v24  ;;  %v46_v57 = vld [vmem:[%s1133_s0 + $0xc8] sm:$0xff]  ;;  %v71_v58 = vpack.c.bf16 %v44_v55, %v43_v54  ;;  %v47_v60 = vld [vmem:[%s1133_s0 + $0xd0] sm:$0xff]  ;;  %v48_v61 = vld [vmem:[%s1133_s0 + $0xd8] sm:$0xff] }
   0xf   :  { %714 = vmatprep.subr.bf16.mxu1 %v345_v29  ;;  %v72_v59 = vpack.c.bf16 %v46_v57, %v45_v56  ;;  %v49_v62 = vld [vmem:[%s1133_s0 + $0xe0] sm:$0xff]  ;;  %v50_v63 = vld [vmem:[%s1133_s0 + $0xe8] sm:$0xff]  ;;  %v73_v0 = vpack.c.bf16 %v48_v61, %v47_v60  ;;  %v51_v2 = vld [vmem:[%s1133_s0 + $0xf0] sm:$0xff] }
  0x10   :  { %v74_v1 = vpack.c.bf16 %v50_v63, %v49_v62  ;;  %v52_v3 = vld [vmem:[%s1133_s0 + $0xf8] sm:$0xff]  ;;  %v328_v5 = vld [vmem:[%s1134_s3 + $0x20] sm:$0xff]  ;;  %v329_v6 = vld [vmem:[%s1134_s3 + $0x28] sm:$0xff] }
  0x11   :  { %667 = vmatpush3.bf16.msra.mxu0 %v346_v24  ;;  %v75_v4 = vpack.c.bf16 %v52_v3, %v51_v2  ;;  %v342_v7 = vpack.c.bf16 %v329_v6, %v328_v5  ;;  %v326_v8 = vld [vmem:[%s1134_s3 + $0x10] sm:$0xff]  ;;  %v327_v9 = vld [vmem:[%s1134_s3 + $0x18] sm:$0xff]  ;;  %v324_v11 = vld [vmem:[%s1134_s3] sm:$0xff] }
  0x12   :  { %668 = vmatprep.subr.bf16.mxu0 %v345_v29  ;;  %722 = vmatpush3.bf16.msra.mxu1 %v345_v29  ;;  %v341_v10 = vpack.c.bf16 %v327_v9, %v326_v8  ;;  %v325_v12 = vld [vmem:[%s1134_s3 + $0x8] sm:$0xff]  ;;  %v933_v16 = vld [vmem:[%s1135_s2] ss:$0 sm:$0xff] }
  0x13   :  { %715 = vmatprep.subr.bf16.mxu1 %v344_v36  ;;  %v340_v13 = vpack.c.bf16 %v325_v12, %v324_v11 }
  0x14   :  { %637 = vmatmul.mubr.msk.bf16.gmra.mxu0 %vm82_vm0, %v63_v27 }
  0x15   :  { %640 = vmatprep.mubr.msk.bf16.mxu0 %vm82_vm0, %v64_v28  ;;  %669 = vmatpush3.bf16.msra.mxu0 %v345_v29 }
  0x16   :  { %670 = vmatprep.subr.bf16.mxu0 %v344_v36  ;;  %723 = vmatpush3.bf16.msra.mxu1 %v344_v36 }
  0x17   :  { %716 = vmatprep.subr.bf16.mxu1 %v343_v41 }
  0x19   :  { %671 = vmatpush3.bf16.msra.mxu0 %v344_v36 }
  0x1a   :  { %672 = vmatprep.subr.bf16.mxu0 %v343_v41  ;;  %724 = vmatpush3.bf16.msra.mxu1 %v343_v41 }
  0x1b   :  { %717 = vmatprep.subr.bf16.mxu1 %v342_v7 }
  0x1c   :  { %641 = vmatmul.mubr.msk.bf16.gmra.mxu0 %vm82_vm0, %v65_v39 }
  0x1d   :  { %644 = vmatprep.mubr.msk.bf16.mxu0 %vm82_vm0, %v66_v40  ;;  %673 = vmatpush3.bf16.msra.mxu0 %v343_v41 }
  0x1e   :  { %674 = vmatprep.subr.bf16.mxu0 %v342_v7  ;;  %725 = vmatpush3.bf16.msra.mxu1 %v342_v7 }
  0x1f   :  { %718 = vmatprep.subr.bf16.mxu1 %v341_v10 }
  0x21   :  { %675 = vmatpush3.bf16.msra.mxu0 %v342_v7 }
  0x22   :  { %676 = vmatprep.subr.bf16.mxu0 %v341_v10  ;;  %726 = vmatpush3.bf16.msra.mxu1 %v341_v10 }
  0x23   :  { %719 = vmatprep.subr.bf16.mxu1 %v340_v13 }
  0x24   :  { %645 = vmatmul.mubr.msk.bf16.gmra.mxu0 %vm82_vm0, %v67_v46 }
  0x25   :  { %648 = vmatprep.mubr.msk.bf16.mxu0 %vm82_vm0, %v68_v47  ;;  %677 = vmatpush3.bf16.msra.mxu0 %v341_v10 }
  0x26   :  { %678 = vmatprep.subr.bf16.mxu0 %v340_v13  ;;  %727 = vmatpush3.bf16.msra.mxu1 %v340_v13 }
  0x29   :  { %679 = vmatpush3.bf16.msra.mxu0 %v340_v13 }
  0x2c   :  { %649 = vmatmul.mubr.msk.bf16.gmra.mxu0 %vm82_vm0, %v69_v52 }
  0x2d   :  { %652 = vmatprep.mubr.msk.bf16.mxu0 %vm82_vm0, %v70_v53 }
  0x34   :  { %653 = vmatmul.mubr.msk.bf16.gmra.mxu0 %vm82_vm0, %v71_v58 }
  0x35   :  { %656 = vmatprep.mubr.msk.bf16.mxu0 %vm82_vm0, %v72_v59 }
  0x3c   :  { %657 = vmatmul.mubr.msk.bf16.gmra.mxu0 %vm82_vm0, %v73_v0 }
  0x3d   :  { %660 = vmatprep.mubr.msk.bf16.mxu0 %vm82_vm0, %v74_v1 }
  0x44   :  { %661 = vmatmul.mubr.msk.bf16.gmra.mxu0 %vm82_vm0, %v75_v4 }
  0xcc   :  { %v634_v14 = vpop.f32.mrf.mxu0 }
  0xcd   :  { %v174_v20 = vadd.f32 %v634_v14, %v933_v16 }
  0xce   :  { %v165_v15 = vpop.f32.mrf.mxu0 }
  0xcf   :  { %v166_v18 = vadd.f32 %v933_v16, %v165_v15  ;;  %v294_v27 = vmax.f32 %v174_v20, 0.0 }
  0xd0   :  { %v635_v17 = vpop.f32.mrf.mxu0 }
  0xd1   :  { %v177_v19 = vadd.f32 %v635_v17, %v933_v16  ;;  %v292_v25 = vmax.f32 %v166_v18, 0.0 }
  0xd2   :  { %v168_v21 = vpop.f32.mrf.mxu0 }
  0xd3   :  { %v169_v22 = vadd.f32 %v933_v16, %v168_v21  ;;  %v295_v23 = vmax.f32 %v177_v19, 0.0 }
  0xd4   :  { %v638_v24 = vpop.f32.mrf.mxu0 }
  0xd5   :  { %v293_v26 = vmax.f32 %v169_v22, 0.0  ;;  %v350_v30 = vpack.c.bf16 %v295_v23, %v294_v27  ;;  %v190_v34 = vadd.f32 %v638_v24, %v933_v16 }
  0xd6   :  { %v181_v28 = vpop.f32.mrf.mxu0 }
  0xd7   :  { %v349_v29 = vpack.c.bf16 %v293_v26, %v292_v25  ;;  %v182_v32 = vadd.f32 %v933_v16, %v181_v28  ;;  %v298_v41 = vmax.f32 %v190_v34, 0.0 }
  0xd8   :  { %v639_v31 = vpop.f32.mrf.mxu0 }
  0xd9   :  { %v193_v33 = vadd.f32 %v639_v31, %v933_v16  ;;  %680 = vmatprep.mubr.bf16.mxu0 %v349_v29  ;;  %v296_v39 = vmax.f32 %v182_v32, 0.0 }
  0xda   :  { %v184_v35 = vpop.f32.mrf.mxu0  ;;  %681 = vmatmul.mubr.bf16.vlgmr.msra.gmra.mxu0 %v350_v30 }
  0xdb   :  { %v185_v36 = vadd.f32 %v933_v16, %v184_v35  ;;  %v299_v37 = vmax.f32 %v193_v33, 0.0 }
  0xdc   :  { %v642_v38 = vpop.f32.mrf.mxu0 }
  0xdd   :  { %v297_v40 = vmax.f32 %v185_v36, 0.0  ;;  %v352_v44 = vpack.c.bf16 %v299_v37, %v298_v41  ;;  %v206_v48 = vadd.f32 %v642_v38, %v933_v16 }
  0xde   :  { %v197_v42 = vpop.f32.mrf.mxu0 }
  0xdf   :  { %v351_v43 = vpack.c.bf16 %v297_v40, %v296_v39  ;;  %v198_v46 = vadd.f32 %v933_v16, %v197_v42  ;;  %v302_v55 = vmax.f32 %v206_v48, 0.0 }
  0xe0   :  { %v643_v45 = vpop.f32.mrf.mxu0 }
  0xe1   :  { %v209_v47 = vadd.f32 %v643_v45, %v933_v16  ;;  %684 = vmatprep.mubr.bf16.mxu1 %v351_v43  ;;  %v300_v53 = vmax.f32 %v198_v46, 0.0 }
  0xe2   :  { %v200_v49 = vpop.f32.mrf.mxu0  ;;  %685 = vmatmul.mubr.bf16.vlgmr.msra.gmra.mxu1 %v352_v44 }
  0xe3   :  { %v201_v50 = vadd.f32 %v933_v16, %v200_v49  ;;  %v303_v51 = vmax.f32 %v209_v47, 0.0 }
  0xe4   :  { %v646_v52 = vpop.f32.mrf.mxu0 }
  0xe5   :  { %v301_v54 = vmax.f32 %v201_v50, 0.0  ;;  %v354_v58 = vpack.c.bf16 %v303_v51, %v302_v55  ;;  %v222_v62 = vadd.f32 %v646_v52, %v933_v16 }
  0xe6   :  { %v213_v56 = vpop.f32.mrf.mxu0 }
  0xe7   :  { %v353_v57 = vpack.c.bf16 %v301_v54, %v300_v53  ;;  %v214_v60 = vadd.f32 %v933_v16, %v213_v56  ;;  %v306_v5 = vmax.f32 %v222_v62, 0.0 }
  0xe8   :  { %v647_v59 = vpop.f32.mrf.mxu0 }
  0xe9   :  { %v225_v61 = vadd.f32 %v647_v59, %v933_v16  ;;  %688 = vmatprep.mubr.bf16.mxu1 %v353_v57  ;;  %v304_v3 = vmax.f32 %v214_v60, 0.0 }
  0xea   :  { %v216_v63 = vpop.f32.mrf.mxu0  ;;  %689 = vmatmul.mubr.bf16.gmra.mxu1 %v354_v58 }
  0xeb   :  { %v217_v0 = vadd.f32 %v933_v16, %v216_v63  ;;  %v307_v1 = vmax.f32 %v225_v61, 0.0 }
  0xec   :  { %v650_v2 = vpop.f32.mrf.mxu0 }
  0xed   :  { %v305_v4 = vmax.f32 %v217_v0, 0.0  ;;  %v356_v8 = vpack.c.bf16 %v307_v1, %v306_v5  ;;  %v238_v12 = vadd.f32 %v650_v2, %v933_v16  ;;  %v970_v0 = vld [vmem:[%s1136_s4] ss:$0 sm:$0xff] }
  0xee   :  { %v229_v6 = vpop.f32.mrf.mxu0 }
  0xef   :  { %v355_v7 = vpack.c.bf16 %v305_v4, %v304_v3  ;;  %v230_v10 = vadd.f32 %v933_v16, %v229_v6  ;;  %v310_v20 = vmax.f32 %v238_v12, 0.0 }
  0xf0   :  { %v651_v9 = vpop.f32.mrf.mxu0 }
  0xf1   :  { %v241_v11 = vadd.f32 %v651_v9, %v933_v16  ;;  %692 = vmatprep.mubr.bf16.mxu1 %v355_v7  ;;  %v308_v18 = vmax.f32 %v230_v10, 0.0 }
  0xf2   :  { %v232_v13 = vpop.f32.mrf.mxu0  ;;  %693 = vmatmul.mubr.bf16.gmra.mxu1 %v356_v8 }
  0xf3   :  { %v233_v14 = vadd.f32 %v933_v16, %v232_v13  ;;  %v311_v15 = vmax.f32 %v241_v11, 0.0 }
  0xf4   :  { %v654_v17 = vpop.f32.mrf.mxu0 }
  0xf5   :  { %v309_v19 = vmax.f32 %v233_v14, 0.0  ;;  %v358_v23 = vpack.c.bf16 %v311_v15, %v310_v20  ;;  %v254_v27 = vadd.f32 %v654_v17, %v933_v16 }
  0xf6   :  { %v245_v21 = vpop.f32.mrf.mxu0 }
  0xf7   :  { %v357_v22 = vpack.c.bf16 %v309_v19, %v308_v18  ;;  %v246_v25 = vadd.f32 %v933_v16, %v245_v21  ;;  %v314_v34 = vmax.f32 %v254_v27, 0.0 }
  0xf8   :  { %v655_v24 = vpop.f32.mrf.mxu0 }
  0xf9   :  { %v257_v26 = vadd.f32 %v655_v24, %v933_v16  ;;  %696 = vmatprep.mubr.bf16.mxu1 %v357_v22  ;;  %v312_v32 = vmax.f32 %v246_v25, 0.0 }
  0xfa   :  { %v248_v28 = vpop.f32.mrf.mxu0  ;;  %697 = vmatmul.mubr.bf16.gmra.mxu1 %v358_v23 }
  0xfb   :  { %v249_v29 = vadd.f32 %v933_v16, %v248_v28  ;;  %v315_v30 = vmax.f32 %v257_v26, 0.0 }
  0xfc   :  { %v658_v31 = vpop.f32.mrf.mxu0 }
  0xfd   :  { %v313_v33 = vmax.f32 %v249_v29, 0.0  ;;  %v360_v37 = vpack.c.bf16 %v315_v30, %v314_v34  ;;  %v270_v41 = vadd.f32 %v658_v31, %v933_v16 }
  0xfe   :  { %v261_v35 = vpop.f32.mrf.mxu0 }
  0xff   :  { %v359_v36 = vpack.c.bf16 %v313_v33, %v312_v32  ;;  %v262_v39 = vadd.f32 %v933_v16, %v261_v35  ;;  %v318_v48 = vmax.f32 %v270_v41, 0.0 }
 0x100   :  { %v659_v38 = vpop.f32.mrf.mxu0 }
 0x101   :  { %v273_v40 = vadd.f32 %v659_v38, %v933_v16  ;;  %700 = vmatprep.mubr.bf16.mxu1 %v359_v36  ;;  %v316_v46 = vmax.f32 %v262_v39, 0.0 }
 0x102   :  { %v264_v42 = vpop.f32.mrf.mxu0  ;;  %701 = vmatmul.mubr.bf16.gmra.mxu1 %v360_v37 }
 0x103   :  { %v265_v43 = vadd.f32 %v933_v16, %v264_v42  ;;  %v319_v44 = vmax.f32 %v273_v40, 0.0 }
 0x104   :  { %v662_v45 = vpop.f32.mrf.mxu0 }
 0x105   :  { %v317_v47 = vmax.f32 %v265_v43, 0.0  ;;  %v362_v51 = vpack.c.bf16 %v319_v44, %v318_v48  ;;  %v286_v55 = vadd.f32 %v662_v45, %v933_v16 }
 0x106   :  { %v277_v49 = vpop.f32.mrf.mxu0 }
 0x107   :  { %v361_v50 = vpack.c.bf16 %v317_v47, %v316_v46  ;;  %v278_v53 = vadd.f32 %v933_v16, %v277_v49  ;;  %v322_v61 = vmax.f32 %v286_v55, 0.0 }
 0x108   :  { %v663_v52 = vpop.f32.mrf.mxu0 }
 0x109   :  { %v289_v54 = vadd.f32 %v663_v52, %v933_v16  ;;  %704 = vmatprep.mubr.bf16.mxu1 %v361_v50  ;;  %v320_v59 = vmax.f32 %v278_v53, 0.0 }
 0x10a   :  { %v280_v56 = vpop.f32.mrf.mxu0  ;;  %705 = vmatmul.mubr.bf16.gmra.mxu1 %v362_v51 }
 0x10b   :  { %v281_v57 = vadd.f32 %v933_v16, %v280_v56  ;;  %v323_v58 = vmax.f32 %v289_v54, 0.0 }
 0x10d   :  { %v321_v60 = vmax.f32 %v281_v57, 0.0  ;;  %v364_v63 = vpack.c.bf16 %v323_v58, %v322_v61 }
 0x10f   :  { %v363_v62 = vpack.c.bf16 %v321_v60, %v320_v59 }
 0x111   :  { %708 = vmatprep.mubr.bf16.mxu1 %v363_v62 }
 0x112   :  { %709 = vmatmul.mubr.bf16.gmra.mxu1 %v364_v63 }
 0x19a   :  { %v682_v1 = vpop.f32.mrf.mxu0 }
 0x19b   :  { %v414_v2 = vadd.f32 %v682_v1, %v970_v0 }
 0x19c   :  { %v405_v3 = vpop.f32.mrf.mxu0 }
 0x19d   :  { %534 = vst.msk [vmem:[%s1137_s5 + $0x10] sm:$0xff] %vm82_vm0, %v414_v2  ;;  %v406_v16 = vadd.f32 %v970_v0, %v405_v3 }
 0x19e   :  { %v683_v4 = vpop.f32.mrf.mxu0 }
 0x19f   :  { %532 = vst.msk [vmem:[%s1137_s5] sm:$0xff] %vm82_vm0, %v406_v16  ;;  %v417_v5 = vadd.f32 %v683_v4, %v970_v0 }
 0x1a0   :  { %v408_v6 = vpop.f32.mrf.mxu0 }
 0x1a1   :  { %535 = vst.msk [vmem:[%s1137_s5 + $0x18] sm:$0xff] %vm82_vm0, %v417_v5  ;;  %v409_v7 = vadd.f32 %v970_v0, %v408_v6 }
 0x1a2   :  { %v686_v8 = vpop.f32.mrf.mxu1 }
 0x1a3   :  { %533 = vst.msk [vmem:[%s1137_s5 + $0x8] sm:$0xff] %vm82_vm0, %v409_v7  ;;  %v430_v9 = vadd.f32 %v686_v8, %v970_v0 }
 0x1a4   :  { %v421_v10 = vpop.f32.mrf.mxu1 }
 0x1a5   :  { %538 = vst.msk [vmem:[%s1137_s5 + $0x30] sm:$0xff] %vm82_vm0, %v430_v9  ;;  %v422_v11 = vadd.f32 %v970_v0, %v421_v10 }
 0x1a6   :  { %v687_v12 = vpop.f32.mrf.mxu1 }
 0x1a7   :  { %536 = vst.msk [vmem:[%s1137_s5 + $0x20] sm:$0xff] %vm82_vm0, %v422_v11  ;;  %v433_v13 = vadd.f32 %v687_v12, %v970_v0 }
 0x1a8   :  { %v424_v14 = vpop.f32.mrf.mxu1 }
 0x1a9   :  { %539 = vst.msk [vmem:[%s1137_s5 + $0x38] sm:$0xff] %vm82_vm0, %v433_v13  ;;  %v425_v15 = vadd.f32 %v970_v0, %v424_v14 }
 0x1aa   :  { %v690_v17 = vpop.f32.mrf.mxu1 }
 0x1ab   :  { %537 = vst.msk [vmem:[%s1137_s5 + $0x28] sm:$0xff] %vm82_vm0, %v425_v15  ;;  %v446_v18 = vadd.f32 %v690_v17, %v970_v0 }
 0x1ac   :  { %v437_v19 = vpop.f32.mrf.mxu1 }
 0x1ad   :  { %542 = vst.msk [vmem:[%s1137_s5 + $0x50] sm:$0xff] %vm82_vm0, %v446_v18  ;;  %v438_v20 = vadd.f32 %v970_v0, %v437_v19 }
 0x1ae   :  { %v691_v21 = vpop.f32.mrf.mxu1 }
 0x1af   :  { %540 = vst.msk [vmem:[%s1137_s5 + $0x40] sm:$0xff] %vm82_vm0, %v438_v20  ;;  %v449_v22 = vadd.f32 %v691_v21, %v970_v0 }
 0x1b0   :  { %v440_v23 = vpop.f32.mrf.mxu1 }
 0x1b1   :  { %543 = vst.msk [vmem:[%s1137_s5 + $0x58] sm:$0xff] %vm82_vm0, %v449_v22  ;;  %v441_v24 = vadd.f32 %v970_v0, %v440_v23 }
 0x1b2   :  { %v694_v25 = vpop.f32.mrf.mxu1 }
 0x1b3   :  { %541 = vst.msk [vmem:[%s1137_s5 + $0x48] sm:$0xff] %vm82_vm0, %v441_v24  ;;  %v462_v26 = vadd.f32 %v694_v25, %v970_v0 }
 0x1b4   :  { %v453_v27 = vpop.f32.mrf.mxu1 }
 0x1b5   :  { %546 = vst.msk [vmem:[%s1137_s5 + $0x70] sm:$0xff] %vm82_vm0, %v462_v26  ;;  %v454_v28 = vadd.f32 %v970_v0, %v453_v27 }
 0x1b6   :  { %v695_v29 = vpop.f32.mrf.mxu1 }
 0x1b7   :  { %544 = vst.msk [vmem:[%s1137_s5 + $0x60] sm:$0xff] %vm82_vm0, %v454_v28  ;;  %v465_v30 = vadd.f32 %v695_v29, %v970_v0 }
 0x1b8   :  { %v456_v31 = vpop.f32.mrf.mxu1 }
 0x1b9   :  { %547 = vst.msk [vmem:[%s1137_s5 + $0x78] sm:$0xff] %vm82_vm0, %v465_v30  ;;  %v457_v32 = vadd.f32 %v970_v0, %v456_v31 }
 0x1ba   :  { %v698_v33 = vpop.f32.mrf.mxu1 }
 0x1bb   :  { %545 = vst.msk [vmem:[%s1137_s5 + $0x68] sm:$0xff] %vm82_vm0, %v457_v32  ;;  %v478_v34 = vadd.f32 %v698_v33, %v970_v0 }
 0x1bc   :  { %v469_v35 = vpop.f32.mrf.mxu1 }
 0x1bd   :  { %550 = vst.msk [vmem:[%s1137_s5 + $0x90] sm:$0xff] %vm82_vm0, %v478_v34  ;;  %v470_v36 = vadd.f32 %v970_v0, %v469_v35 }
 0x1be   :  { %v699_v37 = vpop.f32.mrf.mxu1 }
 0x1bf   :  { %548 = vst.msk [vmem:[%s1137_s5 + $0x80] sm:$0xff] %vm82_vm0, %v470_v36  ;;  %v481_v38 = vadd.f32 %v699_v37, %v970_v0 }
 0x1c0   :  { %v472_v39 = vpop.f32.mrf.mxu1 }
 0x1c1   :  { %551 = vst.msk [vmem:[%s1137_s5 + $0x98] sm:$0xff] %vm82_vm0, %v481_v38  ;;  %v473_v40 = vadd.f32 %v970_v0, %v472_v39 }
 0x1c2   :  { %v702_v41 = vpop.f32.mrf.mxu1 }
 0x1c3   :  { %549 = vst.msk [vmem:[%s1137_s5 + $0x88] sm:$0xff] %vm82_vm0, %v473_v40  ;;  %v494_v42 = vadd.f32 %v702_v41, %v970_v0 }
 0x1c4   :  { %v485_v43 = vpop.f32.mrf.mxu1 }
 0x1c5   :  { %554 = vst.msk [vmem:[%s1137_s5 + $0xb0] sm:$0xff] %vm82_vm0, %v494_v42  ;;  %v486_v44 = vadd.f32 %v970_v0, %v485_v43 }
 0x1c6   :  { %v703_v45 = vpop.f32.mrf.mxu1 }
 0x1c7   :  { %552 = vst.msk [vmem:[%s1137_s5 + $0xa0] sm:$0xff] %vm82_vm0, %v486_v44  ;;  %v497_v46 = vadd.f32 %v703_v45, %v970_v0 }
 0x1c8   :  { %v488_v47 = vpop.f32.mrf.mxu1 }
 0x1c9   :  { %555 = vst.msk [vmem:[%s1137_s5 + $0xb8] sm:$0xff] %vm82_vm0, %v497_v46  ;;  %v489_v48 = vadd.f32 %v970_v0, %v488_v47 }
 0x1ca   :  { %v706_v49 = vpop.f32.mrf.mxu1 }
 0x1cb   :  { %553 = vst.msk [vmem:[%s1137_s5 + $0xa8] sm:$0xff] %vm82_vm0, %v489_v48  ;;  %v510_v50 = vadd.f32 %v706_v49, %v970_v0 }
 0x1cc   :  { %v501_v51 = vpop.f32.mrf.mxu1 }
 0x1cd   :  { %558 = vst.msk [vmem:[%s1137_s5 + $0xd0] sm:$0xff] %vm82_vm0, %v510_v50  ;;  %v502_v52 = vadd.f32 %v970_v0, %v501_v51 }
 0x1ce   :  { %v707_v53 = vpop.f32.mrf.mxu1 }
 0x1cf   :  { %556 = vst.msk [vmem:[%s1137_s5 + $0xc0] sm:$0xff] %vm82_vm0, %v502_v52  ;;  %v513_v54 = vadd.f32 %v707_v53, %v970_v0 }
 0x1d0   :  { %v504_v55 = vpop.f32.mrf.mxu1 }
 0x1d1   :  { %559 = vst.msk [vmem:[%s1137_s5 + $0xd8] sm:$0xff] %vm82_vm0, %v513_v54  ;;  %v505_v56 = vadd.f32 %v970_v0, %v504_v55 }
 0x1d2   :  { %v710_v57 = vpop.f32.mrf.mxu1 }
 0x1d3   :  { %557 = vst.msk [vmem:[%s1137_s5 + $0xc8] sm:$0xff] %vm82_vm0, %v505_v56  ;;  %v526_v58 = vadd.f32 %v710_v57, %v970_v0 }
 0x1d4   :  { %v517_v59 = vpop.f32.mrf.mxu1 }
 0x1d5   :  { %562 = vst.msk [vmem:[%s1137_s5 + $0xf0] sm:$0xff] %vm82_vm0, %v526_v58  ;;  %v518_v60 = vadd.f32 %v970_v0, %v517_v59 }
 0x1d6   :  { %v711_v61 = vpop.f32.mrf.mxu1 }
 0x1d7   :  { %560 = vst.msk [vmem:[%s1137_s5 + $0xe0] sm:$0xff] %vm82_vm0, %v518_v60  ;;  %v529_v62 = vadd.f32 %v711_v61, %v970_v0 }
 0x1d8   :  { %v520_v63 = vpop.f32.mrf.mxu1 }
 0x1d9   :  { %563 = vst.msk [vmem:[%s1137_s5 + $0xf8] sm:$0xff] %vm82_vm0, %v529_v62  ;;  %v521_v1 = vadd.f32 %v970_v0, %v520_v63 }
 0x1db   :  { %561 = vst.msk [vmem:[%s1137_s5 + $0xe8] sm:$0xff] %vm82_vm0, %v521_v1 }

// kernel: _lambda_.52
= control target key start
LH: loop header
LB: loop body
LE: loop exit
PB: predicated region body
PF: predicated region fallthrough
CT: control target
= control target key end

     0   :  { %vm52_vm0 = vcmask 523264   ;;  %vm127_vm1 = vcmask 261120   ;;  %s463_s1 = inlined_call_operand.vmem [shape: f32[64,32], index: 1, kind: input, shape index: {}]   ;;  %s464_s0 = inlined_call_operand.vmem [shape: f32[32,64], index: 0, kind: input, shape index: {}]   ;;  %s465_s3 = inlined_call_operand.vmem [shape: f32[32,32], index: 3, kind: input, shape index: {}]   ;;  %s466_s5 = inlined_call_operand.vmem [shape: f32[64,32], index: 5, kind: input, shape index: {}]   ;;  %s467_s2 = inlined_call_operand.vmem [shape: f32[1,32], index: 2, kind: input, shape index: {}]   ;;  %s468_s4 = inlined_call_operand.vmem [shape: f32[1,32], index: 4, kind: input, shape index: {}]   ;;  %s469_s6 = inlined_call_operand.vmem [shape: f32[1,32], index: 6, kind: input, shape index: {}]   ;;  %s470_s7 = inlined_call_operand.vmem [shape: f32[32,32], index: 7, kind: output, shape index: {}]  }
   0x1   :  { %v39_v0 = vld [vmem:[%s463_s1 + $0x30] sm:$0xff]  ;;  %v40_v1 = vld [vmem:[%s463_s1 + $0x38] sm:$0xff]  ;;  %v37_v2 = vld [vmem:[%s463_s1 + $0x20] sm:$0xff] }
   0x2   :  { %v44_v3 = vpack.c.bf16 %v40_v1, %v39_v0  ;;  %v38_v4 = vld [vmem:[%s463_s1 + $0x28] sm:$0xff]  ;;  %v35_v6 = vld [vmem:[%s463_s1 + $0x10] sm:$0xff]  ;;  %v36_v7 = vld [vmem:[%s463_s1 + $0x18] sm:$0xff] }
   0x3   :  { %v43_v5 = vpack.c.bf16 %v38_v4, %v37_v2  ;;  %v27_v8 = vld [vmem:[%s464_s0] sm:$0xff]  ;;  %v28_v9 = vld [vmem:[%s464_s0 + $0x8] sm:$0xff]  ;;  %v42_v11 = vpack.c.bf16 %v36_v7, %v35_v6  ;;  %v29_v15 = vld [vmem:[%s464_s0 + $0x10] sm:$0xff] }
   0x4   :  { %288 = vmatprep.subr.bf16.mxu0 %v44_v3  ;;  %v31_v10 = vpack.c.bf16 %v28_v9, %v27_v8  ;;  %v33_v12 = vld [vmem:[%s463_s1] sm:$0xff]  ;;  %v34_v13 = vld [vmem:[%s463_s1 + $0x8] sm:$0xff]  ;;  %v30_v16 = vld [vmem:[%s464_s0 + $0x18] sm:$0xff] }
   0x5   :  { %289 = vmatpush3.bf16.msra.mxu0 %v44_v3  ;;  %v41_v14 = vpack.c.bf16 %v34_v13, %v33_v12  ;;  %v32_v17 = vpack.c.bf16 %v30_v16, %v29_v15  ;;  %v116_v18 = vld [vmem:[%s465_s3 + $0x10] sm:$0xff]  ;;  %v117_v19 = vld [vmem:[%s465_s3 + $0x18] sm:$0xff]  ;;  %v114_v21 = vld [vmem:[%s465_s3] sm:$0xff] }
   0x6   :  { %290 = vmatprep.subr.bf16.mxu0 %v43_v5  ;;  %296 = vmatprep.mubr.msk.bf16.mxu0 %vm52_vm0, %v31_v10  ;;  %v119_v20 = vpack.c.bf16 %v117_v19, %v116_v18  ;;  %v115_v22 = vld [vmem:[%s465_s3 + $0x8] sm:$0xff]  ;;  %v189_v24 = vld [vmem:[%s466_s5 + $0x30] sm:$0xff]  ;;  %v190_v25 = vld [vmem:[%s466_s5 + $0x38] sm:$0xff] }
   0x7   :  { %v118_v23 = vpack.c.bf16 %v115_v22, %v114_v21  ;;  %v194_v26 = vpack.c.bf16 %v190_v25, %v189_v24  ;;  %v263_v29 = vld [vmem:[%s467_s2] ss:$0 sm:$0xff]  ;;  %v188_v40 = vld [vmem:[%s466_s5 + $0x28] sm:$0xff]  ;;  %v185_v45 = vld [vmem:[%s466_s5 + $0x10] sm:$0xff] }
   0x8   :  { %300 = vmatprep.subr.bf16.mxu1 %v119_v20  ;;  %v187_v39 = vld [vmem:[%s466_s5 + $0x20] sm:$0xff]  ;;  %v186_v46 = vld [vmem:[%s466_s5 + $0x18] sm:$0xff]  ;;  %v184_v49 = vld [vmem:[%s466_s5 + $0x8] sm:$0xff] }
   0x9   :  { %291 = vmatpush3.bf16.msra.mxu0 %v43_v5  ;;  %301 = vmatpush3.bf16.msra.mxu1 %v119_v20  ;;  %v193_v44 = vpack.c.bf16 %v188_v40, %v187_v39  ;;  %v192_v47 = vpack.c.bf16 %v186_v46, %v185_v45  ;;  %v183_v48 = vld [vmem:[%s466_s5] sm:$0xff] }
   0xa   :  { %292 = vmatprep.subr.bf16.mxu0 %v42_v11  ;;  %302 = vmatprep.subr.bf16.mxu1 %v118_v23  ;;  %v191_v50 = vpack.c.bf16 %v184_v49, %v183_v48  ;;  %v266_v54 = vld [vmem:[%s468_s4] ss:$0 sm:$0xff] }
   0xb   :  { %v269_v56 = vld [vmem:[%s469_s6] ss:$0 sm:$0xff] }
   0xd   :  { %293 = vmatpush3.bf16.msra.mxu0 %v42_v11  ;;  %303 = vmatpush3.bf16.msra.mxu1 %v118_v23 }
   0xe   :  { %294 = vmatprep.subr.bf16.mxu0 %v41_v14  ;;  %308 = vmatprep.subr.bf16.mxu1 %v194_v26 }
  0x11   :  { %295 = vmatpush3.bf16.msra.mxu0 %v41_v14 }
  0x14   :  { %297 = vmatmul.mubr.msk.bf16.vlgmr.msra.gmra.mxu0 %vm52_vm0, %v32_v17 }
  0xd4   :  { %v298_v27 = vpop.f32.mrf.mxu0 }
  0xd5   :  { %v102_v33 = vadd.f32 %v298_v27, %v263_v29 }
  0xd6   :  { %v93_v28 = vpop.f32.mrf.mxu0 }
  0xd7   :  { %v94_v31 = vadd.f32 %v263_v29, %v93_v28  ;;  %v110_v41 = vmax.f32 %v102_v33, 0.0 }
  0xd8   :  { %v299_v30 = vpop.f32.mrf.mxu0 }
  0xd9   :  { %v105_v32 = vadd.f32 %v299_v30, %v263_v29  ;;  %v108_v37 = vmax.f32 %v94_v31, 0.0 }
  0xda   :  { %v96_v34 = vpop.f32.mrf.mxu0 }
  0xdb   :  { %v97_v35 = vadd.f32 %v263_v29, %v96_v34  ;;  %v111_v36 = vmax.f32 %v105_v32, 0.0 }
  0xdd   :  { %v109_v38 = vmax.f32 %v97_v35, 0.0  ;;  %v113_v43 = vpack.c.bf16 %v111_v36, %v110_v41 }
  0xdf   :  { %v112_v42 = vpack.c.bf16 %v109_v38, %v108_v37 }
  0xe1   :  { %304 = vmatprep.mubr.msk.bf16.mxu1 %vm127_vm1, %v112_v42 }
  0xe2   :  { %305 = vmatmul.mubr.msk.bf16.vlgmr.msra.gmra.mxu1 %vm127_vm1, %v113_v43 }
  0xe3   :  { %309 = vmatpush3.bf16.msra.mxu1 %v194_v26  ;;  %316 = vmatprep.mubr.msk.bf16.mxu1 %vm52_vm0, %v31_v10 }
  0xe4   :  { %310 = vmatprep.subr.bf16.mxu1 %v193_v44 }
  0xe7   :  { %311 = vmatpush3.bf16.msra.mxu1 %v193_v44 }
  0xe8   :  { %312 = vmatprep.subr.bf16.mxu1 %v192_v47 }
  0xeb   :  { %313 = vmatpush3.bf16.msra.mxu1 %v192_v47 }
  0xec   :  { %314 = vmatprep.subr.bf16.mxu1 %v191_v50 }
  0xef   :  { %315 = vmatpush3.bf16.msra.mxu1 %v191_v50 }
  0xf2   :  { %317 = vmatmul.mubr.msk.bf16.vlgmr.msra.gmra.mxu1 %vm52_vm0, %v32_v17 }
 0x1a2   :  { %v306_v51 = vpop.f32.mrf.mxu1 }
 0x1a3   :  { %v177_v58 = vadd.f32 %v306_v51, %v266_v54 }
 0x1a4   :  { %v168_v52 = vpop.f32.mrf.mxu1 }
 0x1a5   :  { %v169_v61 = vadd.f32 %v266_v54, %v168_v52 }
 0x1a6   :  { %v307_v53 = vpop.f32.mrf.mxu1 }
 0x1a7   :  { %v180_v1 = vadd.f32 %v307_v53, %v266_v54 }
 0x1a8   :  { %v171_v55 = vpop.f32.mrf.mxu1 }
 0x1a9   :  { %v172_v5 = vadd.f32 %v266_v54, %v171_v55 }
 0x1b2   :  { %v318_v57 = vpop.f32.mrf.mxu1 }
 0x1b3   :  { %v245_v59 = vadd.f32 %v318_v57, %v269_v56 }
 0x1b4   :  { %v236_v60 = vpop.f32.mrf.mxu1 }
 0x1b5   :  { %v253_v62 = vadd.f32 %v245_v59, %v177_v58  ;;  %v237_v63 = vadd.f32 %v269_v56, %v236_v60 }
 0x1b6   :  { %v319_v0 = vpop.f32.mrf.mxu1 }
 0x1b7   :  { %257 = vst.msk [vmem:[%s470_s7 + $0x10] sm:$0xff] %vm127_vm1, %v253_v62  ;;  %v251_v2 = vadd.f32 %v237_v63, %v169_v61  ;;  %v248_v3 = vadd.f32 %v319_v0, %v269_v56 }
 0x1b8   :  { %v239_v4 = vpop.f32.mrf.mxu1 }
 0x1b9   :  { %255 = vst.msk [vmem:[%s470_s7] sm:$0xff] %vm127_vm1, %v251_v2  ;;  %v254_v6 = vadd.f32 %v248_v3, %v180_v1  ;;  %v240_v7 = vadd.f32 %v269_v56, %v239_v4 }
 0x1bb   :  { %258 = vst.msk [vmem:[%s470_s7 + $0x18] sm:$0xff] %vm127_vm1, %v254_v6  ;;  %v252_v8 = vadd.f32 %v240_v7, %v172_v5 }
 0x1bd   :  { %256 = vst.msk [vmem:[%s470_s7 + $0x8] sm:$0xff] %vm127_vm1, %v252_v8 }

// kernel: _lambda_.59
= control target key start
LH: loop header
LB: loop body
LE: loop exit
PB: predicated region body
PF: predicated region fallthrough
CT: control target
= control target key end

     0   :  { %vm43_vm0 = vcmask 261120   ;;  %vm972_vm1 = vcmask 1041409   ;;  %vm974_vm2 = vcmask 1042434   ;;  %vm976_vm3 = vcmask 1043459   ;;  %s2099_s0 = inlined_call_operand.vmem [shape: f32[32,8,32], index: 0, kind: input, shape index: {}]   ;;  %s2100_s1 = inlined_call_operand.vmem [shape: f32[32,8,32], index: 1, kind: input, shape index: {}]   ;;  %s2101_s2 = inlined_call_operand.vmem [shape: f32[32,32], index: 2, kind: output, shape index: {}]  }
   0x1   :  { %v1165_v0 = vld [vmem:[%s2099_s0] sm:$0xff]  ;;  %v1170_v1 = vld [vmem:[%s2099_s0 + $0x8] sm:$0xff]  ;;  %v1175_v2 = vld [vmem:[%s2099_s0 + $0x10] sm:$0xff]  ;;  %vm978_vm4 = vcmask 1044484   ;;  %vm980_vm5 = vcmask 1045509   ;;  %vm982_vm6 = vcmask 1046534  }
   0x2   :  { %v44_v3 = vsel %vm43_vm0, %v1165_v0, -inf  ;;  %v51_v4 = vsel %vm43_vm0, %v1170_v1, -inf  ;;  %v58_v5 = vsel %vm43_vm0, %v1175_v2, -inf  ;;  %v1186_v6 = vld [vmem:[%s2099_s0 + $0x18] sm:$0xff]  ;;  %v1191_v7 = vld [vmem:[%s2099_s0 + $0x20] sm:$0xff]  ;;  %v1196_v8 = vld [vmem:[%s2099_s0 + $0x28] sm:$0xff] }
   0x3   :  { %v45_v9 = vrot.slane %v44_v3, 4  ;;  %v52_v10 = vrot.slane %v51_v4, 4  ;;  %v59_v11 = vrot.slane %v58_v5, 4  ;;  %v65_v12 = vsel %vm43_vm0, %v1186_v6, -inf  ;;  %v1207_v15 = vld [vmem:[%s2099_s0 + $0x30] sm:$0xff]  ;;  %v1212_v18 = vld [vmem:[%s2099_s0 + $0x38] sm:$0xff] }
   0x4   :  { %v72_v13 = vsel %vm43_vm0, %v1191_v7, -inf  ;;  %v79_v14 = vsel %vm43_vm0, %v1196_v8, -inf  ;;  %v66_v20 = vrot.slane %v65_v12, 4  ;;  %v86_v23 = vsel %vm43_vm0, %v1207_v15, -inf  ;;  %v1221_v29 = vld [vmem:[%s2099_s0 + $0x40] sm:$0xff]  ;;  %v1226_v30 = vld [vmem:[%s2099_s0 + $0x48] sm:$0xff] }
   0x5   :  { %v46_v16 = vmax.f32 %v44_v3, %v45_v9  ;;  %v53_v17 = vmax.f32 %v51_v4, %v52_v10  ;;  %v60_v19 = vmax.f32 %v58_v5, %v59_v11  ;;  %v73_v21 = vrot.slane %v72_v13, 4  ;;  %2147 = vst [vmem:[#allocation2_spill] sm:$0xff] %v1226_v30  ;;  %v1231_v34 = vld [vmem:[%s2099_s0 + $0x50] sm:$0xff]  ;;  %v1236_v36 = vld [vmem:[%s2099_s0 + $0x58] sm:$0xff]  ;;  %v1241_v37 = vld [vmem:[%s2099_s0 + $0x60] sm:$0xff] }
   0x6   :  { %v80_v22 = vrot.slane %v79_v14, 4  ;;  %v93_v26 = vsel %vm43_vm0, %v1212_v18, -inf  ;;  %v67_v28 = vmax.f32 %v65_v12, %v66_v20  ;;  %v87_v33 = vrot.slane %v86_v23, 4  ;;  %2148 = vst [vmem:[#allocation3_spill] sm:$0xff] %v1231_v34  ;;  %2149 = vst [vmem:[#allocation4_spill] sm:$0xff] %v1236_v36  ;;  %v1246_v38 = vld [vmem:[%s2099_s0 + $0x68] sm:$0xff] }
   0x7   :  { %v47_v24 = vrot.slane %v46_v16, 2  ;;  %v54_v25 = vrot.slane %v53_v17, 2  ;;  %v61_v27 = vrot.slane %v60_v19, 2  ;;  %v74_v31 = vmax.f32 %v72_v13, %v73_v21  ;;  %2150 = vst [vmem:[#allocation5_spill] sm:$0xff] %v1241_v37  ;;  %2151 = vst [vmem:[#allocation6_spill] sm:$0xff] %v1246_v38  ;;  %v1251_v41 = vld [vmem:[%s2099_s0 + $0x70] sm:$0xff] }
   0x8   :  { %v81_v32 = vmax.f32 %v79_v14, %v80_v22  ;;  %v94_v35 = vrot.slane %v93_v26, 4  ;;  %2152 = vst [vmem:[#allocation7_spill] sm:$0xff] %v1251_v41  ;;  %v1256_v42 = vld [vmem:[%s2099_s0 + $0x78] sm:$0xff]  ;;  %v68_v44 = vrot.slane %v67_v28, 2  ;;  %v100_v45 = vsel %vm43_vm0, %v1221_v29, -inf }
   0x9   :  { %v48_v39 = vmax.f32 %v46_v16, %v47_v24  ;;  %v55_v40 = vmax.f32 %v53_v17, %v54_v25  ;;  %2153 = vst [vmem:[#allocation8_spill] sm:$0xff] %v1256_v42  ;;  %v62_v43 = vmax.f32 %v60_v19, %v61_v27  ;;  %v107_v46 = vsel %vm43_vm0, %v1226_v30, -inf  ;;  %v1288_v24 = vld [vmem:[%s2099_s0 + $0x88] sm:$0xff]  ;;  %v1293_v25 = vld [vmem:[%s2099_s0 + $0x90] sm:$0xff] }
   0xa   :  { %v75_v47 = vrot.slane %v74_v31, 2  ;;  %v82_v48 = vrot.slane %v81_v32, 2  ;;  %v88_v49 = vmax.f32 %v86_v23, %v87_v33  ;;  %v114_v50 = vsel %vm43_vm0, %v1231_v34, -inf  ;;  %v1283_v23 = vld [vmem:[%s2099_s0 + $0x80] sm:$0xff]  ;;  %2155 = vst [vmem:[#allocation10_spill] sm:$0xff] %v1288_v24  ;;  %2156 = vst [vmem:[#allocation11_spill] sm:$0xff] %v1293_v25 }
   0xb   :  { %v95_v51 = vmax.f32 %v93_v26, %v94_v35  ;;  %v121_v52 = vsel %vm43_vm0, %v1236_v36, -inf  ;;  %v128_v53 = vsel %vm43_vm0, %v1241_v37, -inf  ;;  %v135_v54 = vsel %vm43_vm0, %v1246_v38, -inf  ;;  %2154 = vst [vmem:[#allocation9_spill] sm:$0xff] %v1283_v23 }
   0xc   :  { %v101_v55 = vrot.slane %v100_v45, 4  ;;  %v108_v56 = vrot.slane %v107_v46, 4  ;;  %v142_v57 = vsel %vm43_vm0, %v1251_v41, -inf  ;;  %v149_v58 = vsel %vm43_vm0, %v1256_v42, -inf }
   0xd   :  { %v49_v59 = vrot.slane %v48_v39, 1  ;;  %v56_v60 = vrot.slane %v55_v40, 1  ;;  %v63_v61 = vrot.slane %v62_v43, 1  ;;  %v115_v62 = vrot.slane %v114_v50, 4 }
   0xe   :  { %v69_v63 = vmax.f32 %v67_v28, %v68_v44  ;;  %v122_v3 = vrot.slane %v121_v52, 4  ;;  %v129_v4 = vrot.slane %v128_v53, 4  ;;  %v136_v5 = vrot.slane %v135_v54, 4 }
   0xf   :  { %v76_v9 = vmax.f32 %v74_v31, %v75_v47  ;;  %v89_v10 = vrot.slane %v88_v49, 2  ;;  %v143_v11 = vrot.slane %v142_v57, 4  ;;  %v150_v12 = vrot.slane %v149_v58, 4 }
  0x10   :  { %v83_v13 = vmax.f32 %v81_v32, %v82_v48  ;;  %v96_v14 = vrot.slane %v95_v51, 2  ;;  %v102_v16 = vmax.f32 %v100_v45, %v101_v55  ;;  %v109_v17 = vmax.f32 %v107_v46, %v108_v56  ;;  %v1298_v46 = vld [vmem:[%s2099_s0 + $0x98] sm:$0xff]  ;;  %v1311_v55 = vld [vmem:[%s2099_s0 + $0xa0] sm:$0xff] }
  0x11   :  { %v1274_v19 = vmax.f32 %v48_v39, %v49_v59  ;;  %v1276_v20 = vmax.f32 %v55_v40, %v56_v60  ;;  %v1278_v21 = vmax.f32 %v62_v43, %v63_v61  ;;  %v116_v22 = vmax.f32 %v114_v50, %v115_v62  ;;  %2157 = vst [vmem:[#allocation12_spill] sm:$0xff] %v1298_v46 }
  0x12   :  { %v70_v26 = vrot.slane %v69_v63, 1  ;;  %v123_v27 = vmax.f32 %v121_v52, %v122_v3  ;;  %v130_v28 = vmax.f32 %v128_v53, %v129_v4  ;;  %v137_v31 = vmax.f32 %v135_v54, %v136_v5  ;;  %2158 = vst [vmem:[#allocation13_spill] sm:$0xff] %v1311_v55 }
  0x13   :  { %v77_v32 = vrot.slane %v76_v9, 1  ;;  %v90_v33 = vmax.f32 %v88_v49, %v89_v10  ;;  %v144_v35 = vmax.f32 %v142_v57, %v143_v11  ;;  %v151_v39 = vmax.f32 %v149_v58, %v150_v12 }
  0x14   :  { %v84_v40 = vrot.slane %v83_v13, 1  ;;  %v97_v43 = vmax.f32 %v95_v51, %v96_v14  ;;  %v103_v44 = vrot.slane %v102_v16, 2  ;;  %v110_v45 = vrot.slane %v109_v17, 2 }
  0x15   :  { %v117_v47 = vrot.slane %v116_v22, 2  ;;  %v156_v48 = vsel %vm43_vm0, %v1283_v23, -inf  ;;  %v163_v50 = vsel %vm43_vm0, %v1288_v24, -inf  ;;  %v170_v49 = vsel %vm43_vm0, %v1293_v25, -inf }
  0x16   :  { %v1306_v52 = vmax.f32 %v69_v63, %v70_v26  ;;  %v124_v51 = vrot.slane %v123_v27, 2  ;;  %v131_v53 = vrot.slane %v130_v28, 2  ;;  %v138_v54 = vrot.slane %v137_v31, 2 }
  0x17   :  { %v1313_v56 = vmax.f32 %v76_v9, %v77_v32  ;;  %v91_v57 = vrot.slane %v90_v33, 1  ;;  %v145_v58 = vrot.slane %v144_v35, 2  ;;  %v152_v59 = vrot.slane %v151_v39, 2 }
  0x18   :  { %v157_v60 = vrot.slane %v156_v48, 4  ;;  %v164_v61 = vrot.slane %v163_v50, 4  ;;  %v171_v62 = vrot.slane %v170_v49, 4  ;;  %v177_v63 = vsel %vm43_vm0, %v1298_v46, -inf  ;;  %v1326_v46 = vld [vmem:[%s2099_s0 + $0xa8] sm:$0xff] }
  0x19   :  { %v98_v3 = vrot.slane %v97_v43, 1  ;;  %v104_v4 = vmax.f32 %v102_v16, %v103_v44  ;;  %v111_v5 = vmax.f32 %v109_v17, %v110_v45  ;;  %v118_v10 = vmax.f32 %v116_v22, %v117_v47  ;;  %2159 = vst [vmem:[#allocation14_spill] sm:$0xff] %v1326_v46  ;;  %v1331_v16 = vld [vmem:[%s2099_s0 + $0xb0] sm:$0xff] }
  0x1a   :  { %v125_v11 = vmax.f32 %v123_v27, %v124_v51  ;;  %v132_v12 = vmax.f32 %v130_v28, %v131_v53  ;;  %v139_v14 = vmax.f32 %v137_v31, %v138_v54  ;;  %v184_v9 = vsel %vm43_vm0, %v1311_v55, -inf  ;;  %2160 = vst [vmem:[#allocation15_spill] sm:$0xff] %v1331_v16  ;;  %v1406_v55 = vld [vmem:[%s2099_s0 + $0xf8] sm:$0xff] }
  0x1b   :  { %v1319_v26 = vmax.f32 %v83_v13, %v84_v40  ;;  %v1321_v32 = vmax.f32 %v90_v33, %v91_v57  ;;  %v146_v25 = vmax.f32 %v144_v35, %v145_v58  ;;  %v178_v24 = vrot.slane %v177_v63, 4  ;;  %2176 = vst [vmem:[#allocation31_spill] sm:$0xff] %v1406_v55 }
  0x1c   :  { %v153_v17 = vmax.f32 %v151_v39, %v152_v59  ;;  %v158_v22 = vmax.f32 %v156_v48, %v157_v60  ;;  %v165_v27 = vmax.f32 %v163_v50, %v164_v61  ;;  %v172_v28 = vmax.f32 %v170_v49, %v171_v62  ;;  %v1342_v48 = vld [vmem:[%s2099_s0 + $0xb8] sm:$0xff]  ;;  %v1353_v61 = vld [vmem:[%s2099_s0 + $0xc0] sm:$0xff]  ;;  %v1358_v62 = vld [vmem:[%s2099_s0 + $0xc8] sm:$0xff] }
  0x1d   :  { %v105_v13 = vrot.slane %v104_v4, 1  ;;  %v112_v31 = vrot.slane %v111_v5, 1  ;;  %v119_v33 = vrot.slane %v118_v10, 1  ;;  %v185_v40 = vrot.slane %v184_v9, 4  ;;  %2161 = vst [vmem:[#allocation16_spill] sm:$0xff] %v1342_v48  ;;  %2164 = vst [vmem:[#allocation19_spill] sm:$0xff] %v1353_v61 }
  0x1e   :  { %v1333_v35 = vmax.f32 %v97_v43, %v98_v3  ;;  %v126_v44 = vrot.slane %v125_v11, 1  ;;  %v133_v45 = vrot.slane %v132_v12, 1  ;;  %v140_v47 = vrot.slane %v139_v14, 1  ;;  %2165 = vst [vmem:[#allocation20_spill] sm:$0xff] %v1358_v62 }
  0x1f   :  { %v147_v51 = vrot.slane %v146_v25, 1  ;;  %v179_v53 = vmax.f32 %v177_v63, %v178_v24  ;;  %v191_v54 = vsel %vm43_vm0, %v1326_v46, -inf  ;;  %v198_v39 = vsel %vm43_vm0, %v1331_v16, -inf  ;;  %v1363_v63 = vld [vmem:[%s2099_s0 + $0xd0] sm:$0xff] }
  0x20   :  { %v154_v50 = vrot.slane %v153_v17, 1  ;;  %v159_v49 = vrot.slane %v158_v22, 2  ;;  %v166_v43 = vrot.slane %v165_v27, 2  ;;  %v173_v57 = vrot.slane %v172_v28, 2  ;;  %2166 = vst [vmem:[#allocation21_spill] sm:$0xff] %v1363_v63 }
  0x21   :  { %v1344_v58 = vmax.f32 %v104_v4, %v105_v13  ;;  %v1346_v59 = vmax.f32 %v111_v5, %v112_v31  ;;  %v1348_v24 = vmax.f32 %v118_v10, %v119_v33  ;;  %v186_v60 = vmax.f32 %v184_v9, %v185_v40  ;;  %v1372_v9 = vld [vmem:[%s2099_s0 + $0xd8] sm:$0xff] }
  0x22   :  { %v1365_v3 = vmax.f32 %v125_v11, %v126_v44  ;;  %v1367_v4 = vmax.f32 %v132_v12, %v133_v45  ;;  %v192_v5 = vrot.slane %v191_v54, 4  ;;  %v199_v10 = vrot.slane %v198_v39, 4  ;;  %2169 = vst [vmem:[#allocation24_spill] sm:$0xff] %v1372_v9  ;;  %v1383_v11 = vld [vmem:[%s2099_s0 + $0xe0] sm:$0xff]  ;;  %v1388_v12 = vld [vmem:[%s2099_s0 + $0xe8] sm:$0xff] }
  0x23   :  { %2162 = vst [vmem:[#allocation17_spill] sm:$0xff] %v1346_v59  ;;  %2163 = vst [vmem:[#allocation18_spill] sm:$0xff] %v1348_v24  ;;  %v1374_v13 = vmax.f32 %v139_v14, %v140_v47  ;;  %v1376_v31 = vmax.f32 %v146_v25, %v147_v51  ;;  %v180_v33 = vrot.slane %v179_v53, 2  ;;  %v205_v40 = vsel %vm43_vm0, %v1342_v48, -inf  ;;  %v1393_v14 = vld [vmem:[%s2099_s0 + $0xf0] sm:$0xff] }
  0x24   :  { %2167 = vst [vmem:[#allocation22_spill] sm:$0xff] %v1365_v3  ;;  %2168 = vst [vmem:[#allocation23_spill] sm:$0xff] %v1367_v4  ;;  %v1395_v25 = vmax.f32 %v153_v17, %v154_v50  ;;  %v160_v44 = vmax.f32 %v158_v22, %v159_v49  ;;  %v167_v45 = vmax.f32 %v165_v27, %v166_v43  ;;  %v187_v51 = vrot.slane %v186_v60, 2 }
  0x25   :  { %2170 = vst [vmem:[#allocation25_spill] sm:$0xff] %v1374_v13  ;;  %2171 = vst [vmem:[#allocation26_spill] sm:$0xff] %v1376_v31  ;;  %v174_v47 = vmax.f32 %v172_v28, %v173_v57  ;;  %v212_v48 = vsel %vm43_vm0, %v1353_v61, -inf  ;;  %v219_v16 = vsel %vm43_vm0, %v1358_v62, -inf  ;;  %v226_v46 = vsel %vm43_vm0, %v1363_v63, -inf }
  0x26   :  { %2172 = vst [vmem:[#allocation27_spill] sm:$0xff] %v1383_v11  ;;  %2173 = vst [vmem:[#allocation28_spill] sm:$0xff] %v1388_v12  ;;  %v193_v17 = vmax.f32 %v191_v54, %v192_v5  ;;  %v200_v50 = vmax.f32 %v198_v39, %v199_v10  ;;  %v206_v22 = vrot.slane %v205_v40, 4  ;;  %v233_v27 = vsel %vm43_vm0, %v1372_v9, -inf }
  0x27   :  { %2174 = vst [vmem:[#allocation29_spill] sm:$0xff] %v1393_v14  ;;  %2175 = vst [vmem:[#allocation30_spill] sm:$0xff] %v1395_v25  ;;  %v181_v28 = vmax.f32 %v179_v53, %v180_v33  ;;  %v240_v49 = vsel %vm43_vm0, %v1383_v11, -inf  ;;  %v247_v43 = vsel %vm43_vm0, %v1388_v12, -inf  ;;  %v254_v57 = vsel %vm43_vm0, %v1393_v14, -inf }
  0x28   :  { %v161_v63 = vrot.slane %v160_v44, 1  ;;  %v213_v62 = vrot.slane %v212_v48, 4  ;;  %v220_v61 = vrot.slane %v219_v16, 4  ;;  %v227_v23 = vrot.slane %v226_v46, 4 }
  0x29   :  { %v168_v54 = vrot.slane %v167_v45, 1  ;;  %v175_v39 = vrot.slane %v174_v47, 1  ;;  %v234_v5 = vrot.slane %v233_v27, 4  ;;  %v261_v10 = vsel %vm43_vm0, %v1406_v55, -inf }
  0x2a   :  { %v188_v53 = vmax.f32 %v186_v60, %v187_v51  ;;  %v241_v33 = vrot.slane %v240_v49, 4  ;;  %v248_v9 = vrot.slane %v247_v43, 4  ;;  %v255_v11 = vrot.slane %v254_v57, 4 }
  0x2b   :  { %v182_v42 = vrot.slane %v181_v28, 1  ;;  %v194_v25 = vrot.slane %v193_v17, 2  ;;  %v201_v12 = vrot.slane %v200_v50, 2  ;;  %v207_v41 = vmax.f32 %v205_v40, %v206_v22 }
  0x2c   :  { %v214_v31 = vmax.f32 %v212_v48, %v213_v62  ;;  %v221_v14 = vmax.f32 %v219_v16, %v220_v61  ;;  %v228_v38 = vmax.f32 %v226_v46, %v227_v23  ;;  %v262_v13 = vrot.slane %v261_v10, 4 }
  0x2d   :  { %v1418_v37 = vmax.f32 %v160_v44, %v161_v63  ;;  %v1420_v4 = vmax.f32 %v167_v45, %v168_v54  ;;  %v1422_v36 = vmax.f32 %v174_v47, %v175_v39  ;;  %v235_v3 = vmax.f32 %v233_v27, %v234_v5 }
  0x2e   :  { %v189_v55 = vrot.slane %v188_v53, 1  ;;  %v242_v60 = vmax.f32 %v240_v49, %v241_v33  ;;  %v249_v51 = vmax.f32 %v247_v43, %v248_v9  ;;  %v256_v34 = vmax.f32 %v254_v57, %v255_v11 }
  0x2f   :  { %v1424_v24 = vmax.f32 %v181_v28, %v182_v42  ;;  %v195_v30 = vmax.f32 %v193_v17, %v194_v25  ;;  %v202_v59 = vmax.f32 %v200_v50, %v201_v12  ;;  %v208_v40 = vrot.slane %v207_v41, 2 }
  0x30   :  { %v215_v48 = vrot.slane %v214_v31, 2  ;;  %v222_v16 = vrot.slane %v221_v14, 2  ;;  %v229_v23 = vrot.slane %v228_v38, 2  ;;  %v263_v46 = vmax.f32 %v261_v10, %v262_v13 }
  0x31   :  { %v236_v61 = vrot.slane %v235_v3, 2  ;;  %v268_v62 = vsub.f32 %v1165_v0, %v1274_v19  ;;  %v269_v63 = vsub.f32 %v1170_v1, %v1276_v20  ;;  %v270_v9 = vsub.f32 %v1175_v2, %v1278_v21 }
  0x32   :  { %v243_v11 = vrot.slane %v242_v60, 2  ;;  %v250_v42 = vrot.slane %v249_v51, 2  ;;  %v257_v44 = vrot.slane %v256_v34, 2  ;;  %v271_v12 = vsub.f32 %v1186_v6, %v1306_v52 }
  0x33   :  { %v1434_v25 = vmax.f32 %v188_v53, %v189_v55  ;;  %v196_v45 = vrot.slane %v195_v30, 1  ;;  %v209_v13 = vmax.f32 %v207_v41, %v208_v40  ;;  %v272_v47 = vsub.f32 %v1191_v7, %v1313_v56 }
  0x34   :  { %v216_v0 = vmax.f32 %v214_v31, %v215_v48  ;;  %v223_v19 = vmax.f32 %v221_v14, %v222_v16  ;;  %v230_v17 = vmax.f32 %v228_v38, %v229_v23  ;;  %v264_v1 = vrot.slane %v263_v46, 2  ;;  %v2177_v16 = vld [vmem:[#allocation17_spill] sm:$0xff]  ;;  %v2178_v23 = vld [vmem:[#allocation2_spill] sm:$0xff] }
  0x35   :  { %v237_v20 = vmax.f32 %v235_v3, %v236_v61  ;;  %v300_v50 = vmul.f32 1.442695, %v268_v62  ;;  %v302_v2 = vmul.f32 1.442695, %v269_v63  ;;  %v304_v21 = vmul.f32 1.442695, %v270_v9 }
  0x36   :  { %v244_v22 = vmax.f32 %v242_v60, %v243_v11  ;;  %v251_v27 = vmax.f32 %v249_v51, %v250_v42  ;;  %v258_v28 = vmax.f32 %v256_v34, %v257_v44  ;;  %v306_v49 = vmul.f32 1.442695, %v271_v12  ;;  %v2181_v62 = vld [vmem:[#allocation22_spill] sm:$0xff]  ;;  %v2182_v63 = vld [vmem:[#allocation4_spill] sm:$0xff]  ;;  %v2185_v44 = vld [vmem:[#allocation25_spill] sm:$0xff] }
  0x37   :  { %v203_v6 = vrot.slane %v202_v59, 1  ;;  %v210_v52 = vrot.slane %v209_v13, 1  ;;  %1019 = vpow2.f32 %v300_v50  ;;  %v308_v55 = vmul.f32 1.442695, %v272_v47  ;;  %v2186_v12 = vld [vmem:[#allocation6_spill] sm:$0xff]  ;;  %v2188_v47 = vld [vmem:[#allocation7_spill] sm:$0xff] }
  0x38   :  { %v217_v41 = vrot.slane %v216_v0, 1  ;;  %v224_v43 = vrot.slane %v223_v19, 1  ;;  %v265_v57 = vmax.f32 %v263_v46, %v264_v1  ;;  %1021 = vpow2.f32 %v302_v2  ;;  %v2180_v46 = vld [vmem:[#allocation3_spill] sm:$0xff]  ;;  %v2191_v1 = vld [vmem:[#allocation9_spill] sm:$0xff]  ;;  %v2192_v2 = vld [vmem:[#allocation10_spill] sm:$0xff] }
  0x39   :  { %v231_v7 = vrot.slane %v230_v17, 1  ;;  %v238_v56 = vrot.slane %v237_v20, 1  ;;  %v273_v38 = vsub.f32 %v1196_v8, %v1319_v26  ;;  %1023 = vpow2.f32 %v304_v21 }
  0x3a   :  { %v245_v3 = vrot.slane %v244_v22, 1  ;;  %v252_v31 = vrot.slane %v251_v27, 1  ;;  %v259_v14 = vrot.slane %v258_v28, 1  ;;  %1025 = vpow2.f32 %v306_v49 }
  0x3b   :  { %v1440_v34 = vmax.f32 %v195_v30, %v196_v45  ;;  %v1442_v54 = vmax.f32 %v202_v59, %v203_v6  ;;  %v1444_v39 = vmax.f32 %v209_v13, %v210_v52  ;;  %1027 = vpow2.f32 %v308_v55  ;;  %v2187_v13 = vld [vmem:[#allocation26_spill] sm:$0xff]  ;;  %v2195_v52 = vld [vmem:[#allocation13_spill] sm:$0xff] }
  0x3c   :  { %v1446_v5 = vmax.f32 %v216_v0, %v217_v41  ;;  %v1448_v10 = vmax.f32 %v223_v19, %v224_v43  ;;  %v266_v53 = vrot.slane %v265_v57, 1  ;;  %v274_v8 = vsub.f32 %v1207_v15, %v1321_v32  ;;  %v2179_v32 = vld [vmem:[#allocation18_spill] sm:$0xff]  ;;  %v2190_v19 = vld [vmem:[#allocation8_spill] sm:$0xff] }
  0x3d   :  { %v1452_v26 = vmax.f32 %v230_v17, %v231_v7  ;;  %v1454_v33 = vmax.f32 %v237_v20, %v238_v56  ;;  %v275_v30 = vsub.f32 %v1212_v18, %v1333_v35  ;;  %v310_v59 = vmul.f32 1.442695, %v273_v38  ;;  %v2183_v18 = vld [vmem:[#allocation23_spill] sm:$0xff]  ;;  %v2184_v35 = vld [vmem:[#allocation5_spill] sm:$0xff]  ;;  %v2189_v0 = vld [vmem:[#allocation30_spill] sm:$0xff] }
  0x3e   :  { %v1458_v60 = vmax.f32 %v244_v22, %v245_v3  ;;  %v1460_v51 = vmax.f32 %v251_v27, %v252_v31  ;;  %v1462_v40 = vmax.f32 %v258_v28, %v259_v14  ;;  %v276_v48 = vsub.f32 %v1221_v29, %v1344_v58  ;;  %v2193_v22 = vld [vmem:[#allocation11_spill] sm:$0xff]  ;;  %v2194_v28 = vld [vmem:[#allocation12_spill] sm:$0xff]  ;;  %v2196_v41 = vld [vmem:[#allocation14_spill] sm:$0xff] }
  0x3f   :  { %v277_v15 = vsub.f32 %v2178_v23, %v2177_v16  ;;  %v278_v61 = vsub.f32 %v2180_v46, %v2179_v32  ;;  %v279_v9 = vsub.f32 %v2182_v63, %v2181_v62  ;;  %v280_v11 = vsub.f32 %v2184_v35, %v2183_v18  ;;  %v2204_v35 = vld [vmem:[#allocation28_spill] sm:$0xff] }
  0x40   :  { %v1474_v42 = vmax.f32 %v265_v57, %v266_v53  ;;  %v281_v45 = vsub.f32 %v2186_v12, %v2185_v44  ;;  %v282_v29 = vsub.f32 %v2188_v47, %v2187_v13  ;;  %v312_v58 = vmul.f32 1.442695, %v274_v8  ;;  %v2205_v47 = vld [vmem:[#allocation29_spill] sm:$0xff] }
  0x41   :  { %v283_v17 = vsub.f32 %v2190_v19, %v2189_v0  ;;  %v284_v20 = vsub.f32 %v2191_v1, %v1418_v37  ;;  %1029 = vpow2.f32 %v310_v59  ;;  %v314_v50 = vmul.f32 1.442695, %v275_v30  ;;  %v2197_v37 = vld [vmem:[#allocation15_spill] sm:$0xff]  ;;  %v2201_v59 = vld [vmem:[#allocation21_spill] sm:$0xff] }
  0x42   :  { %v285_v21 = vsub.f32 %v2192_v2, %v1420_v4  ;;  %v286_v27 = vsub.f32 %v2193_v22, %v1422_v36  ;;  %v287_v49 = vsub.f32 %v2194_v28, %v1424_v24  ;;  %v316_v6 = vmul.f32 1.442695, %v276_v48  ;;  %v2198_v4 = vld [vmem:[#allocation16_spill] sm:$0xff]  ;;  %v2199_v36 = vld [vmem:[#allocation19_spill] sm:$0xff] }
  0x43   :  { %v288_v55 = vsub.f32 %v2195_v52, %v1434_v25  ;;  %v289_v43 = vsub.f32 %v2196_v41, %v1440_v34  ;;  %v290_v57 = vsub.f32 %v2197_v37, %v1442_v54  ;;  %v318_v7 = vmul.f32 1.442695, %v277_v15  ;;  %v2200_v25 = vld [vmem:[#allocation20_spill] sm:$0xff]  ;;  %v2206_v19 = vld [vmem:[#allocation31_spill] sm:$0xff] }
  0x44   :  { %v1496_v56 = vpop.eup %1019  ;;  %v291_v38 = vsub.f32 %v2198_v4, %v1444_v39  ;;  %v292_v3 = vsub.f32 %v2199_v36, %v1446_v5  ;;  %1031 = vpow2.f32 %v312_v58  ;;  %v320_v24 = vmul.f32 1.442695, %v278_v61  ;;  %v2202_v61 = vld [vmem:[#allocation24_spill] sm:$0xff] }
  0x45   :  { %v1502_v31 = vpop.eup %1021  ;;  %v293_v14 = vsub.f32 %v2200_v25, %v1448_v10  ;;  %1033 = vpow2.f32 %v314_v50  ;;  %v322_v34 = vmul.f32 1.442695, %v279_v9  ;;  %v364_v54 = vsel %vm43_vm0, %v1496_v56, 0.0 }
  0x46   :  { %v1508_v53 = vpop.eup %1023  ;;  %1035 = vpow2.f32 %v316_v6  ;;  %v324_v8 = vmul.f32 1.442695, %v280_v11  ;;  %v365_v39 = vrot.slane %v364_v54, 4  ;;  %v371_v5 = vsel %vm43_vm0, %v1502_v31, 0.0 }
  0x47   :  { %v1512_v30 = vpop.eup %1025  ;;  %v294_v48 = vsub.f32 %v2201_v59, %v1452_v26  ;;  %1037 = vpow2.f32 %v318_v7  ;;  %v326_v10 = vmul.f32 1.442695, %v281_v45  ;;  %v378_v16 = vsel %vm43_vm0, %v1508_v53, 0.0  ;;  %v2203_v26 = vld [vmem:[#allocation27_spill] sm:$0xff] }
  0x48   :  { %v1518_v23 = vpop.eup %1027  ;;  %1039 = vpow2.f32 %v320_v24  ;;  %v366_v15 = vadd.f32 %v365_v39, %v364_v54  ;;  %v372_v32 = vrot.slane %v371_v5, 4  ;;  %v385_v46 = vsel %vm43_vm0, %v1512_v30, 0.0 }
  0x49   :  { %v295_v62 = vsub.f32 %v2202_v61, %v1454_v33  ;;  %1041 = vpow2.f32 %v322_v34  ;;  %v328_v63 = vmul.f32 1.442695, %v282_v29  ;;  %v379_v9 = vrot.slane %v378_v16, 4 }
  0x4a   :  { %v296_v18 = vsub.f32 %v2203_v26, %v1458_v60  ;;  %v297_v11 = vsub.f32 %v2204_v35, %v1460_v51  ;;  %1043 = vpow2.f32 %v324_v8  ;;  %v330_v44 = vmul.f32 1.442695, %v283_v17 }
  0x4b   :  { %1045 = vpow2.f32 %v326_v10  ;;  %v332_v12 = vmul.f32 1.442695, %v284_v20  ;;  %v386_v45 = vrot.slane %v385_v46, 4  ;;  %v392_v13 = vsel %vm43_vm0, %v1518_v23, 0.0 }
  0x4c   :  { %v298_v33 = vsub.f32 %v2205_v47, %v1462_v40  ;;  %v334_v58 = vmul.f32 1.442695, %v285_v21  ;;  %v367_v29 = vrot.slane %v366_v15, 2  ;;  %v373_v0 = vadd.f32 %v372_v32, %v371_v5 }
  0x4d   :  { %v299_v60 = vsub.f32 %v2206_v19, %v1474_v42  ;;  %1047 = vpow2.f32 %v328_v63  ;;  %v336_v1 = vmul.f32 1.442695, %v286_v27  ;;  %v380_v51 = vadd.f32 %v379_v9, %v378_v16 }
  0x4e   :  { %v1534_v50 = vpop.eup %1029  ;;  %1049 = vpow2.f32 %v330_v44  ;;  %v338_v17 = vmul.f32 1.442695, %v287_v49  ;;  %v340_v20 = vmul.f32 1.442695, %v288_v55  ;;  %v393_v2 = vrot.slane %v392_v13, 4 }
  0x4f   :  { %1051 = vpow2.f32 %v332_v12  ;;  %v342_v22 = vmul.f32 1.442695, %v289_v43  ;;  %v344_v28 = vmul.f32 1.442695, %v290_v57  ;;  %v387_v6 = vadd.f32 %v386_v45, %v385_v46 }
  0x50   :  { %1053 = vpow2.f32 %v334_v58  ;;  %v346_v40 = vmul.f32 1.442695, %v291_v38  ;;  %v368_v21 = vadd.f32 %v367_v29, %v366_v15  ;;  %v374_v52 = vrot.slane %v373_v0, 2 }
  0x51   :  { %v1536_v41 = vpop.eup %1031  ;;  %1055 = vpow2.f32 %v336_v1  ;;  %v348_v42 = vmul.f32 1.442695, %v292_v3  ;;  %v381_v27 = vrot.slane %v380_v51, 2  ;;  %v399_v37 = vsel %vm43_vm0, %v1534_v50, 0.0 }
  0x52   :  { %v1540_v7 = vpop.eup %1033  ;;  %1057 = vpow2.f32 %v338_v17  ;;  %v350_v49 = vmul.f32 1.442695, %v293_v14  ;;  %v352_v55 = vmul.f32 1.442695, %v294_v48  ;;  %v394_v43 = vadd.f32 %v393_v2, %v392_v13 }
  0x53   :  { %v1542_v57 = vpop.eup %1035  ;;  %1059 = vpow2.f32 %v340_v20  ;;  %v354_v4 = vmul.f32 1.442695, %v295_v62  ;;  %v356_v38 = vmul.f32 1.442695, %v296_v18  ;;  %v388_v36 = vrot.slane %v387_v6, 2 }
  0x54   :  { %2207 = vst [vmem:[#allocation17_spill] sm:$0xff] %v1542_v57  ;;  %v1544_v24 = vpop.eup %1037  ;;  %1061 = vpow2.f32 %v342_v22  ;;  %v369_v3 = vrot.slane %v368_v21, 1  ;;  %v375_v25 = vadd.f32 %v374_v52, %v373_v0  ;;  %v400_v34 = vrot.slane %v399_v37, 4 }
  0x55   :  { %2208 = vst [vmem:[#allocation2_spill] sm:$0xff] %v1544_v24  ;;  %v1546_v54 = vpop.eup %1039  ;;  %1063 = vpow2.f32 %v344_v28  ;;  %v358_v8 = vmul.f32 1.442695, %v297_v11  ;;  %v1548_v39 = vmul.f32 1.442695, %v298_v33  ;;  %v382_v14 = vadd.f32 %v381_v27, %v380_v51 }
  0x56   :  { %2209 = vst [vmem:[#allocation18_spill] sm:$0xff] %v1546_v54  ;;  %v1550_v5 = vpop.eup %1041  ;;  %1065 = vpow2.f32 %v346_v40  ;;  %v1552_v59 = vmul.f32 1.442695, %v299_v60  ;;  %v395_v48 = vrot.slane %v394_v43, 2  ;;  %v406_v10 = vsel %vm43_vm0, %v1536_v41, 0.0 }
  0x57   :  { %2210 = vst [vmem:[#allocation3_spill] sm:$0xff] %v1550_v5  ;;  %v1556_v16 = vpop.eup %1043  ;;  %1067 = vpow2.f32 %v348_v42  ;;  %v389_v15 = vadd.f32 %v388_v36, %v387_v6  ;;  %v413_v32 = vsel %vm43_vm0, %v1540_v7, 0.0  ;;  %v420_v46 = vsel %vm43_vm0, %v1542_v57, 0.0 }
  0x58   :  { %2211 = vst [vmem:[#allocation22_spill] sm:$0xff] %v1556_v16  ;;  %v1562_v61 = vpop.eup %1045  ;;  %1069 = vpow2.f32 %v350_v49  ;;  %v1564_v62 = vadd.f32 %v369_v3, %v368_v21  ;;  %v376_v63 = vrot.slane %v375_v25, 1  ;;  %v401_v9 = vadd.f32 %v400_v34, %v399_v37 }
  0x59   :  { %2212 = vst [vmem:[#allocation4_spill] sm:$0xff] %v1562_v61  ;;  %v383_v26 = vrot.slane %v382_v14, 1  ;;  %v407_v18 = vrot.slane %v406_v10, 4  ;;  %v427_v35 = vsel %vm43_vm0, %v1544_v24, 0.0  ;;  %v434_v11 = vsel %vm43_vm0, %v1546_v54, 0.0 }
  0x5a   :  { %v1570_v44 = vpop.eup %1047  ;;  %v396_v12 = vadd.f32 %v395_v48, %v394_v43  ;;  %v414_v45 = vrot.slane %v413_v32, 4  ;;  %v421_v13 = vrot.slane %v420_v46, 4  ;;  %v441_v47 = vsel %vm43_vm0, %v1550_v5, 0.0 }
  0x5b   :  { %2213 = vst [vmem:[#allocation23_spill] sm:$0xff] %v1570_v44  ;;  %v1574_v33 = vpop.eup %1049  ;;  %1071 = vpow2.f32 %v352_v55  ;;  %v390_v58 = vrot.slane %v389_v15, 1  ;;  %v448_v29 = vsel %vm43_vm0, %v1556_v16, 0.0  ;;  %v455_v0 = vsel %vm43_vm0, %v1562_v61, 0.0 }
  0x5c   :  { %2214 = vst [vmem:[#allocation5_spill] sm:$0xff] %v1574_v33  ;;  %v1580_v19 = vpop.eup %1051  ;;  %v1582_v60 = vadd.f32 %v376_v63, %v375_v25  ;;  %v402_v1 = vrot.slane %v401_v9, 2  ;;  %v428_v51 = vrot.slane %v427_v35, 4  ;;  %v435_v17 = vrot.slane %v434_v11, 4 }
  0x5d   :  { %2215 = vst [vmem:[#allocation25_spill] sm:$0xff] %v1580_v19  ;;  %v1584_v20 = vpop.eup %1053  ;;  %1073 = vpow2.f32 %v354_v4  ;;  %v1586_v2 = vadd.f32 %v383_v26, %v382_v14  ;;  %v408_v22 = vadd.f32 %v407_v18, %v406_v10  ;;  %v442_v28 = vrot.slane %v441_v47, 4 }
  0x5e   :  { %2216 = vst [vmem:[#allocation6_spill] sm:$0xff] %v1584_v20  ;;  %v1588_v6 = vpop.eup %1055  ;;  %v415_v40 = vadd.f32 %v414_v45, %v413_v32  ;;  %v422_v21 = vadd.f32 %v421_v13, %v420_v46  ;;  %v449_v52 = vrot.slane %v448_v29, 4  ;;  %v456_v42 = vrot.slane %v455_v0, 4 }
  0x5f   :  { %2217 = vst [vmem:[#allocation26_spill] sm:$0xff] %v1588_v6  ;;  %v1590_v27 = vpop.eup %1057  ;;  %1075 = vpow2.f32 %v356_v38  ;;  %v1592_v37 = vadd.f32 %v390_v58, %v389_v15  ;;  %v397_v49 = vrot.slane %v396_v12, 1  ;;  %v462_v55 = vsel %vm43_vm0, %v1570_v44, 0.0 }
  0x60   :  { %2218 = vst [vmem:[#allocation7_spill] sm:$0xff] %v1590_v27  ;;  %v1596_v43 = vpop.eup %1059  ;;  %1077 = vpow2.f32 %v358_v8  ;;  %v403_v4 = vadd.f32 %v402_v1, %v401_v9  ;;  %v429_v36 = vadd.f32 %v428_v51, %v427_v35  ;;  %v436_v3 = vadd.f32 %v435_v17, %v434_v11 }
  0x61   :  { %2219 = vst [vmem:[#allocation30_spill] sm:$0xff] %v1596_v43  ;;  %v1598_v25 = vpop.eup %1061  ;;  %v409_v34 = vrot.slane %v408_v22, 2  ;;  %v443_v14 = vadd.f32 %v442_v28, %v441_v47  ;;  %v463_v48 = vrot.slane %v462_v55, 4  ;;  %v469_v38 = vsel %vm43_vm0, %v1574_v33, 0.0 }
  0x62   :  { %2220 = vst [vmem:[#allocation8_spill] sm:$0xff] %v1598_v25  ;;  %v1602_v10 = vpop.eup %1063  ;;  %v416_v15 = vrot.slane %v415_v40, 2  ;;  %v423_v32 = vrot.slane %v422_v21, 2  ;;  %v450_v46 = vadd.f32 %v449_v52, %v448_v29  ;;  %v457_v63 = vadd.f32 %v456_v42, %v455_v0 }
  0x63   :  { %2221 = vst [vmem:[#allocation9_spill] sm:$0xff] %v1602_v10  ;;  %v1604_v26 = vpop.eup %1065  ;;  %v464_v8 = vadd.f32 %v463_v48, %v462_v55  ;;  %v470_v9 = vrot.slane %v469_v38, 4  ;;  %v476_v18 = vsel %vm43_vm0, %v1580_v19, 0.0  ;;  %v483_v35 = vsel %vm43_vm0, %v1584_v20, 0.0 }
  0x64   :  { %2222 = vst [vmem:[#allocation10_spill] sm:$0xff] %v1604_v26  ;;  %v1610_v11 = vpop.eup %1067  ;;  %v1612_v45 = vadd.f32 %v397_v49, %v396_v12  ;;  %v430_v13 = vrot.slane %v429_v36, 2  ;;  %v437_v47 = vrot.slane %v436_v3, 2  ;;  %v477_v58 = vrot.slane %v476_v18, 4 }
  0x65   :  { %2223 = vst [vmem:[#allocation11_spill] sm:$0xff] %v1610_v11  ;;  %v1614_v1 = vpop.eup %1069  ;;  %1079 = vpow2.f32 %v1548_v39  ;;  %v404_v29 = vrot.slane %v403_v4, 1  ;;  %v410_v0 = vadd.f32 %v409_v34, %v408_v22  ;;  %v444_v51 = vrot.slane %v443_v14, 2 }
  0x66   :  { %2224 = vst [vmem:[#allocation12_spill] sm:$0xff] %v1614_v1  ;;  %v451_v17 = vrot.slane %v450_v46, 2  ;;  %v458_v28 = vrot.slane %v457_v63, 2  ;;  %v484_v52 = vrot.slane %v483_v35, 4  ;;  %v490_v42 = vsel %vm43_vm0, %v1588_v6, 0.0 }
  0x67   :  { %v417_v55 = vadd.f32 %v416_v15, %v415_v40  ;;  %v424_v48 = vadd.f32 %v423_v32, %v422_v21  ;;  %v465_v12 = vrot.slane %v464_v8, 2  ;;  %v471_v49 = vadd.f32 %v470_v9, %v469_v38 }
  0x68   :  { %v1619_v20 = vpop.eup %1071  ;;  %v431_v19 = vadd.f32 %v430_v13, %v429_v36  ;;  %v438_v33 = vadd.f32 %v437_v47, %v436_v3  ;;  %v478_v44 = vadd.f32 %v477_v58, %v476_v18  ;;  %v497_v39 = vsel %vm43_vm0, %v1590_v27, 0.0 }
  0x69   :  { %2225 = vst [vmem:[#allocation13_spill] sm:$0xff] %v1619_v20  ;;  %1081 = vpow2.f32 %v1552_v59  ;;  %v411_v22 = vrot.slane %v410_v0, 1  ;;  %v445_v34 = vadd.f32 %v444_v51, %v443_v14  ;;  %v491_v61 = vrot.slane %v490_v42, 4 }
  0x6a   :  { %v1624_v16 = vpop.eup %1073  ;;  %v452_v6 = vadd.f32 %v451_v17, %v450_v46  ;;  %v459_v40 = vadd.f32 %v458_v28, %v457_v63  ;;  %v485_v21 = vadd.f32 %v484_v52, %v483_v35  ;;  %v504_v38 = vsel %vm43_vm0, %v1596_v43, 0.0 }
  0x6b   :  { %2226 = vst [vmem:[#allocation14_spill] sm:$0xff] %v1624_v16  ;;  %v418_v15 = vrot.slane %v417_v55, 1  ;;  %v466_v36 = vadd.f32 %v465_v12, %v464_v8  ;;  %v472_v3 = vrot.slane %v471_v49, 2  ;;  %v498_v32 = vrot.slane %v497_v39, 4 }
  0x6c   :  { %v1628_v9 = vpop.eup %1075  ;;  %v425_v18 = vrot.slane %v424_v48, 1  ;;  %v432_v13 = vrot.slane %v431_v19, 1  ;;  %v439_v59 = vrot.slane %v438_v33, 1  ;;  %v479_v47 = vrot.slane %v478_v44, 2 }
  0x6d   :  { %2227 = vst [vmem:[#allocation15_spill] sm:$0xff] %v1628_v9  ;;  %v1630_v14 = vpop.eup %1077  ;;  %v1632_v58 = vadd.f32 %v404_v29, %v403_v4  ;;  %v446_v46 = vrot.slane %v445_v34, 1  ;;  %v492_v63 = vadd.f32 %v491_v61, %v490_v42  ;;  %v505_v35 = vrot.slane %v504_v38, 4 }
  0x6e   :  { %2228 = vst [vmem:[#allocation16_spill] sm:$0xff] %v1630_v14  ;;  %v1634_v51 = vadd.f32 %v411_v22, %v410_v0  ;;  %v453_v17 = vrot.slane %v452_v6, 1  ;;  %v460_v28 = vrot.slane %v459_v40, 1  ;;  %v486_v8 = vrot.slane %v485_v21, 2 }
  0x6f   :  { %v1636_v52 = vadd.f32 %v418_v15, %v417_v55  ;;  %v467_v12 = vrot.slane %v466_v36, 1  ;;  %v473_v43 = vadd.f32 %v472_v3, %v471_v49  ;;  %v499_v27 = vadd.f32 %v498_v32, %v497_v39 }
  0x70   :  { %v1638_v5 = vadd.f32 %v425_v18, %v424_v48  ;;  %v1640_v54 = vadd.f32 %v432_v13, %v431_v19  ;;  %v1642_v24 = vadd.f32 %v439_v59, %v438_v33  ;;  %v480_v4 = vadd.f32 %v479_v47, %v478_v44 }
  0x71   :  { %v1644_v29 = vadd.f32 %v446_v46, %v445_v34  ;;  %v493_v61 = vrot.slane %v492_v63, 2  ;;  %v506_v0 = vadd.f32 %v505_v35, %v504_v38  ;;  %v511_v42 = vsel %vm43_vm0, %v1598_v25, 0.0 }
  0x72   :  { %v1648_v22 = vpop.eup %1079  ;;  %v1650_v55 = vadd.f32 %v453_v17, %v452_v6  ;;  %v1652_v49 = vadd.f32 %v460_v28, %v459_v40  ;;  %v487_v48 = vadd.f32 %v486_v8, %v485_v21  ;;  %v518_v19 = vsel %vm43_vm0, %v1602_v10, 0.0 }
  0x73   :  { %v1656_v33 = vadd.f32 %v467_v12, %v466_v36  ;;  %v474_v44 = vrot.slane %v473_v43, 1  ;;  %v500_v39 = vrot.slane %v499_v27, 2  ;;  %v525_v34 = vsel %vm43_vm0, %v1604_v26, 0.0 }
  0x74   :  { %v481_v38 = vrot.slane %v480_v4, 1  ;;  %v512_v15 = vrot.slane %v511_v42, 4  ;;  %v532_v3 = vsel %vm43_vm0, %v1610_v11, 0.0  ;;  %v539_v6 = vsel %vm43_vm0, %v1614_v1, 0.0 }
  0x75   :  { %v494_v40 = vadd.f32 %v493_v61, %v492_v63  ;;  %v507_v21 = vrot.slane %v506_v0, 2  ;;  %v519_v32 = vrot.slane %v518_v19, 4  ;;  %v546_v36 = vsel %vm43_vm0, %v1619_v20, 0.0 }
  0x76   :  { %v1666_v18 = vpop.eup %1081  ;;  %v488_v13 = vrot.slane %v487_v48, 1  ;;  %v526_v59 = vrot.slane %v525_v34, 4  ;;  %v553_v47 = vsel %vm43_vm0, %v1624_v16, 0.0  ;;  %v560_v46 = vsel %vm43_vm0, %v1628_v9, 0.0 }
  0x77   :  { %v501_v35 = vadd.f32 %v500_v39, %v499_v27  ;;  %v533_v17 = vrot.slane %v532_v3, 4  ;;  %v540_v28 = vrot.slane %v539_v6, 4  ;;  %v567_v63 = vsel %vm43_vm0, %v1630_v14, 0.0 }
  0x78   :  { %v1674_v8 = vadd.f32 %v474_v44, %v473_v43  ;;  %v1676_v12 = vadd.f32 %v481_v38, %v480_v4  ;;  %v513_v61 = vadd.f32 %v512_v15, %v511_v42  ;;  %v547_v20 = vrot.slane %v546_v36, 4 }
  0x79   :  { %v495_v1 = vrot.slane %v494_v40, 1  ;;  %v520_v11 = vadd.f32 %v519_v32, %v518_v19  ;;  %v554_v26 = vrot.slane %v553_v47, 4  ;;  %v561_v10 = vrot.slane %v560_v46, 4 }
  0x7a   :  { %v508_v16 = vadd.f32 %v507_v21, %v506_v0  ;;  %v527_v25 = vadd.f32 %v526_v59, %v525_v34  ;;  %v568_v57 = vrot.slane %v567_v63, 4  ;;  %v574_v27 = vsel %vm43_vm0, %v1648_v22, 0.0 }
  0x7b   :  { %v1680_v39 = vadd.f32 %v488_v13, %v487_v48  ;;  %v502_v9 = vrot.slane %v501_v35, 1  ;;  %v534_v14 = vadd.f32 %v533_v17, %v532_v3  ;;  %v541_v43 = vadd.f32 %v540_v28, %v539_v6 }
  0x7c   :  { %v514_v44 = vrot.slane %v513_v61, 2  ;;  %v548_v4 = vadd.f32 %v547_v20, %v546_v36  ;;  %v575_v38 = vrot.slane %v574_v27, 4  ;;  %v581_v42 = vsel %vm43_vm0, %v1666_v18, 0.0 }
  0x7d   :  { %v1684_v19 = vadd.f32 %v495_v1, %v494_v40  ;;  %v521_v15 = vrot.slane %v520_v11, 2  ;;  %v555_v0 = vadd.f32 %v554_v26, %v553_v47  ;;  %v562_v34 = vadd.f32 %v561_v10, %v560_v46 }
  0x7e   :  { %v528_v21 = vrot.slane %v527_v25, 2  ;;  %v569_v32 = vadd.f32 %v568_v57, %v567_v63  ;;  %v582_v59 = vrot.slane %v581_v42, 4  ;;  %1083 = vrcp.f32 %v1564_v62 }
  0x7f   :  { %v535_v48 = vrot.slane %v534_v14, 2  ;;  %v542_v13 = vrot.slane %v541_v43, 2  ;;  %v576_v3 = vadd.f32 %v575_v38, %v574_v27  ;;  %1085 = vrcp.f32 %v1582_v60 }
  0x80   :  { %v509_v20 = vrot.slane %v508_v16, 1  ;;  %v549_v6 = vrot.slane %v548_v4, 2  ;;  %v583_v36 = vadd.f32 %v582_v59, %v581_v42  ;;  %1087 = vrcp.f32 %v1586_v2 }
  0x81   :  { %v515_v1 = vadd.f32 %v514_v44, %v513_v61  ;;  %v556_v40 = vrot.slane %v555_v0, 2  ;;  %v563_v17 = vrot.slane %v562_v34, 2  ;;  %1089 = vrcp.f32 %v1592_v37 }
  0x82   :  { %v522_v10 = vadd.f32 %v521_v15, %v520_v11  ;;  %v529_v57 = vadd.f32 %v528_v21, %v527_v25  ;;  %v570_v26 = vrot.slane %v569_v32, 2  ;;  %1091 = vrcp.f32 %v1612_v45  ;;  %v653_v21 = vld [vmem:[%s2100_s1 + $0x8] sm:$0xff] }
  0x83   :  { %v536_v62 = vadd.f32 %v535_v48, %v534_v14  ;;  %v543_v47 = vadd.f32 %v542_v13, %v541_v43  ;;  %v577_v46 = vrot.slane %v576_v3, 2  ;;  %1093 = vrcp.f32 %v1632_v58 }
  0x84   :  { %v1692_v60 = vadd.f32 %v502_v9, %v501_v35  ;;  %v550_v28 = vadd.f32 %v549_v6, %v548_v4  ;;  %v584_v63 = vrot.slane %v583_v36, 2  ;;  %1095 = vrcp.f32 %v1634_v51 }
  0x85   :  { %v516_v2 = vrot.slane %v515_v1, 1  ;;  %v557_v61 = vadd.f32 %v556_v40, %v555_v0  ;;  %v564_v27 = vadd.f32 %v563_v17, %v562_v34  ;;  %1097 = vrcp.f32 %v1636_v52  ;;  %v656_v17 = vld [vmem:[%s2100_s1 + $0x20] sm:$0xff] }
  0x86   :  { %v523_v37 = vrot.slane %v522_v10, 1  ;;  %v530_v25 = vrot.slane %v529_v57, 1  ;;  %v571_v11 = vadd.f32 %v570_v26, %v569_v32  ;;  %1099 = vrcp.f32 %v1638_v5 }
  0x87   :  { %v537_v45 = vrot.slane %v536_v62, 1  ;;  %v544_v14 = vrot.slane %v543_v47, 1  ;;  %v578_v43 = vadd.f32 %v577_v46, %v576_v3  ;;  %1101 = vrcp.f32 %v1640_v54 }
  0x88   :  { %v510_v9 = vadd.f32 %v509_v20, %v508_v16  ;;  %v551_v58 = vrot.slane %v550_v28, 1  ;;  %v585_v35 = vadd.f32 %v584_v63, %v583_v36  ;;  %1103 = vrcp.f32 %v1642_v24  ;;  %v652_v24 = vld [vmem:[%s2100_s1] sm:$0xff]  ;;  %v659_v63 = vld [vmem:[%s2100_s1 + $0x38] sm:$0xff] }
  0x89   :  { %v517_v51 = vadd.f32 %v516_v2, %v515_v1  ;;  %v558_v44 = vrot.slane %v557_v61, 1  ;;  %v565_v4 = vrot.slane %v564_v27, 1  ;;  %1105 = vrcp.f32 %v1644_v29 }
  0x8a   :  { %v524_v52 = vadd.f32 %v523_v37, %v522_v10  ;;  %v531_v38 = vadd.f32 %v530_v25, %v529_v57  ;;  %v572_v42 = vrot.slane %v571_v11, 1  ;;  %1107 = vrcp.f32 %v1650_v55  ;;  %v657_v57 = vld [vmem:[%s2100_s1 + $0x28] sm:$0xff]  ;;  %v660_v25 = vld [vmem:[%s2100_s1 + $0x40] sm:$0xff] }
  0x8b   :  { %v1084_v5 = vpop.eup %1083  ;;  %v1701_v15 = vadd.f32 %v537_v45, %v536_v62  ;;  %v1703_v0 = vadd.f32 %v544_v14, %v543_v47  ;;  %v579_v54 = vrot.slane %v578_v43, 1  ;;  %1109 = vrcp.f32 %v1652_v49  ;;  %v658_v47 = vld [vmem:[%s2100_s1 + $0x30] sm:$0xff] }
  0x8c   :  { %v1086_v16 = vpop.eup %1085  ;;  %v1709_v34 = vadd.f32 %v551_v58, %v550_v28  ;;  %v586_v29 = vrot.slane %v585_v35, 1  ;;  %1111 = vrcp.f32 %v1656_v33  ;;  %v620_v55 = vmul.f32 %v1084_v5, %v1496_v56  ;;  %v654_v33 = vld [vmem:[%s2100_s1 + $0x10] sm:$0xff] }
  0x8d   :  { %v1088_v32 = vpop.eup %1087  ;;  %v1716_v59 = vadd.f32 %v558_v44, %v557_v61  ;;  %v1718_v49 = vadd.f32 %v565_v4, %v564_v27  ;;  %1113 = vrcp.f32 %v1674_v8  ;;  %v621_v48 = vmul.f32 %v1086_v16, %v1502_v31  ;;  %v655_v31 = vld [vmem:[%s2100_s1 + $0x18] sm:$0xff]  ;;  %v2231_v44 = vld [vmem:[#allocation18_spill] sm:$0xff] }
  0x8e   :  { %v1090_v13 = vpop.eup %1089  ;;  %v1722_v3 = vadd.f32 %v572_v42, %v571_v11  ;;  %1115 = vrcp.f32 %v1676_v12  ;;  %v622_v56 = vmul.f32 %v1088_v32, %v1508_v53  ;;  %v684_v20 = vmul.f32 %v652_v24, %v620_v55  ;;  %v2229_v27 = vld [vmem:[#allocation17_spill] sm:$0xff] }
  0x8f   :  { %v1092_v6 = vpop.eup %1091  ;;  %v1729_v36 = vadd.f32 %v579_v54, %v578_v43  ;;  %1117 = vrcp.f32 %v1680_v39  ;;  %v623_v8 = vmul.f32 %v1090_v13, %v1512_v30  ;;  %v685_v1 = vmul.f32 %v653_v21, %v621_v48  ;;  %v2232_v54 = vld [vmem:[#allocation3_spill] sm:$0xff]  ;;  %v663_v16 = vld [vmem:[%s2100_s1 + $0x58] sm:$0xff]  ;;  %v2233_v21 = vld [vmem:[#allocation22_spill] sm:$0xff] }
  0x90   :  { %v1094_v12 = vpop.eup %1093  ;;  %v1736_v40 = vadd.f32 %v586_v29, %v585_v35  ;;  %1119 = vrcp.f32 %v1684_v19  ;;  %v624_v53 = vmul.f32 %v1092_v6, %v1518_v23  ;;  %v716_v39 = vsel %vm43_vm0, %v684_v20, 0.0  ;;  %v664_v48 = vld [vmem:[%s2100_s1 + $0x60] sm:$0xff]  ;;  %v2234_v20 = vld [vmem:[#allocation4_spill] sm:$0xff] }
  0x91   :  { %v1096_v10 = vpop.eup %1095  ;;  %1121 = vrcp.f32 %v1692_v60  ;;  %v625_v30 = vmul.f32 %v1094_v12, %v1534_v50  ;;  %v1749_v26 = vmul.f32 %v654_v33, %v622_v56  ;;  %v717_v19 = vrot.slane %v716_v39, 4 }
  0x92   :  { %v1098_v62 = vpop.eup %1097  ;;  %1123 = vrcp.f32 %v510_v9  ;;  %v626_v23 = vmul.f32 %v1096_v10, %v1536_v41  ;;  %v1755_v46 = vmul.f32 %v655_v31, %v623_v8  ;;  %v723_v60 = vsel %vm43_vm0, %v685_v1, 0.0  ;;  %v661_v9 = vld [vmem:[%s2100_s1 + $0x48] sm:$0xff] }
  0x93   :  { %v1100_v50 = vpop.eup %1099  ;;  %1125 = vrcp.f32 %v517_v51  ;;  %v627_v28 = vmul.f32 %v1098_v62, %v1540_v7  ;;  %v1762_v2 = vmul.f32 %v656_v17, %v624_v53  ;;  %v718_v61 = vadd.f32 %v717_v19, %v716_v39  ;;  %v2230_v7 = vld [vmem:[#allocation2_spill] sm:$0xff]  ;;  %v2235_v1 = vld [vmem:[#allocation23_spill] sm:$0xff]  ;;  %v666_v53 = vld [vmem:[%s2100_s1 + $0x70] sm:$0xff] }
  0x94   :  { %v1102_v41 = vpop.eup %1101  ;;  %1127 = vrcp.f32 %v524_v52  ;;  %v628_v37 = vmul.f32 %v1100_v50, %v2229_v27  ;;  %v1768_v11 = vmul.f32 %v657_v57, %v625_v30  ;;  %v724_v45 = vrot.slane %v723_v60, 4  ;;  %v662_v52 = vld [vmem:[%s2100_s1 + $0x50] sm:$0xff]  ;;  %v667_v57 = vld [vmem:[%s2100_s1 + $0x78] sm:$0xff] }
  0x95   :  { %v1104_v14 = vpop.eup %1103  ;;  %1129 = vrcp.f32 %v531_v38  ;;  %v629_v43 = vmul.f32 %v1102_v41, %v2230_v7  ;;  %v1774_v58 = vmul.f32 %v658_v47, %v626_v23  ;;  %v719_v35 = vrot.slane %v718_v61, 2  ;;  %v2237_v47 = vld [vmem:[#allocation25_spill] sm:$0xff]  ;;  %v669_v41 = vld [vmem:[%s2100_s1 + $0x88] sm:$0xff] }
  0x96   :  { %v1106_v51 = vpop.eup %1105  ;;  %1131 = vrcp.f32 %v1701_v15  ;;  %v630_v4 = vmul.f32 %v1104_v14, %v2231_v44  ;;  %v1781_v42 = vmul.f32 %v659_v63, %v627_v28  ;;  %v725_v38 = vadd.f32 %v724_v45, %v723_v60  ;;  %v2238_v63 = vld [vmem:[#allocation6_spill] sm:$0xff]  ;;  %v670_v14 = vld [vmem:[%s2100_s1 + $0x90] sm:$0xff]  ;;  %v671_v44 = vld [vmem:[%s2100_s1 + $0x98] sm:$0xff] }
  0x97   :  { %v1108_v5 = vpop.eup %1107  ;;  %1133 = vrcp.f32 %v1703_v0  ;;  %v631_v24 = vmul.f32 %v1106_v51, %v2232_v54  ;;  %v1788_v29 = vmul.f32 %v660_v25, %v628_v37  ;;  %v720_v15 = vadd.f32 %v719_v35, %v718_v61  ;;  %v665_v0 = vld [vmem:[%s2100_s1 + $0x68] sm:$0xff]  ;;  %v2239_v25 = vld [vmem:[#allocation26_spill] sm:$0xff] }
  0x98   :  { %v1110_v55 = vpop.eup %1109  ;;  %1135 = vrcp.f32 %v1709_v34  ;;  %v632_v32 = vmul.f32 %v1108_v5, %v2233_v21  ;;  %v1798_v13 = vmul.f32 %v661_v9, %v629_v43  ;;  %v726_v56 = vrot.slane %v725_v38, 2  ;;  %v2240_v35 = vld [vmem:[#allocation7_spill] sm:$0xff]  ;;  %v2241_v5 = vld [vmem:[#allocation30_spill] sm:$0xff] }
  0x99   :  { %v1112_v33 = vpop.eup %1111  ;;  %1137 = vrcp.f32 %v1716_v59  ;;  %v633_v6 = vmul.f32 %v1110_v55, %v2234_v20  ;;  %v1802_v8 = vmul.f32 %v662_v52, %v630_v4  ;;  %v721_v34 = vrot.slane %v720_v15, 1  ;;  %v2236_v59 = vld [vmem:[#allocation5_spill] sm:$0xff] }
  0x9a   :  { %v1114_v31 = vpop.eup %1113  ;;  %1139 = vrcp.f32 %v1718_v49  ;;  %v634_v12 = vmul.f32 %v1112_v33, %v2235_v1  ;;  %v1809_v17 = vmul.f32 %v663_v16, %v631_v24  ;;  %v727_v39 = vadd.f32 %v726_v56, %v725_v38  ;;  %v668_v49 = vld [vmem:[%s2100_s1 + $0x80] sm:$0xff]  ;;  %v2243_v20 = vld [vmem:[#allocation9_spill] sm:$0xff] }
  0x9b   :  { %v1116_v10 = vpop.eup %1115  ;;  %1141 = vrcp.f32 %v1722_v3  ;;  %v635_v30 = vmul.f32 %v1114_v31, %v2236_v59  ;;  %v1819_v19 = vmul.f32 %v664_v48, %v632_v32  ;;  %v1821_v62 = vmul.f32 %v665_v0, %v633_v6  ;;  %v672_v24 = vld [vmem:[%s2100_s1 + $0xa0] sm:$0xff]  ;;  %v2242_v32 = vld [vmem:[#allocation8_spill] sm:$0xff]  ;;  %v675_v59 = vld [vmem:[%s2100_s1 + $0xb8] sm:$0xff] }
  0x9c   :  { %v1118_v23 = vpop.eup %1117  ;;  %1143 = vrcp.f32 %v1729_v36  ;;  %v636_v60 = vmul.f32 %v1116_v10, %v2237_v47  ;;  %v1825_v3 = vadd.f32 %v721_v34, %v720_v15  ;;  %v728_v50 = vrot.slane %v727_v39, 1  ;;  %v674_v34 = vld [vmem:[%s2100_s1 + $0xb0] sm:$0xff] }
  0x9d   :  { %v1120_v28 = vpop.eup %1119  ;;  %1145 = vrcp.f32 %v1736_v40  ;;  %v637_v61 = vmul.f32 %v1118_v23, %v2238_v63  ;;  %v1832_v27 = vmul.f32 %v666_v53, %v634_v12  ;;  %v730_v37 = vsel %vm43_vm0, %v1749_v26, 0.0  ;;  %v2245_v23 = vld [vmem:[#allocation11_spill] sm:$0xff] }
  0x9e   :  { %v1122_v36 = vpop.eup %1121  ;;  %v638_v45 = vmul.f32 %v1120_v28, %v2239_v25  ;;  %v1840_v7 = vmul.f32 %v667_v57, %v635_v30  ;;  %v1842_v40 = vmul.f32 %v668_v49, %v636_v60  ;;  %v731_v43 = vrot.slane %v730_v37, 4  ;;  %v676_v60 = vld [vmem:[%s2100_s1 + $0xc0] sm:$0xff]  ;;  %v678_v25 = vld [vmem:[%s2100_s1 + $0xd0] sm:$0xff] }
  0x9f   :  { %v1124_v9 = vpop.eup %1123  ;;  %v639_v51 = vmul.f32 %v1122_v36, %v2240_v35  ;;  %v1848_v26 = vadd.f32 %v728_v50, %v727_v39  ;;  %v737_v4 = vsel %vm43_vm0, %v1755_v46, 0.0  ;;  %v744_v52 = vsel %vm43_vm0, %v1762_v2, 0.0  ;;  %v673_v46 = vld [vmem:[%s2100_s1 + $0xa8] sm:$0xff]  ;;  %v2244_v39 = vld [vmem:[#allocation10_spill] sm:$0xff]  ;;  %v2247_v35 = vld [vmem:[#allocation13_spill] sm:$0xff] }
  0xa0   :  { %v1126_v38 = vpop.eup %1125  ;;  %v640_v54 = vmul.f32 %v1124_v9, %v2241_v5  ;;  %v1858_v16 = vmul.f32 %v669_v41, %v637_v61  ;;  %v732_v15 = vadd.f32 %v731_v43, %v730_v37  ;;  %v738_v55 = vrot.slane %v737_v4, 4  ;;  %v2246_v41 = vld [vmem:[#allocation12_spill] sm:$0xff]  ;;  %v677_v36 = vld [vmem:[%s2100_s1 + $0xc8] sm:$0xff]  ;;  %v2248_v5 = vld [vmem:[#allocation14_spill] sm:$0xff] }
  0xa1   :  { %v1128_v21 = vpop.eup %1127  ;;  %v641_v48 = vmul.f32 %v1126_v38, %v2242_v32  ;;  %v1864_v0 = vmul.f32 %v670_v14, %v638_v45  ;;  %v745_v2 = vrot.slane %v744_v52, 4  ;;  %v751_v56 = vsel %vm43_vm0, %v1768_v11, 0.0 }
  0xa2   :  { %v1130_v33 = vpop.eup %1129  ;;  %v642_v6 = vmul.f32 %v1128_v21, %v2243_v20  ;;  %v1872_v31 = vmul.f32 %v671_v44, %v639_v51  ;;  %v733_v1 = vrot.slane %v732_v15, 2  ;;  %v739_v12 = vadd.f32 %v738_v55, %v737_v4 }
  0xa3   :  { %v1132_v53 = vpop.eup %1131  ;;  %v643_v10 = vmul.f32 %v1130_v33, %v2244_v39  ;;  %v1878_v30 = vmul.f32 %v672_v24, %v640_v54  ;;  %v746_v11 = vadd.f32 %v745_v2, %v744_v52  ;;  %v752_v57 = vrot.slane %v751_v56, 4  ;;  %v679_v24 = vld [vmem:[%s2100_s1 + $0xd8] sm:$0xff] }
  0xa4   :  { %v1134_v49 = vpop.eup %1133  ;;  %v644_v47 = vmul.f32 %v1132_v53, %v2245_v23  ;;  %v1884_v50 = vmul.f32 %v673_v46, %v641_v48  ;;  %v734_v28 = vadd.f32 %v733_v1, %v732_v15  ;;  %v740_v63 = vrot.slane %v739_v12, 2  ;;  %v680_v15 = vld [vmem:[%s2100_s1 + $0xe0] sm:$0xff]  ;;  %v2249_v46 = vld [vmem:[#allocation15_spill] sm:$0xff]  ;;  %v2250_v1 = vld [vmem:[#allocation16_spill] sm:$0xff] }
  0xa5   :  { %v1136_v61 = vpop.eup %1135  ;;  %v645_v37 = vmul.f32 %v1134_v49, %v2246_v41  ;;  %v1893_v45 = vmul.f32 %v674_v34, %v642_v6  ;;  %v747_v14 = vrot.slane %v746_v11, 2  ;;  %v753_v43 = vadd.f32 %v752_v57, %v751_v56  ;;  %v681_v56 = vld [vmem:[%s2100_s1 + $0xe8] sm:$0xff]  ;;  %v682_v57 = vld [vmem:[%s2100_s1 + $0xf0] sm:$0xff]  ;;  %v683_v49 = vld [vmem:[%s2100_s1 + $0xf8] sm:$0xff] }
  0xa6   :  { %v1138_v9 = vpop.eup %1137  ;;  %v646_v51 = vmul.f32 %v1136_v61, %v2247_v35  ;;  %v1896_v44 = vmul.f32 %v675_v59, %v643_v10  ;;  %v735_v4 = vrot.slane %v734_v28, 1  ;;  %v741_v52 = vadd.f32 %v740_v63, %v739_v12 }
  0xa7   :  { %v1140_v38 = vpop.eup %1139  ;;  %v647_v54 = vmul.f32 %v1138_v9, %v2248_v5  ;;  %v1905_v55 = vmul.f32 %v676_v60, %v644_v47  ;;  %v748_v21 = vadd.f32 %v747_v14, %v746_v11  ;;  %v754_v32 = vrot.slane %v753_v43, 2 }
  0xa8   :  { %v1142_v48 = vpop.eup %1141  ;;  %v648_v2 = vmul.f32 %v1140_v38, %v2249_v46  ;;  %v1911_v33 = vmul.f32 %v677_v36, %v645_v37  ;;  %v1913_v20 = vmul.f32 %v678_v25, %v646_v51  ;;  %v742_v6 = vrot.slane %v741_v52, 1 }
  0xa9   :  { %v1144_v34 = vpop.eup %1143  ;;  %v649_v12 = vmul.f32 %v1142_v48, %v2250_v1  ;;  %v1916_v53 = vadd.f32 %v735_v4, %v734_v28  ;;  %v749_v39 = vrot.slane %v748_v21, 1  ;;  %v755_v10 = vadd.f32 %v754_v32, %v753_v43 }
  0xaa   :  { %v1146_v59 = vpop.eup %1145  ;;  %v650_v11 = vmul.f32 %v1144_v34, %v1648_v22  ;;  %v1925_v23 = vmul.f32 %v679_v24, %v647_v54  ;;  %v1927_v47 = vmul.f32 %v680_v15, %v648_v2  ;;  %v758_v60 = vsel %vm43_vm0, %v1774_v58, 0.0 }
  0xab   :  { %v651_v28 = vmul.f32 %v1146_v59, %v1666_v18  ;;  %v1932_v63 = vmul.f32 %v681_v56, %v649_v12  ;;  %v1934_v22 = vadd.f32 %v742_v6, %v741_v52  ;;  %v1936_v61 = vadd.f32 %v749_v39, %v748_v21 }
  0xac   :  { %v756_v41 = vrot.slane %v755_v10, 1  ;;  %v759_v37 = vrot.slane %v758_v60, 4  ;;  %v765_v36 = vsel %vm43_vm0, %v1781_v42, 0.0  ;;  %v772_v25 = vsel %vm43_vm0, %v1788_v29, 0.0 }
  0xad   :  { %v1942_v14 = vmul.f32 %v682_v57, %v650_v11  ;;  %v1944_v43 = vmul.f32 %v683_v49, %v651_v28  ;;  %v766_v58 = vrot.slane %v765_v36, 4  ;;  %v773_v18 = vrot.slane %v772_v25, 4 }
  0xae   :  { %v760_v9 = vadd.f32 %v759_v37, %v758_v60  ;;  %v779_v35 = vsel %vm43_vm0, %v1798_v13, 0.0  ;;  %v786_v51 = vsel %vm43_vm0, %v1802_v8, 0.0  ;;  %v793_v4 = vsel %vm43_vm0, %v1809_v17, 0.0 }
  0xaf   :  { %v767_v42 = vadd.f32 %v766_v58, %v765_v36  ;;  %v774_v52 = vadd.f32 %v773_v18, %v772_v25  ;;  %v780_v38 = vrot.slane %v779_v35, 4  ;;  %v787_v29 = vrot.slane %v786_v51, 4 }
  0xb0   :  { %v761_v5 = vrot.slane %v760_v9, 2  ;;  %v794_v54 = vrot.slane %v793_v4, 4  ;;  %v800_v24 = vsel %vm43_vm0, %v1819_v19, 0.0  ;;  %v807_v15 = vsel %vm43_vm0, %v1821_v62, 0.0 }
  0xb1   :  { %v768_v21 = vrot.slane %v767_v42, 2  ;;  %v775_v13 = vrot.slane %v774_v52, 2  ;;  %v781_v32 = vadd.f32 %v780_v38, %v779_v35  ;;  %v788_v48 = vadd.f32 %v787_v29, %v786_v51 }
  0xb2   :  { %v762_v8 = vadd.f32 %v761_v5, %v760_v9  ;;  %v795_v46 = vadd.f32 %v794_v54, %v793_v4  ;;  %v801_v2 = vrot.slane %v800_v24, 4  ;;  %v808_v17 = vrot.slane %v807_v15, 4 }
  0xb3   :  { %v769_v56 = vadd.f32 %v768_v21, %v767_v42  ;;  %v776_v6 = vadd.f32 %v775_v13, %v774_v52  ;;  %v782_v34 = vrot.slane %v781_v32, 2  ;;  %v789_v1 = vrot.slane %v788_v48, 2 }
  0xb4   :  { %v763_v12 = vrot.slane %v762_v8, 1  ;;  %v796_v39 = vrot.slane %v795_v46, 2  ;;  %v802_v59 = vadd.f32 %v801_v2, %v800_v24  ;;  %v809_v11 = vadd.f32 %v808_v17, %v807_v15 }
  0xb5   :  { %v770_v19 = vrot.slane %v769_v56, 1  ;;  %v777_v57 = vrot.slane %v776_v6, 1  ;;  %v783_v49 = vadd.f32 %v782_v34, %v781_v32  ;;  %v790_v62 = vadd.f32 %v789_v1, %v788_v48 }
  0xb6   :  { %v1956_v60 = vadd.f32 %v756_v41, %v755_v10  ;;  %v797_v28 = vadd.f32 %v796_v39, %v795_v46  ;;  %v803_v37 = vrot.slane %v802_v59, 2  ;;  %v810_v36 = vrot.slane %v809_v11, 2 }
  0xb7   :  { %v1958_v25 = vadd.f32 %v763_v12, %v762_v8  ;;  %v1960_v58 = vadd.f32 %v770_v19, %v769_v56  ;;  %v784_v18 = vrot.slane %v783_v49, 1  ;;  %v791_v9 = vrot.slane %v790_v62, 1 }
  0xb8   :  { %v798_v35 = vrot.slane %v797_v28, 1  ;;  %v804_v51 = vadd.f32 %v803_v37, %v802_v59  ;;  %v811_v4 = vadd.f32 %v810_v36, %v809_v11  ;;  %v814_v42 = vsel %vm43_vm0, %v1832_v27, 0.0 }
  0xb9   :  { %v1964_v52 = vadd.f32 %v777_v57, %v776_v6  ;;  %v1966_v38 = vadd.f32 %v784_v18, %v783_v49  ;;  %v815_v10 = vrot.slane %v814_v42, 4  ;;  %v821_v41 = vsel %vm43_vm0, %v1840_v7, 0.0 }
  0xba   :  { %v1970_v29 = vadd.f32 %v791_v9, %v790_v62  ;;  %v1972_v5 = vadd.f32 %v798_v35, %v797_v28  ;;  %v805_v54 = vrot.slane %v804_v51, 1  ;;  %v822_v24 = vrot.slane %v821_v41, 4 }
  0xbb   :  { %v816_v15 = vadd.f32 %v815_v10, %v814_v42  ;;  %v828_v21 = vsel %vm43_vm0, %v1842_v40, 0.0  ;;  %v835_v27 = vsel %vm43_vm0, %v1858_v16, 0.0  ;;  %v842_v13 = vsel %vm43_vm0, %v1864_v0, 0.0 }
  0xbc   :  { %v1980_v32 = vadd.f32 %v805_v54, %v804_v51  ;;  %v812_v48 = vrot.slane %v811_v4, 1  ;;  %v823_v7 = vadd.f32 %v822_v24, %v821_v41  ;;  %v829_v8 = vrot.slane %v828_v21, 4 }
  0xbd   :  { %v817_v46 = vrot.slane %v816_v15, 2  ;;  %v836_v2 = vrot.slane %v835_v27, 4  ;;  %v843_v17 = vrot.slane %v842_v13, 4  ;;  %v849_v56 = vsel %vm43_vm0, %v1872_v31, 0.0 }
  0xbe   :  { %v824_v6 = vrot.slane %v823_v7, 2  ;;  %v830_v34 = vadd.f32 %v829_v8, %v828_v21  ;;  %v850_v40 = vrot.slane %v849_v56, 4  ;;  %v856_v16 = vsel %vm43_vm0, %v1878_v30, 0.0 }
  0xbf   :  { %v818_v1 = vadd.f32 %v817_v46, %v816_v15  ;;  %v837_v12 = vadd.f32 %v836_v2, %v835_v27  ;;  %v844_v0 = vadd.f32 %v843_v17, %v842_v13  ;;  %v857_v39 = vrot.slane %v856_v16, 4 }
  0xc0   :  { %v825_v59 = vadd.f32 %v824_v6, %v823_v7  ;;  %v831_v11 = vrot.slane %v830_v34, 2  ;;  %v851_v19 = vadd.f32 %v850_v40, %v849_v56  ;;  %v863_v57 = vsel %vm43_vm0, %v1884_v50, 0.0 }
  0xc1   :  { %v819_v49 = vrot.slane %v818_v1, 1  ;;  %v838_v62 = vrot.slane %v837_v12, 2  ;;  %v845_v28 = vrot.slane %v844_v0, 2  ;;  %v858_v31 = vadd.f32 %v857_v39, %v856_v16 }
  0xc2   :  { %v826_v37 = vrot.slane %v825_v59, 1  ;;  %v832_v36 = vadd.f32 %v831_v11, %v830_v34  ;;  %v852_v18 = vrot.slane %v851_v19, 2  ;;  %v864_v9 = vrot.slane %v863_v57, 4 }
  0xc3   :  { %v1988_v35 = vadd.f32 %v812_v48, %v811_v4  ;;  %v839_v30 = vadd.f32 %v838_v62, %v837_v12  ;;  %v846_v51 = vadd.f32 %v845_v28, %v844_v0  ;;  %v859_v42 = vrot.slane %v858_v31, 2 }
  0xc4   :  { %v1990_v10 = vadd.f32 %v819_v49, %v818_v1  ;;  %v833_v41 = vrot.slane %v832_v36, 1  ;;  %v853_v54 = vadd.f32 %v852_v18, %v851_v19  ;;  %v865_v24 = vadd.f32 %v864_v9, %v863_v57 }
  0xc5   :  { %v840_v15 = vrot.slane %v839_v30, 1  ;;  %v847_v50 = vrot.slane %v846_v51, 1  ;;  %v860_v21 = vadd.f32 %v859_v42, %v858_v31  ;;  %v870_v27 = vsel %vm43_vm0, %v1893_v45, 0.0 }
  0xc6   :  { %v1994_v13 = vadd.f32 %v826_v37, %v825_v59  ;;  %v854_v7 = vrot.slane %v853_v54, 1  ;;  %v866_v8 = vrot.slane %v865_v24, 2  ;;  %v871_v4 = vrot.slane %v870_v27, 4 }
  0xc7   :  { %v1996_v48 = vadd.f32 %v833_v41, %v832_v36  ;;  %v1998_v46 = vadd.f32 %v840_v15, %v839_v30  ;;  %v861_v2 = vrot.slane %v860_v21, 1  ;;  %v877_v17 = vsel %vm43_vm0, %v1896_v44, 0.0 }
  0xc8   :  { %v2002_v56 = vadd.f32 %v847_v50, %v846_v51  ;;  %v867_v6 = vadd.f32 %v866_v8, %v865_v24  ;;  %v872_v34 = vadd.f32 %v871_v4, %v870_v27  ;;  %v878_v40 = vrot.slane %v877_v17, 4 }
  0xc9   :  { %v2004_v16 = vadd.f32 %v854_v7, %v853_v54  ;;  %v884_v45 = vsel %vm43_vm0, %v1905_v55, 0.0  ;;  %v891_v1 = vsel %vm43_vm0, %v1911_v33, 0.0  ;;  %v898_v12 = vsel %vm43_vm0, %v1913_v20, 0.0 }
  0xca   :  { %v2012_v0 = vadd.f32 %v861_v2, %v860_v21  ;;  %v873_v39 = vrot.slane %v872_v34, 2  ;;  %v879_v44 = vadd.f32 %v878_v40, %v877_v17  ;;  %v885_v59 = vrot.slane %v884_v45, 4 }
  0xcb   :  { %v892_v11 = vrot.slane %v891_v1, 4  ;;  %v899_v19 = vrot.slane %v898_v12, 4  ;;  %v905_v57 = vsel %vm43_vm0, %v1925_v23, 0.0  ;;  %v912_v49 = vsel %vm43_vm0, %v1927_v47, 0.0 }
  0xcc   :  { %v868_v55 = vrot.slane %v867_v6, 1  ;;  %v874_v62 = vadd.f32 %v873_v39, %v872_v34  ;;  %v880_v33 = vrot.slane %v879_v44, 2  ;;  %v886_v28 = vadd.f32 %v885_v59, %v884_v45 }
  0xcd   :  { %v893_v20 = vadd.f32 %v892_v11, %v891_v1  ;;  %v900_v31 = vadd.f32 %v899_v19, %v898_v12  ;;  %v906_v37 = vrot.slane %v905_v57, 4  ;;  %v913_v36 = vrot.slane %v912_v49, 4 }
  0xce   :  { %v875_v18 = vrot.slane %v874_v62, 1  ;;  %v2018_v9 = vadd.f32 %v880_v33, %v879_v44  ;;  %v887_v30 = vrot.slane %v886_v28, 2  ;;  %v919_v23 = vsel %vm43_vm0, %v1932_v63, 0.0 }
  0xcf   :  { %v894_v47 = vrot.slane %v893_v20, 2  ;;  %v901_v51 = vrot.slane %v900_v31, 2  ;;  %v907_v42 = vadd.f32 %v906_v37, %v905_v57  ;;  %v914_v41 = vadd.f32 %v913_v36, %v912_v49 }
  0xd0   :  { %v2022_v54 = vadd.f32 %v868_v55, %v867_v6  ;;  %v2024_v24 = vadd.f32 %v875_v18, %v874_v62  ;;  %v888_v15 = vadd.f32 %v887_v30, %v886_v28  ;;  %v920_v50 = vrot.slane %v919_v23, 4 }
  0xd1   :  { %v895_v21 = vadd.f32 %v894_v47, %v893_v20  ;;  %v902_v27 = vadd.f32 %v901_v51, %v900_v31  ;;  %v908_v7 = vrot.slane %v907_v42, 2  ;;  %v915_v8 = vrot.slane %v914_v41, 2 }
  0xd2   :  { %vm984_vm7 = vcmask 1047559   ;;  %v882_v63 = vrot.slane %v2018_v9, 1  ;;  %v889_v4 = vrot.slane %v888_v15, 1  ;;  %v921_v2 = vadd.f32 %v920_v50, %v919_v23 }
  0xd3   :  { %v926_v17 = vsel %vm43_vm0, %v1942_v14, 0.0  ;;  %v896_v34 = vrot.slane %v895_v21, 1  ;;  %v903_v6 = vrot.slane %v902_v27, 1  ;;  %v909_v40 = vadd.f32 %v908_v7, %v907_v42 }
  0xd4   :  { %v916_v45 = vadd.f32 %v915_v8, %v914_v41  ;;  %v890_v1 = vadd.f32 %v889_v4, %v888_v15  ;;  %v922_v12 = vrot.slane %v921_v2, 2  ;;  %v927_v39 = vrot.slane %v926_v17, 4 }
  0xd5   :  { %v933_v44 = vsel %vm43_vm0, %v1944_v43, 0.0  ;;  %v897_v59 = vadd.f32 %v896_v34, %v895_v21  ;;  %v904_v11 = vadd.f32 %v903_v6, %v902_v27  ;;  %v910_v19 = vrot.slane %v909_v40, 1 }
  0xd6   :  { %v917_v57 = vrot.slane %v916_v45, 1  ;;  %v923_v49 = vadd.f32 %v922_v12, %v921_v2  ;;  %v928_v55 = vadd.f32 %v927_v39, %v926_v17  ;;  %v934_v62 = vrot.slane %v933_v44, 4 }
  0xd7   :  { %v973_v14 = vsel %vm972_vm1, %v1848_v26, %v1825_v3  ;;  %v911_v33 = vadd.f32 %v910_v19, %v909_v40  ;;  %v986_v43 = vsel %vm972_vm1, %v1966_v38, %v1964_v52  ;;  %v993_v26 = vsel %vm972_vm1, %v1998_v46, %v1996_v48 }
  0xd8   :  { %v918_v28 = vadd.f32 %v917_v57, %v916_v45  ;;  %v975_v20 = vsel %vm974_vm2, %v1916_v53, %v973_v14  ;;  %v924_v31 = vrot.slane %v923_v49, 1  ;;  %v929_v37 = vrot.slane %v928_v55, 2 }
  0xd9   :  { %v935_v36 = vadd.f32 %v934_v62, %v933_v44  ;;  %v977_v18 = vsel %vm976_vm3, %v1934_v22, %v975_v20  ;;  %v987_v3 = vsel %vm974_vm2, %v1970_v29, %v986_v43  ;;  %v1000_v53 = vsel %vm972_vm1, %v897_v59, %v890_v1 }
  0xda   :  { %v979_v30 = vsel %vm978_vm4, %v1936_v61, %v977_v18  ;;  %v925_v23 = vadd.f32 %v924_v31, %v923_v49  ;;  %v930_v52 = vadd.f32 %v929_v37, %v928_v55  ;;  %v988_v61 = vsel %vm976_vm3, %v1972_v5, %v987_v3 }
  0xdb   :  { %v936_v38 = vrot.slane %v935_v36, 2  ;;  %v981_v47 = vsel %vm980_vm5, %v1956_v60, %v979_v30  ;;  %v994_v29 = vsel %vm974_vm2, %v2002_v56, %v993_v26  ;;  %v1001_v51 = vsel %vm974_vm2, %v904_v11, %v1000_v53 }
  0xdc   :  { %v983_v22 = vsel %vm982_vm6, %v1958_v25, %v981_v47  ;;  %v931_v48 = vrot.slane %v930_v52, 1  ;;  %v989_v41 = vsel %vm978_vm4, %v1980_v32, %v988_v61  ;;  %v883_v60 = vadd.f32 %v882_v63, %v2018_v9 }
  0xdd   :  { %v937_v46 = vadd.f32 %v936_v38, %v935_v36  ;;  %v985_v42 = vsel %vm984_vm7, %v1960_v58, %v983_v22  ;;  %v990_v25 = vsel %vm980_vm5, %v1988_v35, %v989_v41  ;;  %v995_v5 = vsel %vm976_vm3, %v2004_v16, %v994_v29 }
  0xde   :  { %v1002_v56 = vsel %vm976_vm3, %v911_v33, %v1001_v51  ;;  %1011 = vst.msk [vmem:[%s2101_s2] sm:$0xff] %vm43_vm0, %v985_v42  ;;  %v932_v15 = vadd.f32 %v931_v48, %v930_v52  ;;  %v991_v32 = vsel %vm982_vm6, %v1990_v10, %v990_v25  ;;  %v996_v9 = vsel %vm978_vm4, %v2012_v0, %v995_v5 }
  0xdf   :  { %v938_v58 = vrot.slane %v937_v46, 1  ;;  %v992_v35 = vsel %vm984_vm7, %v1994_v13, %v991_v32  ;;  %v997_v16 = vsel %vm980_vm5, %v2022_v54, %v996_v9  ;;  %v1003_v50 = vsel %vm978_vm4, %v918_v28, %v1002_v56 }
  0xe0   :  { %v998_v27 = vsel %vm982_vm6, %v2024_v24, %v997_v16  ;;  %v1004_v7 = vsel %vm980_vm5, %v925_v23, %v1003_v50  ;;  %1012 = vst.msk [vmem:[%s2101_s2 + $0x8] sm:$0xff] %vm43_vm0, %v992_v35 }
  0xe1   :  { %v939_v21 = vadd.f32 %v938_v58, %v937_v46  ;;  %v999_v10 = vsel %vm984_vm7, %v883_v60, %v998_v27  ;;  %v1005_v13 = vsel %vm982_vm6, %v932_v15, %v1004_v7 }
  0xe2   :  { %1013 = vst.msk [vmem:[%s2101_s2 + $0x10] sm:$0xff] %vm43_vm0, %v999_v10 }
  0xe3   :  { %v1006_v0 = vsel %vm984_vm7, %v939_v21, %v1005_v13 }
  0xe4   :  { %1014 = vst.msk [vmem:[%s2101_s2 + $0x18] sm:$0xff] %vm43_vm0, %v1006_v0 }

// kernel: _lambda_.69
= control target key start
LH: loop header
LB: loop body
LE: loop exit
PB: predicated region body
PF: predicated region fallthrough
CT: control target
= control target key end

     0   :  { %vm40_vm0 = vcmask 261120   ;;  %s252_s1 = inlined_call_operand.vmem [shape: f32[32,32], index: 1, kind: input, shape index: {}]   ;;  %s253_s0 = inlined_call_operand.vmem [shape: f32[64,32], index: 0, kind: input, shape index: {}]   ;;  %s254_s2 = inlined_call_operand.vmem [shape: f32[1,32], index: 2, kind: input, shape index: {}]   ;;  %s255_s3 = inlined_call_operand.vmem [shape: f32[64,32], index: 3, kind: output, shape index: {}]  }
   0x1   :  { %v25_v0 = vld [vmem:[%s252_s1 + $0x10] sm:$0xff]  ;;  %v26_v1 = vld [vmem:[%s252_s1 + $0x18] sm:$0xff]  ;;  %v23_v2 = vld [vmem:[%s252_s1] sm:$0xff] }
   0x2   :  { %v28_v3 = vpack.c.bf16 %v26_v1, %v25_v0  ;;  %v24_v4 = vld [vmem:[%s252_s1 + $0x8] sm:$0xff]  ;;  %v15_v5 = vld [vmem:[%s253_s0] sm:$0xff]  ;;  %v17_v12 = vld [vmem:[%s253_s0 + $0x10] sm:$0xff] }
   0x3   :  { %v16_v6 = vld [vmem:[%s253_s0 + $0x8] sm:$0xff]  ;;  %v27_v7 = vpack.c.bf16 %v24_v4, %v23_v2  ;;  %v19_v9 = vld [vmem:[%s253_s0 + $0x20] sm:$0xff]  ;;  %v18_v13 = vld [vmem:[%s253_s0 + $0x18] sm:$0xff] }
   0x4   :  { %v30_v8 = vpack.c.bf16 %v16_v6, %v15_v5  ;;  %v20_v10 = vld [vmem:[%s253_s0 + $0x28] sm:$0xff]  ;;  %141 = vmatprep.subr.bf16.mxu0 %v28_v3  ;;  %153 = vmatprep.subr.bf16.mxu1 %v28_v3  ;;  %v21_v14 = vld [vmem:[%s253_s0 + $0x30] sm:$0xff]  ;;  %v22_v15 = vld [vmem:[%s253_s0 + $0x38] sm:$0xff]  ;;  %v31_v16 = vpack.c.bf16 %v18_v13, %v17_v12 }
   0x5   :  { %v32_v11 = vpack.c.bf16 %v20_v10, %v19_v9  ;;  %142 = vmatpush3.bf16.msra.mxu0 %v28_v3  ;;  %155 = vmatpush3.bf16.msra.mxu1 %v28_v3  ;;  %v33_v17 = vpack.c.bf16 %v22_v15, %v21_v14  ;;  %v130_v18 = vld [vmem:[%s254_s2] ss:$0 sm:$0xff] }
   0x6   :  { %143 = vmatprep.subr.bf16.mxu0 %v27_v7  ;;  %154 = vmatprep.subr.bf16.mxu1 %v27_v7 }
   0x7   :  { %145 = vmatprep.mubr.msk.bf16.mxu0 %vm40_vm0, %v30_v8  ;;  %149 = vmatprep.mubr.msk.bf16.mxu1 %vm40_vm0, %v32_v11 }
   0x9   :  { %144 = vmatpush3.bf16.msra.mxu0 %v27_v7  ;;  %156 = vmatpush3.bf16.msra.mxu1 %v27_v7 }
   0xc   :  { %146 = vmatmul.mubr.msk.bf16.vlgmr.msra.gmra.mxu0 %vm40_vm0, %v31_v16  ;;  %150 = vmatmul.mubr.msk.bf16.vlgmr.msra.gmra.mxu1 %vm40_vm0, %v33_v17 }
  0xcc   :  { %v147_v19 = vpop.f32.mrf.mxu0  ;;  %v151_v20 = vpop.f32.mrf.mxu1 }
  0xcd   :  { %v96_v21 = vadd.f32 %v147_v19, %v130_v18  ;;  %v112_v22 = vadd.f32 %v151_v20, %v130_v18 }
  0xce   :  { %v87_v23 = vpop.f32.mrf.mxu0  ;;  %v103_v24 = vpop.f32.mrf.mxu1 }
  0xcf   :  { %120 = vst.msk [vmem:[%s255_s3 + $0x10] sm:$0xff] %vm40_vm0, %v96_v21  ;;  %124 = vst.msk [vmem:[%s255_s3 + $0x30] sm:$0xff] %vm40_vm0, %v112_v22  ;;  %v88_v25 = vadd.f32 %v130_v18, %v87_v23  ;;  %v104_v26 = vadd.f32 %v130_v18, %v103_v24 }
  0xd0   :  { %v148_v27 = vpop.f32.mrf.mxu0  ;;  %v152_v28 = vpop.f32.mrf.mxu1 }
  0xd1   :  { %118 = vst.msk [vmem:[%s255_s3] sm:$0xff] %vm40_vm0, %v88_v25  ;;  %122 = vst.msk [vmem:[%s255_s3 + $0x20] sm:$0xff] %vm40_vm0, %v104_v26  ;;  %v99_v29 = vadd.f32 %v148_v27, %v130_v18  ;;  %v115_v30 = vadd.f32 %v152_v28, %v130_v18 }
  0xd2   :  { %v90_v31 = vpop.f32.mrf.mxu0  ;;  %v106_v32 = vpop.f32.mrf.mxu1 }
  0xd3   :  { %121 = vst.msk [vmem:[%s255_s3 + $0x18] sm:$0xff] %vm40_vm0, %v99_v29  ;;  %125 = vst.msk [vmem:[%s255_s3 + $0x38] sm:$0xff] %vm40_vm0, %v115_v30  ;;  %v91_v33 = vadd.f32 %v130_v18, %v90_v31  ;;  %v107_v34 = vadd.f32 %v130_v18, %v106_v32 }
  0xd5   :  { %119 = vst.msk [vmem:[%s255_s3 + $0x8] sm:$0xff] %vm40_vm0, %v91_v33  ;;  %123 = vst.msk [vmem:[%s255_s3 + $0x28] sm:$0xff] %vm40_vm0, %v107_v34 }

// kernel: _lambda_.67
= control target key start
LH: loop header
LB: loop body
LE: loop exit
PB: predicated region body
PF: predicated region fallthrough
CT: control target
= control target key end

     0   :  { %vm82_vm0 = vcmask 261120   ;;  %vm532_vm1 = vcmask 523264   ;;  %s1133_s1 = inlined_call_operand.vmem [shape: f32[32,128], index: 1, kind: input, shape index: {}]   ;;  %s1134_s0 = inlined_call_operand.vmem [shape: f32[256,32], index: 0, kind: input, shape index: {}]   ;;  %s1135_s3 = inlined_call_operand.vmem [shape: f32[128,64], index: 3, kind: input, shape index: {}]   ;;  %s1136_s2 = inlined_call_operand.vmem [shape: f32[1,128], index: 2, kind: input, shape index: {}]   ;;  %s1137_s4 = inlined_call_operand.vmem [shape: f32[1,64], index: 4, kind: input, shape index: {}]   ;;  %s1138_s5 = inlined_call_operand.vmem [shape: f32[256,64], index: 5, kind: output, shape index: {}]  }
   0x1   :  { %v55_v0 = vld [vmem:[%s1133_s1 + $0x10] sm:$0xff]  ;;  %v56_v1 = vld [vmem:[%s1133_s1 + $0x18] sm:$0xff]  ;;  %v53_v2 = vld [vmem:[%s1133_s1] sm:$0xff] }
   0x2   :  { %v58_v3 = vpack.c.bf16 %v56_v1, %v55_v0  ;;  %v54_v4 = vld [vmem:[%s1133_s1 + $0x8] sm:$0xff]  ;;  %v21_v5 = vld [vmem:[%s1134_s0] sm:$0xff]  ;;  %v23_v9 = vld [vmem:[%s1134_s0 + $0x10] sm:$0xff] }
   0x3   :  { %v22_v6 = vld [vmem:[%s1134_s0 + $0x8] sm:$0xff]  ;;  %v57_v7 = vpack.c.bf16 %v54_v4, %v53_v2  ;;  %v24_v10 = vld [vmem:[%s1134_s0 + $0x18] sm:$0xff]  ;;  %v25_v11 = vld [vmem:[%s1134_s0 + $0x20] sm:$0xff] }
   0x4   :  { %v60_v8 = vpack.c.bf16 %v22_v6, %v21_v5  ;;  %629 = vmatprep.subr.bf16.mxu0 %v58_v3  ;;  %v26_v12 = vld [vmem:[%s1134_s0 + $0x28] sm:$0xff]  ;;  %v61_v13 = vpack.c.bf16 %v24_v10, %v23_v9  ;;  %v27_v15 = vld [vmem:[%s1134_s0 + $0x30] sm:$0xff]  ;;  %v28_v16 = vld [vmem:[%s1134_s0 + $0x38] sm:$0xff] }
   0x5   :  { %630 = vmatpush3.bf16.msra.mxu0 %v58_v3  ;;  %v62_v14 = vpack.c.bf16 %v26_v12, %v25_v11  ;;  %v338_v17 = vld [vmem:[%s1135_s3 + $0x70] sm:$0xff]  ;;  %v339_v18 = vld [vmem:[%s1135_s3 + $0x78] sm:$0xff]  ;;  %v336_v19 = vld [vmem:[%s1135_s3 + $0x60] sm:$0xff]  ;;  %v63_v27 = vpack.c.bf16 %v28_v16, %v27_v15 }
   0x6   :  { %633 = vmatprep.mubr.msk.bf16.mxu0 %vm82_vm0, %v60_v8  ;;  %631 = vmatprep.subr.bf16.mxu0 %v57_v7  ;;  %v29_v20 = vld [vmem:[%s1134_s0 + $0x40] sm:$0xff]  ;;  %v30_v21 = vld [vmem:[%s1134_s0 + $0x48] sm:$0xff]  ;;  %v347_v22 = vpack.c.bf16 %v339_v18, %v338_v17  ;;  %v334_v25 = vld [vmem:[%s1135_s3 + $0x50] sm:$0xff] }
   0x7   :  { %v337_v23 = vld [vmem:[%s1135_s3 + $0x68] sm:$0xff]  ;;  %v335_v26 = vld [vmem:[%s1135_s3 + $0x58] sm:$0xff]  ;;  %v64_v28 = vpack.c.bf16 %v30_v21, %v29_v20  ;;  %v332_v30 = vld [vmem:[%s1135_s3 + $0x40] sm:$0xff] }
   0x8   :  { %v346_v24 = vpack.c.bf16 %v337_v23, %v336_v19  ;;  %713 = vmatprep.subr.bf16.mxu1 %v347_v22  ;;  %v345_v29 = vpack.c.bf16 %v335_v26, %v334_v25  ;;  %v333_v31 = vld [vmem:[%s1135_s3 + $0x48] sm:$0xff]  ;;  %v31_v32 = vld [vmem:[%s1134_s0 + $0x50] sm:$0xff]  ;;  %v32_v33 = vld [vmem:[%s1134_s0 + $0x58] sm:$0xff] }
   0x9   :  { %632 = vmatpush3.bf16.msra.mxu0 %v57_v7  ;;  %721 = vmatpush3.bf16.msra.mxu1 %v347_v22  ;;  %v33_v34 = vld [vmem:[%s1134_s0 + $0x60] sm:$0xff]  ;;  %v34_v35 = vld [vmem:[%s1134_s0 + $0x68] sm:$0xff]  ;;  %v344_v36 = vpack.c.bf16 %v333_v31, %v332_v30  ;;  %v330_v37 = vld [vmem:[%s1135_s3 + $0x30] sm:$0xff]  ;;  %v65_v39 = vpack.c.bf16 %v32_v33, %v31_v32 }
   0xa   :  { %665 = vmatprep.subr.bf16.mxu0 %v347_v22  ;;  %714 = vmatprep.subr.bf16.mxu1 %v346_v24  ;;  %v331_v38 = vld [vmem:[%s1135_s3 + $0x38] sm:$0xff]  ;;  %v66_v40 = vpack.c.bf16 %v34_v35, %v33_v34  ;;  %v35_v42 = vld [vmem:[%s1134_s0 + $0x70] sm:$0xff]  ;;  %v37_v44 = vld [vmem:[%s1134_s0 + $0x80] sm:$0xff] }
   0xb   :  { %v343_v41 = vpack.c.bf16 %v331_v38, %v330_v37  ;;  %v36_v43 = vld [vmem:[%s1134_s0 + $0x78] sm:$0xff]  ;;  %v38_v45 = vld [vmem:[%s1134_s0 + $0x88] sm:$0xff]  ;;  %v39_v48 = vld [vmem:[%s1134_s0 + $0x90] sm:$0xff] }
   0xc   :  { %634 = vmatmul.mubr.msk.bf16.vlgmr.msra.gmra.mxu0 %vm82_vm0, %v61_v13  ;;  %v67_v46 = vpack.c.bf16 %v36_v43, %v35_v42  ;;  %v68_v47 = vpack.c.bf16 %v38_v45, %v37_v44  ;;  %v40_v49 = vld [vmem:[%s1134_s0 + $0x98] sm:$0xff]  ;;  %v41_v50 = vld [vmem:[%s1134_s0 + $0xa0] sm:$0xff]  ;;  %v42_v51 = vld [vmem:[%s1134_s0 + $0xa8] sm:$0xff] }
   0xd   :  { %637 = vmatprep.mubr.msk.bf16.mxu0 %vm82_vm0, %v62_v14  ;;  %666 = vmatpush3.bf16.msra.mxu0 %v347_v22  ;;  %v69_v52 = vpack.c.bf16 %v40_v49, %v39_v48  ;;  %v70_v53 = vpack.c.bf16 %v42_v51, %v41_v50  ;;  %v43_v54 = vld [vmem:[%s1134_s0 + $0xb0] sm:$0xff]  ;;  %v44_v55 = vld [vmem:[%s1134_s0 + $0xb8] sm:$0xff]  ;;  %v45_v56 = vld [vmem:[%s1134_s0 + $0xc0] sm:$0xff] }
   0xe   :  { %667 = vmatprep.subr.bf16.mxu0 %v346_v24  ;;  %722 = vmatpush3.bf16.msra.mxu1 %v346_v24  ;;  %v46_v57 = vld [vmem:[%s1134_s0 + $0xc8] sm:$0xff]  ;;  %v71_v58 = vpack.c.bf16 %v44_v55, %v43_v54  ;;  %v47_v60 = vld [vmem:[%s1134_s0 + $0xd0] sm:$0xff]  ;;  %v48_v61 = vld [vmem:[%s1134_s0 + $0xd8] sm:$0xff] }
   0xf   :  { %715 = vmatprep.subr.bf16.mxu1 %v345_v29  ;;  %v72_v59 = vpack.c.bf16 %v46_v57, %v45_v56  ;;  %v49_v62 = vld [vmem:[%s1134_s0 + $0xe0] sm:$0xff]  ;;  %v50_v63 = vld [vmem:[%s1134_s0 + $0xe8] sm:$0xff]  ;;  %v73_v0 = vpack.c.bf16 %v48_v61, %v47_v60  ;;  %v51_v2 = vld [vmem:[%s1134_s0 + $0xf0] sm:$0xff] }
  0x10   :  { %v74_v1 = vpack.c.bf16 %v50_v63, %v49_v62  ;;  %v52_v3 = vld [vmem:[%s1134_s0 + $0xf8] sm:$0xff]  ;;  %v328_v5 = vld [vmem:[%s1135_s3 + $0x20] sm:$0xff]  ;;  %v329_v6 = vld [vmem:[%s1135_s3 + $0x28] sm:$0xff] }
  0x11   :  { %668 = vmatpush3.bf16.msra.mxu0 %v346_v24  ;;  %v75_v4 = vpack.c.bf16 %v52_v3, %v51_v2  ;;  %v342_v7 = vpack.c.bf16 %v329_v6, %v328_v5  ;;  %v326_v8 = vld [vmem:[%s1135_s3 + $0x10] sm:$0xff]  ;;  %v327_v9 = vld [vmem:[%s1135_s3 + $0x18] sm:$0xff]  ;;  %v324_v11 = vld [vmem:[%s1135_s3] sm:$0xff] }
  0x12   :  { %669 = vmatprep.subr.bf16.mxu0 %v345_v29  ;;  %723 = vmatpush3.bf16.msra.mxu1 %v345_v29  ;;  %v341_v10 = vpack.c.bf16 %v327_v9, %v326_v8  ;;  %v325_v12 = vld [vmem:[%s1135_s3 + $0x8] sm:$0xff]  ;;  %v934_v16 = vld [vmem:[%s1136_s2] ss:$0 sm:$0xff] }
  0x13   :  { %716 = vmatprep.subr.bf16.mxu1 %v344_v36  ;;  %v340_v13 = vpack.c.bf16 %v325_v12, %v324_v11 }
  0x14   :  { %638 = vmatmul.mubr.msk.bf16.gmra.mxu0 %vm82_vm0, %v63_v27 }
  0x15   :  { %641 = vmatprep.mubr.msk.bf16.mxu0 %vm82_vm0, %v64_v28  ;;  %670 = vmatpush3.bf16.msra.mxu0 %v345_v29 }
  0x16   :  { %671 = vmatprep.subr.bf16.mxu0 %v344_v36  ;;  %724 = vmatpush3.bf16.msra.mxu1 %v344_v36 }
  0x17   :  { %717 = vmatprep.subr.bf16.mxu1 %v343_v41 }
  0x19   :  { %672 = vmatpush3.bf16.msra.mxu0 %v344_v36 }
  0x1a   :  { %673 = vmatprep.subr.bf16.mxu0 %v343_v41  ;;  %725 = vmatpush3.bf16.msra.mxu1 %v343_v41 }
  0x1b   :  { %718 = vmatprep.subr.bf16.mxu1 %v342_v7 }
  0x1c   :  { %642 = vmatmul.mubr.msk.bf16.gmra.mxu0 %vm82_vm0, %v65_v39 }
  0x1d   :  { %645 = vmatprep.mubr.msk.bf16.mxu0 %vm82_vm0, %v66_v40  ;;  %674 = vmatpush3.bf16.msra.mxu0 %v343_v41 }
  0x1e   :  { %675 = vmatprep.subr.bf16.mxu0 %v342_v7  ;;  %726 = vmatpush3.bf16.msra.mxu1 %v342_v7 }
  0x1f   :  { %719 = vmatprep.subr.bf16.mxu1 %v341_v10 }
  0x21   :  { %676 = vmatpush3.bf16.msra.mxu0 %v342_v7 }
  0x22   :  { %677 = vmatprep.subr.bf16.mxu0 %v341_v10  ;;  %727 = vmatpush3.bf16.msra.mxu1 %v341_v10 }
  0x23   :  { %720 = vmatprep.subr.bf16.mxu1 %v340_v13 }
  0x24   :  { %646 = vmatmul.mubr.msk.bf16.gmra.mxu0 %vm82_vm0, %v67_v46 }
  0x25   :  { %649 = vmatprep.mubr.msk.bf16.mxu0 %vm82_vm0, %v68_v47  ;;  %678 = vmatpush3.bf16.msra.mxu0 %v341_v10 }
  0x26   :  { %679 = vmatprep.subr.bf16.mxu0 %v340_v13  ;;  %728 = vmatpush3.bf16.msra.mxu1 %v340_v13 }
  0x29   :  { %680 = vmatpush3.bf16.msra.mxu0 %v340_v13 }
  0x2c   :  { %650 = vmatmul.mubr.msk.bf16.gmra.mxu0 %vm82_vm0, %v69_v52 }
  0x2d   :  { %653 = vmatprep.mubr.msk.bf16.mxu0 %vm82_vm0, %v70_v53 }
  0x34   :  { %654 = vmatmul.mubr.msk.bf16.gmra.mxu0 %vm82_vm0, %v71_v58 }
  0x35   :  { %657 = vmatprep.mubr.msk.bf16.mxu0 %vm82_vm0, %v72_v59 }
  0x3c   :  { %658 = vmatmul.mubr.msk.bf16.gmra.mxu0 %vm82_vm0, %v73_v0 }
  0x3d   :  { %661 = vmatprep.mubr.msk.bf16.mxu0 %vm82_vm0, %v74_v1 }
  0x44   :  { %662 = vmatmul.mubr.msk.bf16.gmra.mxu0 %vm82_vm0, %v75_v4 }
  0xcc   :  { %v635_v14 = vpop.f32.mrf.mxu0 }
  0xcd   :  { %v174_v20 = vadd.f32 %v635_v14, %v934_v16 }
  0xce   :  { %v165_v15 = vpop.f32.mrf.mxu0 }
  0xcf   :  { %v166_v18 = vadd.f32 %v934_v16, %v165_v15  ;;  %v294_v27 = vmax.f32 %v174_v20, 0.0 }
  0xd0   :  { %v636_v17 = vpop.f32.mrf.mxu0 }
  0xd1   :  { %v177_v19 = vadd.f32 %v636_v17, %v934_v16  ;;  %v292_v25 = vmax.f32 %v166_v18, 0.0 }
  0xd2   :  { %v168_v21 = vpop.f32.mrf.mxu0 }
  0xd3   :  { %v169_v22 = vadd.f32 %v934_v16, %v168_v21  ;;  %v295_v23 = vmax.f32 %v177_v19, 0.0 }
  0xd4   :  { %v639_v24 = vpop.f32.mrf.mxu0 }
  0xd5   :  { %v293_v26 = vmax.f32 %v169_v22, 0.0  ;;  %v350_v30 = vpack.c.bf16 %v295_v23, %v294_v27  ;;  %v190_v34 = vadd.f32 %v639_v24, %v934_v16 }
  0xd6   :  { %v181_v28 = vpop.f32.mrf.mxu0 }
  0xd7   :  { %v349_v29 = vpack.c.bf16 %v293_v26, %v292_v25  ;;  %v182_v32 = vadd.f32 %v934_v16, %v181_v28  ;;  %v298_v41 = vmax.f32 %v190_v34, 0.0 }
  0xd8   :  { %v640_v31 = vpop.f32.mrf.mxu0 }
  0xd9   :  { %v193_v33 = vadd.f32 %v640_v31, %v934_v16  ;;  %681 = vmatprep.mubr.bf16.mxu0 %v349_v29  ;;  %v296_v39 = vmax.f32 %v182_v32, 0.0 }
  0xda   :  { %v184_v35 = vpop.f32.mrf.mxu0  ;;  %682 = vmatmul.mubr.bf16.vlgmr.msra.gmra.mxu0 %v350_v30 }
  0xdb   :  { %v185_v36 = vadd.f32 %v934_v16, %v184_v35  ;;  %v299_v37 = vmax.f32 %v193_v33, 0.0 }
  0xdc   :  { %v643_v38 = vpop.f32.mrf.mxu0 }
  0xdd   :  { %v297_v40 = vmax.f32 %v185_v36, 0.0  ;;  %v352_v44 = vpack.c.bf16 %v299_v37, %v298_v41  ;;  %v206_v48 = vadd.f32 %v643_v38, %v934_v16 }
  0xde   :  { %v197_v42 = vpop.f32.mrf.mxu0 }
  0xdf   :  { %v351_v43 = vpack.c.bf16 %v297_v40, %v296_v39  ;;  %v198_v46 = vadd.f32 %v934_v16, %v197_v42  ;;  %v302_v55 = vmax.f32 %v206_v48, 0.0 }
  0xe0   :  { %v644_v45 = vpop.f32.mrf.mxu0 }
  0xe1   :  { %v209_v47 = vadd.f32 %v644_v45, %v934_v16  ;;  %685 = vmatprep.mubr.bf16.mxu1 %v351_v43  ;;  %v300_v53 = vmax.f32 %v198_v46, 0.0 }
  0xe2   :  { %v200_v49 = vpop.f32.mrf.mxu0  ;;  %686 = vmatmul.mubr.bf16.vlgmr.msra.gmra.mxu1 %v352_v44 }
  0xe3   :  { %v201_v50 = vadd.f32 %v934_v16, %v200_v49  ;;  %v303_v51 = vmax.f32 %v209_v47, 0.0 }
  0xe4   :  { %v647_v52 = vpop.f32.mrf.mxu0 }
  0xe5   :  { %v301_v54 = vmax.f32 %v201_v50, 0.0  ;;  %v354_v58 = vpack.c.bf16 %v303_v51, %v302_v55  ;;  %v222_v62 = vadd.f32 %v647_v52, %v934_v16 }
  0xe6   :  { %v213_v56 = vpop.f32.mrf.mxu0 }
  0xe7   :  { %v353_v57 = vpack.c.bf16 %v301_v54, %v300_v53  ;;  %v214_v60 = vadd.f32 %v934_v16, %v213_v56  ;;  %v306_v5 = vmax.f32 %v222_v62, 0.0 }
  0xe8   :  { %v648_v59 = vpop.f32.mrf.mxu0 }
  0xe9   :  { %v225_v61 = vadd.f32 %v648_v59, %v934_v16  ;;  %689 = vmatprep.mubr.bf16.mxu1 %v353_v57  ;;  %v304_v3 = vmax.f32 %v214_v60, 0.0 }
  0xea   :  { %v216_v63 = vpop.f32.mrf.mxu0  ;;  %690 = vmatmul.mubr.bf16.gmra.mxu1 %v354_v58 }
  0xeb   :  { %v217_v0 = vadd.f32 %v934_v16, %v216_v63  ;;  %v307_v1 = vmax.f32 %v225_v61, 0.0 }
  0xec   :  { %v651_v2 = vpop.f32.mrf.mxu0 }
  0xed   :  { %v305_v4 = vmax.f32 %v217_v0, 0.0  ;;  %v356_v8 = vpack.c.bf16 %v307_v1, %v306_v5  ;;  %v238_v12 = vadd.f32 %v651_v2, %v934_v16  ;;  %v971_v0 = vld [vmem:[%s1137_s4] ss:$0 sm:$0xff] }
  0xee   :  { %v229_v6 = vpop.f32.mrf.mxu0 }
  0xef   :  { %v355_v7 = vpack.c.bf16 %v305_v4, %v304_v3  ;;  %v230_v10 = vadd.f32 %v934_v16, %v229_v6  ;;  %v310_v20 = vmax.f32 %v238_v12, 0.0 }
  0xf0   :  { %v652_v9 = vpop.f32.mrf.mxu0 }
  0xf1   :  { %v241_v11 = vadd.f32 %v652_v9, %v934_v16  ;;  %693 = vmatprep.mubr.bf16.mxu1 %v355_v7  ;;  %v308_v18 = vmax.f32 %v230_v10, 0.0 }
  0xf2   :  { %v232_v13 = vpop.f32.mrf.mxu0  ;;  %694 = vmatmul.mubr.bf16.gmra.mxu1 %v356_v8 }
  0xf3   :  { %v233_v14 = vadd.f32 %v934_v16, %v232_v13  ;;  %v311_v15 = vmax.f32 %v241_v11, 0.0 }
  0xf4   :  { %v655_v17 = vpop.f32.mrf.mxu0 }
  0xf5   :  { %v309_v19 = vmax.f32 %v233_v14, 0.0  ;;  %v358_v23 = vpack.c.bf16 %v311_v15, %v310_v20  ;;  %v254_v27 = vadd.f32 %v655_v17, %v934_v16 }
  0xf6   :  { %v245_v21 = vpop.f32.mrf.mxu0 }
  0xf7   :  { %v357_v22 = vpack.c.bf16 %v309_v19, %v308_v18  ;;  %v246_v25 = vadd.f32 %v934_v16, %v245_v21  ;;  %v314_v34 = vmax.f32 %v254_v27, 0.0 }
  0xf8   :  { %v656_v24 = vpop.f32.mrf.mxu0 }
  0xf9   :  { %v257_v26 = vadd.f32 %v656_v24, %v934_v16  ;;  %697 = vmatprep.mubr.bf16.mxu1 %v357_v22  ;;  %v312_v32 = vmax.f32 %v246_v25, 0.0 }
  0xfa   :  { %v248_v28 = vpop.f32.mrf.mxu0  ;;  %698 = vmatmul.mubr.bf16.gmra.mxu1 %v358_v23 }
  0xfb   :  { %v249_v29 = vadd.f32 %v934_v16, %v248_v28  ;;  %v315_v30 = vmax.f32 %v257_v26, 0.0 }
  0xfc   :  { %v659_v31 = vpop.f32.mrf.mxu0 }
  0xfd   :  { %v313_v33 = vmax.f32 %v249_v29, 0.0  ;;  %v360_v37 = vpack.c.bf16 %v315_v30, %v314_v34  ;;  %v270_v41 = vadd.f32 %v659_v31, %v934_v16 }
  0xfe   :  { %v261_v35 = vpop.f32.mrf.mxu0 }
  0xff   :  { %v359_v36 = vpack.c.bf16 %v313_v33, %v312_v32  ;;  %v262_v39 = vadd.f32 %v934_v16, %v261_v35  ;;  %v318_v48 = vmax.f32 %v270_v41, 0.0 }
 0x100   :  { %v660_v38 = vpop.f32.mrf.mxu0 }
 0x101   :  { %v273_v40 = vadd.f32 %v660_v38, %v934_v16  ;;  %701 = vmatprep.mubr.bf16.mxu1 %v359_v36  ;;  %v316_v46 = vmax.f32 %v262_v39, 0.0 }
 0x102   :  { %v264_v42 = vpop.f32.mrf.mxu0  ;;  %702 = vmatmul.mubr.bf16.gmra.mxu1 %v360_v37 }
 0x103   :  { %v265_v43 = vadd.f32 %v934_v16, %v264_v42  ;;  %v319_v44 = vmax.f32 %v273_v40, 0.0 }
 0x104   :  { %v663_v45 = vpop.f32.mrf.mxu0 }
 0x105   :  { %v317_v47 = vmax.f32 %v265_v43, 0.0  ;;  %v362_v51 = vpack.c.bf16 %v319_v44, %v318_v48  ;;  %v286_v55 = vadd.f32 %v663_v45, %v934_v16 }
 0x106   :  { %v277_v49 = vpop.f32.mrf.mxu0 }
 0x107   :  { %v361_v50 = vpack.c.bf16 %v317_v47, %v316_v46  ;;  %v278_v53 = vadd.f32 %v934_v16, %v277_v49  ;;  %v322_v61 = vmax.f32 %v286_v55, 0.0 }
 0x108   :  { %v664_v52 = vpop.f32.mrf.mxu0 }
 0x109   :  { %v289_v54 = vadd.f32 %v664_v52, %v934_v16  ;;  %705 = vmatprep.mubr.bf16.mxu1 %v361_v50  ;;  %v320_v59 = vmax.f32 %v278_v53, 0.0 }
 0x10a   :  { %v280_v56 = vpop.f32.mrf.mxu0  ;;  %706 = vmatmul.mubr.bf16.gmra.mxu1 %v362_v51 }
 0x10b   :  { %v281_v57 = vadd.f32 %v934_v16, %v280_v56  ;;  %v323_v58 = vmax.f32 %v289_v54, 0.0 }
 0x10d   :  { %v321_v60 = vmax.f32 %v281_v57, 0.0  ;;  %v364_v63 = vpack.c.bf16 %v323_v58, %v322_v61 }
 0x10f   :  { %v363_v62 = vpack.c.bf16 %v321_v60, %v320_v59 }
 0x111   :  { %709 = vmatprep.mubr.bf16.mxu1 %v363_v62 }
 0x112   :  { %710 = vmatmul.mubr.bf16.gmra.mxu1 %v364_v63 }
 0x19a   :  { %v683_v1 = vpop.f32.mrf.mxu0 }
 0x19b   :  { %v414_v2 = vadd.f32 %v683_v1, %v971_v0 }
 0x19c   :  { %v405_v3 = vpop.f32.mrf.mxu0 }
 0x19d   :  { %535 = vst.msk [vmem:[%s1138_s5 + $0x10] sm:$0xff] %vm532_vm1, %v414_v2  ;;  %v406_v16 = vadd.f32 %v971_v0, %v405_v3 }
 0x19e   :  { %v684_v4 = vpop.f32.mrf.mxu0 }
 0x19f   :  { %533 = vst.msk [vmem:[%s1138_s5] sm:$0xff] %vm532_vm1, %v406_v16  ;;  %v417_v5 = vadd.f32 %v684_v4, %v971_v0 }
 0x1a0   :  { %v408_v6 = vpop.f32.mrf.mxu0 }
 0x1a1   :  { %536 = vst.msk [vmem:[%s1138_s5 + $0x18] sm:$0xff] %vm532_vm1, %v417_v5  ;;  %v409_v7 = vadd.f32 %v971_v0, %v408_v6 }
 0x1a2   :  { %v687_v8 = vpop.f32.mrf.mxu1 }
 0x1a3   :  { %534 = vst.msk [vmem:[%s1138_s5 + $0x8] sm:$0xff] %vm532_vm1, %v409_v7  ;;  %v430_v9 = vadd.f32 %v687_v8, %v971_v0 }
 0x1a4   :  { %v421_v10 = vpop.f32.mrf.mxu1 }
 0x1a5   :  { %539 = vst.msk [vmem:[%s1138_s5 + $0x30] sm:$0xff] %vm532_vm1, %v430_v9  ;;  %v422_v11 = vadd.f32 %v971_v0, %v421_v10 }
 0x1a6   :  { %v688_v12 = vpop.f32.mrf.mxu1 }
 0x1a7   :  { %537 = vst.msk [vmem:[%s1138_s5 + $0x20] sm:$0xff] %vm532_vm1, %v422_v11  ;;  %v433_v13 = vadd.f32 %v688_v12, %v971_v0 }
 0x1a8   :  { %v424_v14 = vpop.f32.mrf.mxu1 }
 0x1a9   :  { %540 = vst.msk [vmem:[%s1138_s5 + $0x38] sm:$0xff] %vm532_vm1, %v433_v13  ;;  %v425_v15 = vadd.f32 %v971_v0, %v424_v14 }
 0x1aa   :  { %v691_v17 = vpop.f32.mrf.mxu1 }
 0x1ab   :  { %538 = vst.msk [vmem:[%s1138_s5 + $0x28] sm:$0xff] %vm532_vm1, %v425_v15  ;;  %v446_v18 = vadd.f32 %v691_v17, %v971_v0 }
 0x1ac   :  { %v437_v19 = vpop.f32.mrf.mxu1 }
 0x1ad   :  { %543 = vst.msk [vmem:[%s1138_s5 + $0x50] sm:$0xff] %vm532_vm1, %v446_v18  ;;  %v438_v20 = vadd.f32 %v971_v0, %v437_v19 }
 0x1ae   :  { %v692_v21 = vpop.f32.mrf.mxu1 }
 0x1af   :  { %541 = vst.msk [vmem:[%s1138_s5 + $0x40] sm:$0xff] %vm532_vm1, %v438_v20  ;;  %v449_v22 = vadd.f32 %v692_v21, %v971_v0 }
 0x1b0   :  { %v440_v23 = vpop.f32.mrf.mxu1 }
 0x1b1   :  { %544 = vst.msk [vmem:[%s1138_s5 + $0x58] sm:$0xff] %vm532_vm1, %v449_v22  ;;  %v441_v24 = vadd.f32 %v971_v0, %v440_v23 }
 0x1b2   :  { %v695_v25 = vpop.f32.mrf.mxu1 }
 0x1b3   :  { %542 = vst.msk [vmem:[%s1138_s5 + $0x48] sm:$0xff] %vm532_vm1, %v441_v24  ;;  %v462_v26 = vadd.f32 %v695_v25, %v971_v0 }
 0x1b4   :  { %v453_v27 = vpop.f32.mrf.mxu1 }
 0x1b5   :  { %547 = vst.msk [vmem:[%s1138_s5 + $0x70] sm:$0xff] %vm532_vm1, %v462_v26  ;;  %v454_v28 = vadd.f32 %v971_v0, %v453_v27 }
 0x1b6   :  { %v696_v29 = vpop.f32.mrf.mxu1 }
 0x1b7   :  { %545 = vst.msk [vmem:[%s1138_s5 + $0x60] sm:$0xff] %vm532_vm1, %v454_v28  ;;  %v465_v30 = vadd.f32 %v696_v29, %v971_v0 }
 0x1b8   :  { %v456_v31 = vpop.f32.mrf.mxu1 }
 0x1b9   :  { %548 = vst.msk [vmem:[%s1138_s5 + $0x78] sm:$0xff] %vm532_vm1, %v465_v30  ;;  %v457_v32 = vadd.f32 %v971_v0, %v456_v31 }
 0x1ba   :  { %v699_v33 = vpop.f32.mrf.mxu1 }
 0x1bb   :  { %546 = vst.msk [vmem:[%s1138_s5 + $0x68] sm:$0xff] %vm532_vm1, %v457_v32  ;;  %v478_v34 = vadd.f32 %v699_v33, %v971_v0 }
 0x1bc   :  { %v469_v35 = vpop.f32.mrf.mxu1 }
 0x1bd   :  { %551 = vst.msk [vmem:[%s1138_s5 + $0x90] sm:$0xff] %vm532_vm1, %v478_v34  ;;  %v470_v36 = vadd.f32 %v971_v0, %v469_v35 }
 0x1be   :  { %v700_v37 = vpop.f32.mrf.mxu1 }
 0x1bf   :  { %549 = vst.msk [vmem:[%s1138_s5 + $0x80] sm:$0xff] %vm532_vm1, %v470_v36  ;;  %v481_v38 = vadd.f32 %v700_v37, %v971_v0 }
 0x1c0   :  { %v472_v39 = vpop.f32.mrf.mxu1 }
 0x1c1   :  { %552 = vst.msk [vmem:[%s1138_s5 + $0x98] sm:$0xff] %vm532_vm1, %v481_v38  ;;  %v473_v40 = vadd.f32 %v971_v0, %v472_v39 }
 0x1c2   :  { %v703_v41 = vpop.f32.mrf.mxu1 }
 0x1c3   :  { %550 = vst.msk [vmem:[%s1138_s5 + $0x88] sm:$0xff] %vm532_vm1, %v473_v40  ;;  %v494_v42 = vadd.f32 %v703_v41, %v971_v0 }
 0x1c4   :  { %v485_v43 = vpop.f32.mrf.mxu1 }
 0x1c5   :  { %555 = vst.msk [vmem:[%s1138_s5 + $0xb0] sm:$0xff] %vm532_vm1, %v494_v42  ;;  %v486_v44 = vadd.f32 %v971_v0, %v485_v43 }
 0x1c6   :  { %v704_v45 = vpop.f32.mrf.mxu1 }
 0x1c7   :  { %553 = vst.msk [vmem:[%s1138_s5 + $0xa0] sm:$0xff] %vm532_vm1, %v486_v44  ;;  %v497_v46 = vadd.f32 %v704_v45, %v971_v0 }
 0x1c8   :  { %v488_v47 = vpop.f32.mrf.mxu1 }
 0x1c9   :  { %556 = vst.msk [vmem:[%s1138_s5 + $0xb8] sm:$0xff] %vm532_vm1, %v497_v46  ;;  %v489_v48 = vadd.f32 %v971_v0, %v488_v47 }
 0x1ca   :  { %v707_v49 = vpop.f32.mrf.mxu1 }
 0x1cb   :  { %554 = vst.msk [vmem:[%s1138_s5 + $0xa8] sm:$0xff] %vm532_vm1, %v489_v48  ;;  %v510_v50 = vadd.f32 %v707_v49, %v971_v0 }
 0x1cc   :  { %v501_v51 = vpop.f32.mrf.mxu1 }
 0x1cd   :  { %559 = vst.msk [vmem:[%s1138_s5 + $0xd0] sm:$0xff] %vm532_vm1, %v510_v50  ;;  %v502_v52 = vadd.f32 %v971_v0, %v501_v51 }
 0x1ce   :  { %v708_v53 = vpop.f32.mrf.mxu1 }
 0x1cf   :  { %557 = vst.msk [vmem:[%s1138_s5 + $0xc0] sm:$0xff] %vm532_vm1, %v502_v52  ;;  %v513_v54 = vadd.f32 %v708_v53, %v971_v0 }
 0x1d0   :  { %v504_v55 = vpop.f32.mrf.mxu1 }
 0x1d1   :  { %560 = vst.msk [vmem:[%s1138_s5 + $0xd8] sm:$0xff] %vm532_vm1, %v513_v54  ;;  %v505_v56 = vadd.f32 %v971_v0, %v504_v55 }
 0x1d2   :  { %v711_v57 = vpop.f32.mrf.mxu1 }
 0x1d3   :  { %558 = vst.msk [vmem:[%s1138_s5 + $0xc8] sm:$0xff] %vm532_vm1, %v505_v56  ;;  %v526_v58 = vadd.f32 %v711_v57, %v971_v0 }
 0x1d4   :  { %v517_v59 = vpop.f32.mrf.mxu1 }
 0x1d5   :  { %563 = vst.msk [vmem:[%s1138_s5 + $0xf0] sm:$0xff] %vm532_vm1, %v526_v58  ;;  %v518_v60 = vadd.f32 %v971_v0, %v517_v59 }
 0x1d6   :  { %v712_v61 = vpop.f32.mrf.mxu1 }
 0x1d7   :  { %561 = vst.msk [vmem:[%s1138_s5 + $0xe0] sm:$0xff] %vm532_vm1, %v518_v60  ;;  %v529_v62 = vadd.f32 %v712_v61, %v971_v0 }
 0x1d8   :  { %v520_v63 = vpop.f32.mrf.mxu1 }
 0x1d9   :  { %564 = vst.msk [vmem:[%s1138_s5 + $0xf8] sm:$0xff] %vm532_vm1, %v529_v62  ;;  %v521_v1 = vadd.f32 %v971_v0, %v520_v63 }
 0x1db   :  { %562 = vst.msk [vmem:[%s1138_s5 + $0xe8] sm:$0xff] %vm532_vm1, %v521_v1 }

// kernel: _lambda_.68
= control target key start
LH: loop header
LB: loop body
LE: loop exit
PB: predicated region body
PF: predicated region fallthrough
CT: control target
= control target key end

     0   :  { %s1341_s13 = smov 32   ;;  %vm43_vm0 = vcmask 523264   ;;  %vm812_vm1 = vcmask 261120   ;;  %vm1133_vm2 = vcmask 1041409   ;;  %vm1135_vm3 = vcmask 1042434   ;;  %s2305_s1 = inlined_call_operand.vmem [shape: f32[32,8,32], index: 1, kind: input, shape index: {}]   ;;  %s2306_s0 = inlined_call_operand.vmem [shape: f32[32,8,64], index: 0, kind: input, shape index: {}]   ;;  %s2307_s2 = inlined_call_operand.vmem [shape: f32[32,64], index: 2, kind: output, shape index: {}]  }
   0x1   :  { %v660_v0 = vld [vmem:[%s2305_s1 + $0x40] sm:$0xff]  ;;  %v661_v2 = vld [vmem:[%s2305_s1 + $0x48] sm:$0xff]  ;;  %v662_v11 = vld [vmem:[%s2305_s1 + $0x50] sm:$0xff]  ;;  %vm1137_vm4 = vcmask 1043459   ;;  %vm1139_vm5 = vcmask 1044484   ;;  %vm1141_vm6 = vcmask 1045509  }
   0x2   :  { %v652_v1 = vld [vmem:[%s2305_s1] sm:$0xff]  ;;  %732 = vrot.lane.b32.xlu1 %v660_v0, %s1341_s13  ;;  %v653_v3 = vld [vmem:[%s2305_s1 + $0x8] sm:$0xff]  ;;  %v654_v12 = vld [vmem:[%s2305_s1 + $0x10] sm:$0xff]  ;;  %vm1143_vm7 = vcmask 1046534   ;;  %vm1145_vm8 = vcmask 1047559  }
   0x3   :  { %716 = vrot.lane.b32.xlu0 %v652_v1, %s1341_s13  ;;  %v669_v4 = vld [vmem:[%s2305_s1 + $0x88] sm:$0xff]  ;;  %v668_v5 = vld [vmem:[%s2305_s1 + $0x80] sm:$0xff]  ;;  %v678_v18 = vld [vmem:[%s2305_s1 + $0xd0] sm:$0xff] }
   0x4   :  { %v677_v6 = vld [vmem:[%s2305_s1 + $0xc8] sm:$0xff]  ;;  %v676_v7 = vld [vmem:[%s2305_s1 + $0xc0] sm:$0xff]  ;;  %v670_v19 = vld [vmem:[%s2305_s1 + $0x90] sm:$0xff] }
   0x5   :  { %v1390_v8 = vld [vmem:[%s2306_s0 + $0x40] sm:$0xff]  ;;  %v1410_v13 = vld [vmem:[%s2306_s0 + $0x48] sm:$0xff]  ;;  %v663_v25 = vld [vmem:[%s2305_s1 + $0x58] sm:$0xff] }
   0x6   :  { %734 = vrot.lane.b32.xlu1 %v661_v2, %s1341_s13  ;;  %v100_v9 = vsel %vm43_vm0, %v1390_v8, -inf  ;;  %v1397_v10 = vld [vmem:[%s2306_s0] sm:$0xff]  ;;  %v107_v16 = vsel %vm43_vm0, %v1410_v13, -inf  ;;  %v1421_v17 = vld [vmem:[%s2306_s0 + $0x8] sm:$0xff]  ;;  %v655_v26 = vld [vmem:[%s2305_s1 + $0x18] sm:$0xff] }
   0x7   :  { %718 = vrot.lane.b32.xlu0 %v653_v3, %s1341_s13  ;;  %v101_v14 = vrot.slane %v100_v9, 4  ;;  %v44_v15 = vsel %vm43_vm0, %v1397_v10, -inf  ;;  %v1432_v22 = vld [vmem:[%s2306_s0 + $0x88] sm:$0xff]  ;;  %v108_v23 = vrot.slane %v107_v16, 4  ;;  %v51_v24 = vsel %vm43_vm0, %v1421_v17, -inf  ;;  %v1449_v29 = vld [vmem:[%s2306_s0 + $0x80] sm:$0xff] }
   0x8   :  { %v45_v20 = vrot.slane %v44_v15, 4  ;;  %v163_v28 = vsel %vm43_vm0, %v1432_v22, -inf  ;;  %v52_v31 = vrot.slane %v51_v24, 4  ;;  %v1454_v33 = vld [vmem:[%s2306_s0 + $0xc8] sm:$0xff]  ;;  %v156_v35 = vsel %vm43_vm0, %v1449_v29, -inf  ;;  %v679_v36 = vld [vmem:[%s2305_s1 + $0xd8] sm:$0xff] }
   0x9   :  { %v102_v21 = vmax.f32 %v100_v9, %v101_v14  ;;  %v109_v32 = vmax.f32 %v107_v16, %v108_v23  ;;  %v164_v34 = vrot.slane %v163_v28, 4  ;;  %v671_v37 = vld [vmem:[%s2305_s1 + $0x98] sm:$0xff]  ;;  %v219_v41 = vsel %vm43_vm0, %v1454_v33, -inf  ;;  %v1471_v44 = vld [vmem:[%s2306_s0 + $0xc0] sm:$0xff]  ;;  %v1488_v56 = vld [vmem:[%s2306_s0 + $0x50] sm:$0xff] }
   0xa   :  { %750 = vrot.lane.b32.xlu1 %v669_v4, %s1341_s13  ;;  %v46_v27 = vmax.f32 %v44_v15, %v45_v20  ;;  %v53_v40 = vmax.f32 %v51_v24, %v52_v31  ;;  %v157_v43 = vrot.slane %v156_v35, 4  ;;  %v664_v46 = vld [vmem:[%s2305_s1 + $0x60] sm:$0xff]  ;;  %v220_v49 = vrot.slane %v219_v41, 4  ;;  %v1499_v62 = vld [vmem:[%s2306_s0 + $0x10] sm:$0xff]  ;;  %v657_v9 = vld [vmem:[%s2305_s1 + $0x28] sm:$0xff] }
   0xb   :  { %748 = vrot.lane.b32.xlu0 %v668_v5, %s1341_s13  ;;  %v103_v30 = vrot.slane %v102_v21, 2  ;;  %v110_v42 = vrot.slane %v109_v32, 2  ;;  %v165_v45 = vmax.f32 %v163_v28, %v164_v34  ;;  %v656_v47 = vld [vmem:[%s2305_s1 + $0x20] sm:$0xff]  ;;  %v212_v52 = vsel %vm43_vm0, %v1471_v44, -inf  ;;  %v1521_v15 = vld [vmem:[%s2306_s0 + $0x90] sm:$0xff]  ;;  %v1527_v20 = vld [vmem:[%s2306_s0 + $0x58] sm:$0xff] }
   0xc   :  { %v47_v38 = vrot.slane %v46_v27, 2  ;;  %v54_v51 = vrot.slane %v53_v40, 2  ;;  %v158_v54 = vmax.f32 %v156_v35, %v157_v43  ;;  %v680_v57 = vld [vmem:[%s2305_s1 + $0xe0] sm:$0xff]  ;;  %v221_v60 = vmax.f32 %v219_v41, %v220_v49  ;;  %v673_v28 = vld [vmem:[%s2305_s1 + $0xa8] sm:$0xff] }
   0xd   :  { %v104_v39 = vmax.f32 %v102_v21, %v103_v30  ;;  %v111_v53 = vmax.f32 %v109_v32, %v110_v42  ;;  %v166_v55 = vrot.slane %v165_v45, 2  ;;  %v672_v58 = vld [vmem:[%s2305_s1 + $0xa0] sm:$0xff]  ;;  %v213_v61 = vrot.slane %v212_v52, 4 }
   0xe   :  { %766 = vrot.lane.b32.xlu1 %v677_v6, %s1341_s13  ;;  %v48_v48 = vmax.f32 %v46_v27, %v47_v38  ;;  %v55_v0 = vmax.f32 %v53_v40, %v54_v51  ;;  %v159_v2 = vrot.slane %v158_v54, 2  ;;  %v114_v3 = vsel %vm43_vm0, %v1488_v56, -inf  ;;  %v1510_v6 = vld [vmem:[%s2306_s0 + $0xd0] sm:$0xff]  ;;  %v681_v27 = vld [vmem:[%s2305_s1 + $0xe8] sm:$0xff] }
   0xf   :  { %764 = vrot.lane.b32.xlu0 %v676_v7, %s1341_s13  ;;  %v105_v50 = vrot.slane %v104_v39, 1  ;;  %v112_v1 = vrot.slane %v111_v53, 1  ;;  %v167_v4 = vmax.f32 %v165_v45, %v166_v55  ;;  %v58_v5 = vsel %vm43_vm0, %v1499_v62, -inf  ;;  %v665_v7 = vld [vmem:[%s2305_s1 + $0x68] sm:$0xff] }
  0x10   :  { %v49_v59 = vrot.slane %v48_v48, 1  ;;  %v214_v14 = vmax.f32 %v212_v52, %v213_v61  ;;  %v160_v23 = vmax.f32 %v158_v54, %v159_v2  ;;  %v59_v24 = vrot.slane %v58_v5, 4  ;;  %v1564_v54 = vld [vmem:[%s2306_s0 + $0xd8] sm:$0xff] }
  0x11   :  { %v106_v63 = vmax.f32 %v104_v39, %v105_v50  ;;  %v113_v21 = vmax.f32 %v111_v53, %v112_v1  ;;  %v121_v34 = vsel %vm43_vm0, %v1527_v20, -inf  ;;  %v1547_v39 = vld [vmem:[%s2306_s0 + $0x18] sm:$0xff] }
  0x12   :  { %736 = vrot.lane.b32.xlu1 %v662_v11, %s1341_s13  ;;  %v50_v11 = vmax.f32 %v48_v48, %v49_v59  ;;  %v215_v32 = vrot.slane %v214_v14, 2  ;;  %v161_v41 = vrot.slane %v160_v23, 1  ;;  %v60_v42 = vmax.f32 %v58_v5, %v59_v24 }
  0x13   :  { %720 = vrot.lane.b32.xlu0 %v654_v12, %s1341_s13  ;;  %v222_v12 = vrot.slane %v221_v60, 2  ;;  %v276_v16 = vsub.f32 %v1390_v8, %v106_v63  ;;  %v170_v8 = vsel %vm43_vm0, %v1521_v15, -inf  ;;  %v277_v40 = vsub.f32 %v1410_v13, %v113_v21 }
  0x14   :  { %v268_v30 = vsub.f32 %v1397_v10, %v50_v11  ;;  %v171_v43 = vrot.slane %v170_v8, 4  ;;  %v122_v45 = vrot.slane %v121_v34, 4  ;;  %v216_v13 = vmax.f32 %v214_v14, %v215_v32 }
  0x15   :  { %v223_v31 = vmax.f32 %v221_v60, %v222_v12  ;;  %v316_v35 = vmul.f32 1.442695, %v276_v16  ;;  %v65_v50 = vsel %vm43_vm0, %v1547_v39, -inf  ;;  %v318_v55 = vmul.f32 1.442695, %v277_v40 }
  0x16   :  { %768 = vrot.lane.b32.xlu1 %v678_v18, %s1341_s13  ;;  %v56_v18 = vrot.slane %v55_v0, 1  ;;  %v300_v48 = vmul.f32 1.442695, %v268_v30  ;;  %v172_v59 = vmax.f32 %v170_v8, %v171_v43  ;;  %v123_v61 = vmax.f32 %v121_v34, %v122_v45  ;;  %v675_v34 = vld [vmem:[%s2305_s1 + $0xb8] sm:$0xff] }
  0x17   :  { %752 = vrot.lane.b32.xlu0 %v670_v19, %s1341_s13  ;;  %v115_v19 = vrot.slane %v114_v3, 4  ;;  %v224_v49 = vrot.slane %v223_v31, 1  ;;  %1181 = vpow2.f32 %v316_v35  ;;  %v66_v63 = vrot.slane %v65_v50, 4 }
  0x18   :  { %1183 = vpow2.f32 %v300_v48  ;;  %v217_v2 = vrot.slane %v216_v13, 1  ;;  %v173_v11 = vrot.slane %v172_v59, 2  ;;  %v124_v12 = vrot.slane %v123_v61, 2 }
  0x19   :  { %v225_v1 = vmax.f32 %v223_v31, %v224_v49  ;;  %1185 = vpow2.f32 %v318_v55  ;;  %v67_v14 = vmax.f32 %v65_v50, %v66_v63  ;;  %v1616_v55 = vld [vmem:[%s2306_s0 + $0x60] sm:$0xff] }
  0x1a   :  { %738 = vrot.lane.b32.xlu1 %v663_v25, %s1341_s13  ;;  %v226_v25 = vsel %vm43_vm0, %v1510_v6, -inf  ;;  %v125_v30 = vmax.f32 %v123_v61, %v124_v12 }
  0x1b   :  { %722 = vrot.lane.b32.xlu0 %v655_v26, %s1341_s13  ;;  %v168_v26 = vrot.slane %v167_v4, 1  ;;  %v227_v38 = vrot.slane %v226_v25, 4  ;;  %v68_v31 = vrot.slane %v67_v14, 2 }
  0x1d   :  { %v169_v10 = vmax.f32 %v167_v4, %v168_v26  ;;  %v228_v53 = vmax.f32 %v226_v25, %v227_v38  ;;  %v1590_v26 = vld [vmem:[%s2306_s0 + $0x98] sm:$0xff]  ;;  %v69_v45 = vmax.f32 %v67_v14, %v68_v31 }
  0x1e   :  { %770 = vrot.lane.b32.xlu1 %v679_v36, %s1341_s13  ;;  %v57_v36 = vmax.f32 %v55_v0, %v56_v18  ;;  %v674_v0 = vld [vmem:[%s2305_s1 + $0xb0] sm:$0xff]  ;;  %v667_v18 = vld [vmem:[%s2305_s1 + $0x78] sm:$0xff] }
  0x1f   :  { %754 = vrot.lane.b32.xlu0 %v671_v37, %s1341_s13  ;;  %v116_v37 = vmax.f32 %v114_v3, %v115_v19  ;;  %v285_v60 = vsub.f32 %v1432_v22, %v169_v10  ;;  %v233_v3 = vsel %vm43_vm0, %v1564_v54, -inf  ;;  %v659_v19 = vld [vmem:[%s2305_s1 + $0x38] sm:$0xff]  ;;  %v126_v10 = vrot.slane %v125_v30, 1 }
  0x20   :  { %v269_v51 = vsub.f32 %v1421_v17, %v57_v36  ;;  %v682_v17 = vld [vmem:[%s2305_s1 + $0xf0] sm:$0xff]  ;;  %v234_v16 = vrot.slane %v233_v3, 4 }
  0x21   :  { %v117_v52 = vrot.slane %v116_v37, 2  ;;  %v334_v21 = vmul.f32 1.442695, %v285_v60 }
  0x22   :  { %740 = vrot.lane.b32.xlu1 %v664_v46, %s1341_s13  ;;  %v666_v46 = vld [vmem:[%s2305_s1 + $0x70] sm:$0xff]  ;;  %v302_v4 = vmul.f32 1.442695, %v269_v51  ;;  %v235_v32 = vmax.f32 %v233_v3, %v234_v16  ;;  %v70_v51 = vrot.slane %v69_v45, 1 }
  0x23   :  { %724 = vrot.lane.b32.xlu0 %v656_v47, %s1341_s13  ;;  %v658_v47 = vld [vmem:[%s2305_s1 + $0x30] sm:$0xff]  ;;  %v118_v5 = vmax.f32 %v116_v37, %v117_v52  ;;  %v177_v37 = vsel %vm43_vm0, %v1590_v26, -inf }
  0x24   :  { %1187 = vpow2.f32 %v302_v4  ;;  %v71_v63 = vmax.f32 %v69_v45, %v70_v51 }
  0x25   :  { %v119_v24 = vrot.slane %v118_v5, 1  ;;  %1189 = vpow2.f32 %v334_v21  ;;  %v1642_v21 = vld [vmem:[%s2306_s0 + $0xe0] sm:$0xff] }
  0x26   :  { %772 = vrot.lane.b32.xlu1 %v680_v57, %s1341_s13  ;;  %v162_v57 = vmax.f32 %v160_v23, %v161_v41  ;;  %v218_v23 = vmax.f32 %v216_v13, %v217_v2  ;;  %v1603_v41 = vpop.eup %1181  ;;  %v240_v31 = vsel %vm43_vm0, %v1642_v21, -inf }
  0x27   :  { %756 = vrot.lane.b32.xlu0 %v672_v58, %s1341_s13  ;;  %v61_v58 = vrot.slane %v60_v42, 2  ;;  %v120_v38 = vmax.f32 %v118_v5, %v119_v24  ;;  %v1607_v48 = vpop.eup %1183  ;;  %v420_v49 = vsel %vm43_vm0, %v1603_v41, 0.0 }
  0x28   :  { %v284_v22 = vsub.f32 %v1449_v29, %v162_v57  ;;  %v293_v29 = vsub.f32 %v1454_v33, %v225_v1  ;;  %v683_v33 = vld [vmem:[%s2305_s1 + $0xf8] sm:$0xff]  ;;  %v292_v36 = vsub.f32 %v1471_v44, %v218_v23  ;;  %v1621_v57 = vld [vmem:[%s2306_s0 + $0x20] sm:$0xff]  ;;  %v421_v61 = vrot.slane %v420_v49, 4 }
  0x29   :  { %v278_v13 = vsub.f32 %v1488_v56, %v120_v38  ;;  %v128_v1 = vsel %vm43_vm0, %v1616_v55, -inf  ;;  %v72_v2 = vsel %vm43_vm0, %v1621_v57, -inf }
  0x2a   :  { %742 = vrot.lane.b32.xlu1 %v665_v7, %s1341_s13  ;;  %v229_v7 = vrot.slane %v228_v53, 2  ;;  %v332_v8 = vmul.f32 1.442695, %v284_v22  ;;  %v350_v35 = vmul.f32 1.442695, %v293_v29  ;;  %v422_v14 = vadd.f32 %v421_v61, %v420_v49 }
  0x2b   :  { %726 = vrot.lane.b32.xlu0 %v657_v9, %s1341_s13  ;;  %v62_v9 = vmax.f32 %v60_v42, %v61_v58  ;;  %v348_v44 = vmul.f32 1.442695, %v292_v36  ;;  %v1623_v58 = vpop.eup %1185 }
  0x2c   :  { %v230_v25 = vmax.f32 %v228_v53, %v229_v7  ;;  %1191 = vpow2.f32 %v332_v8  ;;  %v427_v3 = vsel %vm43_vm0, %v1623_v58, 0.0  ;;  %v129_v7 = vrot.slane %v128_v1, 4 }
  0x2d   :  { %1193 = vpow2.f32 %v350_v35 }
  0x2e   :  { %774 = vrot.lane.b32.xlu1 %v681_v27, %s1341_s13  ;;  %v63_v27 = vrot.slane %v62_v9, 1  ;;  %v231_v40 = vrot.slane %v230_v25, 1  ;;  %1195 = vpow2.f32 %v348_v44 }
  0x2f   :  { %758 = vrot.lane.b32.xlu0 %v673_v28, %s1341_s13  ;;  %v174_v28 = vmax.f32 %v172_v59, %v173_v11  ;;  %v127_v59 = vmax.f32 %v125_v30, %v126_v10  ;;  %v241_v10 = vrot.slane %v240_v31, 4 }
  0x30   :  { %v64_v42 = vmax.f32 %v62_v9, %v63_v27  ;;  %v232_v50 = vmax.f32 %v230_v25, %v231_v40 }
  0x31   :  { %v175_v43 = vrot.slane %v174_v28, 1  ;;  %v1635_v22 = vpop.eup %1187  ;;  %v279_v9 = vsub.f32 %v1527_v20, %v127_v59 }
  0x32   :  { %744 = vrot.lane.b32.xlu1 %v666_v46, %s1341_s13  ;;  %v236_v46 = vrot.slane %v235_v32, 2  ;;  %v270_v52 = vsub.f32 %v1499_v62, %v64_v42  ;;  %v364_v62 = vsel %vm43_vm0, %v1607_v48, 0.0  ;;  %v1644_v29 = vpop.eup %1189  ;;  %v371_v20 = vsel %vm43_vm0, %v1635_v22, 0.0 }
  0x33   :  { %728 = vrot.lane.b32.xlu0 %v658_v47, %s1341_s13  ;;  %v178_v47 = vrot.slane %v177_v37, 4  ;;  %v176_v53 = vmax.f32 %v174_v28, %v175_v43  ;;  %v365_v16 = vrot.slane %v364_v62, 4  ;;  %v372_v38 = vrot.slane %v371_v20, 4 }
  0x34   :  { %v237_v60 = vmax.f32 %v235_v32, %v236_v46  ;;  %v304_v4 = vmul.f32 1.442695, %v270_v52 }
  0x35   :  { %v179_v56 = vmax.f32 %v177_v37, %v178_v47  ;;  %v286_v5 = vsub.f32 %v1521_v15, %v176_v53  ;;  %v428_v15 = vrot.slane %v427_v3, 4  ;;  %v366_v32 = vadd.f32 %v365_v16, %v364_v62 }
  0x36   :  { %776 = vrot.lane.b32.xlu1 %v682_v17, %s1341_s13  ;;  %v320_v17 = vmul.f32 1.442695, %v278_v13  ;;  %v238_v11 = vrot.slane %v237_v60, 1  ;;  %v423_v37 = vrot.slane %v422_v14, 2 }
  0x37   :  { %760 = vrot.lane.b32.xlu0 %v674_v0, %s1341_s13  ;;  %v294_v0 = vsub.f32 %v1510_v6, %v232_v50  ;;  %v180_v12 = vrot.slane %v179_v56, 2  ;;  %v73_v6 = vrot.slane %v72_v2, 4  ;;  %v336_v25 = vmul.f32 1.442695, %v286_v5 }
  0x38   :  { %1197 = vpow2.f32 %v320_v17  ;;  %v239_v28 = vmax.f32 %v237_v60, %v238_v11  ;;  %v429_v42 = vadd.f32 %v428_v15, %v427_v3  ;;  %v367_v44 = vrot.slane %v366_v32, 2 }
  0x39   :  { %v352_v23 = vmul.f32 1.442695, %v294_v0  ;;  %v74_v24 = vmax.f32 %v72_v2, %v73_v6  ;;  %1199 = vpow2.f32 %v304_v4  ;;  %v1648_v27 = vpop.eup %1191  ;;  %v181_v30 = vmax.f32 %v179_v56, %v180_v12  ;;  %v1670_v12 = vld [vmem:[%s2306_s0 + $0xa0] sm:$0xff] }
  0x3a   :  { %746 = vrot.lane.b32.xlu1 %v667_v18, %s1341_s13  ;;  %v271_v18 = vsub.f32 %v1547_v39, %v71_v63  ;;  %v322_v39 = vmul.f32 1.442695, %v279_v9  ;;  %v1654_v36 = vpop.eup %1193  ;;  %v476_v43 = vsel %vm43_vm0, %v1648_v27, 0.0  ;;  %v295_v46 = vsub.f32 %v1564_v54, %v239_v28 }
  0x3b   :  { %730 = vrot.lane.b32.xlu0 %v659_v19, %s1341_s13  ;;  %v130_v19 = vmax.f32 %v128_v1, %v129_v7  ;;  %v75_v35 = vrot.slane %v74_v24, 2  ;;  %1201 = vpow2.f32 %v352_v23  ;;  %v182_v47 = vrot.slane %v181_v30, 1  ;;  %v1659_v13 = vpop.eup %1195 }
  0x3c   :  { %1203 = vpow2.f32 %v336_v25  ;;  %v373_v50 = vadd.f32 %v372_v38, %v371_v20  ;;  %v477_v51 = vrot.slane %v476_v43, 4  ;;  %v539_v52 = vsel %vm43_vm0, %v1654_v36, 0.0 }
  0x3d   :  { %v131_v8 = vrot.slane %v130_v19, 2  ;;  %1205 = vpow2.f32 %v322_v39  ;;  %v76_v49 = vmax.f32 %v74_v24, %v75_v35  ;;  %v424_v59 = vadd.f32 %v423_v37, %v422_v14 }
  0x3e   :  { %778 = vrot.lane.b32.xlu1 %v683_v33, %s1341_s13  ;;  %v483_v33 = vsel %vm43_vm0, %v1644_v29, 0.0  ;;  %v430_v60 = vrot.slane %v429_v42, 2  ;;  %v242_v56 = vmax.f32 %v240_v31, %v241_v10  ;;  %v354_v62 = vmul.f32 1.442695, %v295_v46 }
  0x3f   :  { %762 = vrot.lane.b32.xlu0 %v675_v34, %s1341_s13  ;;  %v306_v34 = vmul.f32 1.442695, %v271_v18  ;;  %v132_v40 = vmax.f32 %v130_v19, %v131_v8  ;;  %v484_v45 = vrot.slane %v483_v33, 4  ;;  %v183_v63 = vmax.f32 %v181_v30, %v182_v47 }
  0x40   :  { %v368_v17 = vadd.f32 %v367_v44, %v366_v32  ;;  %v540_v54 = vrot.slane %v539_v52, 4  ;;  %v532_v0 = vsel %vm43_vm0, %v1659_v13, 0.0  ;;  %v77_v1 = vrot.slane %v76_v49, 1 }
  0x41   :  { %1207 = vpow2.f32 %v306_v34  ;;  %v133_v53 = vrot.slane %v132_v40, 1  ;;  %v485_v61 = vadd.f32 %v484_v45, %v483_v33  ;;  %v374_v2 = vrot.slane %v373_v50, 2 }
  0x42   :  { %v478_v3 = vadd.f32 %v477_v51, %v476_v43  ;;  %v425_v7 = vrot.slane %v424_v59, 1  ;;  %v431_v9 = vadd.f32 %v430_v60, %v429_v42  ;;  %v243_v11 = vrot.slane %v242_v56, 2 }
  0x43   :  { %v134_v4 = vmax.f32 %v132_v40, %v133_v53  ;;  %v486_v14 = vrot.slane %v485_v61, 2  ;;  %v533_v16 = vrot.slane %v532_v0, 4  ;;  %1209 = vpow2.f32 %v354_v62 }
  0x44   :  { %v287_v18 = vsub.f32 %v1590_v26, %v183_v63  ;;  %v369_v19 = vrot.slane %v368_v17, 1  ;;  %v541_v15 = vadd.f32 %v540_v54, %v539_v52  ;;  %v78_v23 = vmax.f32 %v76_v49, %v77_v1 }
  0x45   :  { %v1665_v5 = vpop.eup %1197  ;;  %v375_v24 = vadd.f32 %v374_v2, %v373_v50  ;;  %v479_v20 = vrot.slane %v478_v3, 2  ;;  %v280_v25 = vsub.f32 %v1616_v55, %v134_v4  ;;  %v184_v8 = vsel %vm43_vm0, %v1670_v12, -inf }
  0x46   :  { %v1672_v6 = vpop.eup %1199  ;;  %v426_v28 = vadd.f32 %v425_v7, %v424_v59  ;;  %v434_v30 = vsel %vm43_vm0, %v1665_v5, 0.0  ;;  %v244_v26 = vmax.f32 %v242_v56, %v243_v11  ;;  %v432_v33 = vrot.slane %v431_v9, 1 }
  0x47   :  { %v378_v31 = vsel %vm43_vm0, %v1672_v6, 0.0  ;;  %v487_v34 = vadd.f32 %v486_v14, %v485_v61  ;;  %v534_v35 = vadd.f32 %v533_v16, %v532_v0  ;;  %v338_v37 = vmul.f32 1.442695, %v287_v18 }
  0x48   :  { %v1678_v39 = vpop.eup %1201  ;;  %v370_v38 = vadd.f32 %v369_v19, %v368_v17  ;;  %v542_v40 = vrot.slane %v541_v15, 2  ;;  %v272_v42 = vsub.f32 %v1621_v57, %v78_v23  ;;  %v185_v43 = vrot.slane %v184_v8, 4 }
  0x49   :  { %v1684_v32 = vpop.eup %1203  ;;  %v435_v45 = vrot.slane %v434_v30, 4  ;;  %v379_v46 = vrot.slane %v378_v31, 4  ;;  %v546_v47 = vsel %vm43_vm0, %v1678_v39, 0.0  ;;  %v324_v44 = vmul.f32 1.442695, %v280_v25 }
  0x4a   :  { %v1686_v55 = vpop.eup %1205  ;;  %1211 = vrcp.f32 %v426_v28  ;;  %v376_v49 = vrot.slane %v375_v24, 1  ;;  %v490_v50 = vsel %vm43_vm0, %v1684_v32, 0.0  ;;  %v245_v51 = vrot.slane %v244_v26, 1 }
  0x4b   :  { %v480_v52 = vadd.f32 %v479_v20, %v478_v3  ;;  %v535_v53 = vrot.slane %v534_v35, 2  ;;  %v441_v57 = vsel %vm43_vm0, %v1686_v55, 0.0  ;;  %1213 = vpow2.f32 %v338_v37 }
  0x4c   :  { %v547_v59 = vrot.slane %v546_v47, 4  ;;  %v308_v56 = vmul.f32 1.442695, %v272_v42  ;;  %v186_v61 = vmax.f32 %v184_v8, %v185_v43  ;;  %v436_v62 = vadd.f32 %v435_v45, %v434_v30 }
  0x4d   :  { %v380_v63 = vadd.f32 %v379_v46, %v378_v31  ;;  %v491_v17 = vrot.slane %v490_v50, 4  ;;  %1215 = vpow2.f32 %v324_v44  ;;  %v433_v54 = vadd.f32 %v432_v33, %v431_v9  ;;  %v1704_v9 = vld [vmem:[%s2306_s0 + $0x68] sm:$0xff] }
  0x4e   :  { %v1689_v10 = vpop.eup %1207  ;;  %v488_v0 = vrot.slane %v487_v34, 1  ;;  %v442_v1 = vrot.slane %v441_v57, 4  ;;  %v246_v2 = vmax.f32 %v244_v26, %v245_v51  ;;  %1217 = vrcp.f32 %v370_v38  ;;  %v1712_v26 = vld [vmem:[%s2306_s0 + $0x28] sm:$0xff] }
  0x4f   :  { %v385_v60 = vsel %vm43_vm0, %v1689_v10, 0.0  ;;  %v377_v3 = vadd.f32 %v376_v49, %v375_v24  ;;  %v543_v4 = vadd.f32 %v542_v40, %v541_v15  ;;  %v481_v14 = vrot.slane %v480_v52, 1 }
  0x50   :  { %v386_v7 = vrot.slane %v385_v60, 4  ;;  %v1699_v11 = vpop.eup %1209  ;;  %v548_v16 = vadd.f32 %v547_v59, %v546_v47  ;;  %1219 = vpow2.f32 %v308_v56  ;;  %v187_v18 = vrot.slane %v186_v61, 2  ;;  %v1725_v59 = vld [vmem:[%s2306_s0 + $0xe8] sm:$0xff] }
  0x51   :  { %v536_v19 = vadd.f32 %v535_v53, %v534_v35  ;;  %v437_v23 = vrot.slane %v436_v62, 2  ;;  %v381_v20 = vrot.slane %v380_v63, 2  ;;  %v492_v25 = vadd.f32 %v491_v17, %v490_v50 }
  0x52   :  { %1221 = vrcp.f32 %v433_v54  ;;  %v489_v8 = vadd.f32 %v488_v0, %v487_v34  ;;  %v443_v24 = vadd.f32 %v442_v1, %v441_v57  ;;  %v296_v15 = vsub.f32 %v1642_v21, %v246_v2 }
  0x53   :  { %1223 = vrcp.f32 %v377_v3  ;;  %v544_v28 = vrot.slane %v543_v4, 1  ;;  %v387_v30 = vadd.f32 %v386_v7, %v385_v60  ;;  %v553_v31 = vsel %vm43_vm0, %v1699_v11, 0.0 }
  0x54   :  { %v482_v33 = vadd.f32 %v481_v14, %v480_v52  ;;  %v549_v35 = vrot.slane %v548_v16, 2  ;;  %v188_v37 = vmax.f32 %v186_v61, %v187_v18  ;;  %v135_v34 = vsel %vm43_vm0, %v1704_v9, -inf }
  0x55   :  { %v537_v38 = vrot.slane %v536_v19, 1  ;;  %v438_v40 = vadd.f32 %v437_v23, %v436_v62  ;;  %v382_v21 = vadd.f32 %v381_v20, %v380_v63  ;;  %v493_v42 = vrot.slane %v492_v25, 2 }
  0x56   :  { %v444_v43 = vrot.slane %v443_v24, 2  ;;  %v554_v45 = vrot.slane %v553_v31, 4  ;;  %v356_v46 = vmul.f32 1.442695, %v296_v15  ;;  %v79_v47 = vsel %vm43_vm0, %v1712_v26, -inf }
  0x57   :  { %v1718_v44 = vpop.eup %1211  ;;  %1225 = vrcp.f32 %v489_v8  ;;  %v388_v49 = vrot.slane %v387_v30, 2  ;;  %v136_v50 = vrot.slane %v135_v34, 4  ;;  %v545_v52 = vadd.f32 %v544_v28, %v543_v4 }
  0x58   :  { %v1720_v51 = vpop.eup %1213  ;;  %1227 = vrcp.f32 %v482_v33  ;;  %v550_v53 = vadd.f32 %v549_v35, %v548_v16  ;;  %v189_v57 = vrot.slane %v188_v37, 1  ;;  %v538_v60 = vadd.f32 %v537_v38, %v536_v19 }
  0x59   :  { %v439_v56 = vrot.slane %v438_v40, 1  ;;  %v494_v61 = vadd.f32 %v493_v42, %v492_v25  ;;  %v80_v62 = vrot.slane %v79_v47, 4  ;;  %v383_v17 = vrot.slane %v382_v21, 1 }
  0x5a   :  { %v1727_v63 = vpop.eup %1215  ;;  %v445_v54 = vadd.f32 %v444_v43, %v443_v24  ;;  %v555_v0 = vadd.f32 %v554_v45, %v553_v31  ;;  %1229 = vpow2.f32 %v356_v46  ;;  %v389_v1 = vadd.f32 %v388_v49, %v387_v30 }
  0x5b   :  { %v497_v2 = vsel %vm43_vm0, %v1720_v51, 0.0  ;;  %v137_v3 = vmax.f32 %v135_v34, %v136_v50  ;;  %v247_v4 = vsel %vm43_vm0, %v1725_v59, -inf  ;;  %v1733_v7 = vpop.eup %1217  ;;  %1231 = vrcp.f32 %v545_v52 }
  0x5c   :  { %v551_v14 = vrot.slane %v550_v53, 1  ;;  %v190_v16 = vmax.f32 %v188_v37, %v189_v57  ;;  %v440_v19 = vadd.f32 %v439_v56, %v438_v40  ;;  %v495_v23 = vrot.slane %v494_v61, 1 }
  0x5d   :  { %v1735_v18 = vpop.eup %1219  ;;  %v448_v20 = vsel %vm43_vm0, %v1727_v63, 0.0  ;;  %v81_v25 = vmax.f32 %v79_v47, %v80_v62  ;;  %v446_v8 = vrot.slane %v445_v54, 1  ;;  %v556_v24 = vrot.slane %v555_v0, 2 }
  0x5e   :  { %v498_v15 = vrot.slane %v497_v2, 4  ;;  %v248_v28 = vrot.slane %v247_v4, 4  ;;  %1233 = vrcp.f32 %v538_v60  ;;  %v384_v31 = vadd.f32 %v383_v17, %v382_v21 }
  0x5f   :  { %v1739_v30 = vpop.eup %1221  ;;  %v390_v33 = vrot.slane %v389_v1, 1  ;;  %v138_v35 = vrot.slane %v137_v3, 2  ;;  %v552_v37 = vadd.f32 %v551_v14, %v550_v53  ;;  %v449_v38 = vrot.slane %v448_v20, 4 }
  0x60   :  { %v1741_v34 = vpop.eup %1223  ;;  %v392_v40 = vsel %vm43_vm0, %v1735_v18, 0.0  ;;  %v288_v42 = vsub.f32 %v1670_v12, %v190_v16  ;;  %1235 = vrcp.f32 %v440_v19  ;;  %v496_v45 = vadd.f32 %v495_v23, %v494_v61  ;;  %v1753_v61 = vld [vmem:[%s2306_s0 + $0xa8] sm:$0xff] }
  0x61   :  { %v82_v46 = vrot.slane %v81_v25, 2  ;;  %v447_v49 = vadd.f32 %v446_v8, %v445_v54  ;;  %v557_v21 = vadd.f32 %v556_v24, %v555_v0  ;;  %v499_v50 = vadd.f32 %v498_v15, %v497_v2 }
  0x62   :  { %v249_v52 = vmax.f32 %v247_v4, %v248_v28  ;;  %1237 = vrcp.f32 %v384_v31  ;;  %v391_v57 = vadd.f32 %v390_v33, %v389_v1  ;;  %v393_v53 = vrot.slane %v392_v40, 4 }
  0x63   :  { %v139_v60 = vmax.f32 %v137_v3, %v138_v35  ;;  %1239 = vrcp.f32 %v552_v37  ;;  %v450_v62 = vadd.f32 %v449_v38, %v448_v20  ;;  %v340_v17 = vmul.f32 1.442695, %v288_v42 }
  0x64   :  { %v1226_v56 = vpop.eup %1225  ;;  %1241 = vrcp.f32 %v496_v45  ;;  %v83_v14 = vmax.f32 %v81_v25, %v82_v46  ;;  %v558_v54 = vrot.slane %v557_v21, 1  ;;  %v500_v0 = vrot.slane %v499_v50, 2 }
  0x65   :  { %v1228_v12 = vpop.eup %1227  ;;  %1243 = vrcp.f32 %v447_v49  ;;  %v250_v2 = vrot.slane %v249_v52, 2  ;;  %v394_v3 = vadd.f32 %v393_v53, %v392_v40  ;;  %v140_v16 = vrot.slane %v139_v60, 1 }
  0x66   :  { %1245 = vrcp.f32 %v391_v57  ;;  %v451_v23 = vrot.slane %v450_v62, 2  ;;  %v191_v20 = vsel %vm43_vm0, %v1753_v61, -inf  ;;  %v84_v8 = vrot.slane %v83_v14, 1 }
  0x67   :  { %v1755_v4 = vpop.eup %1229  ;;  %1247 = vpow2.f32 %v340_v17  ;;  %v559_v24 = vadd.f32 %v558_v54, %v557_v21  ;;  %v501_v15 = vadd.f32 %v500_v0, %v499_v50  ;;  %v251_v31 = vmax.f32 %v249_v52, %v250_v2 }
  0x68   :  { %v1232_v25 = vpop.eup %1231  ;;  %v560_v28 = vsel %vm43_vm0, %v1755_v4, 0.0  ;;  %v395_v33 = vrot.slane %v394_v3, 2  ;;  %v141_v35 = vmax.f32 %v139_v60, %v140_v16  ;;  %v192_v37 = vrot.slane %v191_v20, 4 }
  0x69   :  { %v452_v40 = vadd.f32 %v451_v23, %v450_v62  ;;  %v561_v45 = vrot.slane %v560_v28, 4  ;;  %v85_v46 = vmax.f32 %v83_v14, %v84_v8  ;;  %1249 = vrcp.f32 %v559_v24 }
  0x6a   :  { %v502_v53 = vrot.slane %v501_v15, 1  ;;  %v252_v21 = vrot.slane %v251_v31, 1  ;;  %v396_v50 = vadd.f32 %v395_v33, %v394_v3  ;;  %v281_v17 = vsub.f32 %v1704_v9, %v141_v35 }
  0x6b   :  { %v1234_v38 = vpop.eup %1233  ;;  %v193_v54 = vmax.f32 %v191_v20, %v192_v37  ;;  %v453_v60 = vrot.slane %v452_v40, 1  ;;  %v628_v62 = vmul.f32 %v1718_v44, %v1603_v41  ;;  %v1774_v14 = vmul.f32 %v1733_v7, %v1607_v48 }
  0x6c   :  { %v562_v2 = vadd.f32 %v561_v45, %v560_v28  ;;  %v273_v16 = vsub.f32 %v1712_v26, %v85_v46  ;;  %v629_v3 = vmul.f32 %v1739_v30, %v1623_v58  ;;  %v621_v9 = vmul.f32 %v1741_v34, %v1635_v22  ;;  %v1792_v34 = vld [vmem:[%s2306_s0 + $0x70] sm:$0xff]  ;;  %v1311_v46 = vld [vmem:[%s2305_s1] sm:$0xff] }
  0x6d   :  { %v1236_v49 = vpop.eup %1235  ;;  %v503_v20 = vadd.f32 %v502_v53, %v501_v15  ;;  %v253_v8 = vmax.f32 %v251_v31, %v252_v21  ;;  %v1782_v33 = vmul.f32 %v1226_v56, %v1644_v29  ;;  %v397_v44 = vrot.slane %v396_v50, 1 }
  0x6e   :  { %v326_v48 = vmul.f32 1.442695, %v281_v17  ;;  %v194_v7 = vrot.slane %v193_v54, 2  ;;  %v1785_v26 = vmul.f32 %v1228_v12, %v1648_v27  ;;  %v645_v35 = vmul.f32 %v1232_v25, %v1654_v36 }
  0x6f   :  { %v1238_v52 = vpop.eup %1237  ;;  %v644_v30 = vmul.f32 %v1234_v38, %v1659_v13  ;;  %v454_v22 = vadd.f32 %v453_v60, %v452_v40  ;;  %v630_v56 = vmul.f32 %v1236_v49, %v1665_v5  ;;  %v563_v31 = vrot.slane %v562_v2, 2  ;;  %v1310_v40 = vld [vmem:[%s2305_s1 + $0x48] sm:$0xff] }
  0x70   :  { %v1240_v0 = vpop.eup %1239  ;;  %v622_v15 = vmul.f32 %v1238_v52, %v1672_v6  ;;  %v310_v27 = vmul.f32 1.442695, %v273_v16  ;;  %1251 = vrcp.f32 %v503_v20  ;;  %v297_v13 = vsub.f32 %v1725_v59, %v253_v8  ;;  %v1314_v16 = vld [vmem:[%s2305_s1 + $0xc0] sm:$0xff]  ;;  %v1850_v8 = vld [vmem:[%s2306_s0 + $0x30] sm:$0xff] }
  0x71   :  { %v1242_v23 = vpop.eup %1241  ;;  %v1799_v12 = vmul.f32 %v1240_v0, %v1678_v39  ;;  %v398_v25 = vadd.f32 %v397_v44, %v396_v50  ;;  %1253 = vpow2.f32 %v326_v48  ;;  %v195_v37 = vmax.f32 %v193_v54, %v194_v7  ;;  %v1313_v54 = vld [vmem:[%s2305_s1 + $0xc8] sm:$0xff] }
  0x72   :  { %v1244_v24 = vpop.eup %1243  ;;  %v1802_v36 = vmul.f32 %v1242_v23, %v1684_v32  ;;  %v142_v38 = vsel %vm43_vm0, %v1792_v34, -inf  ;;  %1255 = vrcp.f32 %v454_v22  ;;  %v1309_v32 = vld [vmem:[%s2305_s1 + $0x40] sm:$0xff]  ;;  %v564_v45 = vadd.f32 %v563_v31, %v562_v2  ;;  %v1315_v23 = vld [vmem:[%s2305_s1 + $0x50] sm:$0xff] }
  0x73   :  { %v1246_v28 = vpop.eup %1245  ;;  %v1808_v5 = vmul.f32 %v1244_v24, %v1686_v55  ;;  %1257 = vpow2.f32 %v310_v27  ;;  %v358_v50 = vmul.f32 1.442695, %v297_v13 }
  0x74   :  { %v1746_v43 = vpop.permute.xlu1 %732  ;;  %v1794_v29 = vpop.eup %1247  ;;  %v1811_v6 = vmul.f32 %v1246_v28, %v1689_v10  ;;  %1259 = vrcp.f32 %v398_v25  ;;  %v565_v48 = vrot.slane %v564_v45, 1 }
  0x75   :  { %v1748_v47 = vpop.permute.xlu0 %716  ;;  %v504_v39 = vsel %vm43_vm0, %v1794_v29, 0.0  ;;  %v821_v59 = vsel %vm812_vm1, %v1309_v32, %v1746_v43  ;;  %v1312_v43 = vld [vmem:[%s2305_s1 + $0x8] sm:$0xff]  ;;  %1261 = vpow2.f32 %v358_v50 }
  0x76   :  { %v813_v49 = vsel %vm812_vm1, %v1311_v46, %v1748_v47  ;;  %v1250_v17 = vpop.eup %1249  ;;  %v505_v60 = vrot.slane %v504_v39, 4  ;;  %v196_v47 = vrot.slane %v195_v37, 1  ;;  %v853_v0 = vmul.f32 %v821_v59, %v628_v62  ;;  %v1855_v62 = vld [vmem:[%s2306_s0 + $0xf0] sm:$0xff]  ;;  %v1317_v32 = vld [vmem:[%s2305_s1 + $0x88] sm:$0xff] }
  0x77   :  { %v1863_v28 = vmul.f32 %v1250_v17, %v1699_v11 }
  0x78   :  { %v1757_v1 = vpop.permute.xlu1 %734  ;;  %v933_v27 = vsel %vm43_vm0, %v853_v0, 0.0  ;;  %v506_v11 = vadd.f32 %v505_v60, %v504_v39 }
  0x79   :  { %v1759_v19 = vpop.permute.xlu0 %718  ;;  %v822_v55 = vsel %vm812_vm1, %v1310_v40, %v1757_v1  ;;  %v143_v1 = vrot.slane %v142_v38, 4  ;;  %v1318_v40 = vld [vmem:[%s2305_s1 + $0x80] sm:$0xff] }
  0x7a   :  { %v814_v53 = vsel %vm812_vm1, %v1312_v43, %v1759_v19  ;;  %v854_v2 = vmul.f32 %v822_v55, %v629_v3  ;;  %v845_v3 = vmul.f32 %v813_v49, %v1774_v14  ;;  %v1869_v14 = vsel %vm43_vm0, %v1850_v8, -inf }
  0x7b   :  { %v846_v24 = vmul.f32 %v814_v53, %v621_v9  ;;  %v1873_v9 = vsel %vm43_vm0, %v1855_v62, -inf  ;;  %v507_v50 = vrot.slane %v506_v11, 2 }
  0x7c   :  { %v1765_v42 = vpop.permute.xlu1 %750  ;;  %v877_v25 = vsel %vm43_vm0, %v845_v3, 0.0 }
  0x7d   :  { %v1767_v57 = vpop.permute.xlu0 %748  ;;  %v830_v59 = vsel %vm812_vm1, %v1317_v32, %v1765_v42  ;;  %v878_v42 = vrot.slane %v877_v25, 4 }
  0x80   :  { %v767_v41 = vpop.permute.xlu1 %766 }
  0x81   :  { %v765_v58 = vpop.permute.xlu0 %764  ;;  %v838_v52 = vsel %vm812_vm1, %v1313_v54, %v767_v41  ;;  %v1316_v41 = vld [vmem:[%s2305_s1 + $0x10] sm:$0xff] }
  0x82   :  { %v837_v19 = vsel %vm812_vm1, %v1314_v16, %v765_v58  ;;  %v870_v7 = vmul.f32 %v838_v52, %v645_v35  ;;  %v1865_v58 = vmax.f32 %v142_v38, %v143_v1  ;;  %v940_v35 = vsel %vm43_vm0, %v854_v2, 0.0 }
  0x83   :  { %v869_v22 = vmul.f32 %v837_v19, %v644_v30  ;;  %v884_v38 = vsel %vm43_vm0, %v846_v24, 0.0  ;;  %v566_v30 = vadd.f32 %v565_v48, %v564_v45  ;;  %v941_v45 = vrot.slane %v940_v35, 4 }
  0x84   :  { %v737_v10 = vpop.permute.xlu1 %736  ;;  %v1052_v39 = vsel %vm43_vm0, %v870_v7, 0.0  ;;  %v145_v55 = vrot.slane %v1865_v58, 2  ;;  %v885_v53 = vrot.slane %v884_v38, 4  ;;  %v87_v16 = vrot.slane %v1869_v14, 4 }
  0x85   :  { %v721_v21 = vpop.permute.xlu0 %720  ;;  %v823_v20 = vsel %vm812_vm1, %v1315_v23, %v737_v10  ;;  %v1252_v10 = vpop.eup %1251  ;;  %v1045_v46 = vsel %vm43_vm0, %v869_v22, 0.0  ;;  %v1053_v54 = vrot.slane %v1052_v39, 4  ;;  %v255_v19 = vrot.slane %v1873_v9, 4 }
  0x86   :  { %v815_v44 = vsel %vm812_vm1, %v1316_v41, %v721_v21  ;;  %v855_v31 = vmul.f32 %v823_v20, %v630_v56  ;;  %v197_v56 = vmax.f32 %v195_v37, %v196_v47  ;;  %v934_v37 = vrot.slane %v933_v27, 4  ;;  %v1893_v43 = vpop.eup %1253 }
  0x87   :  { %v847_v13 = vmul.f32 %v815_v44, %v622_v15  ;;  %v829_v15 = vsel %vm812_vm1, %v1318_v40, %v1767_v57  ;;  %v1256_v1 = vpop.eup %1255  ;;  %v862_v57 = vmul.f32 %v830_v59, %v1782_v33  ;;  %v1046_v47 = vrot.slane %v1045_v46, 4 }
  0x88   :  { %v947_v49 = vsel %vm43_vm0, %v855_v31, 0.0  ;;  %v861_v17 = vmul.f32 %v829_v15, %v1785_v26  ;;  %v289_v52 = vsub.f32 %v1753_v61, %v197_v56  ;;  %v1899_v60 = vpop.eup %1257  ;;  %v769_v2 = vpop.permute.xlu1 %768  ;;  %v935_v23 = vadd.f32 %v934_v37, %v933_v27  ;;  %v1319_v27 = vld [vmem:[%s2305_s1 + $0xd0] sm:$0xff] }
  0x89   :  { %v891_v21 = vsel %vm43_vm0, %v847_v13, 0.0  ;;  %v948_v0 = vrot.slane %v947_v49, 4  ;;  %v942_v20 = vadd.f32 %v941_v45, %v940_v35  ;;  %v753_v24 = vpop.permute.xlu0 %752  ;;  %v1904_v33 = vmul.f32 %v1252_v10, %v1720_v51  ;;  %v1260_v26 = vpop.eup %1259  ;;  %v1320_v35 = vld [vmem:[%s2305_s1 + $0x90] sm:$0xff] }
  0x8a   :  { %v892_v3 = vrot.slane %v891_v21, 4  ;;  %v879_v41 = vadd.f32 %v878_v42, %v877_v25  ;;  %v886_v44 = vadd.f32 %v885_v53, %v884_v38  ;;  %1263 = vrcp.f32 %v566_v30  ;;  %v1916_v25 = vpop.eup %1261 }
  0x8b   :  { %v508_v61 = vadd.f32 %v507_v50, %v506_v11  ;;  %v996_v48 = vsel %vm43_vm0, %v862_v57, 0.0  ;;  %v989_v7 = vsel %vm43_vm0, %v861_v17, 0.0  ;;  %v1054_v22 = vadd.f32 %v1053_v54, %v1052_v39  ;;  %v1321_v17 = vld [vmem:[%s2305_s1 + $0x58] sm:$0xff] }
  0x8c   :  { %v342_v31 = vmul.f32 1.442695, %v289_v52  ;;  %v1047_v13 = vadd.f32 %v1046_v47, %v1045_v46  ;;  %v949_v56 = vadd.f32 %v948_v0, %v947_v49  ;;  %v839_v51 = vsel %vm812_vm1, %v1319_v27, %v769_v2  ;;  %v739_v10 = vpop.permute.xlu1 %738 }
  0x8d   :  { %v831_v11 = vsel %vm812_vm1, %v1320_v35, %v753_v24  ;;  %v936_v38 = vrot.slane %v935_v23, 2  ;;  %v943_v30 = vrot.slane %v942_v20, 2  ;;  %v893_v32 = vadd.f32 %v892_v3, %v891_v21  ;;  %v723_v54 = vpop.permute.xlu0 %722 }
  0x8e   :  { %v1919_v59 = vmax.f32 %v1865_v58, %v145_v55  ;;  %v880_v40 = vrot.slane %v879_v41, 2  ;;  %v887_v15 = vrot.slane %v886_v44, 2  ;;  %v997_v39 = vrot.slane %v996_v48, 4 }
  0x8f   :  { %v1922_v37 = vmax.f32 %v1869_v14, %v87_v16  ;;  %v990_v45 = vrot.slane %v989_v7, 4  ;;  %v1055_v46 = vrot.slane %v1054_v22, 2  ;;  %v871_v49 = vmul.f32 %v839_v51, %v1799_v12 }
  0x90   :  { %v863_v42 = vmul.f32 %v831_v11, %v1802_v36  ;;  %v1048_v53 = vrot.slane %v1047_v13, 2  ;;  %v950_v50 = vrot.slane %v949_v56, 2  ;;  %v509_v57 = vrot.slane %v508_v61, 1 }
  0x91   :  { %1265 = vpow2.f32 %v342_v31  ;;  %v937_v21 = vadd.f32 %v936_v38, %v935_v23  ;;  %v944_v58 = vadd.f32 %v943_v30, %v942_v20  ;;  %v894_v55 = vrot.slane %v893_v32, 2  ;;  %v771_v38 = vpop.permute.xlu1 %770 }
  0x92   :  { %v824_v14 = vsel %vm812_vm1, %v1321_v17, %v739_v10  ;;  %v881_v52 = vadd.f32 %v880_v40, %v879_v41  ;;  %v888_v47 = vadd.f32 %v887_v15, %v886_v44  ;;  %v998_v12 = vadd.f32 %v997_v39, %v996_v48  ;;  %v1322_v41 = vld [vmem:[%s2305_s1 + $0x18] sm:$0xff] }
  0x93   :  { %v1931_v36 = vmul.f32 %v1256_v1, %v1727_v63  ;;  %v991_v0 = vadd.f32 %v990_v45, %v989_v7  ;;  %v1056_v2 = vadd.f32 %v1055_v46, %v1054_v22  ;;  %v1059_v16 = vsel %vm43_vm0, %v871_v49, 0.0  ;;  %v1323_v46 = vld [vmem:[%s2305_s1 + $0xd8] sm:$0xff] }
  0x94   :  { %v1003_v23 = vsel %vm43_vm0, %v863_v42, 0.0  ;;  %v1049_v20 = vadd.f32 %v1048_v53, %v1047_v13  ;;  %v951_v3 = vadd.f32 %v950_v50, %v949_v56  ;;  %v856_v24 = vmul.f32 %v824_v14, %v1808_v5 }
  0x95   :  { %v816_v44 = vsel %vm812_vm1, %v1322_v41, %v723_v54  ;;  %v938_v48 = vrot.slane %v937_v21, 1  ;;  %v945_v31 = vrot.slane %v944_v58, 1  ;;  %v895_v63 = vadd.f32 %v894_v55, %v893_v32 }
  0x96   :  { %v510_v1 = vadd.f32 %v509_v57, %v508_v61  ;;  %v889_v7 = vrot.slane %v888_v47, 1  ;;  %v1060_v22 = vrot.slane %v1059_v16, 4  ;;  %v1004_v27 = vrot.slane %v1003_v23, 4 }
  0x97   :  { %v1941_v51 = vmul.f32 %v1260_v26, %v1735_v18  ;;  %v1943_v13 = vpop.eup %1263  ;;  %v882_v5 = vrot.slane %v881_v52, 1  ;;  %v999_v56 = vrot.slane %v998_v12, 2  ;;  %v992_v35 = vrot.slane %v991_v0, 2 }
  0x98   :  { %v848_v11 = vmul.f32 %v816_v44, %v1811_v6  ;;  %v1057_v30 = vrot.slane %v1056_v2, 1  ;;  %v1050_v40 = vrot.slane %v1049_v20, 1  ;;  %v952_v15 = vrot.slane %v951_v3, 1 }
  0x99   :  { %v954_v32 = vsel %vm43_vm0, %v856_v24, 0.0  ;;  %v939_v61 = vadd.f32 %v938_v48, %v937_v21  ;;  %v946_v39 = vadd.f32 %v945_v31, %v944_v58  ;;  %v896_v10 = vrot.slane %v895_v63, 1  ;;  %v755_v24 = vpop.permute.xlu0 %754 }
  0x9a   :  { %1267 = vrcp.f32 %v510_v1  ;;  %v890_v45 = vadd.f32 %v889_v7, %v888_v47  ;;  %v1061_v18 = vadd.f32 %v1060_v22, %v1059_v16  ;;  %v1005_v26 = vadd.f32 %v1004_v27, %v1003_v23  ;;  %v1324_v7 = vld [vmem:[%s2305_s1 + $0x98] sm:$0xff]  ;;  %v741_v27 = vpop.permute.xlu1 %740 }
  0x9b   :  { %v840_v49 = vsel %vm812_vm1, %v1323_v46, %v771_v38  ;;  %v1951_v6 = vadd.f32 %v999_v56, %v998_v12  ;;  %v1953_v42 = vadd.f32 %v992_v35, %v991_v0  ;;  %v955_v53 = vrot.slane %v954_v32, 4  ;;  %v1992_v38 = vld [vmem:[%s2306_s0 + $0xb0] sm:$0xff] }
  0x9c   :  { %v898_v50 = vsel %vm43_vm0, %v848_v11, 0.0  ;;  %v883_v57 = vadd.f32 %v882_v5, %v881_v52  ;;  %v1058_v21 = vadd.f32 %v1057_v30, %v1056_v2  ;;  %v1051_v58 = vadd.f32 %v1050_v40, %v1049_v20 }
  0x9d   :  { %v953_v55 = vadd.f32 %v952_v15, %v951_v3  ;;  %v1147_v14 = vsel %vm1133_vm2, %v946_v39, %v939_v61  ;;  %v897_v54 = vadd.f32 %v896_v10, %v895_v63  ;;  %v872_v47 = vmul.f32 %v840_v49, %v1863_v28 }
  0x9e   :  { %v1956_v17 = vpop.eup %1265  ;;  %v455_v12 = vsel %vm43_vm0, %v1893_v43, 0.0  ;;  %v1062_v16 = vrot.slane %v1061_v18, 2  ;;  %v1006_v0 = vrot.slane %v1005_v26, 2  ;;  %v899_v23 = vrot.slane %v898_v50, 4 }
  0x9f   :  { %v147_v41 = vrot.slane %v1919_v59, 1  ;;  %v1134_v52 = vsel %vm1133_vm2, %v890_v45, %v883_v57  ;;  %v1001_v2 = vrot.slane %v1951_v6, 1  ;;  %v994_v20 = vrot.slane %v1953_v42, 1 }
  0xa0   :  { %v956_v3 = vadd.f32 %v955_v53, %v954_v32  ;;  %v1967_v44 = vsel %vm1133_vm2, %v1058_v21, %v1051_v58  ;;  %v1970_v28 = vsel %vm1135_vm3, %v953_v55, %v1147_v14  ;;  %v456_v48 = vrot.slane %v455_v12, 4  ;;  %v2027_v14 = vld [vmem:[%s2306_s0 + $0xf8] sm:$0xff] }
  0xa1   :  { %v148_v31 = vmax.f32 %v1919_v59, %v147_v41  ;;  %v1974_v63 = vsel %vm1135_vm3, %v897_v54, %v1134_v52  ;;  %v1066_v1 = vsel %vm43_vm0, %v872_v47, 0.0  ;;  %v832_v22 = vsel %vm812_vm1, %v1324_v7, %v755_v24 }
  0xa2   :  { %v89_v5 = vrot.slane %v1922_v37, 2  ;;  %v1982_v56 = vadd.f32 %v1062_v16, %v1061_v18  ;;  %v1984_v35 = vadd.f32 %v1006_v0, %v1005_v26  ;;  %v1986_v11 = vadd.f32 %v899_v23, %v898_v50 }
  0xa3   :  { %v282_v59 = vsub.f32 %v1792_v34, %v148_v31  ;;  %v957_v30 = vrot.slane %v956_v3, 2  ;;  %v399_v40 = vsel %vm43_vm0, %v1899_v60, 0.0  ;;  %v256_v32 = vmax.f32 %v1873_v9, %v255_v19  ;;  %v1325_v34 = vld [vmem:[%s2305_s1 + $0x60] sm:$0xff]  ;;  %v2010_v9 = vld [vmem:[%s2306_s0 + $0x78] sm:$0xff] }
  0xa4   :  { %v90_v15 = vmax.f32 %v1922_v37, %v89_v5  ;;  %v1067_v61 = vrot.slane %v1066_v1, 4  ;;  %v825_v39 = vsel %vm812_vm1, %v1325_v34, %v741_v27  ;;  %v457_v10 = vadd.f32 %v456_v48, %v455_v12  ;;  %v2015_v19 = vld [vmem:[%s2306_s0 + $0x38] sm:$0xff] }
  0xa5   :  { %v328_v45 = vmul.f32 1.442695, %v282_v59  ;;  %v864_v18 = vmul.f32 %v832_v22, %v1904_v33  ;;  %v257_v46 = vrot.slane %v256_v32, 2  ;;  %v198_v37 = vsel %vm43_vm0, %v1992_v38, -inf }
  0xa6   :  { %v91_v26 = vrot.slane %v90_v15, 1  ;;  %v1064_v53 = vrot.slane %v1982_v56, 1  ;;  %v901_v33 = vrot.slane %v1986_v11, 2  ;;  %v400_v50 = vrot.slane %v399_v40, 4 }
  0xa7   :  { %v2017_v49 = vpop.eup %1267  ;;  %v199_v57 = vrot.slane %v198_v37, 4  ;;  %v2022_v21 = vmul.f32 %v825_v39, %v1931_v36  ;;  %1269 = vpow2.f32 %v328_v45  ;;  %v258_v55 = vmax.f32 %v256_v32, %v257_v46 }
  0xa8   :  { %v92_v58 = vmax.f32 %v90_v15, %v91_v26  ;;  %v458_v54 = vrot.slane %v457_v10, 2  ;;  %v149_v12 = vsel %vm43_vm0, %v2010_v9, -inf  ;;  %v93_v16 = vsel %vm43_vm0, %v2015_v19, -inf }
  0xa9   :  { %v200_v47 = vmax.f32 %v198_v37, %v199_v57  ;;  %v567_v36 = vsel %vm43_vm0, %v1916_v25, 0.0  ;;  %v259_v23 = vrot.slane %v258_v55, 1  ;;  %v150_v24 = vrot.slane %v149_v12, 4 }
  0xaa   :  { %v274_v0 = vsub.f32 %v1850_v8, %v92_v58  ;;  %v401_v41 = vadd.f32 %v400_v50, %v399_v40  ;;  %v94_v48 = vrot.slane %v93_v16, 4  ;;  %v261_v31 = vsel %vm43_vm0, %v2027_v14, -inf }
  0xab   :  { %v201_v52 = vrot.slane %v200_v47, 2  ;;  %v260_v22 = vmax.f32 %v258_v55, %v259_v23  ;;  %v151_v27 = vmax.f32 %v149_v12, %v150_v24  ;;  %v262_v5 = vrot.slane %v261_v31, 4 }
  0xac   :  { %v312_v7 = vmul.f32 1.442695, %v274_v0  ;;  %v2038_v59 = vadd.f32 %v957_v30, %v956_v3  ;;  %v568_v15 = vrot.slane %v567_v36, 4  ;;  %v95_v34 = vmax.f32 %v93_v16, %v94_v48  ;;  %v2046_v3 = vld [vmem:[%s2306_s0 + $0xb8] sm:$0xff] }
  0xad   :  { %v202_v32 = vmax.f32 %v200_v47, %v201_v52  ;;  %v298_v8 = vsub.f32 %v1855_v62, %v260_v22  ;;  %v152_v39 = vrot.slane %v151_v27, 2  ;;  %v263_v45 = vmax.f32 %v261_v31, %v262_v5  ;;  %v725_v62 = vpop.permute.xlu0 %724 }
  0xae   :  { %1271 = vpow2.f32 %v312_v7  ;;  %v2041_v40 = vadd.f32 %v1067_v61, %v1066_v1  ;;  %v402_v26 = vrot.slane %v401_v41, 2  ;;  %v96_v37 = vrot.slane %v95_v34, 2 }
  0xaf   :  { %v203_v46 = vrot.slane %v202_v32, 1  ;;  %v459_v50 = vadd.f32 %v458_v54, %v457_v10  ;;  %v360_v57 = vmul.f32 1.442695, %v298_v8  ;;  %v153_v58 = vmax.f32 %v151_v27, %v152_v39 }
  0xb0   :  { %v264_v55 = vrot.slane %v263_v45, 2  ;;  %v2049_v30 = vsel %vm43_vm0, %v864_v18, 0.0  ;;  %v569_v47 = vadd.f32 %v568_v15, %v567_v36  ;;  %v97_v1 = vmax.f32 %v95_v34, %v96_v37  ;;  %v1326_v18 = vld [vmem:[%s2305_s1 + $0x20] sm:$0xff] }
  0xb1   :  { %v204_v12 = vmax.f32 %v202_v32, %v203_v46  ;;  %v511_v61 = vsel %vm43_vm0, %v1956_v17, 0.0  ;;  %1273 = vpow2.f32 %v360_v57  ;;  %v154_v10 = vrot.slane %v153_v58, 1 }
  0xb2   :  { %v265_v54 = vmax.f32 %v263_v45, %v264_v55  ;;  %v403_v16 = vadd.f32 %v402_v26, %v401_v41  ;;  %v98_v23 = vrot.slane %v97_v1, 1  ;;  %v205_v24 = vsel %vm43_vm0, %v2046_v3, -inf }
  0xb3   :  { %v290_v0 = vsub.f32 %v1992_v38, %v204_v12  ;;  %v817_v36 = vsel %vm812_vm1, %v1326_v18, %v725_v62  ;;  %v460_v52 = vrot.slane %v459_v50, 1  ;;  %v155_v48 = vmax.f32 %v153_v58, %v154_v10  ;;  %v773_v12 = vpop.permute.xlu1 %772 }
  0xb4   :  { %v266_v31 = vrot.slane %v265_v54, 1  ;;  %v2060_v7 = vpop.eup %1269  ;;  %v1065_v22 = vadd.f32 %v1064_v53, %v1982_v56  ;;  %v570_v41 = vrot.slane %v569_v47, 2  ;;  %v512_v27 = vrot.slane %v511_v61, 4 }
  0xb5   :  { %v344_v38 = vmul.f32 1.442695, %v290_v0  ;;  %v462_v5 = vsel %vm43_vm0, %v2060_v7, 0.0  ;;  %v283_v15 = vsub.f32 %v2010_v9, %v155_v48  ;;  %v99_v32 = vmax.f32 %v97_v1, %v98_v23 }
  0xb6   :  { %v206_v34 = vrot.slane %v205_v24, 4  ;;  %v902_v8 = vadd.f32 %v901_v33, %v1986_v11  ;;  %v404_v39 = vrot.slane %v403_v16, 1  ;;  %v463_v45 = vrot.slane %v462_v5, 4 }
  0xb7   :  { %v267_v26 = vmax.f32 %v265_v54, %v266_v31  ;;  %v1011_v46 = vrot.slane %v2049_v30, 4  ;;  %v461_v56 = vadd.f32 %v460_v52, %v459_v50  ;;  %1275 = vpow2.f32 %v344_v38  ;;  %v2094_v38 = vpop.permute.xlu0 %756 }
  0xb8   :  { %v330_v53 = vmul.f32 1.442695, %v283_v15  ;;  %v959_v37 = vrot.slane %v2038_v59, 1  ;;  %v1069_v57 = vrot.slane %v2041_v40, 2  ;;  %v464_v58 = vadd.f32 %v463_v45, %v462_v5  ;;  %v743_v5 = vpop.permute.xlu1 %742 }
  0xb9   :  { %v275_v9 = vsub.f32 %v2015_v19, %v99_v32  ;;  %v571_v55 = vadd.f32 %v570_v41, %v569_v47  ;;  %v513_v62 = vadd.f32 %v512_v27, %v511_v61  ;;  %v207_v11 = vmax.f32 %v205_v24, %v206_v34 }
  0xba   :  { %1277 = vpow2.f32 %v330_v53  ;;  %v405_v1 = vadd.f32 %v404_v39, %v403_v16  ;;  %v465_v10 = vrot.slane %v464_v58, 2  ;;  %v299_v54 = vsub.f32 %v2027_v14, %v267_v26 }
  0xbb   :  { %v2073_v33 = vpop.eup %1271  ;;  %v314_v50 = vmul.f32 1.442695, %v275_v9  ;;  %v961_v0 = vsel %vm43_vm0, %v2022_v21, 0.0  ;;  %v849_v23 = vmul.f32 %v817_v36, %v1941_v51  ;;  %1279 = vrcp.f32 %v461_v56 }
  0xbc   :  { %v406_v19 = vsel %vm43_vm0, %v2073_v33, 0.0  ;;  %v2083_v47 = vsel %vm1135_vm3, %v1065_v22, %v1967_v44  ;;  %v903_v61 = vrot.slane %v902_v8, 1  ;;  %v466_v24 = vadd.f32 %v465_v10, %v464_v58 }
  0xbd   :  { %v407_v16 = vrot.slane %v406_v19, 4  ;;  %v572_v18 = vrot.slane %v571_v55, 1  ;;  %1281 = vpow2.f32 %v314_v50  ;;  %v362_v52 = vmul.f32 1.442695, %v299_v54  ;;  %v1327_v50 = vld [vmem:[%s2305_s1 + $0xe0] sm:$0xff]  ;;  %v727_v54 = vpop.permute.xlu0 %726 }
  0xbe   :  { %v208_v14 = vrot.slane %v207_v11, 2  ;;  %v2085_v48 = vpop.eup %1273  ;;  %1283 = vrcp.f32 %v405_v1  ;;  %v514_v21 = vrot.slane %v513_v62, 2  ;;  %v467_v51 = vrot.slane %v466_v24, 1 }
  0xbf   :  { %v408_v36 = vadd.f32 %v407_v16, %v406_v19  ;;  %v960_v31 = vadd.f32 %v959_v37, %v2038_v59  ;;  %v2089_v41 = vadd.f32 %v1011_v46, %v2049_v30  ;;  %v574_v44 = vsel %vm43_vm0, %v2085_v48, 0.0 }
  0xc0   :  { %1285 = vpow2.f32 %v362_v52  ;;  %v962_v22 = vrot.slane %v961_v0, 4  ;;  %v905_v27 = vsel %vm43_vm0, %v849_v23, 0.0  ;;  %v468_v15 = vadd.f32 %v467_v51, %v466_v24 }
  0xc1   :  { %v409_v32 = vrot.slane %v408_v36, 2  ;;  %v2097_v34 = vadd.f32 %v1069_v57, %v2041_v40  ;;  %v573_v39 = vadd.f32 %v572_v18, %v571_v55  ;;  %v575_v59 = vrot.slane %v574_v44, 4 }
  0xc2   :  { %v209_v45 = vmax.f32 %v207_v11, %v208_v14  ;;  %v2099_v30 = vadd.f32 %v903_v61, %v902_v8  ;;  %v515_v26 = vadd.f32 %v514_v21, %v513_v62  ;;  %1287 = vrcp.f32 %v468_v15 }
  0xc3   :  { %v410_v46 = vadd.f32 %v409_v32, %v408_v36  ;;  %v1013_v56 = vrot.slane %v2089_v41, 2  ;;  %v906_v53 = vrot.slane %v905_v27, 4  ;;  %v576_v37 = vadd.f32 %v575_v59, %v574_v44 }
  0xc4   :  { %v210_v58 = vrot.slane %v209_v45, 1  ;;  %v2102_v9 = vpop.eup %1275  ;;  %v2106_v1 = vsel %vm1137_vm4, %v960_v31, %v1970_v28  ;;  %v2108_v40 = vadd.f32 %v962_v22, %v961_v0  ;;  %v648_v8 = vmul.f32 %v1943_v13, %v1755_v4  ;;  %v2120_v0 = vpop.permute.xlu1 %774 }
  0xc5   :  { %v411_v57 = vrot.slane %v410_v46, 1  ;;  %1289 = vrcp.f32 %v573_v39  ;;  %v577_v55 = vrot.slane %v576_v37, 2  ;;  %v518_v62 = vsel %vm43_vm0, %v2102_v9, 0.0 }
  0xc6   :  { %v211_v11 = vmax.f32 %v209_v45, %v210_v58  ;;  %v841_v28 = vsel %vm812_vm1, %v1327_v50, %v773_v12  ;;  %v516_v23 = vrot.slane %v515_v26, 1  ;;  %v519_v13 = vrot.slane %v518_v62, 4 }
  0xc7   :  { %v2114_v10 = vpop.eup %1277  ;;  %v412_v4 = vadd.f32 %v411_v57, %v410_v46  ;;  %v1071_v19 = vrot.slane %v2097_v34, 1  ;;  %v578_v61 = vadd.f32 %v577_v55, %v576_v37  ;;  %v2126_v52 = vadd.f32 %v906_v53, %v905_v27  ;;  %v1328_v53 = vld [vmem:[%s2305_s1 + $0x68] sm:$0xff]  ;;  %v1329_v57 = vld [vmem:[%s2305_s1 + $0xa0] sm:$0xff] }
  0xc8   :  { %v469_v24 = vsel %vm43_vm0, %v2114_v10, 0.0  ;;  %v291_v16 = vsub.f32 %v2046_v3, %v211_v11  ;;  %v1280_v18 = vpop.eup %1279  ;;  %v520_v14 = vadd.f32 %v519_v13, %v518_v62  ;;  %v964_v21 = vrot.slane %v2108_v40, 2 }
  0xc9   :  { %1291 = vrcp.f32 %v412_v4  ;;  %v470_v12 = vrot.slane %v469_v24, 4  ;;  %v873_v51 = vmul.f32 %v841_v28, %v648_v8  ;;  %v579_v36 = vrot.slane %v578_v61, 1 }
  0xca   :  { %v346_v31 = vmul.f32 1.442695, %v291_v16  ;;  %v2129_v44 = vpop.eup %1281  ;;  %v640_v22 = vmul.f32 %v2017_v49, %v1794_v29  ;;  %v517_v15 = vadd.f32 %v516_v23, %v515_v26  ;;  %v521_v32 = vrot.slane %v520_v14, 2  ;;  %v2142_v29 = vpop.permute.xlu0 %758 }
  0xcb   :  { %v471_v39 = vadd.f32 %v470_v12, %v469_v24  ;;  %v1284_v3 = vpop.eup %1283  ;;  %v633_v27 = vmul.f32 %v1280_v18, %v1893_v43  ;;  %v580_v59 = vadd.f32 %v579_v36, %v578_v61  ;;  %v413_v45 = vsel %vm43_vm0, %v2129_v44, 0.0  ;;  %v745_v49 = vpop.permute.xlu1 %744  ;;  %v1330_v61 = vld [vmem:[%s2305_s1 + $0x70] sm:$0xff] }
  0xcc   :  { %1293 = vpow2.f32 %v346_v31  ;;  %v826_v37 = vsel %vm812_vm1, %v1328_v53, %v743_v5  ;;  %v522_v26 = vadd.f32 %v521_v32, %v520_v14  ;;  %v414_v8 = vrot.slane %v413_v45, 4 }
  0xcd   :  { %v2136_v46 = vpop.eup %1285  ;;  %v472_v58 = vrot.slane %v471_v39, 2  ;;  %v1073_v43 = vsel %vm43_vm0, %v873_v51, 0.0  ;;  %v833_v55 = vsel %vm812_vm1, %v1329_v57, %v2094_v38  ;;  %1295 = vrcp.f32 %v580_v59 }
  0xce   :  { %v581_v62 = vsel %vm43_vm0, %v2136_v46, 0.0  ;;  %v523_v5 = vrot.slane %v522_v26, 1  ;;  %v415_v50 = vadd.f32 %v414_v8, %v413_v45  ;;  %v858_v4 = vmul.f32 %v826_v37, %v633_v27 }
  0xcf   :  { %v473_v11 = vadd.f32 %v472_v58, %v471_v39  ;;  %v582_v28 = vrot.slane %v581_v62, 4  ;;  %v1288_v23 = vpop.eup %1287  ;;  %v625_v13 = vmul.f32 %v1284_v3, %v1899_v60  ;;  %1297 = vrcp.f32 %v517_v15  ;;  %v1331_v60 = vld [vmem:[%s2305_s1 + $0x28] sm:$0xff]  ;;  %v1332_v58 = vld [vmem:[%s2305_s1 + $0x30] sm:$0xff] }
  0xd0   :  { %v827_v24 = vsel %vm812_vm1, %v1330_v61, %v745_v49  ;;  %v634_v38 = vmul.f32 %v1288_v23, %v2060_v7  ;;  %v524_v16 = vadd.f32 %v523_v5, %v522_v26  ;;  %v416_v14 = vrot.slane %v415_v50, 2  ;;  %v729_v7 = vpop.permute.xlu0 %728 }
  0xd1   :  { %v474_v18 = vrot.slane %v473_v11, 1  ;;  %v2161_v12 = vsel %vm1137_vm4, %v2099_v30, %v1974_v63  ;;  %v908_v51 = vrot.slane %v2126_v52, 2  ;;  %v818_v36 = vsel %vm812_vm1, %v1331_v60, %v727_v54 }
  0xd2   :  { %v583_v31 = vadd.f32 %v582_v28, %v581_v62  ;;  %v1290_v15 = vpop.eup %1289  ;;  %v859_v32 = vmul.f32 %v827_v24, %v634_v38  ;;  %1299 = vrcp.f32 %v524_v16  ;;  %v417_v3 = vadd.f32 %v416_v14, %v415_v50  ;;  %v1334_v14 = vld [vmem:[%s2305_s1 + $0xf0] sm:$0xff] }
  0xd3   :  { %v475_v39 = vadd.f32 %v474_v18, %v473_v11  ;;  %v965_v27 = vadd.f32 %v964_v21, %v2108_v40  ;;  %v1074_v59 = vrot.slane %v1073_v43, 4  ;;  %v865_v63 = vmul.f32 %v833_v55, %v640_v22  ;;  %v1333_v21 = vld [vmem:[%s2305_s1 + $0xe8] sm:$0xff]  ;;  %v777_v11 = vpop.permute.xlu1 %776 }
  0xd4   :  { %v584_v30 = vrot.slane %v583_v31, 2  ;;  %v968_v45 = vsel %vm43_vm0, %v858_v4, 0.0  ;;  %v850_v53 = vmul.f32 %v818_v36, %v625_v13  ;;  %v418_v37 = vrot.slane %v417_v3, 1 }
  0xd5   :  { %1301 = vrcp.f32 %v475_v39  ;;  %v909_v54 = vadd.f32 %v908_v51, %v2126_v52  ;;  %v649_v26 = vmul.f32 %v1290_v15, %v1916_v25  ;;  %v819_v8 = vsel %vm812_vm1, %v1332_v58, %v729_v7 }
  0xd6   :  { %v1292_v49 = vpop.eup %1291  ;;  %v585_v40 = vadd.f32 %v584_v30, %v583_v31  ;;  %v842_v22 = vsel %vm812_vm1, %v1333_v21, %v2120_v0  ;;  %v975_v57 = vsel %vm43_vm0, %v859_v32, 0.0  ;;  %v419_v55 = vadd.f32 %v418_v37, %v417_v3  ;;  %v761_v3 = vpop.permute.xlu0 %760 }
  0xd7   :  { %v626_v52 = vmul.f32 %v1292_v49, %v2073_v33  ;;  %v966_v25 = vrot.slane %v965_v27, 1  ;;  %v1017_v62 = vsel %vm43_vm0, %v865_v63, 0.0  ;;  %v969_v5 = vrot.slane %v968_v45, 4 }
  0xd8   :  { %v586_v50 = vrot.slane %v585_v40, 1  ;;  %v1075_v23 = vadd.f32 %v1074_v59, %v1073_v43  ;;  %v912_v4 = vsel %vm43_vm0, %v850_v53, 0.0  ;;  %1303 = vrcp.f32 %v419_v55 }
  0xd9   :  { %v2184_v28 = vpop.eup %1293  ;;  %v851_v13 = vmul.f32 %v819_v8, %v626_v52  ;;  %v874_v0 = vmul.f32 %v842_v22, %v649_v26  ;;  %v976_v61 = vrot.slane %v975_v57, 4  ;;  %v910_v16 = vrot.slane %v909_v54, 1  ;;  %v747_v26 = vpop.permute.xlu1 %746 }
  0xda   :  { %v587_v24 = vadd.f32 %v586_v50, %v585_v40  ;;  %v525_v33 = vsel %vm43_vm0, %v2184_v28, 0.0  ;;  %v1296_v38 = vpop.eup %1295  ;;  %v1018_v18 = vrot.slane %v1017_v62, 4  ;;  %v843_v51 = vsel %vm812_vm1, %v1334_v14, %v777_v11  ;;  %v1337_v11 = vld [vmem:[%s2305_s1 + $0xb0] sm:$0xff] }
  0xdb   :  { %v526_v43 = vrot.slane %v525_v33, 4  ;;  %v970_v60 = vadd.f32 %v969_v5, %v968_v45  ;;  %v919_v36 = vsel %vm43_vm0, %v851_v13, 0.0  ;;  %v650_v31 = vmul.f32 %v1296_v38, %v2085_v48 }
  0xdc   :  { %1305 = vrcp.f32 %v587_v24  ;;  %v1298_v15 = vpop.eup %1297  ;;  %v2198_v32 = vadd.f32 %v1071_v19, %v2097_v34  ;;  %v2203_v7 = vadd.f32 %v1013_v56, %v2089_v41  ;;  %v913_v39 = vrot.slane %v912_v4, 4 }
  0xdd   :  { %v527_v59 = vadd.f32 %v526_v43, %v525_v33  ;;  %v967_v63 = vadd.f32 %v966_v25, %v965_v27  ;;  %v1080_v30 = vsel %vm43_vm0, %v874_v0, 0.0  ;;  %v977_v45 = vadd.f32 %v976_v61, %v975_v57  ;;  %v1335_v27 = vld [vmem:[%s2305_s1 + $0xa8] sm:$0xff] }
  0xde   :  { %v875_v48 = vmul.f32 %v843_v51, %v650_v31  ;;  %v911_v53 = vadd.f32 %v910_v16, %v909_v54  ;;  %v1076_v37 = vrot.slane %v1075_v23, 2  ;;  %v920_v49 = vrot.slane %v919_v36, 4 }
  0xdf   :  { %v528_v58 = vrot.slane %v527_v59, 2  ;;  %v1300_v34 = vpop.eup %1299  ;;  %v2206_v19 = vadd.f32 %v1018_v18, %v1017_v62  ;;  %v971_v8 = vrot.slane %v970_v60, 2  ;;  %v641_v41 = vmul.f32 %v1298_v15, %v1956_v17  ;;  %v1336_v17 = vld [vmem:[%s2305_s1 + $0x78] sm:$0xff]  ;;  %v779_v18 = vpop.permute.xlu1 %778 }
  0xe0   :  { %v1087_v56 = vsel %vm43_vm0, %v875_v48, 0.0  ;;  %v914_v40 = vadd.f32 %v913_v39, %v912_v4  ;;  %v1081_v21 = vrot.slane %v1080_v30, 4  ;;  %v834_v54 = vsel %vm812_vm1, %v1335_v27, %v2142_v29  ;;  %v731_v4 = vpop.permute.xlu0 %730 }
  0xe1   :  { %v529_v22 = vadd.f32 %v528_v58, %v527_v59  ;;  %v978_v52 = vrot.slane %v977_v45, 2  ;;  %v1088_v55 = vrot.slane %v1087_v56, 4  ;;  %v642_v25 = vmul.f32 %v1300_v34, %v2102_v9 }
  0xe2   :  { %v1302_v57 = vpop.eup %1301  ;;  %v828_v62 = vsel %vm812_vm1, %v1336_v17, %v747_v26  ;;  %v921_v5 = vadd.f32 %v920_v49, %v919_v36  ;;  %v835_v50 = vsel %vm812_vm1, %v1337_v11, %v761_v3  ;;  %v1150_v9 = vsel %vm1139_vm5, %v967_v63, %v2106_v1  ;;  %v1339_v63 = vld [vmem:[%s2305_s1 + $0xf8] sm:$0xff] }
  0xe3   :  { %v635_v29 = vmul.f32 %v1302_v57, %v2114_v10  ;;  %v530_v13 = vrot.slane %v529_v22, 1  ;;  %v2227_v0 = vadd.f32 %v1076_v37, %v1075_v23  ;;  %v972_v61 = vadd.f32 %v971_v8, %v970_v60  ;;  %v1338_v10 = vld [vmem:[%s2305_s1 + $0x38] sm:$0xff] }
  0xe4   :  { %v866_v24 = vmul.f32 %v834_v54, %v641_v41  ;;  %v915_v33 = vrot.slane %v914_v40, 2  ;;  %v1082_v38 = vadd.f32 %v1081_v21, %v1080_v30  ;;  %v979_v43 = vadd.f32 %v978_v52, %v977_v45 }
  0xe5   :  { %v860_v16 = vmul.f32 %v828_v62, %v635_v29  ;;  %v531_v14 = vadd.f32 %v530_v13, %v529_v22  ;;  %v1304_v51 = vpop.eup %1303  ;;  %v1089_v36 = vadd.f32 %v1088_v55, %v1087_v56  ;;  %v867_v31 = vmul.f32 %v835_v50, %v642_v25 }
  0xe6   :  { %v820_v1 = vsel %vm812_vm1, %v1338_v10, %v731_v4  ;;  %v922_v23 = vrot.slane %v921_v5, 2  ;;  %v627_v15 = vmul.f32 %v1304_v51, %v2129_v44  ;;  %v2237_v39 = vsel %vm1139_vm5, %v911_v53, %v2161_v12 }
  0xe7   :  { %v982_v60 = vsel %vm43_vm0, %v860_v16, 0.0  ;;  %1307 = vrcp.f32 %v531_v14  ;;  %v1024_v3 = vsel %vm43_vm0, %v866_v24, 0.0  ;;  %v844_v30 = vsel %vm812_vm1, %v1339_v63, %v779_v18  ;;  %v763_v18 = vpop.permute.xlu0 %762 }
  0xe8   :  { %v983_v59 = vrot.slane %v982_v60, 4  ;;  %v973_v48 = vrot.slane %v972_v61, 1  ;;  %v916_v37 = vadd.f32 %v915_v33, %v914_v40  ;;  %v1083_v49 = vrot.slane %v1082_v38, 2 }
  0xe9   :  { %v1306_v45 = vpop.eup %1305  ;;  %v852_v44 = vmul.f32 %v820_v1, %v627_v15  ;;  %v1090_v26 = vrot.slane %v1089_v36, 2  ;;  %v1031_v58 = vsel %vm43_vm0, %v867_v31, 0.0  ;;  %v1020_v34 = vrot.slane %v2206_v19, 2 }
  0xea   :  { %v984_v12 = vadd.f32 %v983_v59, %v982_v60  ;;  %v651_v53 = vmul.f32 %v1306_v45, %v2136_v46  ;;  %v980_v8 = vrot.slane %v979_v43, 1  ;;  %v923_v41 = vadd.f32 %v922_v23, %v921_v5 }
  0xeb   :  { %v926_v56 = vsel %vm43_vm0, %v852_v44, 0.0  ;;  %v1025_v21 = vrot.slane %v1024_v3, 4  ;;  %v974_v57 = vadd.f32 %v973_v48, %v972_v61  ;;  %v917_v40 = vrot.slane %v916_v37, 1 }
  0xec   :  { %v985_v27 = vrot.slane %v984_v12, 2  ;;  %v927_v54 = vrot.slane %v926_v56, 4  ;;  %v876_v22 = vmul.f32 %v844_v30, %v651_v53  ;;  %v1084_v52 = vadd.f32 %v1083_v49, %v1082_v38 }
  0xed   :  { %v1032_v55 = vrot.slane %v1031_v58, 4  ;;  %v1091_v25 = vadd.f32 %v1090_v26, %v1089_v36  ;;  %v1078_v46 = vrot.slane %v2227_v0, 1  ;;  %v981_v50 = vadd.f32 %v980_v8, %v979_v43 }
  0xee   :  { %v986_v17 = vadd.f32 %v985_v27, %v984_v12  ;;  %v928_v62 = vadd.f32 %v927_v54, %v926_v56  ;;  %v1094_v11 = vsel %vm43_vm0, %v876_v22, 0.0  ;;  %v924_v29 = vrot.slane %v923_v41, 1 }
  0xef   :  { %v1095_v5 = vrot.slane %v1094_v11, 4  ;;  %v1026_v4 = vadd.f32 %v1025_v21, %v1024_v3  ;;  %v1151_v33 = vsel %vm1141_vm6, %v974_v57, %v1150_v9  ;;  %v1085_v61 = vrot.slane %v1084_v52, 1  ;;  %v1340_v9 = vld [vmem:[%s2305_s1 + $0xb8] sm:$0xff] }
  0xf0   :  { %v987_v13 = vrot.slane %v986_v17, 1  ;;  %v929_v24 = vrot.slane %v928_v62, 2  ;;  %v1033_v16 = vadd.f32 %v1032_v55, %v1031_v58  ;;  %v918_v14 = vadd.f32 %v917_v40, %v916_v37 }
  0xf1   :  { %v1096_v38 = vadd.f32 %v1095_v5, %v1094_v11  ;;  %v1092_v51 = vrot.slane %v1091_v25, 1  ;;  %v1079_v10 = vadd.f32 %v1078_v46, %v2227_v0  ;;  %v1152_v43 = vsel %vm1143_vm7, %v981_v50, %v1151_v33 }
  0xf2   :  { %v988_v36 = vadd.f32 %v987_v13, %v986_v17  ;;  %v930_v31 = vadd.f32 %v929_v24, %v928_v62  ;;  %v925_v1 = vadd.f32 %v924_v29, %v923_v41  ;;  %v1027_v15 = vrot.slane %v1026_v4, 2 }
  0xf3   :  { %v1097_v23 = vrot.slane %v1096_v38, 2  ;;  %v836_v63 = vsel %vm812_vm1, %v1340_v9, %v763_v18  ;;  %v1086_v30 = vadd.f32 %v1085_v61, %v1084_v52  ;;  %v1034_v45 = vrot.slane %v1033_v16, 2 }
  0xf4   :  { %v1308_v60 = vpop.eup %1307  ;;  %v1153_v3 = vsel %vm1145_vm8, %v988_v36, %v1152_v43  ;;  %v931_v59 = vrot.slane %v930_v31, 1  ;;  %v1163_v37 = vsel %vm1137_vm4, %v2198_v32, %v2083_v47  ;;  %v1142_v49 = vsel %vm1141_vm6, %v918_v14, %v2237_v39 }
  0xf5   :  { %1173 = vst.msk [vmem:[%s2307_s2 + $0x8] sm:$0xff] %vm43_vm0, %v1153_v3  ;;  %v1098_v0 = vadd.f32 %v1097_v23, %v1096_v38  ;;  %v643_v48 = vmul.f32 %v1308_v60, %v2184_v28  ;;  %v1093_v44 = vadd.f32 %v1092_v51, %v1091_v25  ;;  %v1021_v58 = vadd.f32 %v1020_v34, %v2206_v19 }
  0xf6   :  { %v932_v26 = vadd.f32 %v931_v59, %v930_v31  ;;  %v1144_v12 = vsel %vm1143_vm7, %v925_v1, %v1142_v49  ;;  %v1008_v41 = vrot.slane %v1984_v35, 1  ;;  %v1164_v56 = vsel %vm1139_vm5, %v1079_v10, %v1163_v37 }
  0xf7   :  { %v1099_v53 = vrot.slane %v1098_v0, 1  ;;  %v868_v8 = vmul.f32 %v836_v63, %v643_v48  ;;  %v1028_v28 = vadd.f32 %v1027_v15, %v1026_v4  ;;  %v1165_v47 = vsel %vm1141_vm6, %v1086_v30, %v1164_v56 }
  0xf8   :  { %v1146_v21 = vsel %vm1145_vm8, %v932_v26, %v1144_v12  ;;  %v1035_v32 = vadd.f32 %v1034_v45, %v1033_v16  ;;  %v1015_v34 = vrot.slane %v2203_v7, 1  ;;  %v1166_v27 = vsel %vm1143_vm7, %v1093_v44, %v1165_v47 }
  0xf9   :  { %1172 = vst.msk [vmem:[%s2307_s2] sm:$0xff] %vm43_vm0, %v1146_v21  ;;  %v1100_v19 = vadd.f32 %v1099_v53, %v1098_v0  ;;  %v1038_v39 = vsel %vm43_vm0, %v868_v8, 0.0  ;;  %v1022_v22 = vrot.slane %v1021_v58, 1  ;;  %v1002_v40 = vadd.f32 %v1001_v2, %v1951_v6 }
  0xfa   :  { %v1039_v54 = vrot.slane %v1038_v39, 4  ;;  %v995_v52 = vadd.f32 %v994_v20, %v1953_v42  ;;  %v1029_v55 = vrot.slane %v1028_v28, 1  ;;  %v1009_v17 = vadd.f32 %v1008_v41, %v1984_v35 }
  0xfb   :  { %v1167_v57 = vsel %vm1145_vm8, %v1100_v19, %v1166_v27  ;;  %v1036_v62 = vrot.slane %v1035_v32, 1  ;;  %v1016_v11 = vadd.f32 %v1015_v34, %v2203_v7  ;;  %v1023_v50 = vadd.f32 %v1022_v22, %v1021_v58 }
  0xfc   :  { %1175 = vst.msk [vmem:[%s2307_s2 + $0x18] sm:$0xff] %vm43_vm0, %v1167_v57  ;;  %v1040_v25 = vadd.f32 %v1039_v54, %v1038_v39  ;;  %v1154_v6 = vsel %vm1133_vm2, %v1002_v40, %v995_v52  ;;  %v1030_v2 = vadd.f32 %v1029_v55, %v1028_v28 }
  0xfd   :  { %v1155_v42 = vsel %vm1135_vm3, %v1009_v17, %v1154_v6  ;;  %v1037_v20 = vadd.f32 %v1036_v62, %v1035_v32 }
  0xfe   :  { %v1041_v46 = vrot.slane %v1040_v25, 2  ;;  %v1156_v5 = vsel %vm1137_vm4, %v1016_v11, %v1155_v42 }
  0xff   :  { %v1157_v13 = vsel %vm1139_vm5, %v1023_v50, %v1156_v5 }
 0x100   :  { %v1042_v29 = vadd.f32 %v1041_v46, %v1040_v25  ;;  %v1158_v24 = vsel %vm1141_vm6, %v1030_v2, %v1157_v13 }
 0x101   :  { %v1159_v33 = vsel %vm1143_vm7, %v1037_v20, %v1158_v24 }
 0x102   :  { %v1043_v4 = vrot.slane %v1042_v29, 1 }
 0x104   :  { %v1044_v35 = vadd.f32 %v1043_v4, %v1042_v29 }
 0x106   :  { %v1160_v7 = vsel %vm1145_vm8, %v1044_v35, %v1159_v33 }
 0x107   :  { %1174 = vst.msk [vmem:[%s2307_s2 + $0x10] sm:$0xff] %vm43_vm0, %v1160_v7 }

// kernel: _lambda_.70
= control target key start
LH: loop header
LB: loop body
LE: loop exit
PB: predicated region body
PF: predicated region fallthrough
CT: control target
= control target key end

     0   :  { %vm58_vm0 = vcmask 523264   ;;  %vm161_vm1 = vcmask 261120   ;;  %s617_s1 = inlined_call_operand.vmem [shape: f32[64,32], index: 1, kind: input, shape index: {}]   ;;  %s618_s0 = inlined_call_operand.vmem [shape: f32[64,64], index: 0, kind: input, shape index: {}]   ;;  %s619_s3 = inlined_call_operand.vmem [shape: f32[32,32], index: 3, kind: input, shape index: {}]   ;;  %s620_s5 = inlined_call_operand.vmem [shape: f32[64,32], index: 5, kind: input, shape index: {}]   ;;  %s621_s2 = inlined_call_operand.vmem [shape: f32[1,32], index: 2, kind: input, shape index: {}]   ;;  %s622_s4 = inlined_call_operand.vmem [shape: f32[1,32], index: 4, kind: input, shape index: {}]   ;;  %s623_s6 = inlined_call_operand.vmem [shape: f32[1,32], index: 6, kind: input, shape index: {}]   ;;  %s624_s7 = inlined_call_operand.vmem [shape: f32[64,32], index: 7, kind: output, shape index: {}]  }
   0x1   :  { %v45_v0 = vld [vmem:[%s617_s1 + $0x30] sm:$0xff]  ;;  %v46_v1 = vld [vmem:[%s617_s1 + $0x38] sm:$0xff]  ;;  %v43_v2 = vld [vmem:[%s617_s1 + $0x20] sm:$0xff] }
   0x2   :  { %v50_v3 = vpack.c.bf16 %v46_v1, %v45_v0  ;;  %v44_v4 = vld [vmem:[%s617_s1 + $0x28] sm:$0xff]  ;;  %v41_v6 = vld [vmem:[%s617_s1 + $0x10] sm:$0xff]  ;;  %v42_v7 = vld [vmem:[%s617_s1 + $0x18] sm:$0xff] }
   0x3   :  { %v49_v5 = vpack.c.bf16 %v44_v4, %v43_v2  ;;  %v27_v8 = vld [vmem:[%s618_s0] sm:$0xff]  ;;  %v28_v9 = vld [vmem:[%s618_s0 + $0x8] sm:$0xff]  ;;  %v48_v11 = vpack.c.bf16 %v42_v7, %v41_v6  ;;  %v29_v15 = vld [vmem:[%s618_s0 + $0x10] sm:$0xff] }
   0x4   :  { %380 = vmatprep.subr.bf16.mxu0 %v50_v3  ;;  %v488_v10 = vpack.c.bf16 %v28_v9, %v27_v8  ;;  %v39_v12 = vld [vmem:[%s617_s1] sm:$0xff]  ;;  %v40_v13 = vld [vmem:[%s617_s1 + $0x8] sm:$0xff]  ;;  %v30_v16 = vld [vmem:[%s618_s0 + $0x18] sm:$0xff] }
   0x5   :  { %381 = vmatpush3.bf16.msra.mxu0 %v50_v3  ;;  %v47_v14 = vpack.c.bf16 %v40_v13, %v39_v12  ;;  %v31_v17 = vld [vmem:[%s618_s0 + $0x20] sm:$0xff]  ;;  %v32_v18 = vld [vmem:[%s618_s0 + $0x28] sm:$0xff]  ;;  %v510_v19 = vpack.c.bf16 %v30_v16, %v29_v15  ;;  %v33_v21 = vld [vmem:[%s618_s0 + $0x30] sm:$0xff] }
   0x6   :  { %382 = vmatprep.subr.bf16.mxu0 %v49_v5  ;;  %388 = vmatprep.mubr.msk.bf16.mxu0 %vm58_vm0, %v488_v10  ;;  %v512_v20 = vpack.c.bf16 %v32_v18, %v31_v17  ;;  %v34_v22 = vld [vmem:[%s618_s0 + $0x38] sm:$0xff]  ;;  %v150_v24 = vld [vmem:[%s619_s3 + $0x10] sm:$0xff]  ;;  %v148_v27 = vld [vmem:[%s619_s3] sm:$0xff] }
   0x7   :  { %v524_v23 = vpack.c.bf16 %v34_v22, %v33_v21  ;;  %v151_v25 = vld [vmem:[%s619_s3 + $0x18] sm:$0xff]  ;;  %v149_v28 = vld [vmem:[%s619_s3 + $0x8] sm:$0xff]  ;;  %v245_v30 = vld [vmem:[%s620_s5 + $0x30] sm:$0xff] }
   0x8   :  { %v153_v26 = vpack.c.bf16 %v151_v25, %v150_v24  ;;  %v152_v29 = vpack.c.bf16 %v149_v28, %v148_v27  ;;  %v246_v31 = vld [vmem:[%s620_s5 + $0x38] sm:$0xff]  ;;  %v343_v35 = vld [vmem:[%s621_s2] ss:$0 sm:$0xff]  ;;  %v244_v47 = vld [vmem:[%s620_s5 + $0x28] sm:$0xff] }
   0x9   :  { %383 = vmatpush3.bf16.msra.mxu0 %v49_v5  ;;  %v250_v32 = vpack.c.bf16 %v246_v31, %v245_v30  ;;  %v243_v46 = vld [vmem:[%s620_s5 + $0x20] sm:$0xff]  ;;  %v241_v56 = vld [vmem:[%s620_s5 + $0x10] sm:$0xff]  ;;  %v242_v57 = vld [vmem:[%s620_s5 + $0x18] sm:$0xff] }
   0xa   :  { %384 = vmatprep.subr.bf16.mxu0 %v48_v11  ;;  %396 = vmatprep.subr.bf16.mxu1 %v153_v26  ;;  %v249_v53 = vpack.c.bf16 %v244_v47, %v243_v46  ;;  %v248_v62 = vpack.c.bf16 %v242_v57, %v241_v56  ;;  %v239_v1 = vld [vmem:[%s620_s5] sm:$0xff]  ;;  %v240_v2 = vld [vmem:[%s620_s5 + $0x8] sm:$0xff] }
   0xb   :  { %397 = vmatpush3.bf16.msra.mxu1 %v153_v26  ;;  %v247_v6 = vpack.c.bf16 %v240_v2, %v239_v1  ;;  %v353_v16 = vld [vmem:[%s623_s6] ss:$0 sm:$0xff] }
   0xc   :  { %398 = vmatprep.subr.bf16.mxu1 %v152_v29 }
   0xd   :  { %385 = vmatpush3.bf16.msra.mxu0 %v48_v11 }
   0xe   :  { %386 = vmatprep.subr.bf16.mxu0 %v47_v14 }
   0xf   :  { %399 = vmatpush3.bf16.msra.mxu1 %v152_v29 }
  0x10   :  { %408 = vmatprep.subr.bf16.mxu1 %v250_v32 }
  0x11   :  { %387 = vmatpush3.bf16.msra.mxu0 %v47_v14 }
  0x14   :  { %389 = vmatmul.mubr.msk.bf16.vlgmr.msra.gmra.mxu0 %vm58_vm0, %v510_v19 }
  0x15   :  { %392 = vmatprep.mubr.msk.bf16.mxu0 %vm58_vm0, %v512_v20 }
  0x1c   :  { %393 = vmatmul.mubr.msk.bf16.gmra.mxu0 %vm58_vm0, %v524_v23 }
  0xd4   :  { %v390_v33 = vpop.f32.mrf.mxu0 }
  0xd5   :  { %v114_v39 = vadd.f32 %v390_v33, %v343_v35 }
  0xd6   :  { %v105_v34 = vpop.f32.mrf.mxu0 }
  0xd7   :  { %v106_v37 = vadd.f32 %v343_v35, %v105_v34  ;;  %v138_v48 = vmax.f32 %v114_v39, 0.0 }
  0xd8   :  { %v391_v36 = vpop.f32.mrf.mxu0 }
  0xd9   :  { %v117_v38 = vadd.f32 %v391_v36, %v343_v35  ;;  %v136_v44 = vmax.f32 %v106_v37, 0.0 }
  0xda   :  { %v108_v40 = vpop.f32.mrf.mxu0 }
  0xdb   :  { %v109_v41 = vadd.f32 %v343_v35, %v108_v40  ;;  %v139_v42 = vmax.f32 %v117_v38, 0.0 }
  0xdc   :  { %v394_v43 = vpop.f32.mrf.mxu0 }
  0xdd   :  { %v137_v45 = vmax.f32 %v109_v41, 0.0  ;;  %v145_v51 = vpack.c.bf16 %v139_v42, %v138_v48  ;;  %v130_v58 = vadd.f32 %v394_v43, %v343_v35 }
  0xde   :  { %v121_v49 = vpop.f32.mrf.mxu0 }
  0xdf   :  { %v144_v50 = vpack.c.bf16 %v137_v45, %v136_v44  ;;  %v122_v54 = vadd.f32 %v343_v35, %v121_v49  ;;  %v142_v3 = vmax.f32 %v130_v58, 0.0 }
  0xe0   :  { %v395_v52 = vpop.f32.mrf.mxu0 }
  0xe1   :  { %v133_v55 = vadd.f32 %v395_v52, %v343_v35  ;;  %400 = vmatprep.mubr.msk.bf16.mxu1 %vm161_vm1, %v144_v50  ;;  %v140_v63 = vmax.f32 %v122_v54, 0.0 }
  0xe2   :  { %v124_v59 = vpop.f32.mrf.mxu0  ;;  %401 = vmatmul.mubr.msk.bf16.vlgmr.msra.gmra.mxu1 %vm161_vm1, %v145_v51 }
  0xe3   :  { %v125_v60 = vadd.f32 %v343_v35, %v124_v59  ;;  %409 = vmatpush3.bf16.msra.mxu1 %v250_v32  ;;  %v143_v61 = vmax.f32 %v133_v55, 0.0 }
  0xe4   :  { %410 = vmatprep.subr.bf16.mxu1 %v249_v53 }
  0xe5   :  { %v141_v0 = vmax.f32 %v125_v60, 0.0  ;;  %v147_v5 = vpack.c.bf16 %v143_v61, %v142_v3 }
  0xe7   :  { %v146_v4 = vpack.c.bf16 %v141_v0, %v140_v63  ;;  %411 = vmatpush3.bf16.msra.mxu1 %v249_v53 }
  0xe8   :  { %412 = vmatprep.subr.bf16.mxu1 %v248_v62 }
  0xe9   :  { %404 = vmatprep.mubr.msk.bf16.mxu1 %vm161_vm1, %v146_v4 }
  0xea   :  { %405 = vmatmul.mubr.msk.bf16.gmra.mxu1 %vm161_vm1, %v147_v5 }
  0xeb   :  { %413 = vmatpush3.bf16.msra.mxu1 %v248_v62  ;;  %416 = vmatprep.mubr.msk.bf16.mxu1 %vm58_vm0, %v488_v10  ;;  %v348_v10 = vld [vmem:[%s622_s4] ss:$0 sm:$0xff] }
  0xec   :  { %414 = vmatprep.subr.bf16.mxu1 %v247_v6 }
  0xef   :  { %415 = vmatpush3.bf16.msra.mxu1 %v247_v6 }
  0xf2   :  { %417 = vmatmul.mubr.msk.bf16.vlgmr.msra.gmra.mxu1 %vm58_vm0, %v510_v19 }
  0xf3   :  { %420 = vmatprep.mubr.msk.bf16.mxu1 %vm58_vm0, %v512_v20 }
  0xfa   :  { %421 = vmatmul.mubr.msk.bf16.gmra.mxu1 %vm58_vm0, %v524_v23 }
 0x1a2   :  { %v402_v7 = vpop.f32.mrf.mxu1 }
 0x1a3   :  { %v217_v18 = vadd.f32 %v402_v7, %v348_v10 }
 0x1a4   :  { %v208_v8 = vpop.f32.mrf.mxu1 }
 0x1a5   :  { %v209_v21 = vadd.f32 %v348_v10, %v208_v8 }
 0x1a6   :  { %v403_v9 = vpop.f32.mrf.mxu1 }
 0x1a7   :  { %v220_v25 = vadd.f32 %v403_v9, %v348_v10 }
 0x1a8   :  { %v211_v11 = vpop.f32.mrf.mxu1 }
 0x1a9   :  { %v212_v29 = vadd.f32 %v348_v10, %v211_v11 }
 0x1aa   :  { %v406_v12 = vpop.f32.mrf.mxu1 }
 0x1ab   :  { %v233_v33 = vadd.f32 %v406_v12, %v348_v10 }
 0x1ac   :  { %v224_v13 = vpop.f32.mrf.mxu1 }
 0x1ad   :  { %v225_v37 = vadd.f32 %v348_v10, %v224_v13 }
 0x1ae   :  { %v407_v14 = vpop.f32.mrf.mxu1 }
 0x1af   :  { %v236_v41 = vadd.f32 %v407_v14, %v348_v10 }
 0x1b0   :  { %v227_v15 = vpop.f32.mrf.mxu1 }
 0x1b1   :  { %v228_v45 = vadd.f32 %v348_v10, %v227_v15 }
 0x1b2   :  { %v418_v17 = vpop.f32.mrf.mxu1 }
 0x1b3   :  { %v301_v19 = vadd.f32 %v418_v17, %v353_v16 }
 0x1b4   :  { %v292_v20 = vpop.f32.mrf.mxu1 }
 0x1b5   :  { %v325_v22 = vadd.f32 %v301_v19, %v217_v18  ;;  %v293_v23 = vadd.f32 %v353_v16, %v292_v20 }
 0x1b6   :  { %v419_v24 = vpop.f32.mrf.mxu1 }
 0x1b7   :  { %333 = vst.msk [vmem:[%s624_s7 + $0x10] sm:$0xff] %vm161_vm1, %v325_v22  ;;  %v323_v26 = vadd.f32 %v293_v23, %v209_v21  ;;  %v304_v27 = vadd.f32 %v419_v24, %v353_v16 }
 0x1b8   :  { %v295_v28 = vpop.f32.mrf.mxu1 }
 0x1b9   :  { %331 = vst.msk [vmem:[%s624_s7] sm:$0xff] %vm161_vm1, %v323_v26  ;;  %v326_v30 = vadd.f32 %v304_v27, %v220_v25  ;;  %v296_v31 = vadd.f32 %v353_v16, %v295_v28 }
 0x1ba   :  { %v422_v32 = vpop.f32.mrf.mxu1 }
 0x1bb   :  { %334 = vst.msk [vmem:[%s624_s7 + $0x18] sm:$0xff] %vm161_vm1, %v326_v30  ;;  %v324_v34 = vadd.f32 %v296_v31, %v212_v29  ;;  %v317_v35 = vadd.f32 %v422_v32, %v353_v16 }
 0x1bc   :  { %v308_v36 = vpop.f32.mrf.mxu1 }
 0x1bd   :  { %332 = vst.msk [vmem:[%s624_s7 + $0x8] sm:$0xff] %vm161_vm1, %v324_v34  ;;  %v329_v38 = vadd.f32 %v317_v35, %v233_v33  ;;  %v309_v39 = vadd.f32 %v353_v16, %v308_v36 }
 0x1be   :  { %v423_v40 = vpop.f32.mrf.mxu1 }
 0x1bf   :  { %337 = vst.msk [vmem:[%s624_s7 + $0x30] sm:$0xff] %vm161_vm1, %v329_v38  ;;  %v327_v42 = vadd.f32 %v309_v39, %v225_v37  ;;  %v320_v43 = vadd.f32 %v423_v40, %v353_v16 }
 0x1c0   :  { %v311_v44 = vpop.f32.mrf.mxu1 }
 0x1c1   :  { %335 = vst.msk [vmem:[%s624_s7 + $0x20] sm:$0xff] %vm161_vm1, %v327_v42  ;;  %v330_v46 = vadd.f32 %v320_v43, %v236_v41  ;;  %v312_v47 = vadd.f32 %v353_v16, %v311_v44 }
 0x1c3   :  { %338 = vst.msk [vmem:[%s624_s7 + $0x38] sm:$0xff] %vm161_vm1, %v330_v46  ;;  %v328_v48 = vadd.f32 %v312_v47, %v228_v45 }
 0x1c5   :  { %336 = vst.msk [vmem:[%s624_s7 + $0x28] sm:$0xff] %vm161_vm1, %v328_v48 }

// kernel: _lambda_.71
= control target key start
LH: loop header
LB: loop body
LE: loop exit
PB: predicated region body
PF: predicated region fallthrough
CT: control target
= control target key end

     0   :  { %vm70_vm4 = vcmask 261120   ;;  %vm170_vm9 = vcmask 130048   ;;  %vm248_vm10 = vcmask 23552   ;;  %s424_s1 = inlined_call_operand.vmem [shape: f32[32,16], index: 1, kind: input, shape index: {}]   ;;  %s425_s0 = inlined_call_operand.vmem [shape: f32[64,32], index: 0, kind: input, shape index: {}]   ;;  %s426_s3 = inlined_call_operand.vmem [shape: f32[16,3], index: 3, kind: input, shape index: {}]   ;;  %s427_s2 = inlined_call_operand.vmem [shape: f32[1,16], index: 2, kind: input, shape index: {}]   ;;  %s428_s4 = inlined_call_operand.vmem [shape: f32[1,3], index: 4, kind: input, shape index: {}]   ;;  %s429_s5 = inlined_call_operand.vmem [shape: f32[64,3], index: 5, kind: output, shape index: {}]  }
   0x1   :  { %v55_v0 = vld [vmem:[%s424_s1 + $0x10] sm:$0xff]  ;;  %v56_v1 = vld [vmem:[%s424_s1 + $0x18] sm:$0xff]  ;;  %v53_v2 = vld [vmem:[%s424_s1] sm:$0xff] }
   0x2   :  { %v58_v3 = vpack.c.bf16 %v56_v1, %v55_v0  ;;  %v54_v4 = vld [vmem:[%s424_s1 + $0x8] sm:$0xff]  ;;  %v21_v5 = vld [vmem:[%s425_s0] sm:$0xff]  ;;  %v23_v9 = vld [vmem:[%s425_s0 + $0x10] sm:$0xff] }
   0x3   :  { %v22_v6 = vld [vmem:[%s425_s0 + $0x8] sm:$0xff]  ;;  %v57_v7 = vpack.c.bf16 %v54_v4, %v53_v2  ;;  %vm29_vm0 = vcmp.gt.f32.partialorder %v21_v5, 0.0  ;;  %v37_v8 = vmul.f32 0.2, %v21_v5  ;;  %v24_v10 = vld [vmem:[%s425_s0 + $0x18] sm:$0xff]  ;;  %vm31_vm2 = vcmp.gt.f32.partialorder %v23_v9, 0.0 }
   0x4   :  { %vm30_vm1 = vcmp.gt.f32.partialorder %v22_v6, 0.0  ;;  %282 = vmatprep.subr.bf16.mxu0 %v58_v3  ;;  %v38_v11 = vmul.f32 0.2, %v22_v6  ;;  %vm32_vm3 = vcmp.gt.f32.partialorder %v24_v10, 0.0  ;;  %v39_v12 = vmul.f32 0.2, %v23_v9 }
   0x5   :  { %283 = vmatpush3.bf16.msra.mxu0 %v58_v3  ;;  %v45_v13 = vsel %vm29_vm0, %v21_v5, %v37_v8  ;;  %v40_v14 = vmul.f32 0.2, %v24_v10  ;;  %v25_v15 = vld [vmem:[%s425_s0 + $0x20] sm:$0xff]  ;;  %v26_v16 = vld [vmem:[%s425_s0 + $0x28] sm:$0xff]  ;;  %v27_v19 = vld [vmem:[%s425_s0 + $0x30] sm:$0xff] }
   0x6   :  { %284 = vmatprep.subr.bf16.mxu0 %v57_v7  ;;  %v46_v17 = vsel %vm30_vm1, %v22_v6, %v38_v11  ;;  %v47_v18 = vsel %vm31_vm2, %v23_v9, %v39_v12  ;;  %vm33_vm5 = vcmp.gt.f32.partialorder %v25_v15, 0.0  ;;  %vm34_vm6 = vcmp.gt.f32.partialorder %v26_v16, 0.0  ;;  %v28_v20 = vld [vmem:[%s425_s0 + $0x38] sm:$0xff]  ;;  %v156_v34 = vld [vmem:[%s426_s3] sm:$0xff]  ;;  %v157_v35 = vld [vmem:[%s426_s3 + $0x8] sm:$0xff] }
   0x7   :  { %v60_v21 = vpack.c.bf16 %v46_v17, %v45_v13  ;;  %v48_v22 = vsel %vm32_vm3, %v24_v10, %v40_v14  ;;  %v41_v23 = vmul.f32 0.2, %v25_v15  ;;  %v42_v24 = vmul.f32 0.2, %v26_v16  ;;  %v261_v39 = vld [vmem:[%s427_s2] ss:$0 sm:$0xff] }
   0x8   :  { %v61_v25 = vpack.c.bf16 %v48_v22, %v47_v18  ;;  %v43_v28 = vmul.f32 0.2, %v27_v19  ;;  %v44_v29 = vmul.f32 0.2, %v28_v20  ;;  %vm35_vm7 = vcmp.gt.f32.partialorder %v27_v19, 0.0 }
   0x9   :  { %285 = vmatpush3.bf16.msra.mxu0 %v57_v7  ;;  %286 = vmatprep.mubr.msk.bf16.mxu0 %vm70_vm4, %v60_v21  ;;  %v49_v26 = vsel %vm33_vm5, %v25_v15, %v41_v23  ;;  %v50_v27 = vsel %vm34_vm6, %v26_v16, %v42_v24  ;;  %vm36_vm8 = vcmp.gt.f32.partialorder %v28_v20, 0.0  ;;  %v158_v36 = vpack.c.bf16 %v157_v35, %v156_v34  ;;  %v266_v2 = vld [vmem:[%s428_s4] ss:$0 sm:$0xff] }
   0xa   :  { %v62_v30 = vpack.c.bf16 %v50_v27, %v49_v26  ;;  %v51_v31 = vsel %vm35_vm7, %v27_v19, %v43_v28  ;;  %v52_v32 = vsel %vm36_vm8, %v28_v20, %v44_v29 }
   0xb   :  { %v63_v33 = vpack.c.bf16 %v52_v32, %v51_v31  ;;  %294 = vmatprep.subr.bf16.mxu1 %v158_v36 }
   0xc   :  { %287 = vmatmul.mubr.msk.bf16.vlgmr.msra.gmra.mxu0 %vm70_vm4, %v61_v25  ;;  %295 = vmatpush3.bf16.msra.mxu1 %v158_v36 }
   0xd   :  { %290 = vmatprep.mubr.msk.bf16.mxu0 %vm70_vm4, %v62_v30 }
  0x14   :  { %291 = vmatmul.mubr.msk.bf16.gmra.mxu0 %vm70_vm4, %v63_v33 }
  0xcc   :  { %v288_v37 = vpop.f32.mrf.mxu0 }
  0xcd   :  { %v126_v43 = vadd.f32 %v288_v37, %v261_v39 }
  0xce   :  { %v117_v38 = vpop.f32.mrf.mxu0 }
  0xcf   :  { %v118_v41 = vadd.f32 %v261_v39, %v117_v38  ;;  %v150_v50 = vmax.f32 %v126_v43, 0.0 }
  0xd0   :  { %v289_v40 = vpop.f32.mrf.mxu0 }
  0xd1   :  { %v129_v42 = vadd.f32 %v289_v40, %v261_v39  ;;  %v148_v48 = vmax.f32 %v118_v41, 0.0 }
  0xd2   :  { %v120_v44 = vpop.f32.mrf.mxu0 }
  0xd3   :  { %v121_v45 = vadd.f32 %v261_v39, %v120_v44  ;;  %v151_v46 = vmax.f32 %v129_v42, 0.0 }
  0xd4   :  { %v292_v47 = vpop.f32.mrf.mxu0 }
  0xd5   :  { %v149_v49 = vmax.f32 %v121_v45, 0.0  ;;  %v161_v53 = vpack.c.bf16 %v151_v46, %v150_v50  ;;  %v142_v57 = vadd.f32 %v292_v47, %v261_v39 }
  0xd6   :  { %v133_v51 = vpop.f32.mrf.mxu0 }
  0xd7   :  { %v160_v52 = vpack.c.bf16 %v149_v49, %v148_v48  ;;  %v134_v55 = vadd.f32 %v261_v39, %v133_v51  ;;  %v154_v63 = vmax.f32 %v142_v57, 0.0 }
  0xd8   :  { %v293_v54 = vpop.f32.mrf.mxu0 }
  0xd9   :  { %v145_v56 = vadd.f32 %v293_v54, %v261_v39  ;;  %296 = vmatprep.mubr.msk.bf16.mxu1 %vm170_vm9, %v160_v52  ;;  %v152_v61 = vmax.f32 %v134_v55, 0.0 }
  0xda   :  { %v136_v58 = vpop.f32.mrf.mxu0  ;;  %297 = vmatmul.mubr.msk.bf16.vlgmr.msra.gmra.mxu1 %vm170_vm9, %v161_v53 }
  0xdb   :  { %v137_v59 = vadd.f32 %v261_v39, %v136_v58  ;;  %v155_v60 = vmax.f32 %v145_v56, 0.0 }
  0xdd   :  { %v153_v62 = vmax.f32 %v137_v59, 0.0  ;;  %v163_v1 = vpack.c.bf16 %v155_v60, %v154_v63 }
  0xdf   :  { %v162_v0 = vpack.c.bf16 %v153_v62, %v152_v61 }
  0xe1   :  { %300 = vmatprep.mubr.msk.bf16.mxu1 %vm170_vm9, %v162_v0 }
  0xe2   :  { %301 = vmatmul.mubr.msk.bf16.gmra.mxu1 %vm170_vm9, %v163_v1 }
 0x19a   :  { %v298_v3 = vpop.f32.mrf.mxu1 }
 0x19b   :  { %v226_v4 = vadd.f32 %v298_v3, %v266_v2 }
 0x19c   :  { %v217_v5 = vpop.f32.mrf.mxu1 }
 0x19d   :  { %251 = vst.msk [vmem:[%s429_s5 + $0x10] sm:$0xff] %vm248_vm10, %v226_v4  ;;  %v218_v6 = vadd.f32 %v266_v2, %v217_v5 }
 0x19e   :  { %v299_v7 = vpop.f32.mrf.mxu1 }
 0x19f   :  { %249 = vst.msk [vmem:[%s429_s5] sm:$0xff] %vm248_vm10, %v218_v6  ;;  %v229_v8 = vadd.f32 %v299_v7, %v266_v2 }
 0x1a0   :  { %v220_v9 = vpop.f32.mrf.mxu1 }
 0x1a1   :  { %252 = vst.msk [vmem:[%s429_s5 + $0x18] sm:$0xff] %vm248_vm10, %v229_v8  ;;  %v221_v10 = vadd.f32 %v266_v2, %v220_v9 }
 0x1a2   :  { %v302_v11 = vpop.f32.mrf.mxu1 }
 0x1a3   :  { %250 = vst.msk [vmem:[%s429_s5 + $0x8] sm:$0xff] %vm248_vm10, %v221_v10  ;;  %v242_v12 = vadd.f32 %v302_v11, %v266_v2 }
 0x1a4   :  { %v233_v13 = vpop.f32.mrf.mxu1 }
 0x1a5   :  { %255 = vst.msk [vmem:[%s429_s5 + $0x30] sm:$0xff] %vm248_vm10, %v242_v12  ;;  %v234_v14 = vadd.f32 %v266_v2, %v233_v13 }
 0x1a6   :  { %v303_v15 = vpop.f32.mrf.mxu1 }
 0x1a7   :  { %253 = vst.msk [vmem:[%s429_s5 + $0x20] sm:$0xff] %vm248_vm10, %v234_v14  ;;  %v245_v16 = vadd.f32 %v303_v15, %v266_v2 }
 0x1a8   :  { %v236_v17 = vpop.f32.mrf.mxu1 }
 0x1a9   :  { %256 = vst.msk [vmem:[%s429_s5 + $0x38] sm:$0xff] %vm248_vm10, %v245_v16  ;;  %v237_v18 = vadd.f32 %v266_v2, %v236_v17 }
 0x1ab   :  { %254 = vst.msk [vmem:[%s429_s5 + $0x28] sm:$0xff] %vm248_vm10, %v237_v18 }

</bundles_post_ra>
